<compile_context>
chip_gen: v7x
topology: tpu7x:2x2x1
jax: 0.10.0
libtpu: 0.0.40
codegen_flags: <defaults>
</compile_context>

<pallas_src>
import functools

import jax
import jax.numpy as jnp
import numpy as np
from jax.experimental import pallas as pl
from jax.experimental.pallas import tpu as pltpu

NUM_CLASSES = 3
CLASS_PAD = 16           # pad 3 classes -> 16 (bf16 sublane tile); tokens stay on lanes
NEG_INF = -1e30          # bias for pad classes: never wins max, exp() -> 0
CONV_K = 5
CONV_P = 2


# ----------------------------- Pallas kernel --------------------------------
def _conv5_taps(h_bf, masks, w_ref, b_ref):
    """k=5 'same' conv in transposed layout via lane rolls + boundary masks.

    h_bf:  (C, T) bf16 activations (channels x tokens)
    masks: dict delta -> (1, T) bool validity mask
    w_ref: (5, Cout, Cin) bf16 ref,  b_ref: (Cout, 1) f32 ref
    Returns (Cout, T) f32 (pre-ReLU).
    """
    _, T = h_bf.shape
    # delta = 0 tap needs no mask
    acc = jnp.dot(w_ref[2], h_bf, preferred_element_type=jnp.float32)
    # 32-bit view (pairs packed along channels): lane rolls are dtype-safe
    h_u32 = pltpu.bitcast(h_bf, jnp.uint32)                    # (C//2, T), free
    for k, d in ((0, -2), (1, -1), (3, 1), (4, 2)):
        xk = pltpu.roll(h_u32, (-d) % T, 1)                    # xk[:, t] = h[:, t+d]
        xk = pltpu.bitcast(jnp.where(masks[d], xk, 0), jnp.bfloat16)
        # TODO(synk): on v7x this acc+dot chain could be a single K-concatenated
        # dot to keep accumulation in the MRB; kept as-is (concat cost > win here).
        acc = acc + jnp.dot(w_ref[k], xk, preferred_element_type=jnp.float32)
    return acc + b_ref[...]


def decnn_kernel(x_ref,
                 w12_ref, b12_ref,
                 w3_ref, b3_ref, w4_ref, b4_ref, w5_ref, b5_ref,
                 wl_ref, bl_ref,
                 out_ref, *, seq_len):
    T = x_ref.shape[1]                                         # tokens per step
    f32 = jnp.float32

    # per-token in-sequence position (T % seq_len == 0 -> step-invariant) and
    # the 4 boundary masks, computed ONCE and reused by conv3/4/5.
    pos = jax.lax.broadcasted_iota(jnp.int32, (1, T), 1) % seq_len
    masks = {d: jnp.logical_and(pos + d >= 0, pos + d < seq_len)
             for d in (-2, -1, 1, 2)}

    # layer 1: merged conv1||conv2 as a single full-K matmul on the im2col'd x
    h = jnp.dot(w12_ref[...], x_ref[...], preferred_element_type=f32) + b12_ref[...]
    h = jnp.maximum(h, 0.0).astype(jnp.bfloat16)               # (Cmid, T) bf16

    # conv3/4/5 (k=5, 'same') -> relu, bf16 activations between layers
    for w_ref, b_ref in ((w3_ref, b3_ref), (w4_ref, b4_ref), (w5_ref, b5_ref)):
        h = jnp.maximum(_conv5_taps(h, masks, w_ref, b_ref), 0.0).astype(jnp.bfloat16)

    # linear_ae on sublane-padded classes (pad rows have -inf bias)
    logits = jnp.dot(wl_ref[...], h, preferred_element_type=f32) + bl_ref[...]
    # class-axis log_softmax (testing path)
    m = jnp.max(logits, axis=0, keepdims=True)
    lse = m + jnp.log(jnp.sum(jnp.exp(logits - m), axis=0, keepdims=True))
    out_ref[...] = (logits - lse).astype(out_ref.dtype)


# ------------------------------- wrapper -------------------------------------
def _pick_seqs_per_step(batch, seq_len, target_rows=1024, max_rows=2048):
    """Sequences per grid step: large lane-dense token tiles, >=2 steps if possible."""
    cands = [d for d in range(1, batch + 1)
             if batch % d == 0
             and d * seq_len <= max_rows
             and (d * seq_len) % 128 == 0]
    if not cands:
        return batch                      # whole batch: block == full array dims
    multi = [d for d in cands if batch // d >= 2]   # feed both v7x TensorCores
    pool = multi if multi else cands
    big = [d for d in pool if d * seq_len >= target_rows]
    return min(big) if big else max(pool)


@jax.jit
def decnn_forward(x_emb, params):
    """x_emb: (B, L, Cin) f32 -> (B, L, NUM_CLASSES) log-probs."""
    B, L, Cin = x_emb.shape
    bt = _pick_seqs_per_step(B, L)
    cols = bt * L                          # tokens (lanes) per grid step
    n_steps = (B * L) // cols

    f32, bf16 = jnp.float32, jnp.bfloat16

    # merge conv1 (k=5) and conv2 (k=3, center-padded) along Cout, then flatten
    # (tap, Cin) into a single K axis for the layer-1 im2col matmul.
    w1, b1, w2, b2 = params["w1"], params["b1"], params["w2"], params["b2"]
    pad_k = (w1.shape[0] - w2.shape[0]) // 2
    w2p = jnp.pad(w2, ((pad_k, pad_k), (0, 0), (0, 0)))
    w12 = jnp.concatenate([w1, w2p], axis=2)                   # (5, Cin, Cmid)
    Cmid = w12.shape[2]
    k1 = CONV_K * Cin
    k1p = -(-k1 // 128) * 128                                  # MXU-friendly K pad
    w12_t = jnp.pad(w12.reshape(k1, Cmid).T,
                    ((0, 0), (0, k1p - k1))).astype(bf16)      # (Cmid, k1p)
    b12_t = jnp.concatenate([b1, b2], axis=1).reshape(Cmid, 1).astype(f32)

    # conv3/4/5: stored (K, Cin, Cout) -> per-tap (Cout, Cin), bf16
    w3 = jnp.transpose(params["w3"], (0, 2, 1)).astype(bf16)
    w4 = jnp.transpose(params["w4"], (0, 2, 1)).astype(bf16)
    w5 = jnp.transpose(params["w5"], (0, 2, 1)).astype(bf16)
    b3 = params["b3"].reshape(-1, 1).astype(f32)
    b4 = params["b4"].reshape(-1, 1).astype(f32)
    b5 = params["b5"].reshape(-1, 1).astype(f32)

    # classifier: (Cmid, 3) -> (CLASS_PAD, Cmid); pad classes get zero weights
    # and -inf bias so they vanish in the log-softmax.
    wl_t = jnp.pad(params["wl"].T,
                   ((0, CLASS_PAD - NUM_CLASSES), (0, 0))).astype(bf16)
    bl_t = jnp.concatenate(
        [params["bl"].reshape(NUM_CLASSES, 1).astype(f32),
         jnp.full((CLASS_PAD - NUM_CLASSES, 1), NEG_INF, f32)], axis=0)

    # im2col the 5 taps of layer 1 along channels (zero padding = 'same' conv
    # boundary), tokens on lanes.  Layout plumbing only, done once in XLA.
    x_pad = jnp.pad(x_emb, ((0, 0), (CONV_P, CONV_P), (0, 0)))
    xcat = jnp.concatenate([x_pad[:, k:k + L, :] for k in range(CONV_K)], axis=-1)
    xcat = jnp.pad(xcat, ((0, 0), (0, 0), (0, k1p - k1))).astype(bf16)
    x_t = xcat.reshape(B * L, k1p).T                           # (k1p, B*L) bf16

    plist = [w12_t, b12_t, w3, b3, w4, b4, w5, b5, wl_t, bl_t]
    in_specs = [pl.BlockSpec((k1p, cols), lambda i: (0, i))]
    for p in plist:
        # grid-invariant index_map -> Pallas DMAs these weight blocks only once
        in_specs.append(pl.BlockSpec(p.shape, lambda i, n=p.ndim: (0,) * n))

    out_t = pl.pallas_call(
        functools.partial(decnn_kernel, seq_len=L),
        out_shape=jax.ShapeDtypeStruct((CLASS_PAD, B * L), bf16),
        grid=(n_steps,),
        in_specs=in_specs,
        out_specs=pl.BlockSpec((CLASS_PAD, cols), lambda i: (0, i)),
        compiler_params=pltpu.CompilerParams(
            dimension_semantics=("parallel",),
            vmem_limit_bytes=32 * 1024 * 1024),
    )(x_t, *plist)

    return out_t[:NUM_CLASSES].T.reshape(B, L, NUM_CLASSES).astype(f32)


# ----------------------- pure-JAX reference (for check) ----------------------
def _ref_conv1d(x_blc, w_kio, b_1c):
    # mirror the kernel's bf16 MXU inputs / f32 accumulation
    xb = x_blc.astype(jnp.bfloat16).astype(jnp.float32)
    wb = w_kio.astype(jnp.bfloat16).astype(jnp.float32)
    K = w_kio.shape[0]
    P = (K - 1) // 2
    y = jax.lax.conv_general_dilated(
        jnp.transpose(xb, (0, 2, 1)),            # (B, Cin, L)
        jnp.transpose(wb, (2, 1, 0)),            # (Cout, Cin, K)
        window_strides=(1,), padding=[(P, P)],
        dimension_numbers=("NCH", "OIH", "NCH"),
        precision="highest")
    return jnp.transpose(y, (0, 2, 1)) + b_1c.reshape(1, 1, -1)


def ref_forward(x_emb, p):
    c1 = _ref_conv1d(x_emb, p["w1"], p["b1"])
    c2 = _ref_conv1d(x_emb, p["w2"], p["b2"])
    h = jax.nn.relu(jnp.concatenate([c1, c2], axis=-1))
    h = jax.nn.relu(_ref_conv1d(h, p["w3"], p["b3"]))
    h = jax.nn.relu(_ref_conv1d(h, p["w4"], p["b4"]))
    h = jax.nn.relu(_ref_conv1d(h, p["w5"], p["b5"]))
    hb = h.astype(jnp.bfloat16).astype(jnp.float32)
    wlb = p["wl"].astype(jnp.bfloat16).astype(jnp.float32)
    logits = jnp.einsum("blc,cn->bln", hb, wlb,
                        precision="highest") + p["bl"].reshape(1, 1, -1)
    return jax.nn.log_softmax(logits, axis=-1)


# --------------------------------- demo ---------------------------------------
if __name__ == "__main__":
    key = jax.random.PRNGKey(0)
    ks = jax.random.split(key, 16)

    vocab = 50
    gen_dim, dom_dim = 32, 16          # gen_emb.shape[1], domain_emb.shape[1]
    Cin = gen_dim + dom_dim
    B, L = 16, 16                      # 16 seqs of 16 tokens -> 2 steps x 128 tokens

    # frozen embedding tables (the module copies them from numpy arrays)
    gen_table = jax.random.normal(ks[0], (vocab, gen_dim), jnp.float32) * 0.1
    dom_table = jax.random.normal(ks[1], (vocab, dom_dim), jnp.float32) * 0.1

    # conv weights stored as (K, Cin, Cout) = PyTorch (Cout, Cin, K) transposed
    params = {
        "w1": jax.random.normal(ks[2], (5, Cin, 128), jnp.float32) * 0.1,
        "b1": jax.random.normal(ks[3], (1, 128), jnp.float32) * 0.1,
        "w2": jax.random.normal(ks[4], (3, Cin, 128), jnp.float32) * 0.1,
        "b2": jax.random.normal(ks[5], (1, 128), jnp.float32) * 0.1,
        "w3": jax.random.normal(ks[6], (5, 256, 256), jnp.float32) * 0.05,
        "b3": jax.random.normal(ks[7], (1, 256), jnp.float32) * 0.1,
        "w4": jax.random.normal(ks[8], (5, 256, 256), jnp.float32) * 0.05,
        "b4": jax.random.normal(ks[9], (1, 256), jnp.float32) * 0.1,
        "w5": jax.random.normal(ks[10], (5, 256, 256), jnp.float32) * 0.05,
        "b5": jax.random.normal(ks[11], (1, 256), jnp.float32) * 0.1,
        # linear_ae: y = x @ W^T + b with W (3, 256); store W^T = (256, 3)
        "wl": jax.random.normal(ks[12], (256, NUM_CLASSES), jnp.float32) * 0.1,
        "bl": jax.random.normal(ks[13], (1, NUM_CLASSES), jnp.float32) * 0.1,
    }

    # inputs of the forward signature
    x = jax.random.randint(ks[14], (B, L), 0, vocab, dtype=jnp.int32)
    x_len = jnp.full((B,), L, jnp.int32)                               # unused (testing path)
    x_mask = (jnp.arange(L)[None, :] < x_len[:, None]).astype(jnp.int32)  # unused (no CRF)

    # embedding lookup + concat (gather glue, stays in plain JAX)
    x_emb = jnp.concatenate([gen_table[x], dom_table[x]], axis=-1)  # (B, L, Cin)
    # dropout: identity in inference

    out = decnn_forward(x_emb, params)
    jax.block_until_ready(out)

    ref = ref_forward(x_emb, params)
    np.testing.assert_allclose(np.asarray(out), np.asarray(ref),
                               rtol=2e-2, atol=2e-2)

    print("KERNEL_OK")
</pallas_src>

<mosaic_0001>
module attributes {stable_mosaic.version = 11 : i64} {
  func.func @decnn_kernel(%arg0: i32, %arg1: memref<256x128xbf16, #tpu.memory_space<vmem>>, %arg2: memref<256x256xbf16, #tpu.memory_space<vmem>>, %arg3: memref<256x1xf32, #tpu.memory_space<vmem>>, %arg4: memref<5x256x256xbf16, #tpu.memory_space<vmem>>, %arg5: memref<256x1xf32, #tpu.memory_space<vmem>>, %arg6: memref<5x256x256xbf16, #tpu.memory_space<vmem>>, %arg7: memref<256x1xf32, #tpu.memory_space<vmem>>, %arg8: memref<5x256x256xbf16, #tpu.memory_space<vmem>>, %arg9: memref<256x1xf32, #tpu.memory_space<vmem>>, %arg10: memref<16x256xbf16, #tpu.memory_space<vmem>>, %arg11: memref<16x1xf32, #tpu.memory_space<vmem>>, %arg12: memref<16x128xbf16, #tpu.memory_space<vmem>>) attributes {dimension_semantics = [#tpu.dimension_semantics<parallel>], iteration_bounds = array<i64: 2>, scalar_prefetch = 0 : i64, scratch_operands = 0 : i64, tpu.core_type = #tpu.core_type<tc>, window_params = [{transform_indices = @transform_0, window_bounds = array<i64: 256, 128>}, {pipeline_mode = #tpu.pipeline_mode<synchronous>, transform_indices = @transform_1, window_bounds = array<i64: 256, 256>}, {pipeline_mode = #tpu.pipeline_mode<synchronous>, transform_indices = @transform_2, window_bounds = array<i64: 256, 1>}, {pipeline_mode = #tpu.pipeline_mode<synchronous>, transform_indices = @transform_3, window_bounds = array<i64: 5, 256, 256>}, {pipeline_mode = #tpu.pipeline_mode<synchronous>, transform_indices = @transform_4, window_bounds = array<i64: 256, 1>}, {pipeline_mode = #tpu.pipeline_mode<synchronous>, transform_indices = @transform_5, window_bounds = array<i64: 5, 256, 256>}, {pipeline_mode = #tpu.pipeline_mode<synchronous>, transform_indices = @transform_6, window_bounds = array<i64: 256, 1>}, {pipeline_mode = #tpu.pipeline_mode<synchronous>, transform_indices = @transform_7, window_bounds = array<i64: 5, 256, 256>}, {pipeline_mode = #tpu.pipeline_mode<synchronous>, transform_indices = @transform_8, window_bounds = array<i64: 256, 1>}, {pipeline_mode = #tpu.pipeline_mode<synchronous>, transform_indices = @transform_9, window_bounds = array<i64: 16, 256>}, {pipeline_mode = #tpu.pipeline_mode<synchronous>, transform_indices = @transform_10, window_bounds = array<i64: 16, 1>}, {transform_indices = @transform_11, window_bounds = array<i64: 16, 128>}]} {
    %0 = tpu.iota {dimensions = array<i32: 1>} : vector<1x128xi32>
    %c16_i32 = arith.constant 16 : i32
    %c0_i32 = arith.constant 0 : i32
    %1 = arith.cmpi eq, %c16_i32, %c0_i32 : i32
    %c1_i32 = arith.constant 1 : i32
    %2 = arith.select %1, %c1_i32, %c16_i32 : i32
    %3 = vector.broadcast %2 : i32 to vector<1x128xi32>
    %4 = arith.remsi %0, %3 : vector<1x128xi32>
    %c0_i32_0 = arith.constant 0 : i32
    %5 = vector.broadcast %c0_i32_0 : i32 to vector<1x128xi32>
    %6 = arith.cmpi ne, %4, %5 : vector<1x128xi32>
    %c0_i32_1 = arith.constant 0 : i32
    %7 = vector.broadcast %c0_i32_1 : i32 to vector<1x128xi32>
    %8 = arith.cmpi slt, %4, %7 : vector<1x128xi32>
    %c0_i32_2 = arith.constant 0 : i32
    %9 = arith.cmpi slt, %2, %c0_i32_2 : i32
    %10 = vector.broadcast %9 : i1 to vector<1x128xi1>
    %11 = vector.broadcast %10 : vector<1x128xi1> to vector<1x128xi1>
    %12 = arith.xori %8, %11 : vector<1x128xi1>
    %13 = arith.andi %12, %6 : vector<1x128xi1>
    %14 = vector.broadcast %2 : i32 to vector<1x128xi32>
    %15 = arith.addi %4, %14 : vector<1x128xi32>
    %16 = arith.select %13, %15, %4 : vector<1x128xi1>, vector<1x128xi32>
    %c-2_i32 = arith.constant -2 : i32
    %17 = vector.broadcast %c-2_i32 : i32 to vector<1x128xi32>
    %18 = arith.addi %16, %17 : vector<1x128xi32>
    %c0_i32_3 = arith.constant 0 : i32
    %19 = vector.broadcast %c0_i32_3 : i32 to vector<1x128xi32>
    %20 = arith.cmpi sge, %18, %19 : vector<1x128xi32>
    %c-2_i32_4 = arith.constant -2 : i32
    %21 = vector.broadcast %c-2_i32_4 : i32 to vector<1x128xi32>
    %22 = arith.addi %16, %21 : vector<1x128xi32>
    %c16_i32_5 = arith.constant 16 : i32
    %23 = vector.broadcast %c16_i32_5 : i32 to vector<1x128xi32>
    %24 = arith.cmpi slt, %22, %23 : vector<1x128xi32>
    %25 = arith.andi %20, %24 : vector<1x128xi1>
    %c-1_i32 = arith.constant -1 : i32
    %26 = vector.broadcast %c-1_i32 : i32 to vector<1x128xi32>
    %27 = arith.addi %16, %26 : vector<1x128xi32>
    %c0_i32_6 = arith.constant 0 : i32
    %28 = vector.broadcast %c0_i32_6 : i32 to vector<1x128xi32>
    %29 = arith.cmpi sge, %27, %28 : vector<1x128xi32>
    %c-1_i32_7 = arith.constant -1 : i32
    %30 = vector.broadcast %c-1_i32_7 : i32 to vector<1x128xi32>
    %31 = arith.addi %16, %30 : vector<1x128xi32>
    %c16_i32_8 = arith.constant 16 : i32
    %32 = vector.broadcast %c16_i32_8 : i32 to vector<1x128xi32>
    %33 = arith.cmpi slt, %31, %32 : vector<1x128xi32>
    %34 = arith.andi %29, %33 : vector<1x128xi1>
    %c1_i32_9 = arith.constant 1 : i32
    %35 = vector.broadcast %c1_i32_9 : i32 to vector<1x128xi32>
    %36 = arith.addi %16, %35 : vector<1x128xi32>
    %c0_i32_10 = arith.constant 0 : i32
    %37 = vector.broadcast %c0_i32_10 : i32 to vector<1x128xi32>
    %38 = arith.cmpi sge, %36, %37 : vector<1x128xi32>
    %c1_i32_11 = arith.constant 1 : i32
    %39 = vector.broadcast %c1_i32_11 : i32 to vector<1x128xi32>
    %40 = arith.addi %16, %39 : vector<1x128xi32>
    %c16_i32_12 = arith.constant 16 : i32
    %41 = vector.broadcast %c16_i32_12 : i32 to vector<1x128xi32>
    %42 = arith.cmpi slt, %40, %41 : vector<1x128xi32>
    %43 = arith.andi %38, %42 : vector<1x128xi1>
    %c2_i32 = arith.constant 2 : i32
    %44 = vector.broadcast %c2_i32 : i32 to vector<1x128xi32>
    %45 = arith.addi %16, %44 : vector<1x128xi32>
    %c0_i32_13 = arith.constant 0 : i32
    %46 = vector.broadcast %c0_i32_13 : i32 to vector<1x128xi32>
    %47 = arith.cmpi sge, %45, %46 : vector<1x128xi32>
    %c2_i32_14 = arith.constant 2 : i32
    %48 = vector.broadcast %c2_i32_14 : i32 to vector<1x128xi32>
    %49 = arith.addi %16, %48 : vector<1x128xi32>
    %c16_i32_15 = arith.constant 16 : i32
    %50 = vector.broadcast %c16_i32_15 : i32 to vector<1x128xi32>
    %51 = arith.cmpi slt, %49, %50 : vector<1x128xi32>
    %52 = arith.andi %47, %51 : vector<1x128xi1>
    %c0 = arith.constant 0 : index
    %c0_16 = arith.constant 0 : index
    %53 = vector.load %arg2[%c0, %c0_16] : memref<256x256xbf16, #tpu.memory_space<vmem>>, vector<256x256xbf16>
    %c0_17 = arith.constant 0 : index
    %c0_18 = arith.constant 0 : index
    %54 = vector.load %arg1[%c0_17, %c0_18] : memref<256x128xbf16, #tpu.memory_space<vmem>>, vector<256x128xbf16>
    %cst = arith.constant dense<0.000000e+00> : vector<256x128xf32>
    %55 = tpu.matmul %53, %54, %cst {dimension_numbers = #tpu.dot_dimension_numbers<[1], [0], [0], [1], [0, 0, 1, 1], [], []>} : vector<256x256xbf16>, vector<256x128xbf16>, vector<256x128xf32> -> vector<256x128xf32>
    %c0_19 = arith.constant 0 : index
    %c0_20 = arith.constant 0 : index
    %56 = vector.load %arg3[%c0_19, %c0_20] : memref<256x1xf32, #tpu.memory_space<vmem>>, vector<256x1xf32>
    %57 = vector.broadcast %56 : vector<256x1xf32> to vector<256x128xf32>
    %58 = arith.addf %55, %57 : vector<256x128xf32>
    %cst_21 = arith.constant 0.000000e+00 : f32
    %59 = vector.broadcast %cst_21 : f32 to vector<256x128xf32>
    %60 = arith.maximumf %58, %59 : vector<256x128xf32>
    %61 = arith.truncf %60 : vector<256x128xf32> to vector<256x128xbf16>
    %c2 = arith.constant 2 : index
    %c0_22 = arith.constant 0 : index
    %c0_23 = arith.constant 0 : index
    %62 = vector.load %arg4[%c2, %c0_22, %c0_23] : memref<5x256x256xbf16, #tpu.memory_space<vmem>>, vector<1x256x256xbf16>
    %63 = vector.shape_cast %62 : vector<1x256x256xbf16> to vector<256x256xbf16>
    %cst_24 = arith.constant dense<0.000000e+00> : vector<256x128xf32>
    %64 = tpu.matmul %63, %61, %cst_24 {dimension_numbers = #tpu.dot_dimension_numbers<[1], [0], [0], [1], [0, 0, 1, 1], [], []>} : vector<256x256xbf16>, vector<256x128xbf16>, vector<256x128xf32> -> vector<256x128xf32>
    %65 = tpu.bitcast %61 : vector<256x128xbf16> -> vector<128x128xi32>
    %c2_i32_25 = arith.constant 2 : i32
    %66 = tpu.dynamic_rotate %65 by %c2_i32_25 dim 1 : vector<128x128xi32>, i32 -> vector<128x128xi32>
    %c0_i32_26 = arith.constant 0 : i32
    %67 = vector.shape_cast %25 : vector<1x128xi1> to vector<1x128xi1>
    %68 = vector.broadcast %67 : vector<1x128xi1> to vector<128x128xi1>
    %69 = vector.broadcast %c0_i32_26 : i32 to vector<128x128xi32>
    %70 = arith.select %68, %66, %69 : vector<128x128xi1>, vector<128x128xi32>
    %71 = tpu.bitcast %70 : vector<128x128xi32> -> vector<256x128xbf16>
    %c0_27 = arith.constant 0 : index
    %c0_28 = arith.constant 0 : index
    %c0_29 = arith.constant 0 : index
    %72 = vector.load %arg4[%c0_27, %c0_28, %c0_29] : memref<5x256x256xbf16, #tpu.memory_space<vmem>>, vector<1x256x256xbf16>
    %73 = vector.shape_cast %72 : vector<1x256x256xbf16> to vector<256x256xbf16>
    %cst_30 = arith.constant dense<0.000000e+00> : vector<256x128xf32>
    %74 = tpu.matmul %73, %71, %cst_30 {dimension_numbers = #tpu.dot_dimension_numbers<[1], [0], [0], [1], [0, 0, 1, 1], [], []>} : vector<256x256xbf16>, vector<256x128xbf16>, vector<256x128xf32> -> vector<256x128xf32>
    %75 = arith.addf %64, %74 : vector<256x128xf32>
    %c1_i32_31 = arith.constant 1 : i32
    %76 = tpu.dynamic_rotate %65 by %c1_i32_31 dim 1 : vector<128x128xi32>, i32 -> vector<128x128xi32>
    %c0_i32_32 = arith.constant 0 : i32
    %77 = vector.shape_cast %34 : vector<1x128xi1> to vector<1x128xi1>
    %78 = vector.broadcast %77 : vector<1x128xi1> to vector<128x128xi1>
    %79 = vector.broadcast %c0_i32_32 : i32 to vector<128x128xi32>
    %80 = arith.select %78, %76, %79 : vector<128x128xi1>, vector<128x128xi32>
    %81 = tpu.bitcast %80 : vector<128x128xi32> -> vector<256x128xbf16>
    %c1 = arith.constant 1 : index
    %c0_33 = arith.constant 0 : index
    %c0_34 = arith.constant 0 : index
    %82 = vector.load %arg4[%c1, %c0_33, %c0_34] : memref<5x256x256xbf16, #tpu.memory_space<vmem>>, vector<1x256x256xbf16>
    %83 = vector.shape_cast %82 : vector<1x256x256xbf16> to vector<256x256xbf16>
    %cst_35 = arith.constant dense<0.000000e+00> : vector<256x128xf32>
    %84 = tpu.matmul %83, %81, %cst_35 {dimension_numbers = #tpu.dot_dimension_numbers<[1], [0], [0], [1], [0, 0, 1, 1], [], []>} : vector<256x256xbf16>, vector<256x128xbf16>, vector<256x128xf32> -> vector<256x128xf32>
    %85 = arith.addf %75, %84 : vector<256x128xf32>
    %c127_i32 = arith.constant 127 : i32
    %86 = tpu.dynamic_rotate %65 by %c127_i32 dim 1 : vector<128x128xi32>, i32 -> vector<128x128xi32>
    %c0_i32_36 = arith.constant 0 : i32
    %87 = vector.shape_cast %43 : vector<1x128xi1> to vector<1x128xi1>
    %88 = vector.broadcast %87 : vector<1x128xi1> to vector<128x128xi1>
    %89 = vector.broadcast %c0_i32_36 : i32 to vector<128x128xi32>
    %90 = arith.select %88, %86, %89 : vector<128x128xi1>, vector<128x128xi32>
    %91 = tpu.bitcast %90 : vector<128x128xi32> -> vector<256x128xbf16>
    %c3 = arith.constant 3 : index
    %c0_37 = arith.constant 0 : index
    %c0_38 = arith.constant 0 : index
    %92 = vector.load %arg4[%c3, %c0_37, %c0_38] : memref<5x256x256xbf16, #tpu.memory_space<vmem>>, vector<1x256x256xbf16>
    %93 = vector.shape_cast %92 : vector<1x256x256xbf16> to vector<256x256xbf16>
    %cst_39 = arith.constant dense<0.000000e+00> : vector<256x128xf32>
    %94 = tpu.matmul %93, %91, %cst_39 {dimension_numbers = #tpu.dot_dimension_numbers<[1], [0], [0], [1], [0, 0, 1, 1], [], []>} : vector<256x256xbf16>, vector<256x128xbf16>, vector<256x128xf32> -> vector<256x128xf32>
    %95 = arith.addf %85, %94 : vector<256x128xf32>
    %c126_i32 = arith.constant 126 : i32
    %96 = tpu.dynamic_rotate %65 by %c126_i32 dim 1 : vector<128x128xi32>, i32 -> vector<128x128xi32>
    %c0_i32_40 = arith.constant 0 : i32
    %97 = vector.shape_cast %52 : vector<1x128xi1> to vector<1x128xi1>
    %98 = vector.broadcast %97 : vector<1x128xi1> to vector<128x128xi1>
    %99 = vector.broadcast %c0_i32_40 : i32 to vector<128x128xi32>
    %100 = arith.select %98, %96, %99 : vector<128x128xi1>, vector<128x128xi32>
    %101 = tpu.bitcast %100 : vector<128x128xi32> -> vector<256x128xbf16>
    %c4 = arith.constant 4 : index
    %c0_41 = arith.constant 0 : index
    %c0_42 = arith.constant 0 : index
    %102 = vector.load %arg4[%c4, %c0_41, %c0_42] : memref<5x256x256xbf16, #tpu.memory_space<vmem>>, vector<1x256x256xbf16>
    %103 = vector.shape_cast %102 : vector<1x256x256xbf16> to vector<256x256xbf16>
    %cst_43 = arith.constant dense<0.000000e+00> : vector<256x128xf32>
    %104 = tpu.matmul %103, %101, %cst_43 {dimension_numbers = #tpu.dot_dimension_numbers<[1], [0], [0], [1], [0, 0, 1, 1], [], []>} : vector<256x256xbf16>, vector<256x128xbf16>, vector<256x128xf32> -> vector<256x128xf32>
    %105 = arith.addf %95, %104 : vector<256x128xf32>
    %c0_44 = arith.constant 0 : index
    %c0_45 = arith.constant 0 : index
    %106 = vector.load %arg5[%c0_44, %c0_45] : memref<256x1xf32, #tpu.memory_space<vmem>>, vector<256x1xf32>
    %107 = vector.broadcast %106 : vector<256x1xf32> to vector<256x128xf32>
    %108 = arith.addf %105, %107 : vector<256x128xf32>
    %cst_46 = arith.constant 0.000000e+00 : f32
    %109 = vector.broadcast %cst_46 : f32 to vector<256x128xf32>
    %110 = arith.maximumf %108, %109 : vector<256x128xf32>
    %111 = arith.truncf %110 : vector<256x128xf32> to vector<256x128xbf16>
    %c2_47 = arith.constant 2 : index
    %c0_48 = arith.constant 0 : index
    %c0_49 = arith.constant 0 : index
    %112 = vector.load %arg6[%c2_47, %c0_48, %c0_49] : memref<5x256x256xbf16, #tpu.memory_space<vmem>>, vector<1x256x256xbf16>
    %113 = vector.shape_cast %112 : vector<1x256x256xbf16> to vector<256x256xbf16>
    %cst_50 = arith.constant dense<0.000000e+00> : vector<256x128xf32>
    %114 = tpu.matmul %113, %111, %cst_50 {dimension_numbers = #tpu.dot_dimension_numbers<[1], [0], [0], [1], [0, 0, 1, 1], [], []>} : vector<256x256xbf16>, vector<256x128xbf16>, vector<256x128xf32> -> vector<256x128xf32>
    %115 = tpu.bitcast %111 : vector<256x128xbf16> -> vector<128x128xi32>
    %c2_i32_51 = arith.constant 2 : i32
    %116 = tpu.dynamic_rotate %115 by %c2_i32_51 dim 1 : vector<128x128xi32>, i32 -> vector<128x128xi32>
    %c0_i32_52 = arith.constant 0 : i32
    %117 = vector.shape_cast %25 : vector<1x128xi1> to vector<1x128xi1>
    %118 = vector.broadcast %117 : vector<1x128xi1> to vector<128x128xi1>
    %119 = vector.broadcast %c0_i32_52 : i32 to vector<128x128xi32>
    %120 = arith.select %118, %116, %119 : vector<128x128xi1>, vector<128x128xi32>
    %121 = tpu.bitcast %120 : vector<128x128xi32> -> vector<256x128xbf16>
    %c0_53 = arith.constant 0 : index
    %c0_54 = arith.constant 0 : index
    %c0_55 = arith.constant 0 : index
    %122 = vector.load %arg6[%c0_53, %c0_54, %c0_55] : memref<5x256x256xbf16, #tpu.memory_space<vmem>>, vector<1x256x256xbf16>
    %123 = vector.shape_cast %122 : vector<1x256x256xbf16> to vector<256x256xbf16>
    %cst_56 = arith.constant dense<0.000000e+00> : vector<256x128xf32>
    %124 = tpu.matmul %123, %121, %cst_56 {dimension_numbers = #tpu.dot_dimension_numbers<[1], [0], [0], [1], [0, 0, 1, 1], [], []>} : vector<256x256xbf16>, vector<256x128xbf16>, vector<256x128xf32> -> vector<256x128xf32>
    %125 = arith.addf %114, %124 : vector<256x128xf32>
    %c1_i32_57 = arith.constant 1 : i32
    %126 = tpu.dynamic_rotate %115 by %c1_i32_57 dim 1 : vector<128x128xi32>, i32 -> vector<128x128xi32>
    %c0_i32_58 = arith.constant 0 : i32
    %127 = vector.shape_cast %34 : vector<1x128xi1> to vector<1x128xi1>
    %128 = vector.broadcast %127 : vector<1x128xi1> to vector<128x128xi1>
    %129 = vector.broadcast %c0_i32_58 : i32 to vector<128x128xi32>
    %130 = arith.select %128, %126, %129 : vector<128x128xi1>, vector<128x128xi32>
    %131 = tpu.bitcast %130 : vector<128x128xi32> -> vector<256x128xbf16>
    %c1_59 = arith.constant 1 : index
    %c0_60 = arith.constant 0 : index
    %c0_61 = arith.constant 0 : index
    %132 = vector.load %arg6[%c1_59, %c0_60, %c0_61] : memref<5x256x256xbf16, #tpu.memory_space<vmem>>, vector<1x256x256xbf16>
    %133 = vector.shape_cast %132 : vector<1x256x256xbf16> to vector<256x256xbf16>
    %cst_62 = arith.constant dense<0.000000e+00> : vector<256x128xf32>
    %134 = tpu.matmul %133, %131, %cst_62 {dimension_numbers = #tpu.dot_dimension_numbers<[1], [0], [0], [1], [0, 0, 1, 1], [], []>} : vector<256x256xbf16>, vector<256x128xbf16>, vector<256x128xf32> -> vector<256x128xf32>
    %135 = arith.addf %125, %134 : vector<256x128xf32>
    %c127_i32_63 = arith.constant 127 : i32
    %136 = tpu.dynamic_rotate %115 by %c127_i32_63 dim 1 : vector<128x128xi32>, i32 -> vector<128x128xi32>
    %c0_i32_64 = arith.constant 0 : i32
    %137 = vector.shape_cast %43 : vector<1x128xi1> to vector<1x128xi1>
    %138 = vector.broadcast %137 : vector<1x128xi1> to vector<128x128xi1>
    %139 = vector.broadcast %c0_i32_64 : i32 to vector<128x128xi32>
    %140 = arith.select %138, %136, %139 : vector<128x128xi1>, vector<128x128xi32>
    %141 = tpu.bitcast %140 : vector<128x128xi32> -> vector<256x128xbf16>
    %c3_65 = arith.constant 3 : index
    %c0_66 = arith.constant 0 : index
    %c0_67 = arith.constant 0 : index
    %142 = vector.load %arg6[%c3_65, %c0_66, %c0_67] : memref<5x256x256xbf16, #tpu.memory_space<vmem>>, vector<1x256x256xbf16>
    %143 = vector.shape_cast %142 : vector<1x256x256xbf16> to vector<256x256xbf16>
    %cst_68 = arith.constant dense<0.000000e+00> : vector<256x128xf32>
    %144 = tpu.matmul %143, %141, %cst_68 {dimension_numbers = #tpu.dot_dimension_numbers<[1], [0], [0], [1], [0, 0, 1, 1], [], []>} : vector<256x256xbf16>, vector<256x128xbf16>, vector<256x128xf32> -> vector<256x128xf32>
    %145 = arith.addf %135, %144 : vector<256x128xf32>
    %c126_i32_69 = arith.constant 126 : i32
    %146 = tpu.dynamic_rotate %115 by %c126_i32_69 dim 1 : vector<128x128xi32>, i32 -> vector<128x128xi32>
    %c0_i32_70 = arith.constant 0 : i32
    %147 = vector.shape_cast %52 : vector<1x128xi1> to vector<1x128xi1>
    %148 = vector.broadcast %147 : vector<1x128xi1> to vector<128x128xi1>
    %149 = vector.broadcast %c0_i32_70 : i32 to vector<128x128xi32>
    %150 = arith.select %148, %146, %149 : vector<128x128xi1>, vector<128x128xi32>
    %151 = tpu.bitcast %150 : vector<128x128xi32> -> vector<256x128xbf16>
    %c4_71 = arith.constant 4 : index
    %c0_72 = arith.constant 0 : index
    %c0_73 = arith.constant 0 : index
    %152 = vector.load %arg6[%c4_71, %c0_72, %c0_73] : memref<5x256x256xbf16, #tpu.memory_space<vmem>>, vector<1x256x256xbf16>
    %153 = vector.shape_cast %152 : vector<1x256x256xbf16> to vector<256x256xbf16>
    %cst_74 = arith.constant dense<0.000000e+00> : vector<256x128xf32>
    %154 = tpu.matmul %153, %151, %cst_74 {dimension_numbers = #tpu.dot_dimension_numbers<[1], [0], [0], [1], [0, 0, 1, 1], [], []>} : vector<256x256xbf16>, vector<256x128xbf16>, vector<256x128xf32> -> vector<256x128xf32>
    %155 = arith.addf %145, %154 : vector<256x128xf32>
    %c0_75 = arith.constant 0 : index
    %c0_76 = arith.constant 0 : index
    %156 = vector.load %arg7[%c0_75, %c0_76] : memref<256x1xf32, #tpu.memory_space<vmem>>, vector<256x1xf32>
    %157 = vector.broadcast %156 : vector<256x1xf32> to vector<256x128xf32>
    %158 = arith.addf %155, %157 : vector<256x128xf32>
    %cst_77 = arith.constant 0.000000e+00 : f32
    %159 = vector.broadcast %cst_77 : f32 to vector<256x128xf32>
    %160 = arith.maximumf %158, %159 : vector<256x128xf32>
    %161 = arith.truncf %160 : vector<256x128xf32> to vector<256x128xbf16>
    %c2_78 = arith.constant 2 : index
    %c0_79 = arith.constant 0 : index
    %c0_80 = arith.constant 0 : index
    %162 = vector.load %arg8[%c2_78, %c0_79, %c0_80] : memref<5x256x256xbf16, #tpu.memory_space<vmem>>, vector<1x256x256xbf16>
    %163 = vector.shape_cast %162 : vector<1x256x256xbf16> to vector<256x256xbf16>
    %cst_81 = arith.constant dense<0.000000e+00> : vector<256x128xf32>
    %164 = tpu.matmul %163, %161, %cst_81 {dimension_numbers = #tpu.dot_dimension_numbers<[1], [0], [0], [1], [0, 0, 1, 1], [], []>} : vector<256x256xbf16>, vector<256x128xbf16>, vector<256x128xf32> -> vector<256x128xf32>
    %165 = tpu.bitcast %161 : vector<256x128xbf16> -> vector<128x128xi32>
    %c2_i32_82 = arith.constant 2 : i32
    %166 = tpu.dynamic_rotate %165 by %c2_i32_82 dim 1 : vector<128x128xi32>, i32 -> vector<128x128xi32>
    %c0_i32_83 = arith.constant 0 : i32
    %167 = vector.shape_cast %25 : vector<1x128xi1> to vector<1x128xi1>
    %168 = vector.broadcast %167 : vector<1x128xi1> to vector<128x128xi1>
    %169 = vector.broadcast %c0_i32_83 : i32 to vector<128x128xi32>
    %170 = arith.select %168, %166, %169 : vector<128x128xi1>, vector<128x128xi32>
    %171 = tpu.bitcast %170 : vector<128x128xi32> -> vector<256x128xbf16>
    %c0_84 = arith.constant 0 : index
    %c0_85 = arith.constant 0 : index
    %c0_86 = arith.constant 0 : index
    %172 = vector.load %arg8[%c0_84, %c0_85, %c0_86] : memref<5x256x256xbf16, #tpu.memory_space<vmem>>, vector<1x256x256xbf16>
    %173 = vector.shape_cast %172 : vector<1x256x256xbf16> to vector<256x256xbf16>
    %cst_87 = arith.constant dense<0.000000e+00> : vector<256x128xf32>
    %174 = tpu.matmul %173, %171, %cst_87 {dimension_numbers = #tpu.dot_dimension_numbers<[1], [0], [0], [1], [0, 0, 1, 1], [], []>} : vector<256x256xbf16>, vector<256x128xbf16>, vector<256x128xf32> -> vector<256x128xf32>
    %175 = arith.addf %164, %174 : vector<256x128xf32>
    %c1_i32_88 = arith.constant 1 : i32
    %176 = tpu.dynamic_rotate %165 by %c1_i32_88 dim 1 : vector<128x128xi32>, i32 -> vector<128x128xi32>
    %c0_i32_89 = arith.constant 0 : i32
    %177 = vector.shape_cast %34 : vector<1x128xi1> to vector<1x128xi1>
    %178 = vector.broadcast %177 : vector<1x128xi1> to vector<128x128xi1>
    %179 = vector.broadcast %c0_i32_89 : i32 to vector<128x128xi32>
    %180 = arith.select %178, %176, %179 : vector<128x128xi1>, vector<128x128xi32>
    %181 = tpu.bitcast %180 : vector<128x128xi32> -> vector<256x128xbf16>
    %c1_90 = arith.constant 1 : index
    %c0_91 = arith.constant 0 : index
    %c0_92 = arith.constant 0 : index
    %182 = vector.load %arg8[%c1_90, %c0_91, %c0_92] : memref<5x256x256xbf16, #tpu.memory_space<vmem>>, vector<1x256x256xbf16>
    %183 = vector.shape_cast %182 : vector<1x256x256xbf16> to vector<256x256xbf16>
    %cst_93 = arith.constant dense<0.000000e+00> : vector<256x128xf32>
    %184 = tpu.matmul %183, %181, %cst_93 {dimension_numbers = #tpu.dot_dimension_numbers<[1], [0], [0], [1], [0, 0, 1, 1], [], []>} : vector<256x256xbf16>, vector<256x128xbf16>, vector<256x128xf32> -> vector<256x128xf32>
    %185 = arith.addf %175, %184 : vector<256x128xf32>
    %c127_i32_94 = arith.constant 127 : i32
    %186 = tpu.dynamic_rotate %165 by %c127_i32_94 dim 1 : vector<128x128xi32>, i32 -> vector<128x128xi32>
    %c0_i32_95 = arith.constant 0 : i32
    %187 = vector.shape_cast %43 : vector<1x128xi1> to vector<1x128xi1>
    %188 = vector.broadcast %187 : vector<1x128xi1> to vector<128x128xi1>
    %189 = vector.broadcast %c0_i32_95 : i32 to vector<128x128xi32>
    %190 = arith.select %188, %186, %189 : vector<128x128xi1>, vector<128x128xi32>
    %191 = tpu.bitcast %190 : vector<128x128xi32> -> vector<256x128xbf16>
    %c3_96 = arith.constant 3 : index
    %c0_97 = arith.constant 0 : index
    %c0_98 = arith.constant 0 : index
    %192 = vector.load %arg8[%c3_96, %c0_97, %c0_98] : memref<5x256x256xbf16, #tpu.memory_space<vmem>>, vector<1x256x256xbf16>
    %193 = vector.shape_cast %192 : vector<1x256x256xbf16> to vector<256x256xbf16>
    %cst_99 = arith.constant dense<0.000000e+00> : vector<256x128xf32>
    %194 = tpu.matmul %193, %191, %cst_99 {dimension_numbers = #tpu.dot_dimension_numbers<[1], [0], [0], [1], [0, 0, 1, 1], [], []>} : vector<256x256xbf16>, vector<256x128xbf16>, vector<256x128xf32> -> vector<256x128xf32>
    %195 = arith.addf %185, %194 : vector<256x128xf32>
    %c126_i32_100 = arith.constant 126 : i32
    %196 = tpu.dynamic_rotate %165 by %c126_i32_100 dim 1 : vector<128x128xi32>, i32 -> vector<128x128xi32>
    %c0_i32_101 = arith.constant 0 : i32
    %197 = vector.shape_cast %52 : vector<1x128xi1> to vector<1x128xi1>
    %198 = vector.broadcast %197 : vector<1x128xi1> to vector<128x128xi1>
    %199 = vector.broadcast %c0_i32_101 : i32 to vector<128x128xi32>
    %200 = arith.select %198, %196, %199 : vector<128x128xi1>, vector<128x128xi32>
    %201 = tpu.bitcast %200 : vector<128x128xi32> -> vector<256x128xbf16>
    %c4_102 = arith.constant 4 : index
    %c0_103 = arith.constant 0 : index
    %c0_104 = arith.constant 0 : index
    %202 = vector.load %arg8[%c4_102, %c0_103, %c0_104] : memref<5x256x256xbf16, #tpu.memory_space<vmem>>, vector<1x256x256xbf16>
    %203 = vector.shape_cast %202 : vector<1x256x256xbf16> to vector<256x256xbf16>
    %cst_105 = arith.constant dense<0.000000e+00> : vector<256x128xf32>
    %204 = tpu.matmul %203, %201, %cst_105 {dimension_numbers = #tpu.dot_dimension_numbers<[1], [0], [0], [1], [0, 0, 1, 1], [], []>} : vector<256x256xbf16>, vector<256x128xbf16>, vector<256x128xf32> -> vector<256x128xf32>
    %205 = arith.addf %195, %204 : vector<256x128xf32>
    %c0_106 = arith.constant 0 : index
    %c0_107 = arith.constant 0 : index
    %206 = vector.load %arg9[%c0_106, %c0_107] : memref<256x1xf32, #tpu.memory_space<vmem>>, vector<256x1xf32>
    %207 = vector.broadcast %206 : vector<256x1xf32> to vector<256x128xf32>
    %208 = arith.addf %205, %207 : vector<256x128xf32>
    %cst_108 = arith.constant 0.000000e+00 : f32
    %209 = vector.broadcast %cst_108 : f32 to vector<256x128xf32>
    %210 = arith.maximumf %208, %209 : vector<256x128xf32>
    %211 = arith.truncf %210 : vector<256x128xf32> to vector<256x128xbf16>
    %c0_109 = arith.constant 0 : index
    %c0_110 = arith.constant 0 : index
    %212 = vector.load %arg10[%c0_109, %c0_110] : memref<16x256xbf16, #tpu.memory_space<vmem>>, vector<16x256xbf16>
    %cst_111 = arith.constant dense<0.000000e+00> : vector<16x128xf32>
    %213 = tpu.matmul %212, %211, %cst_111 {dimension_numbers = #tpu.dot_dimension_numbers<[1], [0], [0], [1], [0, 0, 1, 1], [], []>} : vector<16x256xbf16>, vector<256x128xbf16>, vector<16x128xf32> -> vector<16x128xf32>
    %c0_112 = arith.constant 0 : index
    %c0_113 = arith.constant 0 : index
    %214 = vector.load %arg11[%c0_112, %c0_113] : memref<16x1xf32, #tpu.memory_space<vmem>>, vector<16x1xf32>
    %215 = vector.broadcast %214 : vector<16x1xf32> to vector<16x128xf32>
    %216 = arith.addf %213, %215 : vector<16x128xf32>
    %cst_114 = arith.constant dense<0xFF800000> : vector<128xf32>
    %217 = vector.multi_reduction <maximumf>, %216, %cst_114 [0] : vector<16x128xf32> to vector<128xf32>
    %218 = vector.shape_cast %217 : vector<128xf32> to vector<1x128xf32>
    %219 = vector.broadcast %218 : vector<1x128xf32> to vector<16x128xf32>
    %220 = arith.subf %216, %219 : vector<16x128xf32>
    %221 = math.exp %220 : vector<16x128xf32>
    %cst_115 = arith.constant dense<0.000000e+00> : vector<128xf32>
    %222 = vector.multi_reduction <add>, %221, %cst_115 [0] : vector<16x128xf32> to vector<128xf32>
    %223 = vector.shape_cast %222 : vector<128xf32> to vector<1x128xf32>
    %224 = math.log %223 : vector<1x128xf32>
    %225 = arith.addf %218, %224 : vector<1x128xf32>
    %226 = vector.broadcast %225 : vector<1x128xf32> to vector<16x128xf32>
    %227 = arith.subf %216, %226 : vector<16x128xf32>
    %228 = arith.truncf %227 : vector<16x128xf32> to vector<16x128xbf16>
    %c0_116 = arith.constant 0 : index
    %c0_117 = arith.constant 0 : index
    %229 = vector.load %arg12[%c0_116, %c0_117] : memref<16x128xbf16, #tpu.memory_space<vmem>>, vector<16x128xbf16>
    tpu.vector_store %arg12[%c0_116, %c0_117], %228 {strides = array<i32>} : memref<16x128xbf16, #tpu.memory_space<vmem>>, vector<16x128xbf16>,
    return
  }
  func.func @transform_0(%arg0: i32) -> (i32, i32) {
    %c0_i32 = arith.constant 0 : i32
    %c0_i32_0 = arith.constant 0 : i32
    return %c0_i32, %arg0 : i32, i32
  }
  func.func @transform_1(%arg0: i32) -> (i32, i32) {
    %c0_i32 = arith.constant 0 : i32
    %c0_i32_0 = arith.constant 0 : i32
    %c0_i32_1 = arith.constant 0 : i32
    return %c0_i32, %c0_i32_0 : i32, i32
  }
  func.func @transform_2(%arg0: i32) -> (i32, i32) {
    %c0_i32 = arith.constant 0 : i32
    %c0_i32_0 = arith.constant 0 : i32
    %c0_i32_1 = arith.constant 0 : i32
    return %c0_i32, %c0_i32_0 : i32, i32
  }
  func.func @transform_3(%arg0: i32) -> (i32, i32, i32) {
    %c0_i32 = arith.constant 0 : i32
    %c0_i32_0 = arith.constant 0 : i32
    %c0_i32_1 = arith.constant 0 : i32
    %c0_i32_2 = arith.constant 0 : i32
    return %c0_i32, %c0_i32_0, %c0_i32_1 : i32, i32, i32
  }
  func.func @transform_4(%arg0: i32) -> (i32, i32) {
    %c0_i32 = arith.constant 0 : i32
    %c0_i32_0 = arith.constant 0 : i32
    %c0_i32_1 = arith.constant 0 : i32
    return %c0_i32, %c0_i32_0 : i32, i32
  }
  func.func @transform_5(%arg0: i32) -> (i32, i32, i32) {
    %c0_i32 = arith.constant 0 : i32
    %c0_i32_0 = arith.constant 0 : i32
    %c0_i32_1 = arith.constant 0 : i32
    %c0_i32_2 = arith.constant 0 : i32
    return %c0_i32, %c0_i32_0, %c0_i32_1 : i32, i32, i32
  }
  func.func @transform_6(%arg0: i32) -> (i32, i32) {
    %c0_i32 = arith.constant 0 : i32
    %c0_i32_0 = arith.constant 0 : i32
    %c0_i32_1 = arith.constant 0 : i32
    return %c0_i32, %c0_i32_0 : i32, i32
  }
  func.func @transform_7(%arg0: i32) -> (i32, i32, i32) {
    %c0_i32 = arith.constant 0 : i32
    %c0_i32_0 = arith.constant 0 : i32
    %c0_i32_1 = arith.constant 0 : i32
    %c0_i32_2 = arith.constant 0 : i32
    return %c0_i32, %c0_i32_0, %c0_i32_1 : i32, i32, i32
  }
  func.func @transform_8(%arg0: i32) -> (i32, i32) {
    %c0_i32 = arith.constant 0 : i32
    %c0_i32_0 = arith.constant 0 : i32
    %c0_i32_1 = arith.constant 0 : i32
    return %c0_i32, %c0_i32_0 : i32, i32
  }
  func.func @transform_9(%arg0: i32) -> (i32, i32) {
    %c0_i32 = arith.constant 0 : i32
    %c0_i32_0 = arith.constant 0 : i32
    %c0_i32_1 = arith.constant 0 : i32
    return %c0_i32, %c0_i32_0 : i32, i32
  }
  func.func @transform_10(%arg0: i32) -> (i32, i32) {
    %c0_i32 = arith.constant 0 : i32
    %c0_i32_0 = arith.constant 0 : i32
    %c0_i32_1 = arith.constant 0 : i32
    return %c0_i32, %c0_i32_0 : i32, i32
  }
  func.func @transform_11(%arg0: i32) -> (i32, i32) {
    %c0_i32 = arith.constant 0 : i32
    %c0_i32_0 = arith.constant 0 : i32
    return %c0_i32, %arg0 : i32, i32
  }
}

</mosaic_0001>

<bundles_post_ra>
// kernel: decnn_forward.1
= control target key start
LH: loop header
LB: loop body
LE: loop exit
PB: predicated region body
PF: predicated region fallthrough
CT: control target
= control target key end

     0   :  { %s12500_s17 = smov 0   ;;  %s12502_s18 = smov 0   ;;  %s17078_s0 = inlined_call_operand.vmem [shape: bf16[256,256], index: 0, kind: input, shape index: {}]   ;;  %s17079_s1 = inlined_call_operand.vmem [shape: bf16[256,256], index: 1, kind: input, shape index: {}]   ;;  %s17080_s2 = inlined_call_operand.vmem [shape: f32[256,1], index: 2, kind: input, shape index: {}]   ;;  %s17081_s3 = inlined_call_operand.vmem [shape: bf16[5,256,256], index: 3, kind: input, shape index: {}]   ;;  %s17082_s4 = inlined_call_operand.vmem [shape: f32[256,1], index: 4, kind: input, shape index: {}]   ;;  %s17083_s5 = inlined_call_operand.vmem [shape: bf16[5,256,256], index: 5, kind: input, shape index: {}]   ;;  %s17084_s6 = inlined_call_operand.vmem [shape: f32[256,1], index: 6, kind: input, shape index: {}]   ;;  %s17085_s7 = inlined_call_operand.vmem [shape: bf16[5,256,256], index: 7, kind: input, shape index: {}]   ;;  %s17086_s8 = inlined_call_operand.vmem [shape: f32[256,1], index: 8, kind: input, shape index: {}]   ;;  %s17087_s9 = inlined_call_operand.vmem [shape: bf16[16,256], index: 9, kind: input, shape index: {}]   ;;  %s17088_s10 = inlined_call_operand.vmem [shape: f32[16,1], index: 10, kind: input, shape index: {}]   ;;  %s17089_s11 = inlined_call_operand.vmem [shape: bf16[16,256], index: 11, kind: output, shape index: {}]  }
   0x1   :  { %s12504_s19 = smov 0  }
   0x2 LB: > { %s17090_s20 = sadd.s32 4294967295, %s12433_s19   ;;  %s12517_s21 = sadd.s32 1, %s12433_s19   ;;  %s12433_s19 = sphi %s12504_s19, %s17097_s19   ;;  %s12429_s18 = sphi %s12502_s18, %s17096_s18   ;;  %s12425_s17 = sphi %s12500_s17, %s17095_s17  }
   0x3   : > { %s25_s22 = ssub.s32 %s12433_s19, %s12517_s21  ;;  %s28_s23 = sadd.s32 1, %s12429_s18 }
   0x4   : > { %p26_p0 = scmp.eq.s32.totalorder %s25_s22, 0  ;;  %p35_p1 = scmp.ne.s32.totalorder %s12429_s18, %s12425_s17 }
   0x5   : > { %p36_p2 = scmp.eq.s32.totalorder %s12433_s19, 0  ;;  %p275_p3 = scmp.eq.s32.totalorder %s17090_s20, 1 }
   0x6   : > { %s12528_s24 = scalar_select %p26_p0, %s12429_s18, %s28_s23  }
   0x7   : > { %p37_p4 = por %p36_p2, %p35_p1  ;;  %p12530_p5 = por %p275_p3, %p35_p1 }
   0x8   : > { %p8744_p6 = scmp.ge.s32.totalorder %s12433_s19, 2 }
   0xa   : > { %327 = sbr.rel (%p8744_p6) target bundleno = 42 (0x2a), region = 56 }
  0x11   : > { %330 = sbr.rel (!%p37_p4) target bundleno = 42 (0x2a), region = 60  ;;  %s332_s26 = sand.u32 (%p37_p4), 1, %s12429_s18  }
  0x12   : > { %s8746_s27 = sshll.u32 (%p37_p4), %s12433_s19, 2  ;;  %s8745_s28 = sshll.u32 (%p37_p4), %s332_s26, 7 }
  0x13   : > { %s12540_s12 = scalar_lea.vmem (%p37_p4), %s17078_s0, %s8746_s27  ;;  %s12544_s13 = scalar_lea.vmem (%p37_p4), [#allocation2], %s8745_s28 }
  0x14   : > { %v352_v0 = vld [vmem:[%s12540_s12] sm:$0xf] (%p37_p4)  ;;  %v354_v1 = vld [vmem:[%s12540_s12 + $0x8] sm:$0xf] (%p37_p4)  ;;  %v356_v2 = vld [vmem:[%s12540_s12 + $0x10] sm:$0xf] (%p37_p4) }
  0x15   : > { %353 = vst [vmem:[%s12544_s13] sm:$0xf] (%p37_p4), %v352_v0  ;;  %355 = vst [vmem:[%s12544_s13 + $0x4] sm:$0xf] (%p37_p4), %v354_v1  ;;  %v358_v3 = vld [vmem:[%s12540_s12 + $0x18] sm:$0xf] (%p37_p4) }
  0x16   : > { %v360_v4 = vld [vmem:[%s12540_s12 + $0x20] sm:$0xf] (%p37_p4)  ;;  %357 = vst [vmem:[%s12544_s13 + $0x8] sm:$0xf] (%p37_p4), %v356_v2  ;;  %359 = vst [vmem:[%s12544_s13 + $0xc] sm:$0xf] (%p37_p4), %v358_v3 }
  0x17   : > { %361 = vst [vmem:[%s12544_s13 + $0x10] sm:$0xf] (%p37_p4), %v360_v4  ;;  %v362_v5 = vld [vmem:[%s12540_s12 + $0x28] sm:$0xf] (%p37_p4)  ;;  %v364_v6 = vld [vmem:[%s12540_s12 + $0x30] sm:$0xf] (%p37_p4) }
  0x18   : > { %v366_v7 = vld [vmem:[%s12540_s12 + $0x38] sm:$0xf]  ;;  %363 = vst [vmem:[%s12544_s13 + $0x14] sm:$0xf] %v362_v5  ;;  %365 = vst [vmem:[%s12544_s13 + $0x18] sm:$0xf] %v364_v6 }
  0x19   : > { %367 = vst [vmem:[%s12544_s13 + $0x1c] sm:$0xf] %v366_v7  ;;  %v368_v8 = vld [vmem:[%s12540_s12 + $0x40] sm:$0xf]  ;;  %v370_v9 = vld [vmem:[%s12540_s12 + $0x48] sm:$0xf] }
  0x1a   : > { %v372_v10 = vld [vmem:[%s12540_s12 + $0x50] sm:$0xf]  ;;  %369 = vst [vmem:[%s12544_s13 + $0x20] sm:$0xf] %v368_v8  ;;  %371 = vst [vmem:[%s12544_s13 + $0x24] sm:$0xf] %v370_v9 }
  0x1b   : > { %373 = vst [vmem:[%s12544_s13 + $0x28] sm:$0xf] %v372_v10  ;;  %v374_v11 = vld [vmem:[%s12540_s12 + $0x58] sm:$0xf]  ;;  %v376_v12 = vld [vmem:[%s12540_s12 + $0x60] sm:$0xf] }
  0x1c   : > { %v378_v13 = vld [vmem:[%s12540_s12 + $0x68] sm:$0xf]  ;;  %375 = vst [vmem:[%s12544_s13 + $0x2c] sm:$0xf] %v374_v11  ;;  %377 = vst [vmem:[%s12544_s13 + $0x30] sm:$0xf] %v376_v12 }
  0x1d   : > { %379 = vst [vmem:[%s12544_s13 + $0x34] sm:$0xf] %v378_v13  ;;  %v380_v14 = vld [vmem:[%s12540_s12 + $0x70] sm:$0xf]  ;;  %v382_v15 = vld [vmem:[%s12540_s12 + $0x78] sm:$0xf] }
  0x1e   : > { %v384_v16 = vld [vmem:[%s12540_s12 + $0x80] sm:$0xf]  ;;  %381 = vst [vmem:[%s12544_s13 + $0x38] sm:$0xf] %v380_v14  ;;  %383 = vst [vmem:[%s12544_s13 + $0x3c] sm:$0xf] %v382_v15 }
  0x1f   : > { %385 = vst [vmem:[%s12544_s13 + $0x40] sm:$0xf] %v384_v16  ;;  %v386_v17 = vld [vmem:[%s12540_s12 + $0x88] sm:$0xf]  ;;  %v388_v18 = vld [vmem:[%s12540_s12 + $0x90] sm:$0xf] }
  0x20   : > { %v390_v19 = vld [vmem:[%s12540_s12 + $0x98] sm:$0xf]  ;;  %387 = vst [vmem:[%s12544_s13 + $0x44] sm:$0xf] %v386_v17  ;;  %389 = vst [vmem:[%s12544_s13 + $0x48] sm:$0xf] %v388_v18 }
  0x21   : > { %391 = vst [vmem:[%s12544_s13 + $0x4c] sm:$0xf] %v390_v19  ;;  %v392_v20 = vld [vmem:[%s12540_s12 + $0xa0] sm:$0xf]  ;;  %v394_v21 = vld [vmem:[%s12540_s12 + $0xa8] sm:$0xf] }
  0x22   : > { %v396_v22 = vld [vmem:[%s12540_s12 + $0xb0] sm:$0xf]  ;;  %393 = vst [vmem:[%s12544_s13 + $0x50] sm:$0xf] %v392_v20  ;;  %395 = vst [vmem:[%s12544_s13 + $0x54] sm:$0xf] %v394_v21 }
  0x23   : > { %397 = vst [vmem:[%s12544_s13 + $0x58] sm:$0xf] %v396_v22  ;;  %v398_v23 = vld [vmem:[%s12540_s12 + $0xb8] sm:$0xf]  ;;  %v400_v24 = vld [vmem:[%s12540_s12 + $0xc0] sm:$0xf] }
  0x24   : > { %v402_v25 = vld [vmem:[%s12540_s12 + $0xc8] sm:$0xf]  ;;  %399 = vst [vmem:[%s12544_s13 + $0x5c] sm:$0xf] %v398_v23  ;;  %401 = vst [vmem:[%s12544_s13 + $0x60] sm:$0xf] %v400_v24 }
  0x25   : > { %403 = vst [vmem:[%s12544_s13 + $0x64] sm:$0xf] %v402_v25  ;;  %v404_v26 = vld [vmem:[%s12540_s12 + $0xd0] sm:$0xf]  ;;  %v406_v27 = vld [vmem:[%s12540_s12 + $0xd8] sm:$0xf] }
  0x26   : > { %v408_v28 = vld [vmem:[%s12540_s12 + $0xe0] sm:$0xf]  ;;  %405 = vst [vmem:[%s12544_s13 + $0x68] sm:$0xf] %v404_v26  ;;  %407 = vst [vmem:[%s12544_s13 + $0x6c] sm:$0xf] %v406_v27 }
  0x27   : > { %409 = vst [vmem:[%s12544_s13 + $0x70] sm:$0xf] %v408_v28  ;;  %v410_v29 = vld [vmem:[%s12540_s12 + $0xe8] sm:$0xf]  ;;  %v412_v30 = vld [vmem:[%s12540_s12 + $0xf0] sm:$0xf] }
  0x28   : > { %v414_v31 = vld [vmem:[%s12540_s12 + $0xf8] sm:$0xf]  ;;  %411 = vst [vmem:[%s12544_s13 + $0x74] sm:$0xf] %v410_v29  ;;  %413 = vst [vmem:[%s12544_s13 + $0x78] sm:$0xf] %v412_v30 }
  0x29   : > { %415 = vst [vmem:[%s12544_s13 + $0x7c] sm:$0xf] %v414_v31 }
  0x2a PF: > { %p8747_p7 = scmp.ge.s32.totalorder %s12433_s19, 1  ;;  %p501_p8 = scmp.lt.s32.totalorder %s12433_s19, 3 }
  0x2c   : > { %p502_p9 = pnand %p8747_p7, %p501_p8 }
  0x2d   : > { %s17091_s14 = sand.u32 (!%p502_p9), 1, %s12425_s17   ;;  %v11636_v32 = vld [vmem:[%s17079_s1 + $0x4] ss:$8 sps:$4 sm:$0xff] (!%p502_p9)   ;;  %v12435_v33 = vmov (!%p502_p9), 0   ;;  %v11634_v53 = vld [vmem:[%s17079_s1] ss:$8 sps:$4 sm:$0xff] (!%p502_p9)  }
  0x2e   : > { %505 = sbr.rel (%p502_p9) target bundleno = 2879 (0xb3f), region = 101  ;;  %s8748_s15 = sshll.u32 (!%p502_p9), %s17091_s14, 7  ;;  %11616 = vset.pattern.permute.xlu0 (!%p502_p9), %v12435_v33  ;;  %11617 = vset.pattern.permute.xlu1 (!%p502_p9), %v12435_v33  ;;  %v641_v50 = vld [vmem:[%s17080_s2] sm:$0xff] (!%p502_p9)  ;;  %v642_v52 = vld [vmem:[%s17080_s2 + $0x8] sm:$0xff] (!%p502_p9)  ;;  %v11637_v54 = vld [vmem:[%s17079_s1 + $0x14] ss:$8 sps:$4 sm:$0xff] (!%p502_p9)  }
  0x2f   : > { %s12616_s23 = scalar_lea.vmem (!%p502_p9), [#allocation2], %s8748_s15  ;;  %1121 = vmatprep.mubr.bf16.mxu0 (!%p502_p9), %v11636_v32  ;;  %675 = vperm.xlu0 (!%p502_p9), %11616, %v641_v50   ;;  %v657_v51 = vld [vmem:[%s17080_s2 + $0x80] sm:$0xff] (!%p502_p9)  ;;  %v658_v55 = vld [vmem:[%s17080_s2 + $0x88] sm:$0xff] (!%p502_p9)  ;;  %v643_v56 = vld [vmem:[%s17080_s2 + $0x10] sm:$0xff] (!%p502_p9)  ;;  %s12436_s12 = smov (!%p502_p9), 2  }
  0x30   : > { %v11618_v34 = vld [vmem:[%s12616_s23 + $0x40] sm:$0xff] (!%p502_p9)   ;;  %v11620_v36 = vld [vmem:[%s12616_s23 + $0x48] sm:$0xff] (!%p502_p9)   ;;  %v11622_v38 = vld [vmem:[%s12616_s23 + $0x50] sm:$0xff] (!%p502_p9)   ;;  %755 = vperm.xlu1 (!%p502_p9), %11617, %v657_v51   ;;  %s12437_s13 = smov (!%p502_p9), 1   ;;  %s12438_s15 = smov (!%p502_p9), 127  }
  0x31   : > { %v11619_v35 = vld [vmem:[%s12616_s23] sm:$0xff] (!%p502_p9)   ;;  %9677 = vmatprep.subr.bf16.mxu0 (!%p502_p9), %v11618_v34  ;;  %v11621_v37 = vld [vmem:[%s12616_s23 + $0x8] sm:$0xff] (!%p502_p9)   ;;  %v11623_v39 = vld [vmem:[%s12616_s23 + $0x10] sm:$0xff] (!%p502_p9)   ;;  %s12439_s16 = smov (!%p502_p9), 126   ;;  %s17093_s30 = sand.u32 (!%p502_p9), 1, %s12425_s17  }
  0x32   : > { %9678 = vmatpush3.bf16.msra.mxu0 (!%p502_p9), %v11619_v35  ;;  %v11624_v40 = vld [vmem:[%s12616_s23 + $0x58] sm:$0xff] (!%p502_p9)   ;;  %v11626_v42 = vld [vmem:[%s12616_s23 + $0x60] sm:$0xff] (!%p502_p9)   ;;  %v11628_v44 = vld [vmem:[%s12616_s23 + $0x68] sm:$0xff] (!%p502_p9)  }
  0x33   : > { %9679 = vmatprep.subr.bf16.mxu0 (!%p502_p9), %v11620_v36  ;;  %v11625_v41 = vld [vmem:[%s12616_s23 + $0x18] sm:$0xff] (!%p502_p9)   ;;  %v11627_v43 = vld [vmem:[%s12616_s23 + $0x20] sm:$0xff] (!%p502_p9)   ;;  %v11629_v45 = vld [vmem:[%s12616_s23 + $0x28] sm:$0xff] (!%p502_p9)   ;;  %680 = vperm.xlu0 (!%p502_p9), %11616, %v642_v52  }
  0x34   : > { %v11630_v46 = vld [vmem:[%s12616_s23 + $0x70] sm:$0xff] (!%p502_p9)   ;;  %v11632_v48 = vld [vmem:[%s12616_s23 + $0x78] sm:$0xff] (!%p502_p9)   ;;  %760 = vperm.xlu1 (!%p502_p9), %11617, %v658_v55   ;;  %v11640_v60 = vld [vmem:[%s17079_s1 + $0x24] ss:$8 sps:$4 sm:$0xff] (!%p502_p9)  }
  0x35   : > { %v11631_v47 = vld [vmem:[%s12616_s23 + $0x30] sm:$0xff]   ;;  %v11633_v49 = vld [vmem:[%s12616_s23 + $0x38] sm:$0xff]   ;;  %v645_v62 = vld [vmem:[%s17080_s2 + $0x20] sm:$0xff]  ;;  %s17094_s20 = sadd.s32 (%p12530_p5), 4294967295, %s12433_s19  }
  0x36   : > { %9680 = vmatpush3.bf16.msra.mxu0 %v11621_v37  ;;  %v644_v57 = vld [vmem:[%s17080_s2 + $0x18] sm:$0xff]  ;;  %v659_v58 = vld [vmem:[%s17080_s2 + $0x90] sm:$0xff]  ;;  %v646_v63 = vld [vmem:[%s17080_s2 + $0x28] sm:$0xff] }
  0x37   : > { %9681 = vmatprep.subr.bf16.mxu0 %v11622_v38  ;;  %685 = vperm.xlu0 %11616, %v643_v56   ;;  %v11639_v59 = vld [vmem:[%s17079_s1 + $0x10] ss:$8 sps:$4 sm:$0xff]   ;;  %v11642_v0 = vld [vmem:[%s17079_s1 + $0x20] ss:$8 sps:$4 sm:$0xff]   ;;  %v11643_v2 = vld [vmem:[%s17079_s1 + $0x34] ss:$8 sps:$4 sm:$0xff]  }
  0x38   : > { %690 = vperm.xlu1 %11617, %v644_v57   ;;  %v660_v61 = vld [vmem:[%s17080_s2 + $0x98] sm:$0xff]  ;;  %v661_v1 = vld [vmem:[%s17080_s2 + $0xa0] sm:$0xff]  ;;  %v662_v3 = vld [vmem:[%s17080_s2 + $0xa8] sm:$0xff] }
  0x39   : > { %v647_v4 = vld [vmem:[%s17080_s2 + $0x30] sm:$0xff]  ;;  %v648_v5 = vld [vmem:[%s17080_s2 + $0x38] sm:$0xff]  ;;  %v11646_v8 = vld [vmem:[%s17079_s1 + $0x44] ss:$8 sps:$4 sm:$0xff]  }
  0x3a   : > { %9682 = vmatpush3.bf16.msra.mxu0 %v11623_v39  ;;  %v663_v6 = vld [vmem:[%s17080_s2 + $0xb0] sm:$0xff]  ;;  %v664_v9 = vld [vmem:[%s17080_s2 + $0xb8] sm:$0xff]  ;;  %v649_v10 = vld [vmem:[%s17080_s2 + $0x40] sm:$0xff] }
  0x3b   : > { %9683 = vmatprep.subr.bf16.mxu0 %v11624_v40  ;;  %765 = vperm.xlu0 %11616, %v659_v58   ;;  %v11645_v7 = vld [vmem:[%s17079_s1 + $0x30] ss:$8 sps:$4 sm:$0xff]   ;;  %v650_v11 = vld [vmem:[%s17080_s2 + $0x48] sm:$0xff]  ;;  %v665_v12 = vld [vmem:[%s17080_s2 + $0xc0] sm:$0xff] }
  0x3c   : > { %770 = vperm.xlu1 %11617, %v660_v61   ;;  %v11648_v13 = vld [vmem:[%s17079_s1 + $0x40] ss:$8 sps:$4 sm:$0xff]   ;;  %v11649_v14 = vld [vmem:[%s17079_s1 + $0x54] ss:$8 sps:$4 sm:$0xff]   ;;  %v11651_v19 = vld [vmem:[%s17079_s1 + $0x50] ss:$8 sps:$4 sm:$0xff]  }
  0x3d   : > { %v666_v15 = vld [vmem:[%s17080_s2 + $0xc8] sm:$0xff]  ;;  %v651_v16 = vld [vmem:[%s17080_s2 + $0x50] sm:$0xff]  ;;  %v652_v17 = vld [vmem:[%s17080_s2 + $0x58] sm:$0xff] }
  0x3e   : > { %9684 = vmatpush3.bf16.msra.mxu0 %v11625_v41  ;;  %v667_v18 = vld [vmem:[%s17080_s2 + $0xd0] sm:$0xff]  ;;  %v11652_v20 = vld [vmem:[%s17079_s1 + $0x64] ss:$8 sps:$4 sm:$0xff]   ;;  %v668_v21 = vld [vmem:[%s17080_s2 + $0xd8] sm:$0xff] }
  0x3f   : > { %9685 = vmatprep.subr.bf16.mxu0 %v11626_v42  ;;  %695 = vperm.xlu0 %11616, %v645_v62   ;;  %v653_v22 = vld [vmem:[%s17080_s2 + $0x60] sm:$0xff]  ;;  %v654_v23 = vld [vmem:[%s17080_s2 + $0x68] sm:$0xff]  ;;  %v11655_v26 = vld [vmem:[%s17079_s1 + $0x74] ss:$8 sps:$4 sm:$0xff]  }
  0x40   : > { %700 = vperm.xlu1 %11617, %v646_v63   ;;  %v669_v24 = vld [vmem:[%s17080_s2 + $0xe0] sm:$0xff]  ;;  %v670_v27 = vld [vmem:[%s17080_s2 + $0xe8] sm:$0xff]  ;;  %v655_v28 = vld [vmem:[%s17080_s2 + $0x70] sm:$0xff] }
  0x41   : > { %v11654_v25 = vld [vmem:[%s17079_s1 + $0x60] ss:$8 sps:$4 sm:$0xff]   ;;  %v656_v29 = vld [vmem:[%s17080_s2 + $0x78] sm:$0xff]  ;;  %v671_v30 = vld [vmem:[%s17080_s2 + $0xf0] sm:$0xff] }
  0x42   : > { %9686 = vmatpush3.bf16.msra.mxu0 %v11627_v43  ;;  %v11657_v31 = vld [vmem:[%s17079_s1 + $0x70] ss:$8 sps:$4 sm:$0xff]   ;;  %v11658_v32 = vld [vmem:[%s17079_s1 + $0x84] ss:$8 sps:$4 sm:$0xff]   ;;  %v11660_v34 = vld [vmem:[%s17079_s1 + $0x80] ss:$8 sps:$4 sm:$0xff]  }
  0x43   : > { %9687 = vmatprep.subr.bf16.mxu0 %v11628_v44  ;;  %775 = vperm.xlu0 %11616, %v661_v1   ;;  %v672_v33 = vld [vmem:[%s17080_s2 + $0xf8] sm:$0xff]  ;;  %v11664_v37 = vld [vmem:[%s17079_s1 + $0xa4] ss:$8 sps:$4 sm:$0xff]   ;;  %v11666_v38 = vld [vmem:[%s17079_s1 + $0xa0] ss:$8 sps:$4 sm:$0xff]  }
  0x44   : > { %780 = vperm.xlu1 %11617, %v662_v3   ;;  %v11661_v35 = vld [vmem:[%s17079_s1 + $0x94] ss:$8 sps:$4 sm:$0xff]   ;;  %v11663_v36 = vld [vmem:[%s17079_s1 + $0x90] ss:$8 sps:$4 sm:$0xff]   ;;  %v11670_v41 = vld [vmem:[%s17079_s1 + $0xc4] ss:$8 sps:$4 sm:$0xff]  }
  0x45   : > { %v11667_v39 = vld [vmem:[%s17079_s1 + $0xb4] ss:$8 sps:$4 sm:$0xff]   ;;  %v11669_v40 = vld [vmem:[%s17079_s1 + $0xb0] ss:$8 sps:$4 sm:$0xff]   ;;  %v11672_v42 = vld [vmem:[%s17079_s1 + $0xc0] ss:$8 sps:$4 sm:$0xff]  }
  0x46   : > { %9688 = vmatpush3.bf16.msra.mxu0 %v11629_v45  ;;  %v11673_v43 = vld [vmem:[%s17079_s1 + $0xd4] ss:$8 sps:$4 sm:$0xff]   ;;  %v11675_v44 = vld [vmem:[%s17079_s1 + $0xd0] ss:$8 sps:$4 sm:$0xff]   ;;  %v11676_v45 = vld [vmem:[%s17079_s1 + $0xe4] ss:$8 sps:$4 sm:$0xff]  }
  0x47   : > { %9689 = vmatprep.subr.bf16.mxu0 %v11630_v46  ;;  %705 = vperm.xlu0 %11616, %v647_v4   ;;  %v11678_v46 = vld [vmem:[%s17079_s1 + $0xe0] ss:$8 sps:$4 sm:$0xff]  }
  0x48   : > { %710 = vperm.xlu1 %11617, %v648_v5  }
  0x4a   : > { %9690 = vmatpush3.bf16.msra.mxu0 %v11631_v47  ;;  %v11679_v47 = vld [vmem:[%s17079_s1 + $0xf4] ss:$8 sps:$4 sm:$0xff]  }
  0x4b   : > { %9691 = vmatprep.subr.bf16.mxu0 %v11632_v48  ;;  %785 = vperm.xlu0 %11616, %v663_v6   ;;  %v11681_v48 = vld [vmem:[%s17079_s1 + $0xf0] ss:$8 sps:$4 sm:$0xff]  }
  0x4c   : > { %790 = vperm.xlu1 %11617, %v664_v9  }
  0x4e   : > { %9692 = vmatpush3.bf16.msra.mxu0 %v11633_v49 }
  0x4f   : > { %715 = vperm.xlu0 %11616, %v649_v10  }
  0x50   : > { %720 = vperm.xlu1 %11617, %v650_v11  }
  0x51   : > { %1122 = vmatmul.mubr.bf16.vlgmr.msra.gmra.mrb[0].mxu0 %v11634_v53 }
  0x52   : > { %1129 = vmatprep.mubr.bf16.mxu0 %v11637_v54 }
  0x53   : > { %795 = vperm.xlu0 %11616, %v665_v12  }
  0x54   : > { %800 = vperm.xlu1 %11617, %v666_v15  }
  0x57   : > { %725 = vperm.xlu0 %11616, %v651_v16  }
  0x58   : > { %730 = vperm.xlu1 %11617, %v652_v17  }
  0x59   : > { %1130 = vmatmul.mubr.bf16.gmra.mrb[4].mxu0 %v11639_v59 }
  0x5a   : > { %1137 = vmatprep.mubr.bf16.mxu0 %v11640_v60 }
  0x5b   : > { %805 = vperm.xlu0 %11616, %v667_v18  }
  0x5c   : > { %810 = vperm.xlu1 %11617, %v668_v21  }
  0x5f   : > { %735 = vperm.xlu0 %11616, %v653_v22  }
  0x60   : > { %740 = vperm.xlu1 %11617, %v654_v23  }
  0x61   : > { %1138 = vmatmul.mubr.bf16.gmra.mrb[8].mxu0 %v11642_v0 }
  0x62   : > { %1145 = vmatprep.mubr.bf16.mxu0 %v11643_v2 }
  0x63   : > { %815 = vperm.xlu0 %11616, %v669_v24  }
  0x64   : > { %820 = vperm.xlu1 %11617, %v670_v27  }
  0x67   : > { %745 = vperm.xlu0 %11616, %v655_v28  }
  0x68   : > { %750 = vperm.xlu1 %11617, %v656_v29  }
  0x69   : > { %1146 = vmatmul.mubr.bf16.gmra.mrb[12].mxu0 %v11645_v7 }
  0x6a   : > { %1153 = vmatprep.mubr.bf16.mxu0 %v11646_v8 }
  0x6b   : > { %825 = vperm.xlu0 %11616, %v671_v30  }
  0x6c   : > { %830 = vperm.xlu1 %11617, %v672_v33  }
  0x71   : > { %1154 = vmatmul.mubr.bf16.gmra.mrb[16].mxu0 %v11648_v13 }
  0x72   : > { %1161 = vmatprep.mubr.bf16.mxu0 %v11649_v14 }
  0x79   : > { %1162 = vmatmul.mubr.bf16.gmra.mrb[20].mxu0 %v11651_v19 }
  0x7a   : > { %1169 = vmatprep.mubr.bf16.mxu0 %v11652_v20 }
  0x81   : > { %1170 = vmatmul.mubr.bf16.gmra.mrb[24].mxu0 %v11654_v25 }
  0x82   : > { %1177 = vmatprep.mubr.bf16.mxu0 %v11655_v26 }
  0x89   : > { %1178 = vmatmul.mubr.bf16.gmra.mrb[28].mxu0 %v11657_v31 }
  0x8a   : > { %1185 = vmatprep.mubr.bf16.mxu0 %v11658_v32 }
  0x91   : > { %1186 = vmatmul.mubr.bf16.gmra.mrb[32].mxu0 %v11660_v34 }
  0x92   : > { %1193 = vmatprep.mubr.bf16.mxu0 %v11661_v35 }
  0x99   : > { %1194 = vmatmul.mubr.bf16.gmra.mrb[36].mxu0 %v11663_v36 }
  0x9a   : > { %1201 = vmatprep.mubr.bf16.mxu0 %v11664_v37 }
  0xa1   : > { %1202 = vmatmul.mubr.bf16.gmra.mrb[40].mxu0 %v11666_v38 }
  0xa2   : > { %1209 = vmatprep.mubr.bf16.mxu0 %v11667_v39 }
  0xa9   : > { %1210 = vmatmul.mubr.bf16.gmra.mrb[44].mxu0 %v11669_v40 }
  0xaa   : > { %1217 = vmatprep.mubr.bf16.mxu0 %v11670_v41 }
  0xae   : > { %v676_v49 = vpop.permute.xlu0 %675 }
  0xaf   : > { %v12823_v50 = vpop.permute.xlu1 %755 }
  0xb1   : > { %1218 = vmatmul.mubr.bf16.gmra.mrb[48].mxu0 %v11672_v42 }
  0xb2   : > { %1225 = vmatprep.mubr.bf16.mxu0 %v11673_v43  ;;  %v681_v51 = vpop.permute.xlu0 %680 }
  0xb3   : > { %v12825_v52 = vpop.permute.xlu1 %760 }
  0xb6   : > { %v686_v53 = vpop.permute.xlu0 %685 }
  0xb7   : > { %v691_v54 = vpop.permute.xlu1 %690 }
  0xb9   : > { %1226 = vmatmul.mubr.bf16.gmra.mrb[52].mxu0 %v11675_v44 }
  0xba   : > { %1233 = vmatprep.mubr.bf16.mxu0 %v11676_v45  ;;  %v12827_v55 = vpop.permute.xlu0 %765 }
  0xbb   : > { %v12829_v56 = vpop.permute.xlu1 %770 }
  0xbe   : > { %v696_v57 = vpop.permute.xlu0 %695 }
  0xbf   : > { %v701_v58 = vpop.permute.xlu1 %700 }
  0xc1   : > { %1234 = vmatmul.mubr.bf16.gmra.mrb[56].mxu0 %v11678_v46 }
  0xc2   : > { %1241 = vmatprep.mubr.bf16.mxu0 %v11679_v47  ;;  %v12831_v0 = vpop.permute.xlu0 %775 }
  0xc3   : > { %v12833_v3 = vpop.permute.xlu1 %780 }
  0xc6   : > { %v706_v9 = vpop.permute.xlu0 %705 }
  0xc7   : > { %v711_v14 = vpop.permute.xlu1 %710 }
  0xc9   : > { %1242 = vmatmul.mubr.bf16.gmra.mrb[60].mxu0 %v11681_v48 }
  0xca   : > { %v12839_v18 = vpop.permute.xlu0 %785 }
  0xcb   : > { %v12841_v23 = vpop.permute.xlu1 %790 }
  0xce   : > { %v716_v30 = vpop.permute.xlu0 %715 }
  0xcf   : > { %v721_v32 = vpop.permute.xlu1 %720 }
  0xd2   : > { %v12849_v41 = vpop.permute.xlu0 %795 }
  0xd3   : > { %v12853_v44 = vpop.permute.xlu1 %800 }
 0x124   : > { %v9693_v59 = vpop.f32.mrb[0].mxu0 }
 0x125   : > { %v9694_v60 = vpop.f32.mrb[1].mxu0 }
 0x126   : > { %v9695_v61 = vadd.f32 %v9694_v60, %v9693_v59  ;;  %v9696_v62 = vpop.f32.mrb[2].mxu0  ;;  %v731_v59 = vpop.permute.xlu1 %730 }
 0x127   : > { %v9697_v63 = vpop.f32.mrb[3].mxu0 }
 0x128   : > { %v1124_v1 = vadd.f32 %v9695_v61, %v676_v49  ;;  %v9698_v2 = vadd.f32 %v9697_v63, %v9696_v62 }
 0x12a   : > { %v1127_v4 = vadd.f32 %v9698_v2, %v681_v51  ;;  %v1250_v5 = vmax.f32 %v1124_v1, 0.0  ;;  %v726_v51 = vpop.permute.xlu0 %725 }
 0x12c   : > { %v1251_v6 = vmax.f32 %v1127_v4, 0.0  ;;  %v9699_v7 = vpop.f32.mrb[4].mxu0 }
 0x12d   : > { %v9700_v8 = vpop.f32.mrb[5].mxu0 }
 0x12e   : > { %v12835_v10 = vpack.c.bf16 %v1251_v6, %v1250_v5  ;;  %v9701_v11 = vadd.f32 %v9700_v8, %v9699_v7  ;;  %v9702_v12 = vpop.f32.mrb[6].mxu0  ;;  %v12859_v63 = vpop.permute.xlu0 %805 }
 0x12f   : > { %v9703_v13 = vpop.f32.mrb[7].mxu0  ;;  %v12861_v6 = vpop.permute.xlu1 %810 }
 0x130   : > { %v1132_v15 = vadd.f32 %v9701_v11, %v686_v53  ;;  %v9704_v16 = vadd.f32 %v9703_v13, %v9702_v12  ;;  %1347 = vrot.lane.b32.xlu0 %v12835_v10, %s12436_s12 }
 0x132   : > { %v1135_v17 = vadd.f32 %v9704_v16, %v691_v54  ;;  %v1252_v19 = vmax.f32 %v1132_v15, 0.0 }
 0x133   : > { %v741_v16 = vpop.permute.xlu1 %740 }
 0x134   : > { %v1253_v20 = vmax.f32 %v1135_v17, 0.0  ;;  %v9705_v21 = vpop.f32.mrb[8].mxu0 }
 0x135   : > { %v9706_v22 = vpop.f32.mrb[9].mxu0 }
 0x136   : > { %v12843_v24 = vpack.c.bf16 %v1253_v20, %v1252_v19  ;;  %v9707_v25 = vadd.f32 %v9706_v22, %v9705_v21  ;;  %v9708_v26 = vpop.f32.mrb[10].mxu0 }
 0x137   : > { %v9709_v27 = vpop.f32.mrb[11].mxu0 }
 0x138   : > { %v1140_v28 = vadd.f32 %v9707_v25, %v696_v57  ;;  %v9710_v29 = vadd.f32 %v9709_v27, %v9708_v26  ;;  %1349 = vrot.lane.b32.xlu0 %v12843_v24, %s12436_s12 }
 0x13a   : > { %v1143_v31 = vadd.f32 %v9710_v29, %v701_v58  ;;  %v1254_v33 = vmax.f32 %v1140_v28, 0.0 }
 0x13c   : > { %v1255_v34 = vmax.f32 %v1143_v31, 0.0  ;;  %v9711_v35 = vpop.f32.mrb[12].mxu0  ;;  %v12873_v31 = vpop.permute.xlu1 %820 }
 0x13d   : > { %v9712_v36 = vpop.f32.mrb[13].mxu0 }
 0x13e   : > { %v12847_v37 = vpack.c.bf16 %v1255_v34, %v1254_v33  ;;  %v9713_v38 = vadd.f32 %v9712_v36, %v9711_v35  ;;  %v9714_v39 = vpop.f32.mrb[14].mxu0 }
 0x13f   : > { %v9715_v40 = vpop.f32.mrb[15].mxu0 }
 0x140   : > { %v1148_v42 = vadd.f32 %v9713_v38, %v706_v9  ;;  %v9716_v43 = vadd.f32 %v9715_v40, %v9714_v39  ;;  %1351 = vrot.lane.b32.xlu0 %v12847_v37, %s12436_s12 }
 0x142   : > { %v1151_v45 = vadd.f32 %v9716_v43, %v711_v14  ;;  %v1256_v46 = vmax.f32 %v1148_v42, 0.0  ;;  %v736_v14 = vpop.permute.xlu0 %735 }
 0x144   : > { %v1257_v47 = vmax.f32 %v1151_v45, 0.0  ;;  %v9717_v48 = vpop.f32.mrb[16].mxu0  ;;  %v751_v45 = vpop.permute.xlu1 %750 }
 0x145   : > { %v9718_v49 = vpop.f32.mrb[17].mxu0 }
 0x146   : > { %v12855_v53 = vpack.c.bf16 %v1257_v47, %v1256_v46  ;;  %v9719_v54 = vadd.f32 %v9718_v49, %v9717_v48  ;;  %v9720_v57 = vpop.f32.mrb[18].mxu0  ;;  %v12869_v28 = vpop.permute.xlu0 %815 }
 0x147   : > { %v9721_v58 = vpop.f32.mrb[19].mxu0 }
 0x148   : > { %v1156_v60 = vadd.f32 %v9719_v54, %v716_v30  ;;  %v9722_v61 = vadd.f32 %v9721_v58, %v9720_v57  ;;  %1353 = vrot.lane.b32.xlu0 %v12855_v53, %s12436_s12 }
 0x14a   : > { %v1159_v62 = vadd.f32 %v9722_v61, %v721_v32  ;;  %v1258_v1 = vmax.f32 %v1156_v60, 0.0  ;;  %v746_v38 = vpop.permute.xlu0 %745 }
 0x14c   : > { %v1259_v2 = vmax.f32 %v1159_v62, 0.0  ;;  %v9723_v4 = vpop.f32.mrb[20].mxu0 }
 0x14d   : > { %v9724_v5 = vpop.f32.mrb[21].mxu0 }
 0x14e   : > { %v12863_v7 = vpack.c.bf16 %v1259_v2, %v1258_v1  ;;  %v9725_v8 = vadd.f32 %v9724_v5, %v9723_v4  ;;  %v9726_v9 = vpop.f32.mrb[22].mxu0 }
 0x14f   : > { %v9727_v11 = vpop.f32.mrb[23].mxu0 }
 0x150   : > { %v1164_v12 = vadd.f32 %v9725_v8, %v726_v51  ;;  %v9728_v13 = vadd.f32 %v9727_v11, %v9726_v9  ;;  %1355 = vrot.lane.b32.xlu0 %v12863_v7, %s12436_s12 }
 0x152   : > { %v1167_v15 = vadd.f32 %v9728_v13, %v731_v59  ;;  %v1260_v17 = vmax.f32 %v1164_v12, 0.0 }
 0x154   : > { %v1261_v19 = vmax.f32 %v1167_v15, 0.0  ;;  %v9729_v20 = vpop.f32.mrb[24].mxu0 }
 0x155   : > { %v9730_v21 = vpop.f32.mrb[25].mxu0 }
 0x156   : > { %v12867_v22 = vpack.c.bf16 %v1261_v19, %v1260_v17  ;;  %v9731_v25 = vadd.f32 %v9730_v21, %v9729_v20  ;;  %v9732_v26 = vpop.f32.mrb[26].mxu0 }
 0x157   : > { %v9733_v27 = vpop.f32.mrb[27].mxu0 }
 0x158   : > { %v1172_v29 = vadd.f32 %v9731_v25, %v736_v14  ;;  %v9734_v30 = vadd.f32 %v9733_v27, %v9732_v26  ;;  %1357 = vrot.lane.b32.xlu0 %v12867_v22, %s12436_s12 }
 0x15a   : > { %v1175_v32 = vadd.f32 %v9734_v30, %v741_v16  ;;  %v1262_v33 = vmax.f32 %v1172_v29, 0.0 }
 0x15c   : > { %v1263_v34 = vmax.f32 %v1175_v32, 0.0  ;;  %v9735_v35 = vpop.f32.mrb[28].mxu0 }
 0x15d   : > { %v9736_v36 = vpop.f32.mrb[29].mxu0 }
 0x15e   : > { %v12875_v39 = vpack.c.bf16 %v1263_v34, %v1262_v33  ;;  %v9737_v40 = vadd.f32 %v9736_v36, %v9735_v35  ;;  %v9738_v42 = vpop.f32.mrb[30].mxu0 }
 0x15f   : > { %v9739_v43 = vpop.f32.mrb[31].mxu0 }
 0x160   : > { %v1180_v46 = vadd.f32 %v9737_v40, %v746_v38  ;;  %v9740_v47 = vadd.f32 %v9739_v43, %v9738_v42  ;;  %1359 = vrot.lane.b32.xlu0 %v12875_v39, %s12436_s12 }
 0x162   : > { %v1183_v48 = vadd.f32 %v9740_v47, %v751_v45  ;;  %v1264_v49 = vmax.f32 %v1180_v46, 0.0 }
 0x164   : > { %v1265_v51 = vmax.f32 %v1183_v48, 0.0  ;;  %v9741_v54 = vpop.f32.mrb[32].mxu0 }
 0x165   : > { %v9742_v57 = vpop.f32.mrb[33].mxu0 }
 0x166   : > { %v12879_v58 = vpack.c.bf16 %v1265_v51, %v1264_v49  ;;  %v9743_v59 = vadd.f32 %v9742_v57, %v9741_v54  ;;  %v9744_v60 = vpop.f32.mrb[34].mxu0 }
 0x167   : > { %v9745_v61 = vpop.f32.mrb[35].mxu0 }
 0x168   : > { %v1188_v62 = vadd.f32 %v9743_v59, %v12823_v50  ;;  %v9746_v1 = vadd.f32 %v9745_v61, %v9744_v60  ;;  %1361 = vrot.lane.b32.xlu0 %v12879_v58, %s12436_s12 }
 0x16a   : > { %v1191_v2 = vadd.f32 %v9746_v1, %v12825_v52  ;;  %v1266_v4 = vmax.f32 %v1188_v62, 0.0 }
 0x16c   : > { %v1267_v5 = vmax.f32 %v1191_v2, 0.0  ;;  %v9747_v8 = vpop.f32.mrb[36].mxu0  ;;  %2087 = vrot.lane.b32.xlu0 %v12835_v10, %s12437_s13 }
 0x16d   : > { %v9748_v9 = vpop.f32.mrb[37].mxu0 }
 0x16e   : > { %v12887_v11 = vpack.c.bf16 %v1267_v5, %v1266_v4  ;;  %v9749_v12 = vadd.f32 %v9748_v9, %v9747_v8  ;;  %v9750_v13 = vpop.f32.mrb[38].mxu0 }
 0x16f   : > { %v9751_v14 = vpop.f32.mrb[39].mxu0 }
 0x170   : > { %v1196_v50 = vadd.f32 %v9749_v12, %v12827_v55  ;;  %v9752_v15 = vadd.f32 %v9751_v14, %v9750_v13  ;;  %1363 = vrot.lane.b32.xlu1 %v12887_v11, %s12436_s12  ;;  %9901 = vmatprep.subr.bf16.mxu0 %v12887_v11 }
 0x171   : > { %2089 = vrot.lane.b32.xlu0 %v12843_v24, %s12437_s13  ;;  %9902 = vmatpush3.bf16.msra.mxu0 %v12835_v10 }
 0x172   : > { %v1199_v52 = vadd.f32 %v9752_v15, %v12829_v56  ;;  %v1268_v16 = vmax.f32 %v1196_v50, 0.0 }
 0x174   : > { %v1269_v17 = vmax.f32 %v1199_v52, 0.0  ;;  %v9753_v19 = vpop.f32.mrb[40].mxu0 }
 0x175   : > { %2091 = vrot.lane.b32.xlu0 %v12847_v37, %s12437_s13  ;;  %v9754_v55 = vpop.f32.mrb[41].mxu0 }
 0x176   : > { %v12899_v20 = vpack.c.bf16 %v1269_v17, %v1268_v16  ;;  %v9755_v21 = vadd.f32 %v9754_v55, %v9753_v19  ;;  %v9756_v25 = vpop.f32.mrb[42].mxu0 }
 0x177   : > { %v9757_v26 = vpop.f32.mrb[43].mxu0 }
 0x178   : > { %v1204_v27 = vadd.f32 %v9755_v21, %v12831_v0  ;;  %v9758_v29 = vadd.f32 %v9757_v26, %v9756_v25  ;;  %1365 = vrot.lane.b32.xlu1 %v12899_v20, %s12436_s12  ;;  %9903 = vmatprep.subr.bf16.mxu0 %v12899_v20  ;;  %v11684_v21 = vld [vmem:[%s17081_s3 + $0x4] ss:$8 sps:$4 sm:$0xff]  }
 0x179   : > { %2093 = vrot.lane.b32.xlu0 %v12855_v53, %s12437_s13  ;;  %9904 = vmatpush3.bf16.msra.mxu0 %v12843_v24 }
 0x17a   : > { %v1207_v56 = vadd.f32 %v9758_v29, %v12833_v3  ;;  %v1270_v30 = vmax.f32 %v1204_v27, 0.0  ;;  %1637 = vmatprep.mubr.bf16.mxu1 %v11684_v21  ;;  %v11744_v21 = vld [vmem:[%s17081_s3 + $0x2a4] ss:$8 sps:$4 sm:$0xff]  }
 0x17c   : > { %v1271_v32 = vmax.f32 %v1207_v56, 0.0  ;;  %v9759_v33 = vpop.f32.mrb[44].mxu0 }
 0x17d   : > { %2095 = vrot.lane.b32.xlu0 %v12863_v7, %s12437_s13  ;;  %v9760_v0 = vpop.f32.mrb[45].mxu0 }
 0x17e   : > { %v12911_v34 = vpack.c.bf16 %v1271_v32, %v1270_v30  ;;  %v9761_v35 = vadd.f32 %v9760_v0, %v9759_v33  ;;  %v9762_v36 = vpop.f32.mrb[46].mxu0  ;;  %v831_v32 = vpop.permute.xlu1 %830 }
 0x17f   : > { %v9763_v38 = vpop.f32.mrb[47].mxu0 }
 0x180   : > { %v1212_v40 = vadd.f32 %v9761_v35, %v12839_v18  ;;  %v9764_v42 = vadd.f32 %v9763_v38, %v9762_v36  ;;  %1367 = vrot.lane.b32.xlu1 %v12911_v34, %s12436_s12  ;;  %9905 = vmatprep.subr.bf16.mxu0 %v12911_v34  ;;  %v11690_v38 = vld [vmem:[%s17081_s3 + $0x214] ss:$8 sps:$4 sm:$0xff]  }
 0x181   : > { %2097 = vrot.lane.b32.xlu0 %v12867_v22, %s12437_s13  ;;  %9906 = vmatpush3.bf16.msra.mxu0 %v12847_v37 }
 0x182   : > { %v1215_v3 = vadd.f32 %v9764_v42, %v12841_v23  ;;  %v1272_v43 = vmax.f32 %v1212_v40, 0.0  ;;  %v11696_v40 = vld [vmem:[%s17081_s3 + $0x224] ss:$8 sps:$4 sm:$0xff]   ;;  %v11699_v42 = vld [vmem:[%s17081_s3 + $0x220] ss:$8 sps:$4 sm:$0xff]  }
 0x184   : > { %v1273_v45 = vmax.f32 %v1215_v3, 0.0  ;;  %v9765_v46 = vpop.f32.mrb[48].mxu0  ;;  %v11705_v3 = vld [vmem:[%s17081_s3 + $0x230] ss:$8 sps:$4 sm:$0xff]  }
 0x185   : > { %2099 = vrot.lane.b32.xlu0 %v12875_v39, %s12437_s13  ;;  %v9766_v18 = vpop.f32.mrb[49].mxu0 }
 0x186   : > { %v12923_v47 = vpack.c.bf16 %v1273_v45, %v1272_v43  ;;  %v9767_v48 = vadd.f32 %v9766_v18, %v9765_v46  ;;  %v9768_v49 = vpop.f32.mrb[50].mxu0  ;;  %v11711_v43 = vld [vmem:[%s17081_s3 + $0x240] ss:$8 sps:$4 sm:$0xff]  }
 0x187   : > { %v9769_v51 = vpop.f32.mrb[51].mxu0  ;;  %v3443_v45 = vld [vmem:[%s17082_s4] sm:$0xff] }
 0x188   : > { %v1220_v54 = vadd.f32 %v9767_v48, %v12849_v41  ;;  %v9770_v57 = vadd.f32 %v9769_v51, %v9768_v49  ;;  %1369 = vrot.lane.b32.xlu1 %v12923_v47, %s12436_s12  ;;  %9907 = vmatprep.subr.bf16.mxu0 %v12923_v47  ;;  %v3459_v18 = vld [vmem:[%s17082_s4 + $0x80] sm:$0xff]  ;;  %v11717_v48 = vld [vmem:[%s17081_s3 + $0x250] ss:$8 sps:$4 sm:$0xff]  }
 0x189   : > { %2101 = vrot.lane.b32.xlu0 %v12879_v58, %s12437_s13  ;;  %9908 = vmatpush3.bf16.msra.mxu0 %v12855_v53  ;;  %v11720_v49 = vld [vmem:[%s17081_s3 + $0x264] ss:$8 sps:$4 sm:$0xff]  }
 0x18a   : > { %v1223_v23 = vadd.f32 %v9770_v57, %v12853_v44  ;;  %v1274_v59 = vmax.f32 %v1220_v54, 0.0  ;;  %v3445_v54 = vld [vmem:[%s17082_s4 + $0x10] sm:$0xff] }
 0x18c   : > { %v1275_v60 = vmax.f32 %v1223_v23, 0.0  ;;  %v9771_v61 = vpop.f32.mrb[52].mxu0  ;;  %v3461_v23 = vld [vmem:[%s17082_s4 + $0x90] sm:$0xff] }
 0x18d   : > { %2539 = vrot.lane.b32.xlu0 %v12835_v10, %s12438_s15  ;;  %v9772_v41 = vpop.f32.mrb[53].mxu0 }
 0x18e   : > { %v12935_v62 = vpack.c.bf16 %v1275_v60, %v1274_v59  ;;  %v9773_v1 = vadd.f32 %v9772_v41, %v9771_v61  ;;  %v9774_v2 = vpop.f32.mrb[54].mxu0  ;;  %v11723_v60 = vld [vmem:[%s17081_s3 + $0x260] ss:$8 sps:$4 sm:$0xff]   ;;  %v11726_v61 = vld [vmem:[%s17081_s3 + $0x274] ss:$8 sps:$4 sm:$0xff]  }
 0x18f   : > { %v9775_v4 = vpop.f32.mrb[55].mxu0 }
 0x190   : > { %v1228_v5 = vadd.f32 %v9773_v1, %v12859_v63  ;;  %v9776_v8 = vadd.f32 %v9775_v4, %v9774_v2  ;;  %1371 = vrot.lane.b32.xlu1 %v12935_v62, %s12436_s12  ;;  %9909 = vmatprep.subr.bf16.mxu0 %v12935_v62  ;;  %v3447_v1 = vld [vmem:[%s17082_s4 + $0x20] sm:$0xff] }
 0x191   : > { %2991 = vrot.lane.b32.xlu0 %v12835_v10, %s12439_s16  ;;  %9910 = vmatpush3.bf16.msra.mxu0 %v12863_v7  ;;  %v3463_v4 = vld [vmem:[%s17082_s4 + $0xa0] sm:$0xff] }
 0x192   : > { %v1231_v44 = vadd.f32 %v9776_v8, %v12861_v6  ;;  %v1276_v9 = vmax.f32 %v1228_v5, 0.0  ;;  %v11729_v5 = vld [vmem:[%s17081_s3 + $0x270] ss:$8 sps:$4 sm:$0xff]  }
 0x194   : > { %v1277_v12 = vmax.f32 %v1231_v44, 0.0  ;;  %v9777_v13 = vpop.f32.mrb[56].mxu0 }
 0x195   : > { %2541 = vrot.lane.b32.xlu0 %v12843_v24, %s12438_s15  ;;  %v9778_v63 = vpop.f32.mrb[57].mxu0 }
 0x196   : > { %v12947_v14 = vpack.c.bf16 %v1277_v12, %v1276_v9  ;;  %v9779_v50 = vadd.f32 %v9778_v63, %v9777_v13  ;;  %v9780_v15 = vpop.f32.mrb[58].mxu0  ;;  %v3449_v9 = vld [vmem:[%s17082_s4 + $0x30] sm:$0xff]  ;;  %v11732_v12 = vld [vmem:[%s17081_s3 + $0x284] ss:$8 sps:$4 sm:$0xff]  }
 0x197   : > { %v9781_v52 = vpop.f32.mrb[59].mxu0  ;;  %v3465_v63 = vld [vmem:[%s17082_s4 + $0xb0] sm:$0xff] }
 0x198   : > { %v1236_v16 = vadd.f32 %v9779_v50, %v12869_v28  ;;  %v9782_v17 = vadd.f32 %v9781_v52, %v9780_v15  ;;  %1373 = vrot.lane.b32.xlu1 %v12947_v14, %s12436_s12  ;;  %9911 = vmatprep.subr.bf16.mxu0 %v12947_v14  ;;  %v11735_v50 = vld [vmem:[%s17081_s3 + $0x280] ss:$8 sps:$4 sm:$0xff]  }
 0x199   : > { %2993 = vrot.lane.b32.xlu0 %v12843_v24, %s12439_s16  ;;  %9912 = vmatpush3.bf16.msra.mxu0 %v12867_v22  ;;  %v11687_v24 = vld [vmem:[%s17081_s3 + $0x204] ss:$8 sps:$4 sm:$0xff]  }
 0x19a   : > { %v1239_v10 = vadd.f32 %v9782_v17, %v12873_v31  ;;  %v1278_v6 = vmax.f32 %v1236_v16, 0.0  ;;  %v826_v31 = vpop.permute.xlu0 %825  ;;  %1958 = vmatprep.mubr.bf16.mxu0 %v11687_v24  ;;  %v3451_v16 = vld [vmem:[%s17082_s4 + $0x40] sm:$0xff]  ;;  %v11738_v17 = vld [vmem:[%s17081_s3 + $0x294] ss:$8 sps:$4 sm:$0xff]  }
 0x19b   : > { %v11747_v24 = vld [vmem:[%s17081_s3 + $0x2a0] ss:$8 sps:$4 sm:$0xff]  }
 0x19c   : > { %v1279_v19 = vmax.f32 %v1239_v10, 0.0  ;;  %v9783_v55 = vpop.f32.mrb[60].mxu0  ;;  %v3467_v10 = vld [vmem:[%s17082_s4 + $0xc0] sm:$0xff] }
 0x19d   : > { %2543 = vrot.lane.b32.xlu0 %v12847_v37, %s12438_s15  ;;  %v9784_v28 = vpop.f32.mrb[61].mxu0 }
 0x19e   : > { %v12962_v25 = vpack.c.bf16 %v1279_v19, %v1278_v6  ;;  %v9785_v26 = vadd.f32 %v9784_v28, %v9783_v55  ;;  %v9786_v27 = vpop.f32.mrb[62].mxu0  ;;  %v11741_v19 = vld [vmem:[%s17081_s3 + $0x290] ss:$8 sps:$4 sm:$0xff]  }
 0x19f   : > { %v9787_v29 = vpop.f32.mrb[63].mxu0  ;;  %v3453_v28 = vld [vmem:[%s17082_s4 + $0x50] sm:$0xff] }
 0x1a0   : > { %v1244_v56 = vadd.f32 %v9785_v26, %v826_v31  ;;  %v9788_v30 = vadd.f32 %v9787_v29, %v9786_v27  ;;  %1375 = vrot.lane.b32.xlu1 %v12962_v25, %s12436_s12  ;;  %9913 = vmatprep.subr.bf16.mxu0 %v12962_v25  ;;  %v3469_v27 = vld [vmem:[%s17082_s4 + $0xd0] sm:$0xff]  ;;  %v3455_v29 = vld [vmem:[%s17082_s4 + $0x60] sm:$0xff] }
 0x1a1   : > { %2995 = vrot.lane.b32.xlu0 %v12847_v37, %s12439_s16  ;;  %9914 = vmatpush3.bf16.msra.mxu0 %v12875_v39  ;;  %v11685_v37 = vld [vmem:[%s17081_s3 + $0x200] ss:$8 sps:$4 sm:$0xff]  }
 0x1a2   : > { %v1247_v33 = vadd.f32 %v9788_v30, %v831_v32  ;;  %v1280_v0 = vmax.f32 %v1244_v56, 0.0  ;;  %v1348_v46 = vpop.permute.xlu0 %1347  ;;  %v11750_v56 = vld [vmem:[%s17081_s3 + $0x2b4] ss:$8 sps:$4 sm:$0xff]   ;;  %v3471_v32 = vld [vmem:[%s17082_s4 + $0xe0] sm:$0xff] }
 0x1a4   : > { %v1281_v35 = vmax.f32 %v1247_v33, 0.0  ;;  %v11753_v33 = vld [vmem:[%s17081_s3 + $0x2b0] ss:$8 sps:$4 sm:$0xff]  }
 0x1a5   : > { %2545 = vrot.lane.b32.xlu0 %v12855_v53, %s12438_s15 }
 0x1a6   : > { %v12975_v36 = vpack.c.bf16 %v1281_v35, %v1280_v0 }
 0x1a8   : > { %1377 = vrot.lane.b32.xlu1 %v12975_v36, %s12436_s12  ;;  %9915 = vmatprep.subr.bf16.mxu0 %v12975_v36 }
 0x1a9   : > { %2997 = vrot.lane.b32.xlu0 %v12855_v53, %s12439_s16  ;;  %9916 = vmatpush3.bf16.msra.mxu0 %v12879_v58  ;;  %v11693_v53 = vld [vmem:[%s17081_s3 + $0x210] ss:$8 sps:$4 sm:$0xff]  }
 0x1aa   : > { %v1350_v51 = vpop.permute.xlu0 %1349 }
 0x1ac   : > { %2103 = vrot.lane.b32.xlu1 %v12887_v11, %s12437_s13  ;;  %1959 = vmatmul.mubr.bf16.vlgmr.msra.gmra.mrb[64].mxu0 %v11685_v37  ;;  %v3457_v37 = vld [vmem:[%s17082_s4 + $0x70] sm:$0xff] }
 0x1ad   : > { %2547 = vrot.lane.b32.xlu0 %v12863_v7, %s12438_s15  ;;  %1966 = vmatprep.mubr.bf16.mxu0 %v11690_v38  ;;  %v11756_v38 = vld [vmem:[%s17081_s3 + $0x2c4] ss:$8 sps:$4 sm:$0xff]  }
 0x1b0   : > { %2105 = vrot.lane.b32.xlu1 %v12899_v20, %s12437_s13 }
 0x1b1   : > { %2999 = vrot.lane.b32.xlu0 %v12863_v7, %s12439_s16  ;;  %v11702_v7 = vld [vmem:[%s17081_s3 + $0x234] ss:$8 sps:$4 sm:$0xff]  }
 0x1b4   : > { %2107 = vrot.lane.b32.xlu1 %v12911_v34, %s12437_s13  ;;  %1967 = vmatmul.mubr.bf16.gmra.mrb[68].mxu0 %v11693_v53  ;;  %v3473_v53 = vld [vmem:[%s17082_s4 + $0xf0] sm:$0xff] }
 0x1b5   : > { %2549 = vrot.lane.b32.xlu0 %v12867_v22, %s12438_s15  ;;  %1974 = vmatprep.mubr.bf16.mxu0 %v11696_v40 }
 0x1b8   : > { %2109 = vrot.lane.b32.xlu1 %v12923_v47, %s12437_s13 }
 0x1b9   : > { %3001 = vrot.lane.b32.xlu0 %v12867_v22, %s12439_s16  ;;  %v11708_v22 = vld [vmem:[%s17081_s3 + $0x244] ss:$8 sps:$4 sm:$0xff]  }
 0x1bc   : > { %2111 = vrot.lane.b32.xlu1 %v12935_v62, %s12437_s13  ;;  %1975 = vmatmul.mubr.bf16.gmra.mrb[72].mxu0 %v11699_v42  ;;  %v3444_v42 = vld [vmem:[%s17082_s4 + $0x8] sm:$0xff] }
 0x1bd   : > { %2551 = vrot.lane.b32.xlu0 %v12875_v39, %s12438_s15  ;;  %1982 = vmatprep.mubr.bf16.mxu0 %v11702_v7  ;;  %v11759_v7 = vld [vmem:[%s17081_s3 + $0x2c0] ss:$8 sps:$4 sm:$0xff]  }
 0x1c0   : > { %2113 = vrot.lane.b32.xlu1 %v12947_v14, %s12437_s13 }
 0x1c1   : > { %3003 = vrot.lane.b32.xlu0 %v12875_v39, %s12439_s16  ;;  %v11714_v39 = vld [vmem:[%s17081_s3 + $0x254] ss:$8 sps:$4 sm:$0xff]  }
 0x1c4   : > { %2115 = vrot.lane.b32.xlu1 %v12962_v25, %s12437_s13  ;;  %1983 = vmatmul.mubr.bf16.gmra.mrb[76].mxu0 %v11705_v3 }
 0x1c5   : > { %2553 = vrot.lane.b32.xlu0 %v12879_v58, %s12438_s15  ;;  %1990 = vmatprep.mubr.bf16.mxu0 %v11708_v22  ;;  %v11762_v22 = vld [vmem:[%s17081_s3 + $0x2d4] ss:$8 sps:$4 sm:$0xff]  }
 0x1c8   : > { %2117 = vrot.lane.b32.xlu1 %v12975_v36, %s12437_s13 }
 0x1c9   : > { %3005 = vrot.lane.b32.xlu0 %v12879_v58, %s12439_s16  ;;  %v547_v58 = vlaneseq }
 0x1cb   : > { %v548_v57 = vand.u32 127, %v547_v58  ;;  %v11768_v58 = vld [vmem:[%s17081_s3 + $0x2e4] ss:$8 sps:$4 sm:$0xff]  }
 0x1cc   : > { %2555 = vrot.lane.b32.xlu1 %v12887_v11, %s12438_s15  ;;  %1991 = vmatmul.mubr.bf16.gmra.mrb[80].mxu0 %v11711_v43  ;;  %v3460_v43 = vld [vmem:[%s17082_s4 + $0x88] sm:$0xff] }
 0x1cd   : > { %3477 = vperm.xlu0 %11616, %v3443_v45   ;;  %1998 = vmatprep.mubr.bf16.mxu0 %v11714_v39  ;;  %v13071_v59 = vand.u32 15, %v548_v57  ;;  %v3446_v45 = vld [vmem:[%s17082_s4 + $0x18] sm:$0xff]  ;;  %v3448_v57 = vld [vmem:[%s17082_s4 + $0x28] sm:$0xff] }
 0x1d0   : > { %3007 = vrot.lane.b32.xlu1 %v12887_v11, %s12439_s16  ;;  %v1352_v11 = vpop.permute.xlu0 %1351 }
 0x1d1   : > { %3557 = vperm.xlu0 %11616, %v3459_v18  }
 0x1d4   : > { %2557 = vrot.lane.b32.xlu1 %v12899_v20, %s12438_s15  ;;  %1999 = vmatmul.mubr.bf16.gmra.mrb[84].mxu0 %v11717_v48  ;;  %v13079_v41 = vpop.permute.xlu0 %1353 }
 0x1d5   : > { %3487 = vperm.xlu0 %11616, %v3445_v54   ;;  %2006 = vmatprep.mubr.bf16.mxu0 %v11720_v49  ;;  %v13254_v54 = vadd.s32 4294967295, %v13071_v59 }
 0x1d7   : > { %vm566_vm1 = vcmp.ge.s32.totalorder %v13254_v54, 0 }
 0x1d8   : > { %3009 = vrot.lane.b32.xlu1 %v12899_v20, %s12439_s16  ;;  %v13087_v20 = vadd.s32 4294967294, %v13071_v59  ;;  %v13089_v2 = vpop.permute.xlu0 %1355 }
 0x1d9   : > { %3567 = vperm.xlu0 %11616, %v3461_v23  }
 0x1da   : > { %vm562_vm0 = vcmp.ge.s32.totalorder %v13087_v20, 0 }
 0x1dc   : > { %2559 = vrot.lane.b32.xlu1 %v12911_v34, %s12438_s15  ;;  %2007 = vmatmul.mubr.bf16.gmra.mrb[88].mxu0 %v11723_v60  ;;  %v13100_v8 = vpop.permute.xlu0 %1357 }
 0x1dd   : > { %3497 = vperm.xlu0 %11616, %v3447_v1   ;;  %2014 = vmatprep.mubr.bf16.mxu0 %v11726_v61  ;;  %v11774_v61 = vld [vmem:[%s17081_s3 + $0x2f4] ss:$8 sps:$4 sm:$0xff]   ;;  %v11682_v1 = vld [vmem:[%s17081_s3] ss:$8 sps:$4 sm:$0xff]  }
 0x1e0   : > { %3011 = vrot.lane.b32.xlu1 %v12911_v34, %s12439_s16  ;;  %v1381_v34 = vsel %vm562_vm0, %v1348_v46, 0  ;;  %v13114_v13 = vpop.permute.xlu0 %1359  ;;  %v11765_v46 = vld [vmem:[%s17081_s3 + $0x2d0] ss:$8 sps:$4 sm:$0xff]  }
 0x1e1   : > { %3577 = vperm.xlu0 %11616, %v3463_v4   ;;  %v1387_v48 = vsel %vm562_vm0, %v13114_v13, 0  ;;  %v11688_v4 = vld [vmem:[%s17081_s3 + $0x14] ss:$8 sps:$4 sm:$0xff]   ;;  %v11783_v13 = vld [vmem:[%s17081_s3 + $0x304] ss:$8 sps:$4 sm:$0xff]  }
 0x1e2   : > { %v1364_v44 = vpop.permute.xlu1 %1363 }
 0x1e3   : > { %11491 = vmatprep.subr.msk.bf16.mxu1 %vm562_vm0, %v1364_v44 }
 0x1e4   : > { %2561 = vrot.lane.b32.xlu1 %v12923_v47, %s12438_s15  ;;  %9790 = vmatpush3.bf16.msra.mxu1 %v1381_v34  ;;  %v13124_v15 = vpop.permute.xlu0 %1361 }
 0x1e5   : > { %3507 = vperm.xlu0 %11616, %v3449_v9   ;;  %2015 = vmatmul.mubr.bf16.gmra.mrb[92].mxu0 %v11729_v5  ;;  %v3450_v9 = vld [vmem:[%s17082_s4 + $0x38] sm:$0xff] }
 0x1e6   : > { %2022 = vmatprep.mubr.bf16.mxu0 %v11732_v12  ;;  %v11777_v12 = vld [vmem:[%s17081_s3 + $0x2f0] ss:$8 sps:$4 sm:$0xff]  }
 0x1e8   : > { %3013 = vrot.lane.b32.xlu1 %v12923_v47, %s12439_s16  ;;  %v1382_v47 = vsel %vm562_vm0, %v1350_v51, 0  ;;  %v13141_v6 = vpop.permute.xlu0 %2087  ;;  %v3462_v51 = vld [vmem:[%s17082_s4 + $0x98] sm:$0xff] }
 0x1e9   : > { %3587 = vperm.xlu0 %11616, %v3465_v63  }
 0x1ea   : > { %v1366_v52 = vpop.permute.xlu1 %1365 }
 0x1eb   : > { %11492 = vmatprep.subr.msk.bf16.mxu1 %vm562_vm0, %v1366_v52  ;;  %v11694_v52 = vld [vmem:[%s17081_s3 + $0x24] ss:$8 sps:$4 sm:$0xff]  }
 0x1ec   : > { %2563 = vrot.lane.b32.xlu1 %v12935_v62, %s12438_s15  ;;  %9792 = vmatpush3.bf16.msra.mxu1 %v1382_v47  ;;  %v13160_v26 = vpop.permute.xlu0 %2089 }
 0x1ed   : > { %3517 = vperm.xlu0 %11616, %v3451_v16   ;;  %2023 = vmatmul.mubr.bf16.gmra.mrb[96].mxu0 %v11735_v50  ;;  %v2122_v63 = vsel %vm566_vm1, %v13160_v26, 0  ;;  %v11692_v50 = vld [vmem:[%s17081_s3 + $0x10] ss:$8 sps:$4 sm:$0xff]  }
 0x1ee   : > { %2030 = vmatprep.mubr.bf16.mxu0 %v11738_v17 }
 0x1f0   : > { %3015 = vrot.lane.b32.xlu1 %v12935_v62, %s12439_s16  ;;  %v1383_v62 = vsel %vm562_vm0, %v1352_v11, 0  ;;  %v13181_v30 = vpop.permute.xlu0 %2091  ;;  %v11771_v11 = vld [vmem:[%s17081_s3 + $0x2e0] ss:$8 sps:$4 sm:$0xff]  }
 0x1f1   : > { %3597 = vperm.xlu0 %11616, %v3467_v10   ;;  %v2123_v47 = vsel %vm566_vm1, %v13181_v30, 0  ;;  %v3452_v10 = vld [vmem:[%s17082_s4 + $0x48] sm:$0xff]  ;;  %v3470_v30 = vld [vmem:[%s17082_s4 + $0xd8] sm:$0xff] }
 0x1f2   : > { %v1368_v55 = vpop.permute.xlu1 %1367 }
 0x1f3   : > { %11493 = vmatprep.subr.msk.bf16.mxu1 %vm562_vm0, %v1368_v55  ;;  %v11698_v55 = vld [vmem:[%s17081_s3 + $0x20] ss:$8 sps:$4 sm:$0xff]  }
 0x1f4   : > { %2565 = vrot.lane.b32.xlu1 %v12947_v14, %s12438_s15  ;;  %9794 = vmatpush3.bf16.msra.mxu1 %v1383_v62  ;;  %v13193_v0 = vpop.permute.xlu0 %2093  ;;  %v11700_v62 = vld [vmem:[%s17081_s3 + $0x34] ss:$8 sps:$4 sm:$0xff]  }
 0x1f5   : > { %3527 = vperm.xlu0 %11616, %v3453_v28   ;;  %2031 = vmatmul.mubr.bf16.gmra.mrb[100].mxu0 %v11741_v19  ;;  %v2124_v19 = vsel %vm566_vm1, %v13193_v0, 0 }
 0x1f6   : > { %2038 = vmatprep.mubr.bf16.mxu0 %v11744_v21  ;;  %v3468_v21 = vld [vmem:[%s17082_s4 + $0xc8] sm:$0xff] }
 0x1f8   : > { %3017 = vrot.lane.b32.xlu1 %v12947_v14, %s12439_s16  ;;  %v1384_v14 = vsel %vm562_vm0, %v13079_v41, 0  ;;  %v13211_v40 = vpop.permute.xlu0 %2095  ;;  %v1388_v41 = vsel %vm562_vm0, %v13124_v15, 0  ;;  %v3466_v15 = vld [vmem:[%s17082_s4 + $0xb8] sm:$0xff] }
 0x1f9   : > { %3607 = vperm.xlu0 %11616, %v3469_v27   ;;  %v2125_v27 = vsel %vm566_vm1, %v13211_v40, 0  ;;  %v11710_v40 = vld [vmem:[%s17081_s3 + $0x40] ss:$8 sps:$4 sm:$0xff]  }
 0x1fa   : > { %v1370_v31 = vpop.permute.xlu1 %1369 }
 0x1fb   : > { %11494 = vmatprep.subr.msk.bf16.mxu1 %vm562_vm0, %v1370_v31 }
 0x1fc   : > { %2567 = vrot.lane.b32.xlu1 %v12962_v25, %s12438_s15  ;;  %9796 = vmatpush3.bf16.msra.mxu1 %v1384_v14  ;;  %v13232_v39 = vpop.permute.xlu0 %2097  ;;  %v11704_v14 = vld [vmem:[%s17081_s3 + $0x30] ss:$8 sps:$4 sm:$0xff]  }
 0x1fd   : > { %3537 = vperm.xlu0 %11616, %v3455_v29   ;;  %2039 = vmatmul.mubr.bf16.gmra.mrb[104].mxu0 %v11747_v24  ;;  %v3454_v24 = vld [vmem:[%s17082_s4 + $0x58] sm:$0xff] }
 0x1fe   : > { %2046 = vmatprep.mubr.bf16.mxu0 %v11750_v56  ;;  %v2126_v56 = vsel %vm566_vm1, %v13232_v39, 0  ;;  %v3458_v39 = vld [vmem:[%s17082_s4 + $0x78] sm:$0xff] }
 0x200   : > { %3019 = vrot.lane.b32.xlu1 %v12962_v25, %s12439_s16  ;;  %v1385_v25 = vsel %vm562_vm0, %v13089_v2, 0  ;;  %v13248_v49 = vpop.permute.xlu0 %2099  ;;  %v3464_v2 = vld [vmem:[%s17082_s4 + $0xa8] sm:$0xff] }
 0x201   : > { %3617 = vperm.xlu0 %11616, %v3471_v32   ;;  %v11706_v32 = vld [vmem:[%s17081_s3 + $0x44] ss:$8 sps:$4 sm:$0xff]   ;;  %v2127_v0 = vsel %vm566_vm1, %v13248_v49, 0 }
 0x202   : > { %v1372_v35 = vpop.permute.xlu1 %1371 }
 0x203   : > { %11495 = vmatprep.subr.msk.bf16.mxu1 %vm562_vm0, %v1372_v35  ;;  %v13366_v35 = vadd.s32 1, %v13071_v59 }
 0x204   : > { %2569 = vrot.lane.b32.xlu1 %v12975_v36, %s12438_s15  ;;  %9798 = vmatpush3.bf16.msra.mxu1 %v1385_v25  ;;  %v13262_v23 = vpop.permute.xlu0 %2101 }
 0x205   : > { %3547 = vperm.xlu0 %11616, %v3457_v37   ;;  %2047 = vmatmul.mubr.bf16.gmra.mrb[108].mxu0 %v11753_v33  ;;  %vm571_vm2 = vcmp.lt.s32.totalorder %v13366_v35, 16  ;;  %v12242_v35 = vld [vmem:[%s17085_s7 + $0xd4] ss:$8 sps:$4 sm:$0xff]  }
 0x206   : > { %2054 = vmatprep.mubr.bf16.mxu0 %v11756_v38  ;;  %v3456_v38 = vld [vmem:[%s17082_s4 + $0x68] sm:$0xff] }
 0x208   : > { %3021 = vrot.lane.b32.xlu1 %v12975_v36, %s12439_s16  ;;  %v1386_v36 = vsel %vm562_vm0, %v13100_v8, 0  ;;  %v2121_v8 = vsel %vm566_vm1, %v13141_v6, 0  ;;  %v13287_v44 = vpop.permute.xlu0 %2539 }
 0x209   : > { %3627 = vperm.xlu0 %11616, %v3473_v53   ;;  %v2128_v53 = vsel %vm566_vm1, %v13262_v23, 0  ;;  %v11724_v23 = vld [vmem:[%s17081_s3 + $0x74] ss:$8 sps:$4 sm:$0xff]  }
 0x20a   : > { %v1374_v3 = vpop.permute.xlu1 %1373 }
 0x20b   : > { %11496 = vmatprep.subr.msk.bf16.mxu1 %vm562_vm0, %v1374_v3  ;;  %v13387_v3 = vadd.s32 2, %v13071_v59 }
 0x20c   : > { %3482 = vperm.xlu1 %11617, %v3444_v42   ;;  %9800 = vmatpush3.bf16.msra.mxu1 %v1386_v36  ;;  %v13312_v16 = vpop.permute.xlu0 %2991  ;;  %v3472_v42 = vld [vmem:[%s17082_s4 + $0xe8] sm:$0xff] }
 0x20d   : > { %2055 = vmatmul.mubr.bf16.gmra.mrb[112].mxu0 %v11759_v7  ;;  %v11712_v7 = vld [vmem:[%s17081_s3 + $0x54] ss:$8 sps:$4 sm:$0xff]   ;;  %vm575_vm3 = vcmp.lt.s32.totalorder %v13387_v3, 16  ;;  %v12315_v3 = vld [vmem:[%s17085_s7 + $0x390] ss:$8 sps:$4 sm:$0xff]  }
 0x20e   : > { %2062 = vmatprep.mubr.bf16.mxu0 %v11762_v22 }
 0x210   : > { %3562 = vperm.xlu1 %11617, %v3460_v43   ;;  %v2542_v28 = vpop.permute.xlu0 %2541  ;;  %v2573_v43 = vsel %vm571_vm2, %v13287_v44, 0 }
 0x211   : > { %v2574_v49 = vsel %vm571_vm2, %v2542_v28, 0  ;;  %v11746_v28 = vld [vmem:[%s17081_s3 + $0xa0] ss:$8 sps:$4 sm:$0xff]  }
 0x212   : > { %v1376_v18 = vpop.permute.xlu1 %1375 }
 0x213   : > { %11497 = vmatprep.subr.msk.bf16.mxu1 %vm562_vm0, %v1376_v18  ;;  %v3474_v18 = vld [vmem:[%s17082_s4 + $0xf8] sm:$0xff] }
 0x214   : > { %3492 = vperm.xlu1 %11617, %v3446_v45   ;;  %9802 = vmatpush3.bf16.msra.mxu1 %v1387_v48  ;;  %v13344_v31 = vpop.permute.xlu0 %2993  ;;  %v11716_v45 = vld [vmem:[%s17081_s3 + $0x50] ss:$8 sps:$4 sm:$0xff]  }
 0x215   : > { %2063 = vmatmul.mubr.bf16.gmra.mrb[116].mxu0 %v11765_v46 }
 0x216   : > { %2070 = vmatprep.mubr.bf16.mxu0 %v11768_v58  ;;  %v11718_v58 = vld [vmem:[%s17081_s3 + $0x64] ss:$8 sps:$4 sm:$0xff]  }
 0x218   : > { %3572 = vperm.xlu1 %11617, %v3462_v51   ;;  %v2544_v37 = vpop.permute.xlu0 %2543 }
 0x21a   : > { %v1378_v60 = vpop.permute.xlu1 %1377 }
 0x21b   : > { %11498 = vmatprep.subr.msk.bf16.mxu1 %vm562_vm0, %v1378_v60 }
 0x21c   : > { %3502 = vperm.xlu1 %11617, %v3448_v57   ;;  %9804 = vmatpush3.bf16.msra.mxu1 %v1388_v41  ;;  %v13389_v22 = vpop.permute.xlu0 %2995 }
 0x21d   : > { %2071 = vmatmul.mubr.bf16.gmra.mrb[120].mxu0 %v11771_v11  ;;  %v11722_v11 = vld [vmem:[%s17081_s3 + $0x60] ss:$8 sps:$4 sm:$0xff]  }
 0x21e   : > { %v2104_v5 = vpop.permute.xlu1 %2103  ;;  %2078 = vmatprep.mubr.bf16.mxu0 %v11774_v61  ;;  %v2575_v61 = vsel %vm571_vm2, %v2544_v37, 0  ;;  %v11758_v37 = vld [vmem:[%s17081_s3 + $0xc0] ss:$8 sps:$4 sm:$0xff]  }
 0x21f   : > { %1638 = vmatmul.mubr.bf16.vlgmr.msra.gmra.mrb[0].mxu1 %v11682_v1  ;;  %11499 = vmatprep.subr.msk.bf16.mxu1 %vm566_vm1, %v2104_v5 }
 0x220   : > { %3582 = vperm.xlu1 %11617, %v3464_v2   ;;  %10014 = vmatpush3.bf16.msra.mxu1 %v2121_v8  ;;  %v2546_v46 = vpop.permute.xlu0 %2545  ;;  %v11728_v2 = vld [vmem:[%s17081_s3 + $0x70] ss:$8 sps:$4 sm:$0xff]  }
 0x221   : > { %1645 = vmatprep.mubr.bf16.mxu1 %v11688_v4  ;;  %v11730_v4 = vld [vmem:[%s17081_s3 + $0x84] ss:$8 sps:$4 sm:$0xff]   ;;  %v2576_v44 = vsel %vm571_vm2, %v2546_v46, 0  ;;  %v11795_v46 = vld [vmem:[%s17081_s3 + $0x320] ss:$8 sps:$4 sm:$0xff]  }
 0x222   : > { %v2106_v34 = vpop.permute.xlu1 %2105 }
 0x223   : > { %11500 = vmatprep.subr.msk.bf16.mxu1 %vm566_vm1, %v2106_v34 }
 0x224   : > { %3512 = vperm.xlu1 %11617, %v3450_v9   ;;  %10016 = vmatpush3.bf16.msra.mxu1 %v2122_v63  ;;  %v13415_v51 = vpop.permute.xlu0 %2997 }
 0x225   : > { %2079 = vmatmul.mubr.bf16.gmra.mrb[124].mxu0 %v11777_v12  ;;  %v11734_v12 = vld [vmem:[%s17081_s3 + $0x80] ss:$8 sps:$4 sm:$0xff]  }
 0x226   : > { %v2108_v17 = vpop.permute.xlu1 %2107  ;;  %2830 = vmatprep.mubr.bf16.mxu0 %v11783_v13  ;;  %v11736_v13 = vld [vmem:[%s17081_s3 + $0x94] ss:$8 sps:$4 sm:$0xff]  }
 0x227   : > { %1646 = vmatmul.mubr.bf16.gmra.mrb[4].mxu1 %v11692_v50  ;;  %11501 = vmatprep.subr.msk.bf16.mxu1 %vm566_vm1, %v2108_v17  ;;  %v11740_v17 = vld [vmem:[%s17081_s3 + $0x90] ss:$8 sps:$4 sm:$0xff]  }
 0x228   : > { %3592 = vperm.xlu1 %11617, %v3466_v15   ;;  %10018 = vmatpush3.bf16.msra.mxu1 %v2123_v47  ;;  %v2548_v41 = vpop.permute.xlu0 %2547  ;;  %v11742_v47 = vld [vmem:[%s17081_s3 + $0xa4] ss:$8 sps:$4 sm:$0xff]  }
 0x229   : > { %1653 = vmatprep.mubr.bf16.mxu1 %v11694_v52  ;;  %v2577_v50 = vsel %vm571_vm2, %v2548_v41, 0  ;;  %v11772_v41 = vld [vmem:[%s17081_s3 + $0xf4] ss:$8 sps:$4 sm:$0xff]  }
 0x22a   : > { %v2110_v6 = vpop.permute.xlu1 %2109 }
 0x22b   : > { %11502 = vmatprep.subr.msk.bf16.mxu1 %vm566_vm1, %v2110_v6 }
 0x22c   : > { %3522 = vperm.xlu1 %11617, %v3452_v10   ;;  %10020 = vmatpush3.bf16.msra.mxu1 %v2124_v19  ;;  %v13437_v5 = vpop.permute.xlu0 %2999 }
 0x22e   : > { %v2112_v26 = vpop.permute.xlu1 %2111 }
 0x22f   : > { %1654 = vmatmul.mubr.bf16.gmra.mrb[8].mxu1 %v11698_v55  ;;  %11503 = vmatprep.subr.msk.bf16.mxu1 %vm566_vm1, %v2112_v26 }
 0x230   : > { %3602 = vperm.xlu1 %11617, %v3468_v21   ;;  %10022 = vmatpush3.bf16.msra.mxu1 %v2125_v27  ;;  %v2550_v34 = vpop.permute.xlu0 %2549  ;;  %v11748_v21 = vld [vmem:[%s17081_s3 + $0xb4] ss:$8 sps:$4 sm:$0xff]  }
 0x231   : > { %1661 = vmatprep.mubr.bf16.mxu1 %v11700_v62  ;;  %v2578_v6 = vsel %vm571_vm2, %v2550_v34, 0 }
 0x232   : > { %v2114_v29 = vpop.permute.xlu1 %2113 }
 0x233   : > { %11504 = vmatprep.subr.msk.bf16.mxu1 %vm566_vm1, %v2114_v29  ;;  %v11752_v29 = vld [vmem:[%s17081_s3 + $0xb0] ss:$8 sps:$4 sm:$0xff]  }
 0x234   : > { %3532 = vperm.xlu1 %11617, %v3454_v24   ;;  %10024 = vmatpush3.bf16.msra.mxu1 %v2126_v56  ;;  %v13455_v15 = vpop.permute.xlu0 %3001 }
 0x236   : > { %v2116_v33 = vpop.permute.xlu1 %2115 }
 0x237   : > { %1662 = vmatmul.mubr.bf16.gmra.mrb[12].mxu1 %v11704_v14  ;;  %11505 = vmatprep.subr.msk.bf16.mxu1 %vm566_vm1, %v2116_v33  ;;  %v11754_v14 = vld [vmem:[%s17081_s3 + $0xc4] ss:$8 sps:$4 sm:$0xff]   ;;  %v11781_v33 = vld [vmem:[%s17081_s3 + $0x300] ss:$8 sps:$4 sm:$0xff]  }
 0x238   : > { %3612 = vperm.xlu1 %11617, %v3470_v30   ;;  %10026 = vmatpush3.bf16.msra.mxu1 %v2127_v0  ;;  %v2552_v19 = vpop.permute.xlu0 %2551  ;;  %v11787_v0 = vld [vmem:[%s17081_s3 + $0x314] ss:$8 sps:$4 sm:$0xff]  }
 0x239   : > { %1669 = vmatprep.mubr.bf16.mxu1 %v11706_v32  ;;  %v2579_v27 = vsel %vm571_vm2, %v2552_v19, 0 }
 0x23a   : > { %v2118_v25 = vpop.permute.xlu1 %2117 }
 0x23b   : > { %11506 = vmatprep.subr.msk.bf16.mxu1 %vm566_vm1, %v2118_v25  ;;  %v11789_v25 = vld [vmem:[%s17081_s3 + $0x310] ss:$8 sps:$4 sm:$0xff]  }
 0x23c   : > { %3542 = vperm.xlu1 %11617, %v3456_v38   ;;  %10028 = vmatpush3.bf16.msra.mxu1 %v2128_v53  ;;  %v13477_v62 = vpop.permute.xlu0 %3003  ;;  %v11760_v38 = vld [vmem:[%s17081_s3 + $0xd4] ss:$8 sps:$4 sm:$0xff]  }
 0x23e   : > { %v2556_v36 = vpop.permute.xlu1 %2555 }
 0x23f   : > { %1670 = vmatmul.mubr.bf16.gmra.mrb[16].mxu1 %v11710_v40  ;;  %11507 = vmatprep.subr.msk.bf16.mxu0 %vm571_vm2, %v2556_v36  ;;  %v11793_v40 = vld [vmem:[%s17081_s3 + $0x324] ss:$8 sps:$4 sm:$0xff]  }
 0x240   : > { %3622 = vperm.xlu1 %11617, %v3472_v42   ;;  %10126 = vmatpush3.bf16.msra.mxu0 %v2573_v43  ;;  %v2554_v56 = vpop.permute.xlu0 %2553 }
 0x241   : > { %1677 = vmatprep.mubr.bf16.mxu1 %v11712_v7  ;;  %v2580_v32 = vsel %vm571_vm2, %v2554_v56, 0  ;;  %v11784_v56 = vld [vmem:[%s17081_s3 + $0x114] ss:$8 sps:$4 sm:$0xff]  }
 0x242   : > { %v3008_v59 = vpop.permute.xlu1 %3007 }
 0x243   : > { %11515 = vmatprep.subr.msk.bf16.mxu1 %vm575_vm3, %v3008_v59 }
 0x244   : > { %3552 = vperm.xlu1 %11617, %v3458_v39   ;;  %v11764_v39 = vld [vmem:[%s17081_s3 + $0xd0] ss:$8 sps:$4 sm:$0xff]  }
 0x246   : > { %v2558_v48 = vpop.permute.xlu1 %2557 }
 0x247   : > { %1678 = vmatmul.mubr.bf16.gmra.mrb[20].mxu1 %v11716_v45  ;;  %11508 = vmatprep.subr.msk.bf16.mxu0 %vm571_vm2, %v2558_v48  ;;  %v11766_v45 = vld [vmem:[%s17081_s3 + $0xe4] ss:$8 sps:$4 sm:$0xff]  }
 0x248   : > { %3632 = vperm.xlu1 %11617, %v3474_v18   ;;  %10128 = vmatpush3.bf16.msra.mxu0 %v2574_v49 }
 0x249   : > { %1685 = vmatprep.mubr.bf16.mxu1 %v11718_v58  ;;  %v11799_v58 = vld [vmem:[%s17081_s3 + $0x334] ss:$8 sps:$4 sm:$0xff]  }
 0x24a   : > { %v13417_v57 = vpop.permute.xlu1 %3009 }
 0x24e   : > { %v2560_v60 = vpop.permute.xlu1 %2559 }
 0x24f   : > { %1686 = vmatmul.mubr.bf16.gmra.mrb[24].mxu1 %v11722_v11  ;;  %11509 = vmatprep.subr.msk.bf16.mxu0 %vm571_vm2, %v2560_v60  ;;  %v11770_v60 = vld [vmem:[%s17081_s3 + $0xe0] ss:$8 sps:$4 sm:$0xff]  }
 0x250   : > { %10130 = vmatpush3.bf16.msra.mxu0 %v2575_v61  ;;  %1693 = vmatprep.mubr.bf16.mxu1 %v11724_v23 }
 0x252   : > { %v13429_v1 = vpop.permute.xlu1 %3011 }
 0x256   : > { %v2562_v8 = vpop.permute.xlu1 %2561 }
 0x257   : > { %1694 = vmatmul.mubr.bf16.gmra.mrb[28].mxu1 %v11728_v2  ;;  %11510 = vmatprep.subr.msk.bf16.mxu0 %vm571_vm2, %v2562_v8  ;;  %v11801_v2 = vld [vmem:[%s17081_s3 + $0x330] ss:$8 sps:$4 sm:$0xff]   ;;  %v11805_v8 = vld [vmem:[%s17081_s3 + $0x344] ss:$8 sps:$4 sm:$0xff]  }
 0x258   : > { %10132 = vmatpush3.bf16.msra.mxu0 %v2576_v44  ;;  %1701 = vmatprep.mubr.bf16.mxu1 %v11730_v4 }
 0x25a   : > { %v13443_v9 = vpop.permute.xlu1 %3013 }
 0x25e   : > { %v2564_v63 = vpop.permute.xlu1 %2563 }
 0x25f   : > { %1702 = vmatmul.mubr.bf16.gmra.mrb[32].mxu1 %v11734_v12  ;;  %11511 = vmatprep.subr.msk.bf16.mxu0 %vm571_vm2, %v2564_v63  ;;  %v11776_v63 = vld [vmem:[%s17081_s3 + $0xf0] ss:$8 sps:$4 sm:$0xff]  }
 0x260   : > { %10134 = vmatpush3.bf16.msra.mxu0 %v2577_v50  ;;  %1709 = vmatprep.mubr.bf16.mxu1 %v11736_v13 }
 0x262   : > { %v13457_v52 = vpop.permute.xlu1 %3015 }
 0x266   : > { %v2566_v10 = vpop.permute.xlu1 %2565 }
 0x267   : > { %1710 = vmatmul.mubr.bf16.gmra.mrb[36].mxu1 %v11740_v17  ;;  %11512 = vmatprep.subr.msk.bf16.mxu0 %vm571_vm2, %v2566_v10  ;;  %v11780_v17 = vld [vmem:[%s17081_s3 + $0x104] ss:$8 sps:$4 sm:$0xff]  }
 0x268   : > { %10136 = vmatpush3.bf16.msra.mxu0 %v2578_v6  ;;  %1717 = vmatprep.mubr.bf16.mxu1 %v11742_v47  ;;  %v11807_v47 = vld [vmem:[%s17081_s3 + $0x340] ss:$8 sps:$4 sm:$0xff]   ;;  %v11811_v6 = vld [vmem:[%s17081_s3 + $0x354] ss:$8 sps:$4 sm:$0xff]  }
 0x26a   : > { %v13469_v55 = vpop.permute.xlu1 %3017 }
 0x26e   : > { %v2568_v26 = vpop.permute.xlu1 %2567 }
 0x26f   : > { %1718 = vmatmul.mubr.bf16.gmra.mrb[40].mxu1 %v11746_v28  ;;  %11513 = vmatprep.subr.msk.bf16.mxu0 %vm571_vm2, %v2568_v26 }
 0x270   : > { %10138 = vmatpush3.bf16.msra.mxu0 %v2579_v27  ;;  %1725 = vmatprep.mubr.bf16.mxu1 %v11748_v21  ;;  %v11778_v27 = vld [vmem:[%s17081_s3 + $0x100] ss:$8 sps:$4 sm:$0xff]  }
 0x272   : > { %v13483_v24 = vpop.permute.xlu1 %3019 }
 0x276   : > { %v2570_v30 = vpop.permute.xlu1 %2569 }
 0x277   : > { %1726 = vmatmul.mubr.bf16.gmra.mrb[44].mxu1 %v11752_v29  ;;  %11514 = vmatprep.subr.msk.bf16.mxu0 %vm571_vm2, %v2570_v30  ;;  %v11813_v30 = vld [vmem:[%s17081_s3 + $0x350] ss:$8 sps:$4 sm:$0xff]  }
 0x278   : > { %10140 = vmatpush3.bf16.msra.mxu0 %v2580_v32  ;;  %1733 = vmatprep.mubr.bf16.mxu1 %v11754_v14  ;;  %v3025_v14 = vsel %vm575_vm3, %v13312_v16, 0 }
 0x27b   : > { %2831 = vmatmul.mubr.bf16.vlgmr.msra.gmra.mrb[128].mxu0 %v11781_v33  ;;  %v11817_v33 = vld [vmem:[%s17081_s3 + $0x364] ss:$8 sps:$4 sm:$0xff]  }
 0x27c   : > { %2838 = vmatprep.mubr.bf16.mxu0 %v11787_v0 }
 0x27f   : > { %1734 = vmatmul.mubr.bf16.gmra.mrb[48].mxu1 %v11758_v37  ;;  %v9917_v53 = vpop.f32.mrb[64].mxu0 }
 0x280   : > { %1741 = vmatprep.mubr.bf16.mxu1 %v11760_v38  ;;  %v9918_v42 = vpop.f32.mrb[65].mxu0 }
 0x281   : > { %v13513_v7 = vadd.f32 %v9918_v42, %v9917_v53  ;;  %v9920_v36 = vpop.f32.mrb[66].mxu0  ;;  %v11786_v53 = vld [vmem:[%s17081_s3 + $0x110] ss:$8 sps:$4 sm:$0xff]   ;;  %v11819_v42 = vld [vmem:[%s17081_s3 + $0x360] ss:$8 sps:$4 sm:$0xff]  }
 0x282   : > { %v9921_v43 = vpop.f32.mrb[67].mxu0 }
 0x283   : > { %2839 = vmatmul.mubr.bf16.gmra.mrb[132].mxu0 %v11789_v25  ;;  %v13518_v59 = vadd.f32 %v9921_v43, %v9920_v36  ;;  %v3026_v25 = vsel %vm575_vm3, %v13344_v31, 0  ;;  %v3027_v31 = vsel %vm575_vm3, %v13389_v22, 0  ;;  %v11823_v43 = vld [vmem:[%s17081_s3 + $0x374] ss:$8 sps:$4 sm:$0xff]  }
 0x284   : > { %2846 = vmatprep.mubr.bf16.mxu0 %v11793_v40 }
 0x287   : > { %1742 = vmatmul.mubr.bf16.gmra.mrb[52].mxu1 %v11764_v39  ;;  %v9923_v18 = vpop.f32.mrb[68].mxu0 }
 0x288   : > { %1749 = vmatprep.mubr.bf16.mxu1 %v11766_v45  ;;  %v9924_v48 = vpop.f32.mrb[69].mxu0 }
 0x289   : > { %v13529_v49 = vadd.f32 %v9924_v48, %v9923_v18  ;;  %v9926_v11 = vpop.f32.mrb[70].mxu0  ;;  %v11792_v18 = vld [vmem:[%s17081_s3 + $0x120] ss:$8 sps:$4 sm:$0xff]   ;;  %v11825_v48 = vld [vmem:[%s17081_s3 + $0x370] ss:$8 sps:$4 sm:$0xff]  }
 0x28a   : > { %v9927_v23 = vpop.f32.mrb[71].mxu0 }
 0x28b   : > { %2847 = vmatmul.mubr.bf16.gmra.mrb[136].mxu0 %v11795_v46  ;;  %v13534_v61 = vadd.f32 %v9927_v23, %v9926_v11  ;;  %v3028_v46 = vsel %vm575_vm3, %v13415_v51, 0  ;;  %v3029_v51 = vsel %vm575_vm3, %v13437_v5, 0  ;;  %v11829_v23 = vld [vmem:[%s17081_s3 + $0x384] ss:$8 sps:$4 sm:$0xff]  }
 0x28c   : > { %2854 = vmatprep.mubr.bf16.mxu0 %v11799_v58 }
 0x28f   : > { %1750 = vmatmul.mubr.bf16.gmra.mrb[56].mxu1 %v11770_v60  ;;  %v9929_v4 = vpop.f32.mrb[72].mxu0 }
 0x290   : > { %1757 = vmatprep.mubr.bf16.mxu1 %v11772_v41  ;;  %v9930_v44 = vpop.f32.mrb[73].mxu0 }
 0x291   : > { %v13545_v12 = vadd.f32 %v9930_v44, %v9929_v4  ;;  %v9932_v34 = vpop.f32.mrb[74].mxu0  ;;  %v11798_v4 = vld [vmem:[%s17081_s3 + $0x130] ss:$8 sps:$4 sm:$0xff]   ;;  %v3006_v44 = vpop.permute.xlu0 %3005 }
 0x292   : > { %v9933_v13 = vpop.f32.mrb[75].mxu0 }
 0x293   : > { %2855 = vmatmul.mubr.bf16.gmra.mrb[140].mxu0 %v11801_v2  ;;  %v13550_v50 = vadd.f32 %v9933_v13, %v9932_v34  ;;  %v3030_v2 = vsel %vm575_vm3, %v13455_v15, 0  ;;  %v3031_v15 = vsel %vm575_vm3, %v13477_v62, 0  ;;  %v11831_v34 = vld [vmem:[%s17081_s3 + $0x380] ss:$8 sps:$4 sm:$0xff]   ;;  %v3022_v13 = vpop.permute.xlu1 %3021 }
 0x294   : > { %2862 = vmatprep.mubr.bf16.mxu0 %v11805_v8 }
 0x297   : > { %1758 = vmatmul.mubr.bf16.gmra.mrb[60].mxu1 %v11776_v63  ;;  %v9935_v10 = vpop.f32.mrb[76].mxu0  ;;  %v11835_v63 = vld [vmem:[%s17081_s3 + $0x394] ss:$8 sps:$4 sm:$0xff]  }
 0x298   : > { %2378 = vmatprep.mubr.bf16.mxu1 %v11780_v17  ;;  %v9936_v19 = vpop.f32.mrb[77].mxu0 }
 0x299   : > { %v13561_v28 = vadd.f32 %v9936_v19, %v9935_v10  ;;  %v9938_v21 = vpop.f32.mrb[78].mxu0  ;;  %v3032_v10 = vsel %vm575_vm3, %v3006_v44, 0 }
 0x29a   : > { %v9939_v26 = vpop.f32.mrb[79].mxu0 }
 0x29b   : > { %2863 = vmatmul.mubr.bf16.gmra.mrb[144].mxu0 %v11807_v47  ;;  %v13566_v29 = vadd.f32 %v9939_v26, %v9938_v21  ;;  %v11808_v21 = vld [vmem:[%s17081_s3 + $0x154] ss:$8 sps:$4 sm:$0xff]  }
 0x29c   : > { %2870 = vmatprep.mubr.bf16.mxu0 %v11811_v6  ;;  %v11804_v6 = vld [vmem:[%s17081_s3 + $0x140] ss:$8 sps:$4 sm:$0xff]  }
 0x29f   : > { %2379 = vmatmul.mubr.bf16.vlgmr.msra.gmra.mrb[64].mxu1 %v11778_v27  ;;  %v9941_v32 = vpop.f32.mrb[80].mxu0  ;;  %v11837_v27 = vld [vmem:[%s17081_s3 + $0x390] ss:$8 sps:$4 sm:$0xff]  }
 0x2a0   : > { %10238 = vmatpush3.bf16.msra.mxu1 %v3025_v14  ;;  %2386 = vmatprep.mubr.bf16.mxu1 %v11784_v56  ;;  %v9942_v0 = vpop.f32.mrb[81].mxu0  ;;  %v11841_v56 = vld [vmem:[%s17081_s3 + $0x3a4] ss:$8 sps:$4 sm:$0xff]  }
 0x2a1   : > { %11516 = vmatprep.subr.msk.bf16.mxu1 %vm575_vm3, %v13417_v57  ;;  %v13583_v37 = vadd.f32 %v9942_v0, %v9941_v32  ;;  %v9944_v16 = vpop.f32.mrb[82].mxu0  ;;  %v11790_v57 = vld [vmem:[%s17081_s3 + $0x124] ss:$8 sps:$4 sm:$0xff]   ;;  %v11810_v0 = vld [vmem:[%s17081_s3 + $0x150] ss:$8 sps:$4 sm:$0xff]  }
 0x2a2   : > { %v9945_v38 = vpop.f32.mrb[83].mxu0 }
 0x2a3   : > { %2871 = vmatmul.mubr.bf16.gmra.mrb[148].mxu0 %v11813_v30  ;;  %v13591_v40 = vadd.f32 %v9945_v38, %v9944_v16  ;;  %v11814_v38 = vld [vmem:[%s17081_s3 + $0x164] ss:$8 sps:$4 sm:$0xff]  }
 0x2a4   : > { %10240 = vmatpush3.bf16.msra.mxu1 %v3026_v25  ;;  %2878 = vmatprep.mubr.bf16.mxu0 %v11817_v33 }
 0x2a5   : > { %11517 = vmatprep.subr.msk.bf16.mxu1 %vm575_vm3, %v13429_v1 }
 0x2a7   : > { %2387 = vmatmul.mubr.bf16.gmra.mrb[68].mxu1 %v11786_v53  ;;  %v9947_v36 = vpop.f32.mrb[84].mxu0  ;;  %v11843_v53 = vld [vmem:[%s17081_s3 + $0x3a0] ss:$8 sps:$4 sm:$0xff]  }
 0x2a8   : > { %10242 = vmatpush3.bf16.msra.mxu1 %v3027_v31  ;;  %2394 = vmatprep.mubr.bf16.mxu1 %v11790_v57  ;;  %v9948_v39 = vpop.f32.mrb[85].mxu0  ;;  %v11847_v57 = vld [vmem:[%s17081_s3 + $0x3b4] ss:$8 sps:$4 sm:$0xff]  }
 0x2a9   : > { %11518 = vmatprep.subr.msk.bf16.mxu1 %vm575_vm3, %v13443_v9  ;;  %v13611_v1 = vadd.f32 %v9948_v39, %v9947_v36  ;;  %v9950_v22 = vpop.f32.mrb[86].mxu0  ;;  %v11796_v9 = vld [vmem:[%s17081_s3 + $0x134] ss:$8 sps:$4 sm:$0xff]   ;;  %v11816_v39 = vld [vmem:[%s17081_s3 + $0x160] ss:$8 sps:$4 sm:$0xff]  }
 0x2aa   : > { %v9951_v45 = vpop.f32.mrb[87].mxu0 }
 0x2ab   : > { %2879 = vmatmul.mubr.bf16.gmra.mrb[152].mxu0 %v11819_v42  ;;  %v13619_v58 = vadd.f32 %v9951_v45, %v9950_v22  ;;  %v11820_v45 = vld [vmem:[%s17081_s3 + $0x174] ss:$8 sps:$4 sm:$0xff]  }
 0x2ac   : > { %10244 = vmatpush3.bf16.msra.mxu1 %v3028_v46  ;;  %2886 = vmatprep.mubr.bf16.mxu0 %v11823_v43 }
 0x2ad   : > { %11519 = vmatprep.subr.msk.bf16.mxu1 %vm575_vm3, %v13457_v52 }
 0x2af   : > { %2395 = vmatmul.mubr.bf16.gmra.mrb[72].mxu1 %v11792_v18  ;;  %v9953_v11 = vpop.f32.mrb[88].mxu0  ;;  %v11849_v18 = vld [vmem:[%s17081_s3 + $0x3b0] ss:$8 sps:$4 sm:$0xff]  }
 0x2b0   : > { %10246 = vmatpush3.bf16.msra.mxu1 %v3029_v51  ;;  %2402 = vmatprep.mubr.bf16.mxu1 %v11796_v9  ;;  %v9954_v60 = vpop.f32.mrb[89].mxu0  ;;  %v11853_v9 = vld [vmem:[%s17081_s3 + $0x3c4] ss:$8 sps:$4 sm:$0xff]  }
 0x2b1   : > { %11520 = vmatprep.subr.msk.bf16.mxu1 %vm575_vm3, %v13469_v55  ;;  %v13639_v52 = vadd.f32 %v9954_v60, %v9953_v11  ;;  %v9956_v5 = vpop.f32.mrb[90].mxu0  ;;  %v11802_v55 = vld [vmem:[%s17081_s3 + $0x144] ss:$8 sps:$4 sm:$0xff]   ;;  %v11822_v60 = vld [vmem:[%s17081_s3 + $0x170] ss:$8 sps:$4 sm:$0xff]  }
 0x2b2   : > { %v9957_v41 = vpop.f32.mrb[91].mxu0 }
 0x2b3   : > { %2887 = vmatmul.mubr.bf16.gmra.mrb[156].mxu0 %v11825_v48  ;;  %v13647_v8 = vadd.f32 %v9957_v41, %v9956_v5  ;;  %v11826_v41 = vld [vmem:[%s17081_s3 + $0x184] ss:$8 sps:$4 sm:$0xff]  }
 0x2b4   : > { %10248 = vmatpush3.bf16.msra.mxu1 %v3030_v2  ;;  %2894 = vmatprep.mubr.bf16.mxu0 %v11829_v23 }
 0x2b5   : > { %11521 = vmatprep.subr.msk.bf16.mxu1 %vm575_vm3, %v13483_v24 }
 0x2b7   : > { %2403 = vmatmul.mubr.bf16.gmra.mrb[76].mxu1 %v11798_v4  ;;  %v11855_v4 = vld [vmem:[%s17081_s3 + $0x3c0] ss:$8 sps:$4 sm:$0xff]  }
 0x2b8   : > { %10250 = vmatpush3.bf16.msra.mxu1 %v3031_v15  ;;  %2410 = vmatprep.mubr.bf16.mxu1 %v11802_v55  ;;  %v9959_v17 = vpop.f32.mrb[92].mxu0  ;;  %v11859_v55 = vld [vmem:[%s17081_s3 + $0x3d4] ss:$8 sps:$4 sm:$0xff]  }
 0x2b9   : > { %11522 = vmatprep.subr.msk.bf16.mxu1 %vm575_vm3, %v3022_v13  ;;  %v9960_v24 = vpop.f32.mrb[93].mxu0 }
 0x2ba   : > { %v13666_v47 = vadd.f32 %v9960_v24, %v9959_v17  ;;  %v9962_v62 = vpop.f32.mrb[94].mxu0  ;;  %v11832_v24 = vld [vmem:[%s17081_s3 + $0x194] ss:$8 sps:$4 sm:$0xff]  }
 0x2bb   : > { %2895 = vmatmul.mubr.bf16.gmra.mrb[160].mxu0 %v11831_v34  ;;  %v9963_v19 = vpop.f32.mrb[95].mxu0 }
 0x2bc   : > { %10252 = vmatpush3.bf16.msra.mxu1 %v3032_v10  ;;  %2902 = vmatprep.mubr.bf16.mxu0 %v11835_v63  ;;  %v13676_v26 = vadd.f32 %v9963_v19, %v9962_v62  ;;  %v11828_v63 = vld [vmem:[%s17081_s3 + $0x180] ss:$8 sps:$4 sm:$0xff]   ;;  %v11861_v10 = vld [vmem:[%s17081_s3 + $0x3d0] ss:$8 sps:$4 sm:$0xff]  }
 0x2bf   : > { %2411 = vmatmul.mubr.bf16.gmra.mrb[80].mxu1 %v11804_v6  ;;  %v11865_v6 = vld [vmem:[%s17081_s3 + $0x3e4] ss:$8 sps:$4 sm:$0xff]  }
 0x2c0   : > { %2418 = vmatprep.mubr.bf16.mxu1 %v11808_v21  ;;  %v9965_v14 = vpop.f32.mrb[96].mxu0 }
 0x2c1   : > { %v9966_v30 = vpop.f32.mrb[97].mxu0 }
 0x2c2   : > { %v13684_v32 = vadd.f32 %v9966_v30, %v9965_v14  ;;  %v9968_v33 = vpop.f32.mrb[98].mxu0  ;;  %v11834_v14 = vld [vmem:[%s17081_s3 + $0x190] ss:$8 sps:$4 sm:$0xff]  }
 0x2c3   : > { %2903 = vmatmul.mubr.bf16.gmra.mrb[164].mxu0 %v11837_v27  ;;  %v9969_v16 = vpop.f32.mrb[99].mxu0 }
 0x2c4   : > { %2910 = vmatprep.mubr.bf16.mxu0 %v11841_v56  ;;  %v13692_v25 = vadd.f32 %v9969_v16, %v9968_v33  ;;  %v11838_v33 = vld [vmem:[%s17081_s3 + $0x1a4] ss:$8 sps:$4 sm:$0xff]   ;;  %v11867_v16 = vld [vmem:[%s17081_s3 + $0x3e0] ss:$8 sps:$4 sm:$0xff]  }
 0x2c7   : > { %2419 = vmatmul.mubr.bf16.gmra.mrb[84].mxu1 %v11810_v0 }
 0x2c8   : > { %2426 = vmatprep.mubr.bf16.mxu1 %v11814_v38  ;;  %v9971_v31 = vpop.f32.mrb[100].mxu0  ;;  %v11871_v38 = vld [vmem:[%s17081_s3 + $0x3f4] ss:$8 sps:$4 sm:$0xff]  }
 0x2c9   : > { %v9972_v42 = vpop.f32.mrb[101].mxu0 }
 0x2ca   : > { %v13700_v36 = vadd.f32 %v9972_v42, %v9971_v31  ;;  %v9974_v43 = vpop.f32.mrb[102].mxu0 }
 0x2cb   : > { %2911 = vmatmul.mubr.bf16.gmra.mrb[168].mxu0 %v11843_v53  ;;  %v9975_v22 = vpop.f32.mrb[103].mxu0 }
 0x2cc   : > { %2918 = vmatprep.mubr.bf16.mxu0 %v11847_v57  ;;  %v13708_v46 = vadd.f32 %v9975_v22, %v9974_v43  ;;  %v11840_v43 = vld [vmem:[%s17081_s3 + $0x1a0] ss:$8 sps:$4 sm:$0xff]   ;;  %v11844_v22 = vld [vmem:[%s17081_s3 + $0x1b4] ss:$8 sps:$4 sm:$0xff]  }
 0x2cf   : > { %2427 = vmatmul.mubr.bf16.gmra.mrb[88].mxu1 %v11816_v39 }
 0x2d0   : > { %2434 = vmatprep.mubr.bf16.mxu1 %v11820_v45  ;;  %v9977_v51 = vpop.f32.mrb[104].mxu0 }
 0x2d1   : > { %v9978_v48 = vpop.f32.mrb[105].mxu0 }
 0x2d2   : > { %v13716_v11 = vadd.f32 %v9978_v48, %v9977_v51  ;;  %v9980_v23 = vpop.f32.mrb[106].mxu0 }
 0x2d3   : > { %2919 = vmatmul.mubr.bf16.gmra.mrb[172].mxu0 %v11849_v18  ;;  %v9981_v5 = vpop.f32.mrb[107].mxu0  ;;  %v11873_v18 = vld [vmem:[%s17081_s3 + $0x3f0] ss:$8 sps:$4 sm:$0xff]  }
 0x2d4   : > { %2926 = vmatprep.mubr.bf16.mxu0 %v11853_v9  ;;  %v13724_v2 = vadd.f32 %v9981_v5, %v9980_v23 }
 0x2d7   : > { %2435 = vmatmul.mubr.bf16.gmra.mrb[92].mxu1 %v11822_v60 }
 0x2d8   : > { %2442 = vmatprep.mubr.bf16.mxu1 %v11826_v41  ;;  %v9983_v15 = vpop.f32.mrb[108].mxu0  ;;  %v11846_v41 = vld [vmem:[%s17081_s3 + $0x1b0] ss:$8 sps:$4 sm:$0xff]  }
 0x2d9   : > { %v9984_v44 = vpop.f32.mrb[109].mxu0 }
 0x2da   : > { %v13732_v34 = vadd.f32 %v9984_v44, %v9983_v15  ;;  %v9986_v13 = vpop.f32.mrb[110].mxu0  ;;  %v11850_v44 = vld [vmem:[%s17081_s3 + $0x1c4] ss:$8 sps:$4 sm:$0xff]  }
 0x2db   : > { %2927 = vmatmul.mubr.bf16.gmra.mrb[176].mxu0 %v11855_v4  ;;  %v9987_v17 = vpop.f32.mrb[111].mxu0 }
 0x2dc   : > { %2934 = vmatprep.mubr.bf16.mxu0 %v11859_v55  ;;  %v13740_v62 = vadd.f32 %v9987_v17, %v9986_v13 }
 0x2df   : > { %2443 = vmatmul.mubr.bf16.gmra.mrb[96].mxu1 %v11828_v63 }
 0x2e0   : > { %2450 = vmatprep.mubr.bf16.mxu1 %v11832_v24  ;;  %v9989_v19 = vpop.f32.mrb[112].mxu0 }
 0x2e1   : > { %v9990_v21 = vpop.f32.mrb[113].mxu0 }
 0x2e2   : > { %v13748_v27 = vadd.f32 %v9990_v21, %v9989_v19  ;;  %v9992_v56 = vpop.f32.mrb[114].mxu0 }
 0x2e3   : > { %2935 = vmatmul.mubr.bf16.gmra.mrb[180].mxu0 %v11861_v10  ;;  %v9993_v30 = vpop.f32.mrb[115].mxu0 }
 0x2e4   : > { %2942 = vmatprep.mubr.bf16.mxu0 %v11865_v6  ;;  %v13756_v0 = vadd.f32 %v9993_v30, %v9992_v56 }
 0x2e7   : > { %2451 = vmatmul.mubr.bf16.gmra.mrb[100].mxu1 %v11834_v14 }
 0x2e8   : > { %2458 = vmatprep.mubr.bf16.mxu1 %v11838_v33  ;;  %v9995_v53 = vpop.f32.mrb[116].mxu0  ;;  %v11852_v33 = vld [vmem:[%s17081_s3 + $0x1c0] ss:$8 sps:$4 sm:$0xff]  }
 0x2e9   : > { %v9996_v57 = vpop.f32.mrb[117].mxu0 }
 0x2ea   : > { %v13764_v31 = vadd.f32 %v9996_v57, %v9995_v53  ;;  %v9998_v42 = vpop.f32.mrb[118].mxu0 }
 0x2eb   : > { %2943 = vmatmul.mubr.bf16.gmra.mrb[184].mxu0 %v11867_v16  ;;  %v9999_v39 = vpop.f32.mrb[119].mxu0 }
 0x2ec   : > { %2950 = vmatprep.mubr.bf16.mxu0 %v11871_v38  ;;  %v13772_v45 = vadd.f32 %v9999_v39, %v9998_v42 }
 0x2ef   : > { %2459 = vmatmul.mubr.bf16.gmra.mrb[104].mxu1 %v11840_v43 }
 0x2f0   : > { %2466 = vmatprep.mubr.bf16.mxu1 %v11844_v22  ;;  %v10001_v9 = vpop.f32.mrb[120].mxu0 }
 0x2f1   : > { %v10002_v51 = vpop.f32.mrb[121].mxu0 }
 0x2f2   : > { %v9805_v48 = vpop.f32.mrb[0].mxu1  ;;  %v13777_v23 = vadd.f32 %v10002_v51, %v10001_v9  ;;  %v10004_v60 = vpop.f32.mrb[122].mxu0  ;;  %v11858_v9 = vld [vmem:[%s17081_s3 + $0x1d0] ss:$8 sps:$4 sm:$0xff]  }
 0x2f3   : > { %v9806_v5 = vpop.f32.mrb[1].mxu1  ;;  %2951 = vmatmul.mubr.bf16.gmra.mrb[188].mxu0 %v11873_v18  ;;  %v10005_v4 = vpop.f32.mrb[123].mxu0 }
 0x2f4   : > { %v9807_v55 = vadd.f32 %v9806_v5, %v9805_v48  ;;  %v9808_v15 = vpop.f32.mrb[2].mxu1  ;;  %v13785_v13 = vadd.f32 %v10005_v4, %v10004_v60  ;;  %v11862_v60 = vld [vmem:[%s17081_s3 + $0x1e4] ss:$8 sps:$4 sm:$0xff]  }
 0x2f5   : > { %v9809_v63 = vpop.f32.mrb[3].mxu1 }
 0x2f6   : > { %v13788_v17 = vadd.f32 %v13513_v7, %v9807_v55  ;;  %v9810_v24 = vadd.f32 %v9809_v63, %v9808_v15  ;;  %v11864_v15 = vld [vmem:[%s17081_s3 + $0x1e0] ss:$8 sps:$4 sm:$0xff]  }
 0x2f7   : > { %2467 = vmatmul.mubr.bf16.gmra.mrb[108].mxu1 %v11846_v41 }
 0x2f8   : > { %v13791_v10 = vadd.f32 %v13518_v59, %v9810_v24  ;;  %2474 = vmatprep.mubr.bf16.mxu1 %v11850_v44  ;;  %v10007_v6 = vpop.f32.mrb[124].mxu0  ;;  %v11856_v59 = vld [vmem:[%s17081_s3 + $0x1d4] ss:$8 sps:$4 sm:$0xff]  }
 0x2f9   : > { %v10008_v19 = vpop.f32.mrb[125].mxu0  ;;  %v11868_v24 = vld [vmem:[%s17081_s3 + $0x1f4] ss:$8 sps:$4 sm:$0xff]  }
 0x2fa   : > { %v9811_v21 = vpop.f32.mrb[4].mxu1  ;;  %v13793_v56 = vadd.f32 %v10008_v19, %v10007_v6  ;;  %v10010_v14 = vpop.f32.mrb[126].mxu0 }
 0x2fb   : > { %v9812_v30 = vpop.f32.mrb[5].mxu1  ;;  %v10011_v16 = vpop.f32.mrb[127].mxu0 }
 0x2fc   : > { %v9813_v7 = vadd.f32 %v9812_v30, %v9811_v21  ;;  %v9814_v38 = vpop.f32.mrb[6].mxu1  ;;  %v13801_v53 = vadd.f32 %v10011_v16, %v10010_v14  ;;  %v11870_v30 = vld [vmem:[%s17081_s3 + $0x1f0] ss:$8 sps:$4 sm:$0xff]  }
 0x2fd   : > { %v9815_v57 = vpop.f32.mrb[7].mxu1 }
 0x2fe   : > { %v13804_v42 = vadd.f32 %v13529_v49, %v9813_v7  ;;  %v9816_v43 = vadd.f32 %v9815_v57, %v9814_v38  ;;  %v11876_v7 = vld [vmem:[%s17081_s3 + $0x404] ss:$8 sps:$4 sm:$0xff]  }
 0x2ff   : > { %2475 = vmatmul.mubr.bf16.gmra.mrb[112].mxu1 %v11852_v33 }
 0x300   : > { %v13807_v39 = vadd.f32 %v13534_v61, %v9816_v43  ;;  %2482 = vmatprep.mubr.bf16.mxu1 %v11856_v59 }
 0x302   : > { %v9817_v22 = vpop.f32.mrb[8].mxu1 }
 0x303   : > { %v9818_v18 = vpop.f32.mrb[9].mxu1 }
 0x304   : > { %v9819_v51 = vadd.f32 %v9818_v18, %v9817_v22  ;;  %v9820_v48 = vpop.f32.mrb[10].mxu1  ;;  %v11874_v22 = vld [vmem:[%s17081_s3 + $0x400] ss:$8 sps:$4 sm:$0xff]  }
 0x305   : > { %v9821_v49 = vpop.f32.mrb[11].mxu1 }
 0x306   : > { %v13816_v5 = vadd.f32 %v13545_v12, %v9819_v51  ;;  %v9822_v41 = vadd.f32 %v9821_v49, %v9820_v48  ;;  %v11877_v51 = vld [vmem:[%s17081_s3 + $0x414] ss:$8 sps:$4 sm:$0xff]  }
 0x307   : > { %2483 = vmatmul.mubr.bf16.gmra.mrb[116].mxu1 %v11858_v9 }
 0x308   : > { %v13819_v61 = vadd.f32 %v13550_v50, %v9822_v41  ;;  %2490 = vmatprep.mubr.bf16.mxu1 %v11862_v60 }
 0x30a   : > { %v9823_v4 = vpop.f32.mrb[12].mxu1 }
 0x30b   : > { %v9824_v55 = vpop.f32.mrb[13].mxu1 }
 0x30c   : > { %v9825_v44 = vadd.f32 %v9824_v55, %v9823_v4  ;;  %v9826_v63 = vpop.f32.mrb[14].mxu1  ;;  %v11879_v4 = vld [vmem:[%s17081_s3 + $0x410] ss:$8 sps:$4 sm:$0xff]  }
 0x30d   : > { %v9827_v12 = vpop.f32.mrb[15].mxu1 }
 0x30e   : > { %v13828_v6 = vadd.f32 %v13561_v28, %v9825_v44  ;;  %v9828_v19 = vadd.f32 %v9827_v12, %v9826_v63  ;;  %v11880_v44 = vld [vmem:[%s17081_s3 + $0x424] ss:$8 sps:$4 sm:$0xff]  }
 0x30f   : > { %2491 = vmatmul.mubr.bf16.gmra.mrb[120].mxu1 %v11864_v15 }
 0x310   : > { %v13831_v50 = vadd.f32 %v13566_v29, %v9828_v19  ;;  %2498 = vmatprep.mubr.bf16.mxu1 %v11868_v24 }
 0x312   : > { %v9829_v21 = vpop.f32.mrb[16].mxu1 }
 0x313   : > { %v9830_v14 = vpop.f32.mrb[17].mxu1 }
 0x314   : > { %v9831_v33 = vadd.f32 %v9830_v14, %v9829_v21  ;;  %v9832_v16 = vpop.f32.mrb[18].mxu1  ;;  %v11882_v21 = vld [vmem:[%s17081_s3 + $0x420] ss:$8 sps:$4 sm:$0xff]  }
 0x315   : > { %v9833_v28 = vpop.f32.mrb[19].mxu1 }
 0x316   : > { %v13840_v38 = vadd.f32 %v13583_v37, %v9831_v33  ;;  %v9834_v59 = vadd.f32 %v9833_v28, %v9832_v16  ;;  %v11883_v33 = vld [vmem:[%s17081_s3 + $0x434] ss:$8 sps:$4 sm:$0xff]  }
 0x317   : > { %2499 = vmatmul.mubr.bf16.gmra.mrb[124].mxu1 %v11870_v30 }
 0x318   : > { %v13843_v29 = vadd.f32 %v13591_v40, %v9834_v59  ;;  %3282 = vmatprep.mubr.bf16.mxu1 %v11876_v7 }
 0x31a   : > { %v9835_v57 = vpop.f32.mrb[20].mxu1 }
 0x31b   : > { %v9836_v43 = vpop.f32.mrb[21].mxu1 }
 0x31c   : > { %v9837_v18 = vadd.f32 %v9836_v43, %v9835_v57  ;;  %v9838_v9 = vpop.f32.mrb[22].mxu1  ;;  %v11885_v57 = vld [vmem:[%s17081_s3 + $0x430] ss:$8 sps:$4 sm:$0xff]  }
 0x31d   : > { %v9839_v37 = vpop.f32.mrb[23].mxu1 }
 0x31e   : > { %v13852_v48 = vadd.f32 %v13611_v1, %v9837_v18  ;;  %v9840_v60 = vadd.f32 %v9839_v37, %v9838_v9  ;;  %v11886_v18 = vld [vmem:[%s17081_s3 + $0x444] ss:$8 sps:$4 sm:$0xff]  }
 0x31f   : > { %3283 = vmatmul.mubr.bf16.vlgmr.msra.gmra.mrb[128].mxu1 %v11874_v22 }
 0x320   : > { %v13855_v40 = vadd.f32 %v13619_v58, %v9840_v60  ;;  %3290 = vmatprep.mubr.bf16.mxu1 %v11877_v51 }
 0x322   : > { %v9841_v49 = vpop.f32.mrb[24].mxu1 }
 0x323   : > { %v9842_v41 = vpop.f32.mrb[25].mxu1 }
 0x324   : > { %v9843_v55 = vadd.f32 %v9842_v41, %v9841_v49  ;;  %v9844_v15 = vpop.f32.mrb[26].mxu1  ;;  %v11888_v49 = vld [vmem:[%s17081_s3 + $0x440] ss:$8 sps:$4 sm:$0xff]  }
 0x325   : > { %v9845_v1 = vpop.f32.mrb[27].mxu1 }
 0x326   : > { %v13864_v63 = vadd.f32 %v13639_v52, %v9843_v55  ;;  %v9846_v24 = vadd.f32 %v9845_v1, %v9844_v15  ;;  %v11889_v55 = vld [vmem:[%s17081_s3 + $0x454] ss:$8 sps:$4 sm:$0xff]  }
 0x327   : > { %3291 = vmatmul.mubr.bf16.gmra.mrb[132].mxu1 %v11879_v4 }
 0x328   : > { %v13867_v58 = vadd.f32 %v13647_v8, %v9846_v24  ;;  %3298 = vmatprep.mubr.bf16.mxu1 %v11880_v44 }
 0x32a   : > { %v9847_v12 = vpop.f32.mrb[28].mxu1 }
 0x32b   : > { %v9848_v19 = vpop.f32.mrb[29].mxu1 }
 0x32c   : > { %v9849_v14 = vadd.f32 %v9848_v19, %v9847_v12  ;;  %v9850_v30 = vpop.f32.mrb[30].mxu1  ;;  %v11891_v12 = vld [vmem:[%s17081_s3 + $0x450] ss:$8 sps:$4 sm:$0xff]  }
 0x32d   : > { %v9851_v52 = vpop.f32.mrb[31].mxu1 }
 0x32e   : > { %v13876_v16 = vadd.f32 %v13666_v47, %v9849_v14  ;;  %v9852_v7 = vadd.f32 %v9851_v52, %v9850_v30  ;;  %v11892_v14 = vld [vmem:[%s17081_s3 + $0x464] ss:$8 sps:$4 sm:$0xff]  }
 0x32f   : > { %3299 = vmatmul.mubr.bf16.gmra.mrb[136].mxu1 %v11882_v21 }
 0x330   : > { %v13879_v8 = vadd.f32 %v13676_v26, %v9852_v7  ;;  %3306 = vmatprep.mubr.bf16.mxu1 %v11883_v33 }
 0x332   : > { %v9853_v28 = vpop.f32.mrb[32].mxu1 }
 0x333   : > { %v9854_v59 = vpop.f32.mrb[33].mxu1 }
 0x334   : > { %v9855_v43 = vadd.f32 %v9854_v59, %v9853_v28  ;;  %v9856_v22 = vpop.f32.mrb[34].mxu1  ;;  %v11894_v28 = vld [vmem:[%s17081_s3 + $0x460] ss:$8 sps:$4 sm:$0xff]  }
 0x335   : > { %v9857_v47 = vpop.f32.mrb[35].mxu1 }
 0x336   : > { %v13888_v9 = vadd.f32 %v13684_v32, %v9855_v43  ;;  %v9858_v51 = vadd.f32 %v9857_v47, %v9856_v22  ;;  %v11895_v43 = vld [vmem:[%s17081_s3 + $0x474] ss:$8 sps:$4 sm:$0xff]  }
 0x337   : > { %3307 = vmatmul.mubr.bf16.gmra.mrb[140].mxu1 %v11885_v57 }
 0x338   : > { %v13891_v26 = vadd.f32 %v13692_v25, %v9858_v51  ;;  %3314 = vmatprep.mubr.bf16.mxu1 %v11886_v18 }
 0x33a   : > { %v9859_v37 = vpop.f32.mrb[36].mxu1 }
 0x33b   : > { %v9860_v60 = vpop.f32.mrb[37].mxu1 }
 0x33c   : > { %v9861_v41 = vadd.f32 %v9860_v60, %v9859_v37  ;;  %v9862_v4 = vpop.f32.mrb[38].mxu1 }
 0x33d   : > { %v9863_v32 = vpop.f32.mrb[39].mxu1 }
 0x33e   : > { %v13900_v15 = vadd.f32 %v13700_v36, %v9861_v41  ;;  %v9864_v44 = vadd.f32 %v9863_v32, %v9862_v4 }
 0x33f   : > { %3315 = vmatmul.mubr.bf16.gmra.mrb[144].mxu1 %v11888_v49 }
 0x340   : > { %v13903_v25 = vadd.f32 %v13708_v46, %v9864_v44  ;;  %3322 = vmatprep.mubr.bf16.mxu1 %v11889_v55 }
 0x342   : > { %v9865_v1 = vpop.f32.mrb[40].mxu1 }
 0x343   : > { %v9866_v24 = vpop.f32.mrb[41].mxu1 }
 0x344   : > { %v9867_v19 = vadd.f32 %v9866_v24, %v9865_v1  ;;  %v9868_v21 = vpop.f32.mrb[42].mxu1 }
 0x345   : > { %v9869_v36 = vpop.f32.mrb[43].mxu1 }
 0x346   : > { %v13912_v30 = vadd.f32 %v13716_v11, %v9867_v19  ;;  %v9870_v33 = vadd.f32 %v9869_v36, %v9868_v21 }
 0x347   : > { %3323 = vmatmul.mubr.bf16.gmra.mrb[148].mxu1 %v11891_v12 }
 0x348   : > { %v13915_v46 = vadd.f32 %v13724_v2, %v9870_v33  ;;  %3330 = vmatprep.mubr.bf16.mxu1 %v11892_v14 }
 0x34a   : > { %v9871_v52 = vpop.f32.mrb[44].mxu1 }
 0x34b   : > { %v9872_v7 = vpop.f32.mrb[45].mxu1 }
 0x34c   : > { %v9873_v59 = vadd.f32 %v9872_v7, %v9871_v52  ;;  %v9874_v57 = vpop.f32.mrb[46].mxu1 }
 0x34d   : > { %v9875_v11 = vpop.f32.mrb[47].mxu1 }
 0x34e   : > { %v13924_v22 = vadd.f32 %v13732_v34, %v9873_v59  ;;  %v9876_v18 = vadd.f32 %v9875_v11, %v9874_v57  ;;  %v10141_v2 = vpop.f32.mrb[128].mxu0  ;;  %v11897_v34 = vld [vmem:[%s17081_s3 + $0x470] ss:$8 sps:$4 sm:$0xff]  }
 0x34f   : > { %3331 = vmatmul.mubr.bf16.gmra.mrb[152].mxu1 %v11894_v28  ;;  %v10142_v47 = vpop.f32.mrb[129].mxu0 }
 0x350   : > { %v13927_v51 = vadd.f32 %v13740_v62, %v9876_v18  ;;  %3338 = vmatprep.mubr.bf16.mxu1 %v11895_v43  ;;  %v13929_v37 = vadd.f32 %v10142_v47, %v10141_v2  ;;  %v10144_v60 = vpop.f32.mrb[130].mxu0  ;;  %v11898_v62 = vld [vmem:[%s17081_s3 + $0x484] ss:$8 sps:$4 sm:$0xff]  }
 0x351   : > { %v10145_v49 = vpop.f32.mrb[131].mxu0 }
 0x352   : > { %v9877_v41 = vpop.f32.mrb[48].mxu1  ;;  %v13931_v4 = vadd.f32 %v10145_v49, %v10144_v60 }
 0x353   : > { %v9878_v55 = vpop.f32.mrb[49].mxu1 }
 0x354   : > { %v9879_v32 = vadd.f32 %v9878_v55, %v9877_v41  ;;  %v9880_v44 = vpop.f32.mrb[50].mxu1 }
 0x355   : > { %v9881_v1 = vpop.f32.mrb[51].mxu1 }
 0x356   : > { %v13940_v24 = vadd.f32 %v13748_v27, %v9879_v32  ;;  %v9882_v12 = vadd.f32 %v9881_v1, %v9880_v44  ;;  %v10147_v19 = vpop.f32.mrb[132].mxu0  ;;  %v11900_v27 = vld [vmem:[%s17081_s3 + $0x480] ss:$8 sps:$4 sm:$0xff]  }
 0x357   : > { %3339 = vmatmul.mubr.bf16.gmra.mrb[156].mxu1 %v11897_v34  ;;  %v10148_v21 = vpop.f32.mrb[133].mxu0 }
 0x358   : > { %v13943_v14 = vadd.f32 %v13756_v0, %v9882_v12  ;;  %3346 = vmatprep.mubr.bf16.mxu1 %v11898_v62  ;;  %v13945_v36 = vadd.f32 %v10148_v21, %v10147_v19  ;;  %v10150_v33 = vpop.f32.mrb[134].mxu0  ;;  %v11901_v0 = vld [vmem:[%s17081_s3 + $0x494] ss:$8 sps:$4 sm:$0xff]  }
 0x359   : > { %v10151_v52 = vpop.f32.mrb[135].mxu0 }
 0x35a   : > { %v9883_v7 = vpop.f32.mrb[52].mxu1  ;;  %v13947_v28 = vadd.f32 %v10151_v52, %v10150_v33 }
 0x35b   : > { %v9884_v59 = vpop.f32.mrb[53].mxu1 }
 0x35c   : > { %v9885_v57 = vadd.f32 %v9884_v59, %v9883_v7  ;;  %v9886_v43 = vpop.f32.mrb[54].mxu1 }
 0x35d   : > { %v9887_v11 = vpop.f32.mrb[55].mxu1 }
 0x35e   : > { %v13956_v18 = vadd.f32 %v13764_v31, %v9885_v57  ;;  %v9888_v2 = vadd.f32 %v9887_v11, %v9886_v43  ;;  %v10153_v47 = vpop.f32.mrb[136].mxu0  ;;  %v11903_v31 = vld [vmem:[%s17081_s3 + $0x490] ss:$8 sps:$4 sm:$0xff]  }
 0x35f   : > { %3347 = vmatmul.mubr.bf16.gmra.mrb[160].mxu1 %v11900_v27  ;;  %v10154_v60 = vpop.f32.mrb[137].mxu0 }
 0x360   : > { %v13959_v49 = vadd.f32 %v13772_v45, %v9888_v2  ;;  %3354 = vmatprep.mubr.bf16.mxu1 %v11901_v0  ;;  %v13961_v41 = vadd.f32 %v10154_v60, %v10153_v47  ;;  %v10156_v55 = vpop.f32.mrb[138].mxu0  ;;  %v11904_v45 = vld [vmem:[%s17081_s3 + $0x4a4] ss:$8 sps:$4 sm:$0xff]  }
 0x361   : > { %v10157_v34 = vpop.f32.mrb[139].mxu0 }
 0x362   : > { %v9889_v32 = vpop.f32.mrb[56].mxu1  ;;  %v13963_v44 = vadd.f32 %v10157_v34, %v10156_v55 }
 0x363   : > { %v9890_v62 = vpop.f32.mrb[57].mxu1 }
 0x364   : > { %v9891_v1 = vadd.f32 %v9890_v62, %v9889_v32  ;;  %v9892_v12 = vpop.f32.mrb[58].mxu1 }
 0x365   : > { %v9893_v19 = vpop.f32.mrb[59].mxu1 }
 0x366   : > { %v13972_v21 = vadd.f32 %v13777_v23, %v9891_v1  ;;  %v9894_v33 = vadd.f32 %v9893_v19, %v9892_v12  ;;  %v10159_v52 = vpop.f32.mrb[140].mxu0  ;;  %v11906_v23 = vld [vmem:[%s17081_s3 + $0x4a0] ss:$8 sps:$4 sm:$0xff]  }
 0x367   : > { %3355 = vmatmul.mubr.bf16.gmra.mrb[164].mxu1 %v11903_v31  ;;  %v10160_v7 = vpop.f32.mrb[141].mxu0 }
 0x368   : > { %v13975_v59 = vadd.f32 %v13785_v13, %v9894_v33  ;;  %3362 = vmatprep.mubr.bf16.mxu1 %v11904_v45  ;;  %v13977_v27 = vadd.f32 %v10160_v7, %v10159_v52  ;;  %v10162_v57 = vpop.f32.mrb[142].mxu0  ;;  %v11907_v13 = vld [vmem:[%s17081_s3 + $0x4b4] ss:$8 sps:$4 sm:$0xff]  }
 0x369   : > { %v10163_v43 = vpop.f32.mrb[143].mxu0 }
 0x36a   : > { %v9895_v0 = vpop.f32.mrb[60].mxu1  ;;  %v13979_v11 = vadd.f32 %v10163_v43, %v10162_v57 }
 0x36b   : > { %v9896_v2 = vpop.f32.mrb[61].mxu1 }
 0x36c   : > { %v9897_v47 = vadd.f32 %v9896_v2, %v9895_v0  ;;  %v9898_v60 = vpop.f32.mrb[62].mxu1 }
 0x36d   : > { %v9899_v55 = vpop.f32.mrb[63].mxu1 }
 0x36e   : > { %v13988_v34 = vadd.f32 %v13793_v56, %v9897_v47  ;;  %v9900_v32 = vadd.f32 %v9899_v55, %v9898_v60  ;;  %v10165_v62 = vpop.f32.mrb[144].mxu0  ;;  %v11909_v56 = vld [vmem:[%s17081_s3 + $0x4b0] ss:$8 sps:$4 sm:$0xff]  }
 0x36f   : > { %3363 = vmatmul.mubr.bf16.gmra.mrb[168].mxu1 %v11906_v23  ;;  %v10166_v31 = vpop.f32.mrb[145].mxu0 }
 0x370   : > { %v13991_v1 = vadd.f32 %v13801_v53, %v9900_v32  ;;  %3370 = vmatprep.mubr.bf16.mxu1 %v11907_v13  ;;  %v13993_v12 = vadd.f32 %v10166_v31, %v10165_v62  ;;  %v10168_v45 = vpop.f32.mrb[146].mxu0  ;;  %v11910_v53 = vld [vmem:[%s17081_s3 + $0x4c4] ss:$8 sps:$4 sm:$0xff]  }
 0x371   : > { %v10169_v19 = vpop.f32.mrb[147].mxu0 }
 0x372   : > { %v10029_v33 = vpop.f32.mrb[64].mxu1  ;;  %v13995_v52 = vadd.f32 %v10169_v19, %v10168_v45 }
 0x373   : > { %v10030_v7 = vpop.f32.mrb[65].mxu1 }
 0x374   : > { %v10031_v57 = vadd.f32 %v10030_v7, %v10029_v33  ;;  %v10032_v43 = vpop.f32.mrb[66].mxu1  ;;  %v11912_v7 = vld [vmem:[%s17081_s3 + $0x4c0] ss:$8 sps:$4 sm:$0xff]  }
 0x375   : > { %v10033_v0 = vpop.f32.mrb[67].mxu1 }
 0x376   : > { %v2507_v2 = vadd.f32 %v10031_v57, %v13788_v17  ;;  %v10034_v23 = vadd.f32 %v10033_v0, %v10032_v43  ;;  %v10171_v47 = vpop.f32.mrb[148].mxu0 }
 0x377   : > { %3371 = vmatmul.mubr.bf16.gmra.mrb[172].mxu1 %v11909_v56  ;;  %v10172_v60 = vpop.f32.mrb[149].mxu0 }
 0x378   : > { %v2508_v13 = vadd.f32 %v10034_v23, %v13791_v10  ;;  %v14006_v55 = vadd.f32 %v13929_v37, %v2507_v2  ;;  %3378 = vmatprep.mubr.bf16.mxu1 %v11910_v53  ;;  %v14008_v32 = vadd.f32 %v10172_v60, %v10171_v47  ;;  %v10174_v62 = vpop.f32.mrb[150].mxu0  ;;  %v11913_v37 = vld [vmem:[%s17081_s3 + $0x4d4] ss:$8 sps:$4 sm:$0xff]  }
 0x379   : > { %v10175_v31 = vpop.f32.mrb[151].mxu0 }
 0x37a   : > { %v14011_v45 = vadd.f32 %v13931_v4, %v2508_v13  ;;  %v10035_v19 = vpop.f32.mrb[68].mxu1  ;;  %v14013_v33 = vadd.f32 %v10175_v31, %v10174_v62 }
 0x37b   : > { %v10036_v17 = vpop.f32.mrb[69].mxu1 }
 0x37c   : > { %v10037_v10 = vadd.f32 %v10036_v17, %v10035_v19  ;;  %v10038_v56 = vpop.f32.mrb[70].mxu1  ;;  %v11915_v17 = vld [vmem:[%s17081_s3 + $0x4d0] ss:$8 sps:$4 sm:$0xff]  }
 0x37d   : > { %v10039_v57 = vpop.f32.mrb[71].mxu1 }
 0x37e   : > { %v2509_v43 = vadd.f32 %v10037_v10, %v13804_v42  ;;  %v10040_v53 = vadd.f32 %v10039_v57, %v10038_v56  ;;  %v10177_v4 = vpop.f32.mrb[152].mxu0 }
 0x37f   : > { %3379 = vmatmul.mubr.bf16.gmra.mrb[176].mxu1 %v11912_v7  ;;  %v10178_v0 = vpop.f32.mrb[153].mxu0 }
 0x380   : > { %v2510_v2 = vadd.f32 %v10040_v53, %v13807_v39  ;;  %v14024_v23 = vadd.f32 %v13945_v36, %v2509_v43  ;;  %3386 = vmatprep.mubr.bf16.mxu1 %v11913_v37  ;;  %v14026_v47 = vadd.f32 %v10178_v0, %v10177_v4  ;;  %v10180_v60 = vpop.f32.mrb[154].mxu0  ;;  %v11916_v36 = vld [vmem:[%s17081_s3 + $0x4e4] ss:$8 sps:$4 sm:$0xff]  }
 0x381   : > { %v10181_v13 = vpop.f32.mrb[155].mxu0 }
 0x382   : > { %v14029_v62 = vadd.f32 %v13947_v28, %v2510_v2  ;;  %v10041_v31 = vpop.f32.mrb[72].mxu1  ;;  %v14031_v19 = vadd.f32 %v10181_v13, %v10180_v60 }
 0x383   : > { %v10042_v42 = vpop.f32.mrb[73].mxu1 }
 0x384   : > { %v10043_v39 = vadd.f32 %v10042_v42, %v10041_v31  ;;  %v10044_v7 = vpop.f32.mrb[74].mxu1  ;;  %v11918_v42 = vld [vmem:[%s17081_s3 + $0x4e0] ss:$8 sps:$4 sm:$0xff]  }
 0x385   : > { %v10045_v10 = vpop.f32.mrb[75].mxu1 }
 0x386   : > { %v2511_v56 = vadd.f32 %v10043_v39, %v13816_v5  ;;  %v10046_v37 = vadd.f32 %v10045_v10, %v10044_v7  ;;  %v10183_v28 = vpop.f32.mrb[156].mxu0 }
 0x387   : > { %3387 = vmatmul.mubr.bf16.gmra.mrb[180].mxu1 %v11915_v17  ;;  %v10184_v57 = vpop.f32.mrb[157].mxu0 }
 0x388   : > { %v2512_v43 = vadd.f32 %v10046_v37, %v13819_v61  ;;  %v14042_v53 = vadd.f32 %v13961_v41, %v2511_v56  ;;  %3394 = vmatprep.mubr.bf16.mxu1 %v11916_v36  ;;  %v14044_v4 = vadd.f32 %v10184_v57, %v10183_v28  ;;  %v10186_v0 = vpop.f32.mrb[158].mxu0  ;;  %v11919_v41 = vld [vmem:[%s17081_s3 + $0x4f4] ss:$8 sps:$4 sm:$0xff]  }
 0x389   : > { %v10187_v2 = vpop.f32.mrb[159].mxu0 }
 0x38a   : > { %v14047_v60 = vadd.f32 %v13963_v44, %v2512_v43  ;;  %v10047_v13 = vpop.f32.mrb[76].mxu1  ;;  %v14049_v31 = vadd.f32 %v10187_v2, %v10186_v0 }
 0x38b   : > { %v10048_v5 = vpop.f32.mrb[77].mxu1 }
 0x38c   : > { %v10049_v61 = vadd.f32 %v10048_v5, %v10047_v13  ;;  %v10050_v17 = vpop.f32.mrb[78].mxu1  ;;  %v11921_v5 = vld [vmem:[%s17081_s3 + $0x4f0] ss:$8 sps:$4 sm:$0xff]  }
 0x38d   : > { %v10051_v39 = vpop.f32.mrb[79].mxu1 }
 0x38e   : > { %v2513_v7 = vadd.f32 %v10049_v61, %v13828_v6  ;;  %v10052_v36 = vadd.f32 %v10051_v39, %v10050_v17  ;;  %v10189_v44 = vpop.f32.mrb[160].mxu0 }
 0x38f   : > { %3395 = vmatmul.mubr.bf16.gmra.mrb[184].mxu1 %v11918_v42  ;;  %v10190_v10 = vpop.f32.mrb[161].mxu0 }
 0x390   : > { %v2514_v56 = vadd.f32 %v10052_v36, %v13831_v50  ;;  %v14060_v37 = vadd.f32 %v13977_v27, %v2513_v7  ;;  %3402 = vmatprep.mubr.bf16.mxu1 %v11919_v41  ;;  %v14062_v28 = vadd.f32 %v10190_v10, %v10189_v44  ;;  %v10192_v57 = vpop.f32.mrb[162].mxu0 }
 0x391   : > { %v10193_v43 = vpop.f32.mrb[163].mxu0 }
 0x392   : > { %v14065_v0 = vadd.f32 %v13979_v11, %v2514_v56  ;;  %v10053_v2 = vpop.f32.mrb[80].mxu1  ;;  %v14067_v13 = vadd.f32 %v10193_v43, %v10192_v57 }
 0x393   : > { %v10054_v6 = vpop.f32.mrb[81].mxu1 }
 0x394   : > { %v10055_v50 = vadd.f32 %v10054_v6, %v10053_v2  ;;  %v10056_v42 = vpop.f32.mrb[82].mxu1 }
 0x395   : > { %v10057_v27 = vpop.f32.mrb[83].mxu1 }
 0x396   : > { %v2515_v61 = vadd.f32 %v10055_v50, %v13840_v38  ;;  %v10058_v17 = vadd.f32 %v10057_v27, %v10056_v42  ;;  %v10195_v41 = vpop.f32.mrb[164].mxu0 }
 0x397   : > { %3403 = vmatmul.mubr.bf16.gmra.mrb[188].mxu1 %v11921_v5  ;;  %v10196_v39 = vpop.f32.mrb[165].mxu0 }
 0x398   : > { %v2516_v11 = vadd.f32 %v10058_v17, %v13843_v29  ;;  %v14075_v7 = vadd.f32 %v13993_v12, %v2515_v61  ;;  %v14077_v36 = vadd.f32 %v10196_v39, %v10195_v41  ;;  %v10198_v44 = vpop.f32.mrb[166].mxu0 }
 0x399   : > { %v10199_v10 = vpop.f32.mrb[167].mxu0 }
 0x39a   : > { %v14080_v56 = vadd.f32 %v13995_v52, %v2516_v11  ;;  %v10059_v57 = vpop.f32.mrb[84].mxu1  ;;  %v14082_v43 = vadd.f32 %v10199_v10, %v10198_v44 }
 0x39b   : > { %v10060_v38 = vpop.f32.mrb[85].mxu1 }
 0x39c   : > { %v10061_v2 = vadd.f32 %v10060_v38, %v10059_v57  ;;  %v10062_v6 = vpop.f32.mrb[86].mxu1 }
 0x39d   : > { %v10063_v5 = vpop.f32.mrb[87].mxu1 }
 0x39e   : > { %v2517_v50 = vadd.f32 %v10061_v2, %v13852_v48  ;;  %v10064_v29 = vadd.f32 %v10063_v5, %v10062_v6  ;;  %v10201_v42 = vpop.f32.mrb[168].mxu0 }
 0x39f   : > { %v10202_v12 = vpop.f32.mrb[169].mxu0 }
 0x3a0   : > { %v2518_v27 = vadd.f32 %v10064_v29, %v13855_v40  ;;  %v14087_v61 = vadd.f32 %v14008_v32, %v2517_v50  ;;  %v14089_v17 = vadd.f32 %v10202_v12, %v10201_v42  ;;  %v10204_v52 = vpop.f32.mrb[170].mxu0 }
 0x3a1   : > { %v10205_v41 = vpop.f32.mrb[171].mxu0 }
 0x3a2   : > { %v14092_v39 = vadd.f32 %v14013_v33, %v2518_v27  ;;  %v10065_v11 = vpop.f32.mrb[88].mxu1  ;;  %v14094_v44 = vadd.f32 %v10205_v41, %v10204_v52 }
 0x3a3   : > { %v10066_v10 = vpop.f32.mrb[89].mxu1 }
 0x3a4   : > { %v10067_v48 = vadd.f32 %v10066_v10, %v10065_v11  ;;  %v10068_v57 = vpop.f32.mrb[90].mxu1 }
 0x3a5   : > { %v10069_v38 = vpop.f32.mrb[91].mxu1 }
 0x3a6   : > { %v2519_v2 = vadd.f32 %v10067_v48, %v13864_v63  ;;  %v10070_v40 = vadd.f32 %v10069_v38, %v10068_v57  ;;  %v10207_v6 = vpop.f32.mrb[172].mxu0 }
 0x3a7   : > { %v10208_v32 = vpop.f32.mrb[173].mxu0 }
 0x3a8   : > { %v2520_v5 = vadd.f32 %v10070_v40, %v13867_v58  ;;  %v14099_v50 = vadd.f32 %v14026_v47, %v2519_v2  ;;  %v14101_v29 = vadd.f32 %v10208_v32, %v10207_v6  ;;  %v10210_v33 = vpop.f32.mrb[174].mxu0 }
 0x3a9   : > { %v10211_v42 = vpop.f32.mrb[175].mxu0 }
 0x3aa   : > { %v14104_v12 = vadd.f32 %v14031_v19, %v2520_v5  ;;  %v10071_v27 = vpop.f32.mrb[92].mxu1  ;;  %v14106_v52 = vadd.f32 %v10211_v42, %v10210_v33 }
 0x3ab   : > { %v10072_v41 = vpop.f32.mrb[93].mxu1 }
 0x3ac   : > { %v10073_v63 = vadd.f32 %v10072_v41, %v10071_v27  ;;  %v10074_v11 = vpop.f32.mrb[94].mxu1 }
 0x3ad   : > { %v10075_v10 = vpop.f32.mrb[95].mxu1 }
 0x3ae   : > { %v2521_v48 = vadd.f32 %v10073_v63, %v13876_v16  ;;  %v10076_v58 = vadd.f32 %v10075_v10, %v10074_v11  ;;  %v10213_v57 = vpop.f32.mrb[176].mxu0 }
 0x3af   : > { %v10214_v47 = vpop.f32.mrb[177].mxu0 }
 0x3b0   : > { %v2522_v38 = vadd.f32 %v10076_v58, %v13879_v8  ;;  %v14111_v2 = vadd.f32 %v14044_v4, %v2521_v48  ;;  %v14113_v40 = vadd.f32 %v10214_v47, %v10213_v57  ;;  %v10216_v19 = vpop.f32.mrb[178].mxu0 }
 0x3b1   : > { %v10217_v6 = vpop.f32.mrb[179].mxu0 }
 0x3b2   : > { %v14116_v32 = vadd.f32 %v14049_v31, %v2522_v38  ;;  %v10077_v5 = vpop.f32.mrb[96].mxu1  ;;  %v14118_v33 = vadd.f32 %v10217_v6, %v10216_v19 }
 0x3b3   : > { %v10078_v42 = vpop.f32.mrb[97].mxu1 }
 0x3b4   : > { %v10079_v16 = vadd.f32 %v10078_v42, %v10077_v5  ;;  %v10080_v27 = vpop.f32.mrb[98].mxu1 }
 0x3b5   : > { %v10081_v41 = vpop.f32.mrb[99].mxu1 }
 0x3b6   : > { %v2523_v63 = vadd.f32 %v10079_v16, %v13888_v9  ;;  %v10082_v8 = vadd.f32 %v10081_v41, %v10080_v27  ;;  %v10219_v11 = vpop.f32.mrb[180].mxu0 }
 0x3b7   : > { %v10220_v4 = vpop.f32.mrb[181].mxu0 }
 0x3b8   : > { %v2524_v10 = vadd.f32 %v10082_v8, %v13891_v26  ;;  %v14123_v48 = vadd.f32 %v14062_v28, %v2523_v63  ;;  %v14125_v58 = vadd.f32 %v10220_v4, %v10219_v11  ;;  %v10222_v31 = vpop.f32.mrb[182].mxu0 }
 0x3b9   : > { %v10223_v57 = vpop.f32.mrb[183].mxu0 }
 0x3ba   : > { %v14128_v47 = vadd.f32 %v14067_v13, %v2524_v10  ;;  %v10083_v38 = vpop.f32.mrb[100].mxu1  ;;  %v14130_v19 = vadd.f32 %v10223_v57, %v10222_v31 }
 0x3bb   : > { %v10084_v6 = vpop.f32.mrb[101].mxu1 }
 0x3bc   : > { %v10085_v9 = vadd.f32 %v10084_v6, %v10083_v38  ;;  %v10086_v5 = vpop.f32.mrb[102].mxu1 }
 0x3bd   : > { %v10087_v42 = vpop.f32.mrb[103].mxu1 }
 0x3be   : > { %v2525_v16 = vadd.f32 %v10085_v9, %v13900_v15  ;;  %v10088_v26 = vadd.f32 %v10087_v42, %v10086_v5  ;;  %v10225_v27 = vpop.f32.mrb[184].mxu0 }
 0x3bf   : > { %v10226_v28 = vpop.f32.mrb[185].mxu0 }
 0x3c0   : > { %v2526_v41 = vadd.f32 %v10088_v26, %v13903_v25  ;;  %v14135_v63 = vadd.f32 %v14077_v36, %v2525_v16  ;;  %v14137_v8 = vadd.f32 %v10226_v28, %v10225_v27  ;;  %v10228_v13 = vpop.f32.mrb[186].mxu0 }
 0x3c1   : > { %v10229_v11 = vpop.f32.mrb[187].mxu0 }
 0x3c2   : > { %v14140_v4 = vadd.f32 %v14082_v43, %v2526_v41  ;;  %v10089_v10 = vpop.f32.mrb[104].mxu1  ;;  %v10230_v31 = vadd.f32 %v10229_v11, %v10228_v13 }
 0x3c3   : > { %v10090_v57 = vpop.f32.mrb[105].mxu1 }
 0x3c4   : > { %v10091_v38 = vadd.f32 %v10090_v57, %v10089_v10  ;;  %v10092_v15 = vpop.f32.mrb[106].mxu1 }
 0x3c5   : > { %v10093_v6 = vpop.f32.mrb[107].mxu1 }
 0x3c6   : > { %v2527_v9 = vadd.f32 %v10091_v38, %v13912_v30  ;;  %v10094_v5 = vadd.f32 %v10093_v6, %v10092_v15  ;;  %v10231_v25 = vpop.f32.mrb[188].mxu0 }
 0x3c7   : > { %v10232_v42 = vpop.f32.mrb[189].mxu0 }
 0x3c8   : > { %v2528_v36 = vadd.f32 %v10094_v5, %v13915_v46  ;;  %v14145_v16 = vadd.f32 %v14089_v17, %v2527_v9  ;;  %v10233_v26 = vadd.f32 %v10232_v42, %v10231_v25  ;;  %v10234_v27 = vpop.f32.mrb[190].mxu0 }
 0x3c9   : > { %v10235_v43 = vpop.f32.mrb[191].mxu0 }
 0x3ca   : > { %v14148_v28 = vadd.f32 %v14094_v44, %v2528_v36  ;;  %v10095_v41 = vpop.f32.mrb[108].mxu1  ;;  %v10236_v13 = vadd.f32 %v10235_v43, %v10234_v27 }
 0x3cb   : > { %v10096_v11 = vpop.f32.mrb[109].mxu1 }
 0x3cc   : > { %v10097_v10 = vadd.f32 %v10096_v11, %v10095_v41  ;;  %v10098_v57 = vpop.f32.mrb[110].mxu1  ;;  %v3478_v41 = vpop.permute.xlu0 %3477 }
 0x3cd   : > { %v10099_v30 = vpop.f32.mrb[111].mxu1 }
 0x3ce   : > { %v2529_v38 = vadd.f32 %v10097_v10, %v13924_v22  ;;  %v10100_v15 = vadd.f32 %v10099_v30, %v10098_v57  ;;  %v3483_v57 = vpop.permute.xlu1 %3482 }
 0x3d0   : > { %v2530_v46 = vadd.f32 %v10100_v15, %v13927_v51  ;;  %v14153_v17 = vadd.f32 %v14101_v29, %v2529_v38 }
 0x3d2   : > { %v14156_v6 = vadd.f32 %v14106_v52, %v2530_v46  ;;  %v10101_v9 = vpop.f32.mrb[112].mxu1 }
 0x3d3   : > { %v10102_v44 = vpop.f32.mrb[113].mxu1 }
 0x3d4   : > { %v10103_v5 = vadd.f32 %v10102_v44, %v10101_v9  ;;  %v10104_v25 = vpop.f32.mrb[114].mxu1  ;;  %v14176_v9 = vpop.permute.xlu1 %3562 }
 0x3d5   : > { %v10105_v42 = vpop.f32.mrb[115].mxu1 }
 0x3d6   : > { %v2531_v36 = vadd.f32 %v10103_v5, %v13940_v24  ;;  %v10106_v27 = vadd.f32 %v10105_v42, %v10104_v25 }
 0x3d8   : > { %v2532_v43 = vadd.f32 %v10106_v27, %v13943_v14  ;;  %v14161_v22 = vadd.f32 %v14113_v40, %v2531_v36  ;;  %v14171_v40 = vpop.permute.xlu0 %3557 }
 0x3da   : > { %v14164_v51 = vadd.f32 %v14118_v33, %v2532_v43  ;;  %v10107_v29 = vpop.f32.mrb[116].mxu1  ;;  %v3493_v43 = vpop.permute.xlu1 %3492 }
 0x3db   : > { %v10108_v52 = vpop.f32.mrb[117].mxu1 }
 0x3dc   : > { %v10109_v11 = vadd.f32 %v10108_v52, %v10107_v29  ;;  %v10110_v10 = vpop.f32.mrb[118].mxu1  ;;  %v3488_v27 = vpop.permute.xlu0 %3487 }
 0x3dd   : > { %v10111_v30 = vpop.f32.mrb[119].mxu1 }
 0x3de   : > { %v2533_v38 = vadd.f32 %v10109_v11, %v13956_v18  ;;  %v10112_v15 = vadd.f32 %v10111_v30, %v10110_v10 }
 0x3e0   : > { %v2534_v24 = vadd.f32 %v10112_v15, %v13959_v49  ;;  %v14169_v14 = vadd.f32 %v14125_v58, %v2533_v38  ;;  %v14185_v30 = vpop.permute.xlu0 %3567 }
 0x3e2   : > { %v14174_v33 = vadd.f32 %v14130_v19, %v2534_v24  ;;  %v10113_v46 = vpop.f32.mrb[120].mxu1  ;;  %v14188_v24 = vpop.permute.xlu1 %3572 }
 0x3e3   : > { %v10114_v44 = vpop.f32.mrb[121].mxu1 }
 0x3e4   : > { %v10115_v5 = vadd.f32 %v10114_v44, %v10113_v46  ;;  %v10116_v25 = vpop.f32.mrb[122].mxu1  ;;  %v3498_v44 = vpop.permute.xlu0 %3497 }
 0x3e5   : > { %v10117_v42 = vpop.f32.mrb[123].mxu1 }
 0x3e6   : > { %v2535_v18 = vadd.f32 %v10115_v5, %v13972_v21  ;;  %v10118_v36 = vadd.f32 %v10117_v42, %v10116_v25 }
 0x3e8   : > { %v2536_v49 = vadd.f32 %v10118_v36, %v13975_v59  ;;  %v14181_v58 = vadd.f32 %v14137_v8, %v2535_v18  ;;  %v3503_v18 = vpop.permute.xlu1 %3502 }
 0x3ea   : > { %v14183_v29 = vadd.f32 %v10230_v31, %v2536_v49  ;;  %v10119_v19 = vpop.f32.mrb[124].mxu1 }
 0x3eb   : > { %v10120_v52 = vpop.f32.mrb[125].mxu1 }
 0x3ec   : > { %v10121_v11 = vadd.f32 %v10120_v52, %v10119_v19  ;;  %v10122_v10 = vpop.f32.mrb[126].mxu1 }
 0x3ed   : > { %v10123_v38 = vpop.f32.mrb[127].mxu1 }
 0x3ee   : > { %v2537_v15 = vadd.f32 %v10121_v11, %v13988_v34  ;;  %v10124_v21 = vadd.f32 %v10123_v38, %v10122_v10  ;;  %v14197_v11 = vpop.permute.xlu0 %3577  ;;  %v14199_v10 = vpop.permute.xlu1 %3582 }
 0x3f0   : > { %v2538_v59 = vadd.f32 %v10124_v21, %v13991_v1  ;;  %v14191_v46 = vadd.f32 %v10233_v26, %v2537_v15 }
 0x3f2   : > { %v14193_v8 = vadd.f32 %v10236_v13, %v2538_v59  ;;  %v10253_v31 = vpop.f32.mrb[128].mxu1 }
 0x3f3   : > { %v10254_v5 = vpop.f32.mrb[129].mxu1 }
 0x3f4   : > { %v10255_v25 = vadd.f32 %v10254_v5, %v10253_v31  ;;  %v10256_v42 = vpop.f32.mrb[130].mxu1 }
 0x3f5   : > { %v10257_v36 = vpop.f32.mrb[131].mxu1 }
 0x3f6   : > { %v3411_v49 = vadd.f32 %v10255_v25, %v14006_v55  ;;  %v10258_v19 = vadd.f32 %v10257_v36, %v10256_v42 }
 0x3f8   : > { %v3635_v34 = vadd.f32 %v3478_v41, %v3411_v49  ;;  %v3412_v52 = vadd.f32 %v10258_v19, %v14011_v45  ;;  %v3508_v41 = vpop.permute.xlu0 %3507 }
 0x3fa   : > { %v3636_v1 = vadd.f32 %v3483_v57, %v3412_v52  ;;  %v10259_v26 = vpop.f32.mrb[132].mxu1  ;;  %v3667_v38 = vmax.f32 %v3635_v34, 0.0  ;;  %v3513_v57 = vpop.permute.xlu1 %3512 }
 0x3fb   : > { %v10260_v13 = vpop.f32.mrb[133].mxu1 }
 0x3fc   : > { %v3668_v15 = vmax.f32 %v3636_v1, 0.0  ;;  %v10261_v21 = vadd.f32 %v10260_v13, %v10259_v26  ;;  %v10262_v59 = vpop.f32.mrb[134].mxu1  ;;  %v14207_v13 = vpop.permute.xlu0 %3587 }
 0x3fd   : > { %v10263_v31 = vpop.f32.mrb[135].mxu1 }
 0x3fe   : > { %v14201_v5 = vpack.c.bf16 %v3668_v15, %v3667_v38  ;;  %v3413_v55 = vadd.f32 %v10261_v21, %v14024_v23  ;;  %v10264_v25 = vadd.f32 %v10263_v31, %v10262_v59 }
 0x400   : > { %v3637_v42 = vadd.f32 %v3488_v27, %v3413_v55  ;;  %v3414_v45 = vadd.f32 %v10264_v25, %v14029_v62  ;;  %3764 = vrot.lane.b32.xlu0 %v14201_v5, %s12436_s12  ;;  %v14212_v62 = vpop.permute.xlu1 %3592  ;;  %v3518_v55 = vpop.permute.xlu0 %3517 }
 0x402   : > { %v3638_v36 = vadd.f32 %v3493_v43, %v3414_v45  ;;  %v10265_v49 = vpop.f32.mrb[136].mxu1  ;;  %v3669_v34 = vmax.f32 %v3637_v42, 0.0 }
 0x403   : > { %v10266_v19 = vpop.f32.mrb[137].mxu1 }
 0x404   : > { %v3670_v52 = vmax.f32 %v3638_v36, 0.0  ;;  %v10267_v1 = vadd.f32 %v10266_v19, %v10265_v49  ;;  %v10268_v26 = vpop.f32.mrb[138].mxu1  ;;  %v3523_v19 = vpop.permute.xlu1 %3522 }
 0x405   : > { %v10269_v38 = vpop.f32.mrb[139].mxu1 }
 0x406   : > { %v14209_v23 = vpack.c.bf16 %v3670_v52, %v3669_v34  ;;  %v3415_v27 = vadd.f32 %v10267_v1, %v14042_v53  ;;  %v10270_v15 = vadd.f32 %v10269_v38, %v10268_v26 }
 0x408   : > { %v3639_v21 = vadd.f32 %v3498_v44, %v3415_v27  ;;  %v3416_v59 = vadd.f32 %v10270_v15, %v14047_v60  ;;  %3766 = vrot.lane.b32.xlu0 %v14209_v23, %s12436_s12  ;;  %v14225_v27 = vpop.permute.xlu1 %3602 }
 0x40a   : > { %v3640_v43 = vadd.f32 %v3503_v18, %v3416_v59  ;;  %v10271_v31 = vpop.f32.mrb[140].mxu1  ;;  %v3671_v42 = vmax.f32 %v3639_v21, 0.0  ;;  %v14223_v18 = vpop.permute.xlu0 %3597 }
 0x40b   : > { %v10272_v25 = vpop.f32.mrb[141].mxu1 }
 0x40c   : > { %v3672_v45 = vmax.f32 %v3640_v43, 0.0  ;;  %v10273_v36 = vadd.f32 %v10272_v25, %v10271_v31  ;;  %v10274_v49 = vpop.f32.mrb[142].mxu1 }
 0x40d   : > { %v10275_v34 = vpop.f32.mrb[143].mxu1 }
 0x40e   : > { %v14217_v53 = vpack.c.bf16 %v3672_v45, %v3671_v42  ;;  %v3417_v52 = vadd.f32 %v10273_v36, %v14060_v37  ;;  %v10276_v44 = vadd.f32 %v10275_v34, %v10274_v49  ;;  %v3528_v42 = vpop.permute.xlu0 %3527 }
 0x410   : > { %v3641_v1 = vadd.f32 %v3508_v41, %v3417_v52  ;;  %v3418_v60 = vadd.f32 %v10276_v44, %v14065_v0  ;;  %3768 = vrot.lane.b32.xlu0 %v14217_v53, %s12436_s12 }
 0x412   : > { %v3642_v26 = vadd.f32 %v3513_v57, %v3418_v60  ;;  %v10277_v38 = vpop.f32.mrb[144].mxu1  ;;  %v3673_v21 = vmax.f32 %v3641_v1, 0.0  ;;  %v3533_v57 = vpop.permute.xlu1 %3532 }
 0x413   : > { %v10278_v15 = vpop.f32.mrb[145].mxu1 }
 0x414   : > { %v3674_v59 = vmax.f32 %v3642_v26, 0.0  ;;  %v10279_v43 = vadd.f32 %v10278_v15, %v10277_v38  ;;  %v10280_v31 = vpop.f32.mrb[146].mxu1  ;;  %v14233_v38 = vpop.permute.xlu0 %3607 }
 0x415   : > { %v10281_v25 = vpop.f32.mrb[147].mxu1 }
 0x416   : > { %v14227_v37 = vpack.c.bf16 %v3674_v59, %v3673_v21  ;;  %v3419_v41 = vadd.f32 %v10279_v43, %v14075_v7  ;;  %v10282_v0 = vadd.f32 %v10281_v25, %v10280_v31 }
 0x418   : > { %v3643_v45 = vadd.f32 %v3518_v55, %v3419_v41  ;;  %v3420_v36 = vadd.f32 %v10282_v0, %v14080_v56  ;;  %3770 = vrot.lane.b32.xlu0 %v14227_v37, %s12436_s12  ;;  %v14238_v56 = vpop.permute.xlu1 %3612  ;;  %v3538_v25 = vpop.permute.xlu0 %3537 }
 0x41a   : > { %v3644_v49 = vadd.f32 %v3523_v19, %v3420_v36  ;;  %v10283_v34 = vpop.f32.mrb[148].mxu1  ;;  %v3675_v44 = vmax.f32 %v3643_v45, 0.0 }
 0x41b   : > { %v10284_v52 = vpop.f32.mrb[149].mxu1 }
 0x41c   : > { %v3676_v1 = vmax.f32 %v3644_v49, 0.0  ;;  %v10285_v60 = vadd.f32 %v10284_v52, %v10283_v34  ;;  %v10286_v26 = vpop.f32.mrb[150].mxu1  ;;  %v3543_v34 = vpop.permute.xlu1 %3542 }
 0x41d   : > { %v10287_v15 = vpop.f32.mrb[151].mxu1 }
 0x41e   : > { %v14235_v7 = vpack.c.bf16 %v3676_v1, %v3675_v44  ;;  %v3421_v55 = vadd.f32 %v10285_v60, %v14087_v61  ;;  %v10288_v21 = vadd.f32 %v10287_v15, %v10286_v26 }
 0x420   : > { %v3645_v59 = vadd.f32 %v3528_v42, %v3421_v55  ;;  %v3422_v43 = vadd.f32 %v10288_v21, %v14092_v39  ;;  %3772 = vrot.lane.b32.xlu0 %v14235_v7, %s12436_s12  ;;  %v14251_v15 = vpop.permute.xlu1 %3622 }
 0x422   : > { %v3646_v19 = vadd.f32 %v3533_v57, %v3422_v43  ;;  %v10289_v31 = vpop.f32.mrb[152].mxu1  ;;  %v3677_v0 = vmax.f32 %v3645_v59, 0.0  ;;  %v14249_v57 = vpop.permute.xlu0 %3617 }
 0x423   : > { %v10290_v41 = vpop.f32.mrb[153].mxu1 }
 0x424   : > { %v3678_v45 = vmax.f32 %v3646_v19, 0.0  ;;  %v10291_v36 = vadd.f32 %v10290_v41, %v10289_v31  ;;  %v10292_v49 = vpop.f32.mrb[154].mxu1 }
 0x425   : > { %v10293_v52 = vpop.f32.mrb[155].mxu1 }
 0x426   : > { %v14243_v61 = vpack.c.bf16 %v3678_v45, %v3677_v0  ;;  %v3423_v44 = vadd.f32 %v10291_v36, %v14099_v50  ;;  %v10294_v42 = vadd.f32 %v10293_v52, %v10292_v49  ;;  %v3548_v41 = vpop.permute.xlu0 %3547  ;;  %v3553_v36 = vpop.permute.xlu1 %3552 }
 0x428   : > { %v3647_v1 = vadd.f32 %v3538_v25, %v3423_v44  ;;  %v3424_v39 = vadd.f32 %v10294_v42, %v14104_v12  ;;  %3774 = vrot.lane.b32.xlu0 %v14243_v61, %s12436_s12 }
 0x42a   : > { %v3648_v60 = vadd.f32 %v3543_v34, %v3424_v39  ;;  %v10295_v26 = vpop.f32.mrb[156].mxu1  ;;  %v3679_v21 = vmax.f32 %v3647_v1, 0.0 }
 0x42b   : > { %v10296_v55 = vpop.f32.mrb[157].mxu1 }
 0x42c   : > { %v3680_v59 = vmax.f32 %v3648_v60, 0.0  ;;  %v10297_v43 = vadd.f32 %v10296_v55, %v10295_v26  ;;  %v10298_v19 = vpop.f32.mrb[158].mxu1 }
 0x42d   : > { %v10299_v31 = vpop.f32.mrb[159].mxu1 }
 0x42e   : > { %v14253_v50 = vpack.c.bf16 %v3680_v59, %v3679_v21  ;;  %v3425_v25 = vadd.f32 %v10297_v43, %v14111_v2  ;;  %v10300_v12 = vadd.f32 %v10299_v31, %v10298_v19 }
 0x430   : > { %v3649_v0 = vadd.f32 %v3548_v41, %v3425_v25  ;;  %v3426_v45 = vadd.f32 %v10300_v12, %v14116_v32  ;;  %3776 = vrot.lane.b32.xlu0 %v14253_v50, %s12436_s12 }
 0x432   : > { %v3650_v49 = vadd.f32 %v3553_v36, %v3426_v45  ;;  %v10301_v34 = vpop.f32.mrb[160].mxu1  ;;  %v3681_v44 = vmax.f32 %v3649_v0, 0.0 }
 0x433   : > { %v10302_v52 = vpop.f32.mrb[161].mxu1 }
 0x434   : > { %v3682_v42 = vmax.f32 %v3650_v49, 0.0  ;;  %v10303_v1 = vadd.f32 %v10302_v52, %v10301_v34  ;;  %v10304_v39 = vpop.f32.mrb[162].mxu1 }
 0x435   : > { %v10305_v60 = vpop.f32.mrb[163].mxu1 }
 0x436   : > { %v14259_v26 = vpack.c.bf16 %v3682_v42, %v3681_v44  ;;  %v3427_v2 = vadd.f32 %v10303_v1, %v14123_v48  ;;  %v10306_v55 = vadd.f32 %v10305_v60, %v10304_v39 }
 0x438   : > { %v3651_v21 = vadd.f32 %v14171_v40, %v3427_v2  ;;  %v3428_v32 = vadd.f32 %v10306_v55, %v14128_v47  ;;  %3778 = vrot.lane.b32.xlu0 %v14259_v26, %s12436_s12 }
 0x43a   : > { %v3652_v59 = vadd.f32 %v14176_v9, %v3428_v32  ;;  %v10307_v43 = vpop.f32.mrb[164].mxu1  ;;  %v3683_v31 = vmax.f32 %v3651_v21, 0.0 }
 0x43b   : > { %v10308_v19 = vpop.f32.mrb[165].mxu1 }
 0x43c   : > { %v3684_v25 = vmax.f32 %v3652_v59, 0.0  ;;  %v10309_v12 = vadd.f32 %v10308_v19, %v10307_v43  ;;  %v10310_v41 = vpop.f32.mrb[166].mxu1  ;;  %4502 = vrot.lane.b32.xlu0 %v14201_v5, %s12437_s13 }
 0x43d   : > { %v10311_v48 = vpop.f32.mrb[167].mxu1 }
 0x43e   : > { %v14269_v0 = vpack.c.bf16 %v3684_v25, %v3683_v31  ;;  %v3429_v40 = vadd.f32 %v10309_v12, %v14135_v63  ;;  %v10312_v47 = vadd.f32 %v10311_v48, %v10310_v41 }
 0x440   : > { %v3653_v45 = vadd.f32 %v14185_v30, %v3429_v40  ;;  %v3430_v36 = vadd.f32 %v10312_v47, %v14140_v4  ;;  %3780 = vrot.lane.b32.xlu1 %v14269_v0, %s12436_s12  ;;  %10461 = vmatprep.subr.bf16.mxu1 %v14269_v0 }
 0x441   : > { %4504 = vrot.lane.b32.xlu0 %v14209_v23, %s12437_s13  ;;  %10462 = vmatpush3.bf16.msra.mxu1 %v14201_v5 }
 0x442   : > { %v3654_v9 = vadd.f32 %v14188_v24, %v3430_v36  ;;  %v10313_v49 = vpop.f32.mrb[168].mxu1  ;;  %v3685_v63 = vmax.f32 %v3653_v45, 0.0 }
 0x443   : > { %v10314_v34 = vpop.f32.mrb[169].mxu1 }
 0x444   : > { %v3686_v52 = vmax.f32 %v3654_v9, 0.0  ;;  %v10315_v44 = vadd.f32 %v10314_v34, %v10313_v49  ;;  %v10316_v30 = vpop.f32.mrb[170].mxu1 }
 0x445   : > { %4506 = vrot.lane.b32.xlu0 %v14217_v53, %s12437_s13  ;;  %v10317_v4 = vpop.f32.mrb[171].mxu1 }
 0x446   : > { %v14283_v42 = vpack.c.bf16 %v3686_v52, %v3685_v63  ;;  %v3431_v1 = vadd.f32 %v10315_v44, %v14145_v16  ;;  %v10318_v39 = vadd.f32 %v10317_v4, %v10316_v30 }
 0x448   : > { %v3655_v60 = vadd.f32 %v14197_v11, %v3431_v1  ;;  %v3432_v2 = vadd.f32 %v10318_v39, %v14148_v28  ;;  %3782 = vrot.lane.b32.xlu1 %v14283_v42, %s12436_s12  ;;  %10463 = vmatprep.subr.bf16.mxu1 %v14283_v42 }
 0x449   : > { %4508 = vrot.lane.b32.xlu0 %v14227_v37, %s12437_s13  ;;  %10464 = vmatpush3.bf16.msra.mxu1 %v14209_v23 }
 0x44a   : > { %v3656_v24 = vadd.f32 %v14199_v10, %v3432_v2  ;;  %v10319_v55 = vpop.f32.mrb[172].mxu1  ;;  %v3687_v16 = vmax.f32 %v3655_v60, 0.0 }
 0x44b   : > { %v10320_v21 = vpop.f32.mrb[173].mxu1 }
 0x44c   : > { %v3688_v32 = vmax.f32 %v3656_v24, 0.0  ;;  %v10321_v59 = vadd.f32 %v10320_v21, %v10319_v55  ;;  %v10322_v11 = vpop.f32.mrb[174].mxu1 }
 0x44d   : > { %4510 = vrot.lane.b32.xlu0 %v14235_v7, %s12437_s13  ;;  %v10323_v28 = vpop.f32.mrb[175].mxu1 }
 0x44e   : > { %v14297_v43 = vpack.c.bf16 %v3688_v32, %v3687_v16  ;;  %v3433_v19 = vadd.f32 %v10321_v59, %v14153_v17  ;;  %v10324_v31 = vadd.f32 %v10323_v28, %v10322_v11 }
 0x450   : > { %v3657_v25 = vadd.f32 %v14207_v13, %v3433_v19  ;;  %v3434_v12 = vadd.f32 %v10324_v31, %v14156_v6  ;;  %3784 = vrot.lane.b32.xlu1 %v14297_v43, %s12436_s12  ;;  %10465 = vmatprep.subr.bf16.mxu1 %v14297_v43 }
 0x451   : > { %4512 = vrot.lane.b32.xlu0 %v14243_v61, %s12437_s13  ;;  %10466 = vmatpush3.bf16.msra.mxu1 %v14217_v53 }
 0x452   : > { %v3658_v10 = vadd.f32 %v14212_v62, %v3434_v12  ;;  %v10325_v41 = vpop.f32.mrb[176].mxu1  ;;  %v3689_v17 = vmax.f32 %v3657_v25, 0.0 }
 0x453   : > { %v10326_v48 = vpop.f32.mrb[177].mxu1 }
 0x454   : > { %v3690_v40 = vmax.f32 %v3658_v10, 0.0  ;;  %v10327_v47 = vadd.f32 %v10326_v48, %v10325_v41  ;;  %v10328_v13 = vpop.f32.mrb[178].mxu1  ;;  %v11924_v10 = vld [vmem:[%s17083_s5 + $0x4] ss:$8 sps:$4 sm:$0xff]  }
 0x455   : > { %4514 = vrot.lane.b32.xlu0 %v14253_v50, %s12437_s13  ;;  %v10329_v6 = vpop.f32.mrb[179].mxu1  ;;  %4052 = vmatprep.mubr.bf16.mxu0 %v11924_v10 }
 0x456   : > { %v14311_v45 = vpack.c.bf16 %v3690_v40, %v3689_v17  ;;  %v3435_v36 = vadd.f32 %v10327_v47, %v14161_v22  ;;  %v10330_v9 = vadd.f32 %v10329_v6, %v10328_v13  ;;  %v3628_v17 = vpop.permute.xlu0 %3627  ;;  %v3633_v13 = vpop.permute.xlu1 %3632 }
 0x458   : > { %v3659_v49 = vadd.f32 %v14223_v18, %v3435_v36  ;;  %v3436_v34 = vadd.f32 %v10330_v9, %v14164_v51  ;;  %3786 = vrot.lane.b32.xlu1 %v14311_v45, %s12436_s12  ;;  %10467 = vmatprep.subr.bf16.mxu1 %v14311_v45 }
 0x459   : > { %4516 = vrot.lane.b32.xlu0 %v14259_v26, %s12437_s13  ;;  %10468 = vmatpush3.bf16.msra.mxu1 %v14227_v37 }
 0x45a   : > { %v3660_v62 = vadd.f32 %v14225_v27, %v3436_v34  ;;  %v10331_v63 = vpop.f32.mrb[180].mxu1  ;;  %v3691_v22 = vmax.f32 %v3659_v49, 0.0  ;;  %v11936_v49 = vld [vmem:[%s17083_s5 + $0x224] ss:$8 sps:$4 sm:$0xff]   ;;  %v11939_v34 = vld [vmem:[%s17083_s5 + $0x220] ss:$8 sps:$4 sm:$0xff]  }
 0x45b   : > { %v10332_v52 = vpop.f32.mrb[181].mxu1 }
 0x45c   : > { %v3692_v44 = vmax.f32 %v3660_v62, 0.0  ;;  %v10333_v30 = vadd.f32 %v10332_v52, %v10331_v63  ;;  %v10334_v18 = vpop.f32.mrb[182].mxu1  ;;  %v11945_v62 = vld [vmem:[%s17083_s5 + $0x230] ss:$8 sps:$4 sm:$0xff]   ;;  %v11951_v63 = vld [vmem:[%s17083_s5 + $0x240] ss:$8 sps:$4 sm:$0xff]  }
 0x45d   : > { %4952 = vrot.lane.b32.xlu0 %v14201_v5, %s12438_s15  ;;  %v10335_v51 = vpop.f32.mrb[183].mxu1  ;;  %v5852_v52 = vld [vmem:[%s17084_s6] sm:$0xff] }
 0x45e   : > { %v14325_v4 = vpack.c.bf16 %v3692_v44, %v3691_v22  ;;  %v3437_v1 = vadd.f32 %v10333_v30, %v14169_v14  ;;  %v10336_v39 = vadd.f32 %v10335_v51, %v10334_v18  ;;  %v5868_v44 = vld [vmem:[%s17084_s6 + $0x80] sm:$0xff]  ;;  %v5854_v51 = vld [vmem:[%s17084_s6 + $0x10] sm:$0xff] }
 0x45f   : > { %v11960_v30 = vld [vmem:[%s17083_s5 + $0x264] ss:$8 sps:$4 sm:$0xff]  }
 0x460   : > { %v3661_v60 = vadd.f32 %v14233_v38, %v3437_v1  ;;  %v3438_v2 = vadd.f32 %v10336_v39, %v14174_v33  ;;  %3788 = vrot.lane.b32.xlu1 %v14325_v4, %s12436_s12  ;;  %10469 = vmatprep.subr.bf16.mxu1 %v14325_v4  ;;  %v5870_v1 = vld [vmem:[%s17084_s6 + $0x90] sm:$0xff]  ;;  %v11963_v39 = vld [vmem:[%s17083_s5 + $0x260] ss:$8 sps:$4 sm:$0xff]  }
 0x461   : > { %5402 = vrot.lane.b32.xlu0 %v14201_v5, %s12439_s16  ;;  %10470 = vmatpush3.bf16.msra.mxu1 %v14235_v7 }
 0x462   : > { %v3662_v27 = vadd.f32 %v14238_v56, %v3438_v2  ;;  %v10337_v24 = vpop.f32.mrb[184].mxu1  ;;  %v3693_v14 = vmax.f32 %v3661_v60, 0.0  ;;  %v11966_v60 = vld [vmem:[%s17083_s5 + $0x274] ss:$8 sps:$4 sm:$0xff]  }
 0x463   : > { %v10338_v55 = vpop.f32.mrb[185].mxu1 }
 0x464   : > { %v3694_v21 = vmax.f32 %v3662_v27, 0.0  ;;  %v10339_v16 = vadd.f32 %v10338_v55, %v10337_v24  ;;  %v10340_v38 = vpop.f32.mrb[186].mxu1  ;;  %v5856_v27 = vld [vmem:[%s17084_s6 + $0x20] sm:$0xff]  ;;  %v11969_v55 = vld [vmem:[%s17083_s5 + $0x270] ss:$8 sps:$4 sm:$0xff]  }
 0x465   : > { %4954 = vrot.lane.b32.xlu0 %v14209_v23, %s12438_s15  ;;  %v10341_v33 = vpop.f32.mrb[187].mxu1  ;;  %v5872_v24 = vld [vmem:[%s17084_s6 + $0xa0] sm:$0xff] }
 0x466   : > { %v14339_v32 = vpack.c.bf16 %v3694_v21, %v3693_v14  ;;  %v3439_v59 = vadd.f32 %v10339_v16, %v14181_v58  ;;  %v10342_v11 = vadd.f32 %v10341_v33, %v10340_v38  ;;  %v5858_v16 = vld [vmem:[%s17084_s6 + $0x30] sm:$0xff]  ;;  %v11972_v38 = vld [vmem:[%s17083_s5 + $0x284] ss:$8 sps:$4 sm:$0xff]  }
 0x468   : > { %v3663_v5 = vadd.f32 %v14249_v57, %v3439_v59  ;;  %v3440_v28 = vadd.f32 %v10342_v11, %v14183_v29  ;;  %3790 = vrot.lane.b32.xlu1 %v14339_v32, %s12436_s12  ;;  %10471 = vmatprep.subr.bf16.mxu1 %v14339_v32  ;;  %v5874_v59 = vld [vmem:[%s17084_s6 + $0xb0] sm:$0xff]  ;;  %v11975_v11 = vld [vmem:[%s17083_s5 + $0x280] ss:$8 sps:$4 sm:$0xff]  }
 0x469   : > { %5404 = vrot.lane.b32.xlu0 %v14209_v23, %s12439_s16  ;;  %10472 = vmatpush3.bf16.msra.mxu1 %v14243_v61 }
 0x46a   : > { %v3664_v56 = vadd.f32 %v14251_v15, %v3440_v28  ;;  %v10343_v19 = vpop.f32.mrb[188].mxu1  ;;  %v3695_v58 = vmax.f32 %v3663_v5, 0.0  ;;  %v11927_v15 = vld [vmem:[%s17083_s5 + $0x204] ss:$8 sps:$4 sm:$0xff]  }
 0x46b   : > { %v10344_v31 = vpop.f32.mrb[189].mxu1  ;;  %4373 = vmatprep.mubr.bf16.mxu1 %v11927_v15 }
 0x46c   : > { %v3696_v25 = vmax.f32 %v3664_v56, 0.0  ;;  %v10345_v12 = vadd.f32 %v10344_v31, %v10343_v19  ;;  %v10346_v57 = vpop.f32.mrb[190].mxu1  ;;  %v5860_v56 = vld [vmem:[%s17084_s6 + $0x40] sm:$0xff]  ;;  %v11978_v19 = vld [vmem:[%s17083_s5 + $0x294] ss:$8 sps:$4 sm:$0xff]  }
 0x46d   : > { %4956 = vrot.lane.b32.xlu0 %v14217_v53, %s12438_s15  ;;  %v10347_v29 = vpop.f32.mrb[191].mxu1 }
 0x46e   : > { %v14356_v41 = vpack.c.bf16 %v3696_v25, %v3695_v58  ;;  %v3441_v23 = vadd.f32 %v10345_v12, %v14191_v46  ;;  %v10348_v48 = vadd.f32 %v10347_v29, %v10346_v57  ;;  %v11981_v25 = vld [vmem:[%s17083_s5 + $0x290] ss:$8 sps:$4 sm:$0xff]   ;;  %v11984_v29 = vld [vmem:[%s17083_s5 + $0x2a4] ss:$8 sps:$4 sm:$0xff]  }
 0x46f   : > { %v5862_v57 = vld [vmem:[%s17084_s6 + $0x50] sm:$0xff] }
 0x470   : > { %v3665_v40 = vadd.f32 %v3628_v17, %v3441_v23  ;;  %v3442_v47 = vadd.f32 %v10348_v48, %v14193_v8  ;;  %3792 = vrot.lane.b32.xlu1 %v14356_v41, %s12436_s12  ;;  %10473 = vmatprep.subr.bf16.mxu1 %v14356_v41  ;;  %v11925_v8 = vld [vmem:[%s17083_s5 + $0x200] ss:$8 sps:$4 sm:$0xff]   ;;  %v5878_v23 = vld [vmem:[%s17084_s6 + $0xd0] sm:$0xff] }
 0x471   : > { %5406 = vrot.lane.b32.xlu0 %v14217_v53, %s12439_s16  ;;  %10474 = vmatpush3.bf16.msra.mxu1 %v14253_v50  ;;  %v11930_v53 = vld [vmem:[%s17083_s5 + $0x214] ss:$8 sps:$4 sm:$0xff]   ;;  %v11987_v48 = vld [vmem:[%s17083_s5 + $0x2a0] ss:$8 sps:$4 sm:$0xff]  }
 0x472   : > { %v3666_v46 = vadd.f32 %v3633_v13, %v3442_v47  ;;  %v3697_v6 = vmax.f32 %v3665_v40, 0.0  ;;  %v3765_v22 = vpop.permute.xlu0 %3764  ;;  %v5864_v17 = vld [vmem:[%s17084_s6 + $0x60] sm:$0xff]  ;;  %v11990_v40 = vld [vmem:[%s17083_s5 + $0x2b4] ss:$8 sps:$4 sm:$0xff]  }
 0x473   : > { %v3796_v33 = vsel %vm562_vm0, %v3765_v22, 0  ;;  %v5880_v13 = vld [vmem:[%s17084_s6 + $0xe0] sm:$0xff]  ;;  %v12005_v22 = vld [vmem:[%s17083_s5 + $0x2d0] ss:$8 sps:$4 sm:$0xff]  }
 0x474   : > { %v3698_v36 = vmax.f32 %v3666_v46, 0.0  ;;  %v11993_v46 = vld [vmem:[%s17083_s5 + $0x2b0] ss:$8 sps:$4 sm:$0xff]  }
 0x475   : > { %4958 = vrot.lane.b32.xlu0 %v14227_v37, %s12438_s15 }
 0x476   : > { %v14371_v9 = vpack.c.bf16 %v3698_v36, %v3697_v6 }
 0x478   : > { %3794 = vrot.lane.b32.xlu1 %v14371_v9, %s12436_s12  ;;  %10475 = vmatprep.subr.bf16.mxu1 %v14371_v9 }
 0x479   : > { %5408 = vrot.lane.b32.xlu0 %v14227_v37, %s12439_s16  ;;  %10476 = vmatpush3.bf16.msra.mxu1 %v14259_v26  ;;  %v11933_v37 = vld [vmem:[%s17083_s5 + $0x210] ss:$8 sps:$4 sm:$0xff]  }
 0x47a   : > { %v3767_v18 = vpop.permute.xlu0 %3766 }
 0x47b   : > { %v3797_v31 = vsel %vm562_vm0, %v3767_v18, 0 }
 0x47c   : > { %4518 = vrot.lane.b32.xlu1 %v14269_v0, %s12437_s13  ;;  %4374 = vmatmul.mubr.bf16.vlgmr.msra.gmra.mrb[192].mxu1 %v11925_v8  ;;  %v5866_v8 = vld [vmem:[%s17084_s6 + $0x70] sm:$0xff] }
 0x47d   : > { %4960 = vrot.lane.b32.xlu0 %v14235_v7, %s12438_s15  ;;  %4381 = vmatprep.mubr.bf16.mxu1 %v11930_v53  ;;  %v11996_v53 = vld [vmem:[%s17083_s5 + $0x2c4] ss:$8 sps:$4 sm:$0xff]  }
 0x480   : > { %4520 = vrot.lane.b32.xlu1 %v14283_v42, %s12437_s13 }
 0x481   : > { %5410 = vrot.lane.b32.xlu0 %v14235_v7, %s12439_s16  ;;  %v11942_v7 = vld [vmem:[%s17083_s5 + $0x234] ss:$8 sps:$4 sm:$0xff]  }
 0x484   : > { %4522 = vrot.lane.b32.xlu1 %v14297_v43, %s12437_s13  ;;  %4382 = vmatmul.mubr.bf16.gmra.mrb[196].mxu1 %v11933_v37  ;;  %v5882_v37 = vld [vmem:[%s17084_s6 + $0xf0] sm:$0xff] }
 0x485   : > { %4962 = vrot.lane.b32.xlu0 %v14243_v61, %s12438_s15  ;;  %4389 = vmatprep.mubr.bf16.mxu1 %v11936_v49 }
 0x488   : > { %4524 = vrot.lane.b32.xlu1 %v14311_v45, %s12437_s13 }
 0x489   : > { %5412 = vrot.lane.b32.xlu0 %v14243_v61, %s12439_s16  ;;  %v11948_v61 = vld [vmem:[%s17083_s5 + $0x244] ss:$8 sps:$4 sm:$0xff]  }
 0x48c   : > { %4526 = vrot.lane.b32.xlu1 %v14325_v4, %s12437_s13  ;;  %4390 = vmatmul.mubr.bf16.gmra.mrb[200].mxu1 %v11939_v34  ;;  %v5853_v34 = vld [vmem:[%s17084_s6 + $0x8] sm:$0xff] }
 0x48d   : > { %4964 = vrot.lane.b32.xlu0 %v14253_v50, %s12438_s15  ;;  %4397 = vmatprep.mubr.bf16.mxu1 %v11942_v7  ;;  %v11999_v7 = vld [vmem:[%s17083_s5 + $0x2c0] ss:$8 sps:$4 sm:$0xff]  }
 0x490   : > { %4528 = vrot.lane.b32.xlu1 %v14339_v32, %s12437_s13 }
 0x491   : > { %5414 = vrot.lane.b32.xlu0 %v14253_v50, %s12439_s16  ;;  %v11954_v50 = vld [vmem:[%s17083_s5 + $0x254] ss:$8 sps:$4 sm:$0xff]  }
 0x494   : > { %4530 = vrot.lane.b32.xlu1 %v14356_v41, %s12437_s13  ;;  %4398 = vmatmul.mubr.bf16.gmra.mrb[204].mxu1 %v11945_v62 }
 0x495   : > { %4966 = vrot.lane.b32.xlu0 %v14259_v26, %s12438_s15  ;;  %4405 = vmatprep.mubr.bf16.mxu1 %v11948_v61  ;;  %v12002_v61 = vld [vmem:[%s17083_s5 + $0x2d4] ss:$8 sps:$4 sm:$0xff]  }
 0x498   : > { %4532 = vrot.lane.b32.xlu1 %v14371_v9, %s12437_s13 }
 0x499   : > { %5416 = vrot.lane.b32.xlu0 %v14259_v26, %s12439_s16  ;;  %v11957_v26 = vld [vmem:[%s17083_s5 + $0x250] ss:$8 sps:$4 sm:$0xff]  }
 0x49c   : > { %4968 = vrot.lane.b32.xlu1 %v14269_v0, %s12438_s15  ;;  %4406 = vmatmul.mubr.bf16.gmra.mrb[208].mxu1 %v11951_v63 }
 0x49d   : > { %5886 = vperm.xlu0 %11616, %v5852_v52   ;;  %4413 = vmatprep.mubr.bf16.mxu1 %v11954_v50  ;;  %v5855_v52 = vld [vmem:[%s17084_s6 + $0x18] sm:$0xff] }
 0x4a0   : > { %5418 = vrot.lane.b32.xlu1 %v14269_v0, %s12439_s16  ;;  %v3769_v0 = vpop.permute.xlu0 %3768 }
 0x4a1   : > { %5966 = vperm.xlu0 %11616, %v5868_v44   ;;  %v3798_v10 = vsel %vm562_vm0, %v3769_v0, 0  ;;  %v5857_v0 = vld [vmem:[%s17084_s6 + $0x28] sm:$0xff] }
 0x4a4   : > { %4970 = vrot.lane.b32.xlu1 %v14283_v42, %s12438_s15  ;;  %4414 = vmatmul.mubr.bf16.gmra.mrb[212].mxu1 %v11957_v26  ;;  %v3771_v2 = vpop.permute.xlu0 %3770  ;;  %v12008_v26 = vld [vmem:[%s17083_s5 + $0x2e4] ss:$8 sps:$4 sm:$0xff]  }
 0x4a5   : > { %5896 = vperm.xlu0 %11616, %v5854_v51   ;;  %4421 = vmatprep.mubr.bf16.mxu1 %v11960_v30  ;;  %v3799_v47 = vsel %vm562_vm0, %v3771_v2, 0  ;;  %v5871_v51 = vld [vmem:[%s17084_s6 + $0x98] sm:$0xff] }
 0x4a6   : > { %v12014_v2 = vld [vmem:[%s17083_s5 + $0x2f4] ss:$8 sps:$4 sm:$0xff]  }
 0x4a8   : > { %5420 = vrot.lane.b32.xlu1 %v14283_v42, %s12439_s16  ;;  %v14478_v42 = vpop.permute.xlu0 %3772 }
 0x4a9   : > { %5976 = vperm.xlu0 %11616, %v5870_v1   ;;  %v12011_v1 = vld [vmem:[%s17083_s5 + $0x2e0] ss:$8 sps:$4 sm:$0xff]  }
 0x4ac   : > { %4972 = vrot.lane.b32.xlu1 %v14297_v43, %s12438_s15  ;;  %4422 = vmatmul.mubr.bf16.gmra.mrb[216].mxu1 %v11963_v39  ;;  %v14488_v14 = vpop.permute.xlu0 %3774 }
 0x4ad   : > { %5906 = vperm.xlu0 %11616, %v5856_v27   ;;  %4429 = vmatprep.mubr.bf16.mxu1 %v11966_v60  ;;  %v3801_v63 = vsel %vm562_vm0, %v14488_v14, 0 }
 0x4b0   : > { %5422 = vrot.lane.b32.xlu1 %v14297_v43, %s12439_s16  ;;  %v14502_v43 = vpop.permute.xlu0 %3776 }
 0x4b1   : > { %5986 = vperm.xlu0 %11616, %v5872_v24   ;;  %v3802_v30 = vsel %vm562_vm0, %v14502_v43, 0  ;;  %v5873_v24 = vld [vmem:[%s17084_s6 + $0xa8] sm:$0xff] }
 0x4b2   : > { %v3781_v21 = vpop.permute.xlu1 %3780 }
 0x4b3   : > { %11523 = vmatprep.subr.msk.bf16.mxu0 %vm562_vm0, %v3781_v21 }
 0x4b4   : > { %4974 = vrot.lane.b32.xlu1 %v14311_v45, %s12438_s15  ;;  %10350 = vmatpush3.bf16.msra.mxu0 %v3796_v33  ;;  %v14512_v5 = vpop.permute.xlu0 %3778  ;;  %v12017_v33 = vld [vmem:[%s17083_s5 + $0x2f0] ss:$8 sps:$4 sm:$0xff]  }
 0x4b5   : > { %5916 = vperm.xlu0 %11616, %v5858_v16   ;;  %4430 = vmatmul.mubr.bf16.gmra.mrb[220].mxu1 %v11969_v55  ;;  %v3803_v27 = vsel %vm562_vm0, %v14512_v5, 0  ;;  %v11928_v55 = vld [vmem:[%s17083_s5 + $0x14] ss:$8 sps:$4 sm:$0xff]   ;;  %v11932_v5 = vld [vmem:[%s17083_s5 + $0x10] ss:$8 sps:$4 sm:$0xff]  }
 0x4b6   : > { %4437 = vmatprep.mubr.bf16.mxu1 %v11972_v38  ;;  %v5859_v38 = vld [vmem:[%s17084_s6 + $0x38] sm:$0xff] }
 0x4b8   : > { %5424 = vrot.lane.b32.xlu1 %v14311_v45, %s12439_s16  ;;  %v5876_v45 = vld [vmem:[%s17084_s6 + $0xc0] sm:$0xff]  ;;  %v14529_v58 = vpop.permute.xlu0 %4502 }
 0x4b9   : > { %5996 = vperm.xlu0 %11616, %v5874_v59   ;;  %v4534_v21 = vsel %vm566_vm1, %v14529_v58, 0  ;;  %v12023_v59 = vld [vmem:[%s17083_s5 + $0x304] ss:$8 sps:$4 sm:$0xff]  }
 0x4ba   : > { %v3783_v28 = vpop.permute.xlu1 %3782  ;;  %v5861_v58 = vld [vmem:[%s17084_s6 + $0x48] sm:$0xff] }
 0x4bb   : > { %11524 = vmatprep.subr.msk.bf16.mxu0 %vm562_vm0, %v3783_v28  ;;  %v5875_v28 = vld [vmem:[%s17084_s6 + $0xb8] sm:$0xff] }
 0x4bc   : > { %4976 = vrot.lane.b32.xlu1 %v14325_v4, %s12438_s15  ;;  %10352 = vmatpush3.bf16.msra.mxu0 %v3797_v31 }
 0x4bd   : > { %5926 = vperm.xlu0 %11616, %v5860_v56   ;;  %4438 = vmatmul.mubr.bf16.gmra.mrb[224].mxu1 %v11975_v11  ;;  %v11934_v56 = vld [vmem:[%s17083_s5 + $0x24] ss:$8 sps:$4 sm:$0xff]  }
 0x4be   : > { %4445 = vmatprep.mubr.bf16.mxu1 %v11978_v19 }
 0x4c0   : > { %5426 = vrot.lane.b32.xlu1 %v14325_v4, %s12439_s16  ;;  %v14548_v4 = vpop.permute.xlu0 %4504 }
 0x4c1   : > { %6006 = vperm.xlu0 %11616, %v5876_v45   ;;  %v4535_v11 = vsel %vm566_vm1, %v14548_v4, 0  ;;  %v11940_v4 = vld [vmem:[%s17083_s5 + $0x34] ss:$8 sps:$4 sm:$0xff]  }
 0x4c2   : > { %v3785_v12 = vpop.permute.xlu1 %3784 }
 0x4c3   : > { %11525 = vmatprep.subr.msk.bf16.mxu0 %vm562_vm0, %v3785_v12 }
 0x4c4   : > { %4978 = vrot.lane.b32.xlu1 %v14339_v32, %s12438_s15  ;;  %10354 = vmatpush3.bf16.msra.mxu0 %v3798_v10  ;;  %v5877_v10 = vld [vmem:[%s17084_s6 + $0xc8] sm:$0xff] }
 0x4c5   : > { %5936 = vperm.xlu0 %11616, %v5862_v57   ;;  %4446 = vmatmul.mubr.bf16.gmra.mrb[228].mxu1 %v11981_v25  ;;  %v11938_v57 = vld [vmem:[%s17083_s5 + $0x20] ss:$8 sps:$4 sm:$0xff]  }
 0x4c6   : > { %4453 = vmatprep.mubr.bf16.mxu1 %v11984_v29 }
 0x4c8   : > { %5428 = vrot.lane.b32.xlu1 %v14339_v32, %s12439_s16  ;;  %v14568_v32 = vpop.permute.xlu0 %4506 }
 0x4c9   : > { %6016 = vperm.xlu0 %11616, %v5878_v23   ;;  %v4536_v45 = vsel %vm566_vm1, %v14568_v32, 0  ;;  %v11944_v32 = vld [vmem:[%s17083_s5 + $0x30] ss:$8 sps:$4 sm:$0xff]  }
 0x4ca   : > { %v3787_v15 = vpop.permute.xlu1 %3786 }
 0x4cb   : > { %11526 = vmatprep.subr.msk.bf16.mxu0 %vm562_vm0, %v3787_v15  ;;  %v5863_v15 = vld [vmem:[%s17084_s6 + $0x58] sm:$0xff] }
 0x4cc   : > { %4980 = vrot.lane.b32.xlu1 %v14356_v41, %s12438_s15  ;;  %10356 = vmatpush3.bf16.msra.mxu0 %v3799_v47  ;;  %v14580_v6 = vpop.permute.xlu0 %4508 }
 0x4cd   : > { %5946 = vperm.xlu0 %11616, %v5864_v17   ;;  %4454 = vmatmul.mubr.bf16.gmra.mrb[232].mxu1 %v11987_v48  ;;  %v4537_v12 = vsel %vm566_vm1, %v14580_v6, 0 }
 0x4ce   : > { %4461 = vmatprep.mubr.bf16.mxu1 %v11990_v40 }
 0x4d0   : > { %5430 = vrot.lane.b32.xlu1 %v14356_v41, %s12439_s16  ;;  %v3800_v41 = vsel %vm562_vm0, %v14478_v42, 0  ;;  %v14598_v49 = vpop.permute.xlu0 %4510  ;;  %v11922_v42 = vld [vmem:[%s17083_s5] ss:$8 sps:$4 sm:$0xff]  }
 0x4d1   : > { %6026 = vperm.xlu0 %11616, %v5880_v13   ;;  %v4538_v48 = vsel %vm566_vm1, %v14598_v49, 0  ;;  %v5879_v13 = vld [vmem:[%s17084_s6 + $0xd8] sm:$0xff]  ;;  %v11950_v49 = vld [vmem:[%s17083_s5 + $0x40] ss:$8 sps:$4 sm:$0xff]  }
 0x4d2   : > { %v3789_v36 = vpop.permute.xlu1 %3788 }
 0x4d3   : > { %11527 = vmatprep.subr.msk.bf16.mxu0 %vm562_vm0, %v3789_v36 }
 0x4d4   : > { %4982 = vrot.lane.b32.xlu1 %v14371_v9, %s12438_s15  ;;  %10358 = vmatpush3.bf16.msra.mxu0 %v3800_v41  ;;  %v14619_v50 = vpop.permute.xlu0 %4512 }
 0x4d5   : > { %5956 = vperm.xlu0 %11616, %v5866_v8   ;;  %4462 = vmatmul.mubr.bf16.gmra.mrb[236].mxu1 %v11993_v46  ;;  %v4539_v47 = vsel %vm566_vm1, %v14619_v50, 0  ;;  %v11946_v46 = vld [vmem:[%s17083_s5 + $0x44] ss:$8 sps:$4 sm:$0xff]  }
 0x4d6   : > { %4469 = vmatprep.mubr.bf16.mxu1 %v11996_v53  ;;  %v5865_v53 = vld [vmem:[%s17084_s6 + $0x68] sm:$0xff] }
 0x4d8   : > { %5432 = vrot.lane.b32.xlu1 %v14371_v9, %s12439_s16  ;;  %v5869_v9 = vld [vmem:[%s17084_s6 + $0x88] sm:$0xff]  ;;  %v14635_v18 = vpop.permute.xlu0 %4514 }
 0x4d9   : > { %6036 = vperm.xlu0 %11616, %v5882_v37   ;;  %v4540_v36 = vsel %vm566_vm1, %v14635_v18, 0 }
 0x4da   : > { %v3791_v62 = vpop.permute.xlu1 %3790 }
 0x4db   : > { %11528 = vmatprep.subr.msk.bf16.mxu0 %vm562_vm0, %v3791_v62 }
 0x4dc   : > { %5891 = vperm.xlu1 %11617, %v5853_v34   ;;  %10360 = vmatpush3.bf16.msra.mxu0 %v3801_v63  ;;  %v14646_v39 = vpop.permute.xlu0 %4516  ;;  %v5881_v34 = vld [vmem:[%s17084_s6 + $0xe8] sm:$0xff] }
 0x4dd   : > { %4470 = vmatmul.mubr.bf16.gmra.mrb[240].mxu1 %v11999_v7  ;;  %v4541_v37 = vsel %vm566_vm1, %v14646_v39, 0  ;;  %v11952_v7 = vld [vmem:[%s17083_s5 + $0x54] ss:$8 sps:$4 sm:$0xff]  }
 0x4de   : > { %4477 = vmatprep.mubr.bf16.mxu1 %v12002_v61  ;;  %v11964_v39 = vld [vmem:[%s17083_s5 + $0x74] ss:$8 sps:$4 sm:$0xff]  }
 0x4e0   : > { %5971 = vperm.xlu1 %11617, %v5869_v9   ;;  %v14670_v16 = vpop.permute.xlu0 %4952  ;;  %v5867_v9 = vld [vmem:[%s17084_s6 + $0x78] sm:$0xff] }
 0x4e1   : > { %v4984_v63 = vsel %vm571_vm2, %v14670_v16, 0 }
 0x4e2   : > { %v3793_v44 = vpop.permute.xlu1 %3792 }
 0x4e3   : > { %11529 = vmatprep.subr.msk.bf16.mxu0 %vm562_vm0, %v3793_v44  ;;  %v5883_v44 = vld [vmem:[%s17084_s6 + $0xf8] sm:$0xff] }
 0x4e4   : > { %5901 = vperm.xlu1 %11617, %v5855_v52   ;;  %10362 = vmatpush3.bf16.msra.mxu0 %v3802_v30  ;;  %v14695_v19 = vpop.permute.xlu0 %5402  ;;  %v11956_v52 = vld [vmem:[%s17083_s5 + $0x50] ss:$8 sps:$4 sm:$0xff]  }
 0x4e5   : > { %4478 = vmatmul.mubr.bf16.gmra.mrb[244].mxu1 %v12005_v22 }
 0x4e6   : > { %4485 = vmatprep.mubr.bf16.mxu1 %v12008_v26  ;;  %v11958_v26 = vld [vmem:[%s17083_s5 + $0x64] ss:$8 sps:$4 sm:$0xff]  }
 0x4e8   : > { %5981 = vperm.xlu1 %11617, %v5871_v51   ;;  %v4955_v29 = vpop.permute.xlu0 %4954 }
 0x4e9   : > { %v4985_v18 = vsel %vm571_vm2, %v4955_v29, 0  ;;  %v11986_v29 = vld [vmem:[%s17083_s5 + $0xa0] ss:$8 sps:$4 sm:$0xff]  }
 0x4ea   : > { %v3795_v60 = vpop.permute.xlu1 %3794 }
 0x4eb   : > { %11530 = vmatprep.subr.msk.bf16.mxu0 %vm562_vm0, %v3795_v60 }
 0x4ec   : > { %5911 = vperm.xlu1 %11617, %v5857_v0   ;;  %10364 = vmatpush3.bf16.msra.mxu0 %v3803_v27  ;;  %v14727_v17 = vpop.permute.xlu0 %5404 }
 0x4ed   : > { %4486 = vmatmul.mubr.bf16.gmra.mrb[248].mxu1 %v12011_v1  ;;  %v11962_v1 = vld [vmem:[%s17083_s5 + $0x60] ss:$8 sps:$4 sm:$0xff]  }
 0x4ee   : > { %v4519_v14 = vpop.permute.xlu1 %4518  ;;  %4493 = vmatprep.mubr.bf16.mxu1 %v12014_v2 }
 0x4ef   : > { %4053 = vmatmul.mubr.bf16.vlgmr.msra.gmra.mrb[192].mxu0 %v11922_v42  ;;  %11531 = vmatprep.subr.msk.bf16.mxu0 %vm566_vm1, %v4519_v14 }
 0x4f0   : > { %5991 = vperm.xlu1 %11617, %v5873_v24   ;;  %10574 = vmatpush3.bf16.msra.mxu0 %v4534_v21  ;;  %v4957_v8 = vpop.permute.xlu0 %4956  ;;  %v11968_v24 = vld [vmem:[%s17083_s5 + $0x70] ss:$8 sps:$4 sm:$0xff]  }
 0x4f1   : > { %4060 = vmatprep.mubr.bf16.mxu0 %v11928_v55  ;;  %v4986_v2 = vsel %vm571_vm2, %v4957_v8, 0  ;;  %v11970_v55 = vld [vmem:[%s17083_s5 + $0x84] ss:$8 sps:$4 sm:$0xff]   ;;  %v11998_v8 = vld [vmem:[%s17083_s5 + $0xc0] ss:$8 sps:$4 sm:$0xff]  }
 0x4f2   : > { %v4521_v43 = vpop.permute.xlu1 %4520 }
 0x4f3   : > { %11532 = vmatprep.subr.msk.bf16.mxu0 %vm566_vm1, %v4521_v43 }
 0x4f4   : > { %5921 = vperm.xlu1 %11617, %v5859_v38   ;;  %10576 = vmatpush3.bf16.msra.mxu0 %v4535_v11  ;;  %v14765_v62 = vpop.permute.xlu0 %5406 }
 0x4f5   : > { %4494 = vmatmul.mubr.bf16.gmra.mrb[252].mxu1 %v12017_v33  ;;  %v11974_v33 = vld [vmem:[%s17083_s5 + $0x80] ss:$8 sps:$4 sm:$0xff]  }
 0x4f6   : > { %v4523_v31 = vpop.permute.xlu1 %4522  ;;  %5241 = vmatprep.mubr.bf16.mxu1 %v12023_v59  ;;  %v11976_v59 = vld [vmem:[%s17083_s5 + $0x94] ss:$8 sps:$4 sm:$0xff]  }
 0x4f7   : > { %4061 = vmatmul.mubr.bf16.gmra.mrb[196].mxu0 %v11932_v5  ;;  %11533 = vmatprep.subr.msk.bf16.mxu0 %vm566_vm1, %v4523_v31  ;;  %v11980_v31 = vld [vmem:[%s17083_s5 + $0x90] ss:$8 sps:$4 sm:$0xff]  }
 0x4f8   : > { %6001 = vperm.xlu1 %11617, %v5875_v28   ;;  %10578 = vmatpush3.bf16.msra.mxu0 %v4536_v45  ;;  %v4959_v22 = vpop.permute.xlu0 %4958  ;;  %v11982_v45 = vld [vmem:[%s17083_s5 + $0xa4] ss:$8 sps:$4 sm:$0xff]  }
 0x4f9   : > { %4068 = vmatprep.mubr.bf16.mxu0 %v11934_v56  ;;  %v4987_v16 = vsel %vm571_vm2, %v4959_v22, 0  ;;  %v12033_v22 = vld [vmem:[%s17083_s5 + $0x320] ss:$8 sps:$4 sm:$0xff]  }
 0x4fa   : > { %v4525_v25 = vpop.permute.xlu1 %4524 }
 0x4fb   : > { %11534 = vmatprep.subr.msk.bf16.mxu0 %vm566_vm1, %v4525_v25 }
 0x4fc   : > { %5931 = vperm.xlu1 %11617, %v5861_v58   ;;  %10580 = vmatpush3.bf16.msra.mxu0 %v4537_v12  ;;  %v14790_v51 = vpop.permute.xlu0 %5408 }
 0x4fe   : > { %v4527_v23 = vpop.permute.xlu1 %4526 }
 0x4ff   : > { %4069 = vmatmul.mubr.bf16.gmra.mrb[200].mxu0 %v11938_v57  ;;  %11535 = vmatprep.subr.msk.bf16.mxu0 %vm566_vm1, %v4527_v23 }
 0x500   : > { %6011 = vperm.xlu1 %11617, %v5877_v10   ;;  %10582 = vmatpush3.bf16.msra.mxu0 %v4538_v48  ;;  %v4961_v27 = vpop.permute.xlu0 %4960  ;;  %v11988_v10 = vld [vmem:[%s17083_s5 + $0xb4] ss:$8 sps:$4 sm:$0xff]  }
 0x501   : > { %4076 = vmatprep.mubr.bf16.mxu0 %v11940_v4  ;;  %v4988_v5 = vsel %vm571_vm2, %v4961_v27, 0  ;;  %v12012_v27 = vld [vmem:[%s17083_s5 + $0xf4] ss:$8 sps:$4 sm:$0xff]  }
 0x502   : > { %v4529_v40 = vpop.permute.xlu1 %4528 }
 0x503   : > { %11536 = vmatprep.subr.msk.bf16.mxu0 %vm566_vm1, %v4529_v40  ;;  %v11992_v40 = vld [vmem:[%s17083_s5 + $0xb0] ss:$8 sps:$4 sm:$0xff]  }
 0x504   : > { %5941 = vperm.xlu1 %11617, %v5863_v15   ;;  %10584 = vmatpush3.bf16.msra.mxu0 %v4539_v47  ;;  %v14812_v14 = vpop.permute.xlu0 %5410 }
 0x506   : > { %v4531_v6 = vpop.permute.xlu1 %4530 }
 0x507   : > { %4077 = vmatmul.mubr.bf16.gmra.mrb[204].mxu0 %v11944_v32  ;;  %11537 = vmatprep.subr.msk.bf16.mxu0 %vm566_vm1, %v4531_v6  ;;  %v11994_v32 = vld [vmem:[%s17083_s5 + $0xc4] ss:$8 sps:$4 sm:$0xff]   ;;  %v12021_v6 = vld [vmem:[%s17083_s5 + $0x300] ss:$8 sps:$4 sm:$0xff]  }
 0x508   : > { %6021 = vperm.xlu1 %11617, %v5879_v13   ;;  %10586 = vmatpush3.bf16.msra.mxu0 %v4540_v36  ;;  %v4963_v43 = vpop.permute.xlu0 %4962  ;;  %v12029_v36 = vld [vmem:[%s17083_s5 + $0x314] ss:$8 sps:$4 sm:$0xff]  }
 0x509   : > { %4084 = vmatprep.mubr.bf16.mxu0 %v11946_v46  ;;  %v4989_v25 = vsel %vm571_vm2, %v4963_v43, 0 }
 0x50a   : > { %v4533_v41 = vpop.permute.xlu1 %4532 }
 0x50b   : > { %11538 = vmatprep.subr.msk.bf16.mxu0 %vm566_vm1, %v4533_v41  ;;  %v12027_v41 = vld [vmem:[%s17083_s5 + $0x310] ss:$8 sps:$4 sm:$0xff]  }
 0x50c   : > { %5951 = vperm.xlu1 %11617, %v5865_v53   ;;  %10588 = vmatpush3.bf16.msra.mxu0 %v4541_v37  ;;  %v14830_v28 = vpop.permute.xlu0 %5412  ;;  %v12000_v53 = vld [vmem:[%s17083_s5 + $0xd4] ss:$8 sps:$4 sm:$0xff]  }
 0x50e   : > { %v4969_v61 = vpop.permute.xlu1 %4968 }
 0x50f   : > { %4085 = vmatmul.mubr.bf16.gmra.mrb[208].mxu0 %v11950_v49  ;;  %11539 = vmatprep.subr.msk.bf16.mxu1 %vm571_vm2, %v4969_v61  ;;  %v12035_v49 = vld [vmem:[%s17083_s5 + $0x324] ss:$8 sps:$4 sm:$0xff]  }
 0x510   : > { %6031 = vperm.xlu1 %11617, %v5881_v34   ;;  %10686 = vmatpush3.bf16.msra.mxu1 %v4984_v63  ;;  %v4965_v12 = vpop.permute.xlu0 %4964 }
 0x511   : > { %4092 = vmatprep.mubr.bf16.mxu0 %v11952_v7  ;;  %v4990_v48 = vsel %vm571_vm2, %v4965_v12, 0 }
 0x512   : > { %v5419_v50 = vpop.permute.xlu1 %5418 }
 0x513   : > { %11547 = vmatprep.subr.msk.bf16.mxu0 %vm575_vm3, %v5419_v50 }
 0x514   : > { %5961 = vperm.xlu1 %11617, %v5867_v9   ;;  %v14852_v4 = vpop.permute.xlu0 %5414  ;;  %v12004_v9 = vld [vmem:[%s17083_s5 + $0xd0] ss:$8 sps:$4 sm:$0xff]  }
 0x516   : > { %v4971_v30 = vpop.permute.xlu1 %4970 }
 0x517   : > { %4093 = vmatmul.mubr.bf16.gmra.mrb[212].mxu0 %v11956_v52  ;;  %11540 = vmatprep.subr.msk.bf16.mxu1 %vm571_vm2, %v4971_v30  ;;  %v12006_v52 = vld [vmem:[%s17083_s5 + $0xe4] ss:$8 sps:$4 sm:$0xff]  }
 0x518   : > { %6041 = vperm.xlu1 %11617, %v5883_v44   ;;  %10688 = vmatpush3.bf16.msra.mxu1 %v4985_v18  ;;  %v4967_v47 = vpop.permute.xlu0 %4966 }
 0x519   : > { %4100 = vmatprep.mubr.bf16.mxu0 %v11958_v26  ;;  %v4991_v46 = vsel %vm571_vm2, %v4967_v47, 0  ;;  %v12041_v26 = vld [vmem:[%s17083_s5 + $0x334] ss:$8 sps:$4 sm:$0xff]  }
 0x51a   : > { %v14792_v0 = vpop.permute.xlu1 %5420  ;;  %v12026_v47 = vld [vmem:[%s17083_s5 + $0x114] ss:$8 sps:$4 sm:$0xff]  }
 0x51e   : > { %v4973_v60 = vpop.permute.xlu1 %4972 }
 0x51f   : > { %4101 = vmatmul.mubr.bf16.gmra.mrb[216].mxu0 %v11962_v1  ;;  %11541 = vmatprep.subr.msk.bf16.mxu1 %vm571_vm2, %v4973_v60  ;;  %v12010_v60 = vld [vmem:[%s17083_s5 + $0xe0] ss:$8 sps:$4 sm:$0xff]  }
 0x520   : > { %10690 = vmatpush3.bf16.msra.mxu1 %v4986_v2  ;;  %4108 = vmatprep.mubr.bf16.mxu0 %v11964_v39 }
 0x522   : > { %v14804_v42 = vpop.permute.xlu1 %5422 }
 0x526   : > { %v4975_v21 = vpop.permute.xlu1 %4974 }
 0x527   : > { %4109 = vmatmul.mubr.bf16.gmra.mrb[220].mxu0 %v11968_v24  ;;  %11542 = vmatprep.subr.msk.bf16.mxu1 %vm571_vm2, %v4975_v21  ;;  %v12039_v24 = vld [vmem:[%s17083_s5 + $0x330] ss:$8 sps:$4 sm:$0xff]   ;;  %v12047_v21 = vld [vmem:[%s17083_s5 + $0x344] ss:$8 sps:$4 sm:$0xff]  }
 0x528   : > { %10692 = vmatpush3.bf16.msra.mxu1 %v4987_v16  ;;  %4116 = vmatprep.mubr.bf16.mxu0 %v11970_v55 }
 0x52a   : > { %v14818_v38 = vpop.permute.xlu1 %5424 }
 0x52e   : > { %v4977_v11 = vpop.permute.xlu1 %4976 }
 0x52f   : > { %4117 = vmatmul.mubr.bf16.gmra.mrb[224].mxu0 %v11974_v33  ;;  %11543 = vmatprep.subr.msk.bf16.mxu1 %vm571_vm2, %v4977_v11  ;;  %v12016_v11 = vld [vmem:[%s17083_s5 + $0xf0] ss:$8 sps:$4 sm:$0xff]  }
 0x530   : > { %10694 = vmatpush3.bf16.msra.mxu1 %v4988_v5  ;;  %4124 = vmatprep.mubr.bf16.mxu0 %v11976_v59 }
 0x532   : > { %v14832_v56 = vpop.permute.xlu1 %5426 }
 0x536   : > { %v4979_v58 = vpop.permute.xlu1 %4978 }
 0x537   : > { %4125 = vmatmul.mubr.bf16.gmra.mrb[228].mxu0 %v11980_v31  ;;  %11544 = vmatprep.subr.msk.bf16.mxu1 %vm571_vm2, %v4979_v58  ;;  %v12020_v31 = vld [vmem:[%s17083_s5 + $0x104] ss:$8 sps:$4 sm:$0xff]  }
 0x538   : > { %10696 = vmatpush3.bf16.msra.mxu1 %v4989_v25  ;;  %4132 = vmatprep.mubr.bf16.mxu0 %v11982_v45  ;;  %v12045_v45 = vld [vmem:[%s17083_s5 + $0x340] ss:$8 sps:$4 sm:$0xff]   ;;  %v12053_v25 = vld [vmem:[%s17083_s5 + $0x354] ss:$8 sps:$4 sm:$0xff]  }
 0x53a   : > { %v14844_v57 = vpop.permute.xlu1 %5428 }
 0x53e   : > { %v4981_v23 = vpop.permute.xlu1 %4980 }
 0x53f   : > { %4133 = vmatmul.mubr.bf16.gmra.mrb[232].mxu0 %v11986_v29  ;;  %11545 = vmatprep.subr.msk.bf16.mxu1 %vm571_vm2, %v4981_v23 }
 0x540   : > { %10698 = vmatpush3.bf16.msra.mxu1 %v4990_v48  ;;  %4140 = vmatprep.mubr.bf16.mxu0 %v11988_v10  ;;  %v12018_v48 = vld [vmem:[%s17083_s5 + $0x100] ss:$8 sps:$4 sm:$0xff]  }
 0x542   : > { %v14858_v15 = vpop.permute.xlu1 %5430 }
 0x546   : > { %v4983_v13 = vpop.permute.xlu1 %4982 }
 0x547   : > { %4141 = vmatmul.mubr.bf16.gmra.mrb[236].mxu0 %v11992_v40  ;;  %11546 = vmatprep.subr.msk.bf16.mxu1 %vm571_vm2, %v4983_v13  ;;  %v12051_v13 = vld [vmem:[%s17083_s5 + $0x350] ss:$8 sps:$4 sm:$0xff]  }
 0x548   : > { %10700 = vmatpush3.bf16.msra.mxu1 %v4991_v46  ;;  %4148 = vmatprep.mubr.bf16.mxu0 %v11994_v32  ;;  %v5434_v32 = vsel %vm575_vm3, %v14695_v19, 0 }
 0x54b   : > { %5242 = vmatmul.mubr.bf16.vlgmr.msra.gmra.mrb[0].mxu1 %v12021_v6  ;;  %v12059_v6 = vld [vmem:[%s17083_s5 + $0x364] ss:$8 sps:$4 sm:$0xff]  }
 0x54c   : > { %5249 = vmatprep.mubr.bf16.mxu1 %v12029_v36 }
 0x54f   : > { %4149 = vmatmul.mubr.bf16.gmra.mrb[240].mxu0 %v11998_v8  ;;  %v10477_v37 = vpop.f32.mrb[192].mxu1 }
 0x550   : > { %4156 = vmatprep.mubr.bf16.mxu0 %v12000_v53  ;;  %v10478_v34 = vpop.f32.mrb[193].mxu1 }
 0x551   : > { %v14888_v7 = vadd.f32 %v10478_v34, %v10477_v37  ;;  %v10480_v61 = vpop.f32.mrb[194].mxu1  ;;  %v12024_v37 = vld [vmem:[%s17083_s5 + $0x110] ss:$8 sps:$4 sm:$0xff]   ;;  %v12057_v34 = vld [vmem:[%s17083_s5 + $0x360] ss:$8 sps:$4 sm:$0xff]  }
 0x552   : > { %v10481_v63 = vpop.f32.mrb[195].mxu1 }
 0x553   : > { %5250 = vmatmul.mubr.bf16.gmra.mrb[4].mxu1 %v12027_v41  ;;  %v14893_v50 = vadd.f32 %v10481_v63, %v10480_v61  ;;  %v5435_v41 = vsel %vm575_vm3, %v14727_v17, 0  ;;  %v5436_v17 = vsel %vm575_vm3, %v14765_v62, 0  ;;  %v12065_v63 = vld [vmem:[%s17083_s5 + $0x374] ss:$8 sps:$4 sm:$0xff]  }
 0x554   : > { %5257 = vmatprep.mubr.bf16.mxu1 %v12035_v49 }
 0x557   : > { %4157 = vmatmul.mubr.bf16.gmra.mrb[244].mxu0 %v12004_v9  ;;  %v10483_v44 = vpop.f32.mrb[196].mxu1 }
 0x558   : > { %4164 = vmatprep.mubr.bf16.mxu0 %v12006_v52  ;;  %v10484_v30 = vpop.f32.mrb[197].mxu1 }
 0x559   : > { %v14904_v18 = vadd.f32 %v10484_v30, %v10483_v44  ;;  %v10486_v1 = vpop.f32.mrb[198].mxu1  ;;  %v12030_v44 = vld [vmem:[%s17083_s5 + $0x120] ss:$8 sps:$4 sm:$0xff]   ;;  %v12063_v30 = vld [vmem:[%s17083_s5 + $0x370] ss:$8 sps:$4 sm:$0xff]  }
 0x55a   : > { %v10487_v39 = vpop.f32.mrb[199].mxu1 }
 0x55b   : > { %5258 = vmatmul.mubr.bf16.gmra.mrb[8].mxu1 %v12033_v22  ;;  %v14909_v2 = vadd.f32 %v10487_v39, %v10486_v1  ;;  %v5437_v22 = vsel %vm575_vm3, %v14790_v51, 0  ;;  %v5438_v51 = vsel %vm575_vm3, %v14812_v14, 0  ;;  %v12071_v39 = vld [vmem:[%s17083_s5 + $0x384] ss:$8 sps:$4 sm:$0xff]  }
 0x55c   : > { %5265 = vmatprep.mubr.bf16.mxu1 %v12041_v26 }
 0x55f   : > { %4165 = vmatmul.mubr.bf16.gmra.mrb[248].mxu0 %v12010_v60  ;;  %v10489_v55 = vpop.f32.mrb[200].mxu1 }
 0x560   : > { %4172 = vmatprep.mubr.bf16.mxu0 %v12012_v27  ;;  %v10490_v16 = vpop.f32.mrb[201].mxu1 }
 0x561   : > { %v14920_v33 = vadd.f32 %v10490_v16, %v10489_v55  ;;  %v10492_v43 = vpop.f32.mrb[202].mxu1  ;;  %v12036_v55 = vld [vmem:[%s17083_s5 + $0x130] ss:$8 sps:$4 sm:$0xff]   ;;  %v5417_v16 = vpop.permute.xlu0 %5416 }
 0x562   : > { %v10493_v59 = vpop.f32.mrb[203].mxu1 }
 0x563   : > { %5266 = vmatmul.mubr.bf16.gmra.mrb[12].mxu1 %v12039_v24  ;;  %v14925_v5 = vadd.f32 %v10493_v59, %v10492_v43  ;;  %v5439_v24 = vsel %vm575_vm3, %v14830_v28, 0  ;;  %v5440_v28 = vsel %vm575_vm3, %v14852_v4, 0  ;;  %v12069_v43 = vld [vmem:[%s17083_s5 + $0x380] ss:$8 sps:$4 sm:$0xff]   ;;  %v5433_v59 = vpop.permute.xlu1 %5432 }
 0x564   : > { %5273 = vmatprep.mubr.bf16.mxu1 %v12047_v21 }
 0x567   : > { %4173 = vmatmul.mubr.bf16.gmra.mrb[252].mxu0 %v12016_v11  ;;  %v10495_v58 = vpop.f32.mrb[204].mxu1  ;;  %v12077_v11 = vld [vmem:[%s17083_s5 + $0x394] ss:$8 sps:$4 sm:$0xff]  }
 0x568   : > { %4791 = vmatprep.mubr.bf16.mxu0 %v12020_v31  ;;  %v10496_v12 = vpop.f32.mrb[205].mxu1 }
 0x569   : > { %v14936_v29 = vadd.f32 %v10496_v12, %v10495_v58  ;;  %v10498_v10 = vpop.f32.mrb[206].mxu1  ;;  %v5441_v58 = vsel %vm575_vm3, %v5417_v16, 0 }
 0x56a   : > { %v10499_v23 = vpop.f32.mrb[207].mxu1 }
 0x56b   : > { %5274 = vmatmul.mubr.bf16.gmra.mrb[16].mxu1 %v12045_v45  ;;  %v14941_v40 = vadd.f32 %v10499_v23, %v10498_v10  ;;  %v12050_v10 = vld [vmem:[%s17083_s5 + $0x154] ss:$8 sps:$4 sm:$0xff]  }
 0x56c   : > { %5281 = vmatprep.mubr.bf16.mxu1 %v12053_v25  ;;  %v12042_v25 = vld [vmem:[%s17083_s5 + $0x140] ss:$8 sps:$4 sm:$0xff]  }
 0x56f   : > { %4792 = vmatmul.mubr.bf16.vlgmr.msra.gmra.mrb[0].mxu0 %v12018_v48  ;;  %v10501_v46 = vpop.f32.mrb[208].mxu1  ;;  %v12075_v48 = vld [vmem:[%s17083_s5 + $0x390] ss:$8 sps:$4 sm:$0xff]  }
 0x570   : > { %10798 = vmatpush3.bf16.msra.mxu0 %v5434_v32  ;;  %4799 = vmatprep.mubr.bf16.mxu0 %v12026_v47  ;;  %v10502_v36 = vpop.f32.mrb[209].mxu1  ;;  %v12083_v47 = vld [vmem:[%s17083_s5 + $0x3a4] ss:$8 sps:$4 sm:$0xff]  }
 0x571   : > { %11548 = vmatprep.subr.msk.bf16.mxu0 %vm575_vm3, %v14792_v0  ;;  %v14958_v8 = vadd.f32 %v10502_v36, %v10501_v46  ;;  %v10504_v19 = vpop.f32.mrb[210].mxu1  ;;  %v12032_v0 = vld [vmem:[%s17083_s5 + $0x124] ss:$8 sps:$4 sm:$0xff]   ;;  %v12048_v36 = vld [vmem:[%s17083_s5 + $0x150] ss:$8 sps:$4 sm:$0xff]  }
 0x572   : > { %v10505_v53 = vpop.f32.mrb[211].mxu1 }
 0x573   : > { %5282 = vmatmul.mubr.bf16.gmra.mrb[20].mxu1 %v12051_v13  ;;  %v14966_v49 = vadd.f32 %v10505_v53, %v10504_v19  ;;  %v12056_v53 = vld [vmem:[%s17083_s5 + $0x164] ss:$8 sps:$4 sm:$0xff]  }
 0x574   : > { %10800 = vmatpush3.bf16.msra.mxu0 %v5435_v41  ;;  %5289 = vmatprep.mubr.bf16.mxu1 %v12059_v6 }
 0x575   : > { %11549 = vmatprep.subr.msk.bf16.mxu0 %vm575_vm3, %v14804_v42 }
 0x577   : > { %4800 = vmatmul.mubr.bf16.gmra.mrb[4].mxu0 %v12024_v37  ;;  %v10507_v61 = vpop.f32.mrb[212].mxu1  ;;  %v12081_v37 = vld [vmem:[%s17083_s5 + $0x3a0] ss:$8 sps:$4 sm:$0xff]  }
 0x578   : > { %10802 = vmatpush3.bf16.msra.mxu0 %v5436_v17  ;;  %4807 = vmatprep.mubr.bf16.mxu0 %v12032_v0  ;;  %v10508_v9 = vpop.f32.mrb[213].mxu1  ;;  %v12089_v0 = vld [vmem:[%s17083_s5 + $0x3b4] ss:$8 sps:$4 sm:$0xff]  }
 0x579   : > { %11550 = vmatprep.subr.msk.bf16.mxu0 %vm575_vm3, %v14818_v38  ;;  %v14986_v42 = vadd.f32 %v10508_v9, %v10507_v61  ;;  %v10510_v62 = vpop.f32.mrb[214].mxu1  ;;  %v12038_v38 = vld [vmem:[%s17083_s5 + $0x134] ss:$8 sps:$4 sm:$0xff]   ;;  %v12054_v9 = vld [vmem:[%s17083_s5 + $0x160] ss:$8 sps:$4 sm:$0xff]  }
 0x57a   : > { %v10511_v52 = vpop.f32.mrb[215].mxu1 }
 0x57b   : > { %5290 = vmatmul.mubr.bf16.gmra.mrb[24].mxu1 %v12057_v34  ;;  %v14994_v26 = vadd.f32 %v10511_v52, %v10510_v62  ;;  %v12062_v52 = vld [vmem:[%s17083_s5 + $0x174] ss:$8 sps:$4 sm:$0xff]  }
 0x57c   : > { %10804 = vmatpush3.bf16.msra.mxu0 %v5437_v22  ;;  %5297 = vmatprep.mubr.bf16.mxu1 %v12065_v63 }
 0x57d   : > { %11551 = vmatprep.subr.msk.bf16.mxu0 %vm575_vm3, %v14832_v56 }
 0x57f   : > { %4808 = vmatmul.mubr.bf16.gmra.mrb[8].mxu0 %v12030_v44  ;;  %v10513_v1 = vpop.f32.mrb[216].mxu1  ;;  %v12087_v44 = vld [vmem:[%s17083_s5 + $0x3b0] ss:$8 sps:$4 sm:$0xff]  }
 0x580   : > { %10806 = vmatpush3.bf16.msra.mxu0 %v5438_v51  ;;  %4815 = vmatprep.mubr.bf16.mxu0 %v12038_v38  ;;  %v10514_v60 = vpop.f32.mrb[217].mxu1  ;;  %v12095_v38 = vld [vmem:[%s17083_s5 + $0x3c4] ss:$8 sps:$4 sm:$0xff]  }
 0x581   : > { %11552 = vmatprep.subr.msk.bf16.mxu0 %vm575_vm3, %v14844_v57  ;;  %v15014_v56 = vadd.f32 %v10514_v60, %v10513_v1  ;;  %v10516_v14 = vpop.f32.mrb[218].mxu1  ;;  %v12044_v57 = vld [vmem:[%s17083_s5 + $0x144] ss:$8 sps:$4 sm:$0xff]   ;;  %v12060_v60 = vld [vmem:[%s17083_s5 + $0x170] ss:$8 sps:$4 sm:$0xff]  }
 0x582   : > { %v10517_v27 = vpop.f32.mrb[219].mxu1 }
 0x583   : > { %5298 = vmatmul.mubr.bf16.gmra.mrb[28].mxu1 %v12063_v30  ;;  %v15022_v21 = vadd.f32 %v10517_v27, %v10516_v14  ;;  %v12068_v27 = vld [vmem:[%s17083_s5 + $0x184] ss:$8 sps:$4 sm:$0xff]  }
 0x584   : > { %10808 = vmatpush3.bf16.msra.mxu0 %v5439_v24  ;;  %5305 = vmatprep.mubr.bf16.mxu1 %v12071_v39 }
 0x585   : > { %11553 = vmatprep.subr.msk.bf16.mxu0 %vm575_vm3, %v14858_v15 }
 0x587   : > { %4816 = vmatmul.mubr.bf16.gmra.mrb[12].mxu0 %v12036_v55  ;;  %v12093_v55 = vld [vmem:[%s17083_s5 + $0x3c0] ss:$8 sps:$4 sm:$0xff]  }
 0x588   : > { %10810 = vmatpush3.bf16.msra.mxu0 %v5440_v28  ;;  %4823 = vmatprep.mubr.bf16.mxu0 %v12044_v57  ;;  %v10519_v31 = vpop.f32.mrb[220].mxu1  ;;  %v12101_v57 = vld [vmem:[%s17083_s5 + $0x3d4] ss:$8 sps:$4 sm:$0xff]  }
 0x589   : > { %11554 = vmatprep.subr.msk.bf16.mxu0 %vm575_vm3, %v5433_v59  ;;  %v10520_v15 = vpop.f32.mrb[221].mxu1 }
 0x58a   : > { %v15041_v45 = vadd.f32 %v10520_v15, %v10519_v31  ;;  %v10522_v4 = vpop.f32.mrb[222].mxu1  ;;  %v12074_v15 = vld [vmem:[%s17083_s5 + $0x194] ss:$8 sps:$4 sm:$0xff]  }
 0x58b   : > { %5306 = vmatmul.mubr.bf16.gmra.mrb[32].mxu1 %v12069_v43  ;;  %v10523_v12 = vpop.f32.mrb[223].mxu1 }
 0x58c   : > { %10812 = vmatpush3.bf16.msra.mxu0 %v5441_v58  ;;  %5313 = vmatprep.mubr.bf16.mxu1 %v12077_v11  ;;  %v15051_v23 = vadd.f32 %v10523_v12, %v10522_v4  ;;  %v12066_v11 = vld [vmem:[%s17083_s5 + $0x180] ss:$8 sps:$4 sm:$0xff]   ;;  %v12099_v58 = vld [vmem:[%s17083_s5 + $0x3d0] ss:$8 sps:$4 sm:$0xff]  }
 0x58f   : > { %4824 = vmatmul.mubr.bf16.gmra.mrb[16].mxu0 %v12042_v25  ;;  %v12107_v25 = vld [vmem:[%s17083_s5 + $0x3e4] ss:$8 sps:$4 sm:$0xff]  }
 0x590   : > { %4831 = vmatprep.mubr.bf16.mxu0 %v12050_v10  ;;  %v10525_v32 = vpop.f32.mrb[224].mxu1 }
 0x591   : > { %v10526_v13 = vpop.f32.mrb[225].mxu1 }
 0x592   : > { %v15059_v46 = vadd.f32 %v10526_v13, %v10525_v32  ;;  %v10528_v6 = vpop.f32.mrb[226].mxu1  ;;  %v12072_v32 = vld [vmem:[%s17083_s5 + $0x190] ss:$8 sps:$4 sm:$0xff]  }
 0x593   : > { %5314 = vmatmul.mubr.bf16.gmra.mrb[36].mxu1 %v12075_v48  ;;  %v10529_v19 = vpop.f32.mrb[227].mxu1 }
 0x594   : > { %5321 = vmatprep.mubr.bf16.mxu1 %v12083_v47  ;;  %v15067_v41 = vadd.f32 %v10529_v19, %v10528_v6  ;;  %v12080_v6 = vld [vmem:[%s17083_s5 + $0x1a4] ss:$8 sps:$4 sm:$0xff]   ;;  %v12105_v19 = vld [vmem:[%s17083_s5 + $0x3e0] ss:$8 sps:$4 sm:$0xff]  }
 0x597   : > { %4832 = vmatmul.mubr.bf16.gmra.mrb[20].mxu0 %v12048_v36 }
 0x598   : > { %4839 = vmatprep.mubr.bf16.mxu0 %v12056_v53  ;;  %v10531_v17 = vpop.f32.mrb[228].mxu1  ;;  %v12113_v53 = vld [vmem:[%s17083_s5 + $0x3f4] ss:$8 sps:$4 sm:$0xff]  }
 0x599   : > { %v10532_v34 = vpop.f32.mrb[229].mxu1 }
 0x59a   : > { %v15075_v61 = vadd.f32 %v10532_v34, %v10531_v17  ;;  %v10534_v63 = vpop.f32.mrb[230].mxu1 }
 0x59b   : > { %5322 = vmatmul.mubr.bf16.gmra.mrb[40].mxu1 %v12081_v37  ;;  %v10535_v62 = vpop.f32.mrb[231].mxu1 }
 0x59c   : > { %5329 = vmatprep.mubr.bf16.mxu1 %v12089_v0  ;;  %v15083_v22 = vadd.f32 %v10535_v62, %v10534_v63  ;;  %v12078_v63 = vld [vmem:[%s17083_s5 + $0x1a0] ss:$8 sps:$4 sm:$0xff]   ;;  %v12086_v62 = vld [vmem:[%s17083_s5 + $0x1b4] ss:$8 sps:$4 sm:$0xff]  }
 0x59f   : > { %4840 = vmatmul.mubr.bf16.gmra.mrb[24].mxu0 %v12054_v9 }
 0x5a0   : > { %4847 = vmatprep.mubr.bf16.mxu0 %v12062_v52  ;;  %v10537_v51 = vpop.f32.mrb[232].mxu1 }
 0x5a1   : > { %v10538_v30 = vpop.f32.mrb[233].mxu1 }
 0x5a2   : > { %v15091_v1 = vadd.f32 %v10538_v30, %v10537_v51  ;;  %v10540_v39 = vpop.f32.mrb[234].mxu1 }
 0x5a3   : > { %5330 = vmatmul.mubr.bf16.gmra.mrb[44].mxu1 %v12087_v44  ;;  %v10541_v14 = vpop.f32.mrb[235].mxu1  ;;  %v12111_v44 = vld [vmem:[%s17083_s5 + $0x3f0] ss:$8 sps:$4 sm:$0xff]  }
 0x5a4   : > { %5337 = vmatprep.mubr.bf16.mxu1 %v12095_v38  ;;  %v15099_v24 = vadd.f32 %v10541_v14, %v10540_v39 }
 0x5a7   : > { %4848 = vmatmul.mubr.bf16.gmra.mrb[28].mxu0 %v12060_v60 }
 0x5a8   : > { %4855 = vmatprep.mubr.bf16.mxu0 %v12068_v27  ;;  %v10543_v28 = vpop.f32.mrb[236].mxu1  ;;  %v12084_v27 = vld [vmem:[%s17083_s5 + $0x1b0] ss:$8 sps:$4 sm:$0xff]  }
 0x5a9   : > { %v10544_v16 = vpop.f32.mrb[237].mxu1 }
 0x5aa   : > { %v15107_v43 = vadd.f32 %v10544_v16, %v10543_v28  ;;  %v10546_v59 = vpop.f32.mrb[238].mxu1  ;;  %v12092_v16 = vld [vmem:[%s17083_s5 + $0x1c4] ss:$8 sps:$4 sm:$0xff]  }
 0x5ab   : > { %5338 = vmatmul.mubr.bf16.gmra.mrb[48].mxu1 %v12093_v55  ;;  %v10547_v31 = vpop.f32.mrb[239].mxu1 }
 0x5ac   : > { %5345 = vmatprep.mubr.bf16.mxu1 %v12101_v57  ;;  %v15115_v4 = vadd.f32 %v10547_v31, %v10546_v59 }
 0x5af   : > { %4856 = vmatmul.mubr.bf16.gmra.mrb[32].mxu0 %v12066_v11 }
 0x5b0   : > { %4863 = vmatprep.mubr.bf16.mxu0 %v12074_v15  ;;  %v10549_v12 = vpop.f32.mrb[240].mxu1 }
 0x5b1   : > { %v10550_v10 = vpop.f32.mrb[241].mxu1 }
 0x5b2   : > { %v15123_v48 = vadd.f32 %v10550_v10, %v10549_v12  ;;  %v10552_v47 = vpop.f32.mrb[242].mxu1 }
 0x5b3   : > { %5346 = vmatmul.mubr.bf16.gmra.mrb[52].mxu1 %v12099_v58  ;;  %v10553_v13 = vpop.f32.mrb[243].mxu1 }
 0x5b4   : > { %5353 = vmatprep.mubr.bf16.mxu1 %v12107_v25  ;;  %v15131_v36 = vadd.f32 %v10553_v13, %v10552_v47 }
 0x5b7   : > { %4864 = vmatmul.mubr.bf16.gmra.mrb[36].mxu0 %v12072_v32 }
 0x5b8   : > { %4871 = vmatprep.mubr.bf16.mxu0 %v12080_v6  ;;  %v10555_v37 = vpop.f32.mrb[244].mxu1  ;;  %v12090_v6 = vld [vmem:[%s17083_s5 + $0x1c0] ss:$8 sps:$4 sm:$0xff]  }
 0x5b9   : > { %v10556_v0 = vpop.f32.mrb[245].mxu1 }
 0x5ba   : > { %v15139_v17 = vadd.f32 %v10556_v0, %v10555_v37  ;;  %v10558_v34 = vpop.f32.mrb[246].mxu1 }
 0x5bb   : > { %5354 = vmatmul.mubr.bf16.gmra.mrb[56].mxu1 %v12105_v19  ;;  %v10559_v9 = vpop.f32.mrb[247].mxu1 }
 0x5bc   : > { %5361 = vmatprep.mubr.bf16.mxu1 %v12113_v53  ;;  %v15147_v52 = vadd.f32 %v10559_v9, %v10558_v34 }
 0x5bf   : > { %4872 = vmatmul.mubr.bf16.gmra.mrb[40].mxu0 %v12078_v63 }
 0x5c0   : > { %4879 = vmatprep.mubr.bf16.mxu0 %v12086_v62  ;;  %v10561_v38 = vpop.f32.mrb[248].mxu1 }
 0x5c1   : > { %v10562_v51 = vpop.f32.mrb[249].mxu1 }
 0x5c2   : > { %v10365_v30 = vpop.f32.mrb[192].mxu0  ;;  %v15152_v39 = vadd.f32 %v10562_v51, %v10561_v38  ;;  %v10564_v60 = vpop.f32.mrb[250].mxu1  ;;  %v12096_v38 = vld [vmem:[%s17083_s5 + $0x1d0] ss:$8 sps:$4 sm:$0xff]  }
 0x5c3   : > { %v10366_v14 = vpop.f32.mrb[193].mxu0  ;;  %5362 = vmatmul.mubr.bf16.gmra.mrb[60].mxu1 %v12111_v44  ;;  %v10565_v55 = vpop.f32.mrb[251].mxu1 }
 0x5c4   : > { %v10367_v57 = vadd.f32 %v10366_v14, %v10365_v30  ;;  %v10368_v28 = vpop.f32.mrb[194].mxu0  ;;  %v15160_v59 = vadd.f32 %v10565_v55, %v10564_v60  ;;  %v12104_v60 = vld [vmem:[%s17083_s5 + $0x1e4] ss:$8 sps:$4 sm:$0xff]  }
 0x5c5   : > { %v10369_v11 = vpop.f32.mrb[195].mxu0 }
 0x5c6   : > { %v15163_v31 = vadd.f32 %v14888_v7, %v10367_v57  ;;  %v10370_v15 = vadd.f32 %v10369_v11, %v10368_v28  ;;  %v12102_v28 = vld [vmem:[%s17083_s5 + $0x1e0] ss:$8 sps:$4 sm:$0xff]  }
 0x5c7   : > { %4880 = vmatmul.mubr.bf16.gmra.mrb[44].mxu0 %v12084_v27 }
 0x5c8   : > { %v15166_v58 = vadd.f32 %v14893_v50, %v10370_v15  ;;  %4887 = vmatprep.mubr.bf16.mxu0 %v12092_v16  ;;  %v10567_v25 = vpop.f32.mrb[252].mxu1  ;;  %v12098_v50 = vld [vmem:[%s17083_s5 + $0x1d4] ss:$8 sps:$4 sm:$0xff]  }
 0x5c9   : > { %v10568_v12 = vpop.f32.mrb[253].mxu1  ;;  %v12110_v15 = vld [vmem:[%s17083_s5 + $0x1f4] ss:$8 sps:$4 sm:$0xff]  }
 0x5ca   : > { %v10371_v10 = vpop.f32.mrb[196].mxu0  ;;  %v15168_v47 = vadd.f32 %v10568_v12, %v10567_v25  ;;  %v10570_v32 = vpop.f32.mrb[254].mxu1 }
 0x5cb   : > { %v10372_v13 = vpop.f32.mrb[197].mxu0  ;;  %v10571_v19 = vpop.f32.mrb[255].mxu1 }
 0x5cc   : > { %v10373_v7 = vadd.f32 %v10372_v13, %v10371_v10  ;;  %v10374_v53 = vpop.f32.mrb[198].mxu0  ;;  %v15176_v37 = vadd.f32 %v10571_v19, %v10570_v32  ;;  %v12108_v13 = vld [vmem:[%s17083_s5 + $0x1f0] ss:$8 sps:$4 sm:$0xff]  }
 0x5cd   : > { %v10375_v0 = vpop.f32.mrb[199].mxu0 }
 0x5ce   : > { %v10376_v34 = vadd.f32 %v10375_v0, %v10374_v53  ;;  %v15179_v63 = vadd.f32 %v14904_v18, %v10373_v7  ;;  %v12116_v7 = vld [vmem:[%s17083_s5 + $0x404] ss:$8 sps:$4 sm:$0xff]  }
 0x5cf   : > { %4888 = vmatmul.mubr.bf16.gmra.mrb[48].mxu0 %v12090_v6 }
 0x5d0   : > { %4895 = vmatprep.mubr.bf16.mxu0 %v12098_v50  ;;  %v15182_v9 = vadd.f32 %v14909_v2, %v10376_v34 }
 0x5d2   : > { %v10377_v62 = vpop.f32.mrb[200].mxu0 }
 0x5d3   : > { %v10378_v44 = vpop.f32.mrb[201].mxu0 }
 0x5d4   : > { %v10379_v51 = vadd.f32 %v10378_v44, %v10377_v62  ;;  %v10380_v30 = vpop.f32.mrb[202].mxu0  ;;  %v12114_v62 = vld [vmem:[%s17083_s5 + $0x400] ss:$8 sps:$4 sm:$0xff]  }
 0x5d5   : > { %v10381_v14 = vpop.f32.mrb[203].mxu0 }
 0x5d6   : > { %v10382_v18 = vadd.f32 %v10381_v14, %v10380_v30  ;;  %v15191_v27 = vadd.f32 %v14920_v33, %v10379_v51  ;;  %v12119_v51 = vld [vmem:[%s17083_s5 + $0x414] ss:$8 sps:$4 sm:$0xff]  }
 0x5d7   : > { %4896 = vmatmul.mubr.bf16.gmra.mrb[52].mxu0 %v12096_v38 }
 0x5d8   : > { %4903 = vmatprep.mubr.bf16.mxu0 %v12104_v60  ;;  %v15194_v2 = vadd.f32 %v14925_v5, %v10382_v18 }
 0x5da   : > { %v10383_v55 = vpop.f32.mrb[204].mxu0 }
 0x5db   : > { %v10384_v57 = vpop.f32.mrb[205].mxu0 }
 0x5dc   : > { %v10385_v16 = vadd.f32 %v10384_v57, %v10383_v55  ;;  %v10386_v11 = vpop.f32.mrb[206].mxu0  ;;  %v12117_v55 = vld [vmem:[%s17083_s5 + $0x410] ss:$8 sps:$4 sm:$0xff]  }
 0x5dd   : > { %v10387_v25 = vpop.f32.mrb[207].mxu0 }
 0x5de   : > { %v10388_v33 = vadd.f32 %v10387_v25, %v10386_v11  ;;  %v15203_v12 = vadd.f32 %v14936_v29, %v10385_v16  ;;  %v12122_v16 = vld [vmem:[%s17083_s5 + $0x424] ss:$8 sps:$4 sm:$0xff]  }
 0x5df   : > { %4904 = vmatmul.mubr.bf16.gmra.mrb[56].mxu0 %v12102_v28 }
 0x5e0   : > { %4911 = vmatprep.mubr.bf16.mxu0 %v12110_v15  ;;  %v15206_v5 = vadd.f32 %v14941_v40, %v10388_v33 }
 0x5e2   : > { %v10389_v10 = vpop.f32.mrb[208].mxu0 }
 0x5e3   : > { %v10390_v32 = vpop.f32.mrb[209].mxu0 }
 0x5e4   : > { %v10391_v6 = vadd.f32 %v10390_v32, %v10389_v10  ;;  %v10392_v19 = vpop.f32.mrb[210].mxu0  ;;  %v12120_v10 = vld [vmem:[%s17083_s5 + $0x420] ss:$8 sps:$4 sm:$0xff]  }
 0x5e5   : > { %v10393_v53 = vpop.f32.mrb[211].mxu0 }
 0x5e6   : > { %v10394_v29 = vadd.f32 %v10393_v53, %v10392_v19  ;;  %v15215_v50 = vadd.f32 %v14958_v8, %v10391_v6  ;;  %v12125_v6 = vld [vmem:[%s17083_s5 + $0x434] ss:$8 sps:$4 sm:$0xff]  }
 0x5e7   : > { %4912 = vmatmul.mubr.bf16.gmra.mrb[60].mxu0 %v12108_v13 }
 0x5e8   : > { %5691 = vmatprep.mubr.bf16.mxu0 %v12116_v7  ;;  %v15218_v40 = vadd.f32 %v14966_v49, %v10394_v29 }
 0x5ea   : > { %v10395_v0 = vpop.f32.mrb[212].mxu0 }
 0x5eb   : > { %v10396_v34 = vpop.f32.mrb[213].mxu0 }
 0x5ec   : > { %v10397_v44 = vadd.f32 %v10396_v34, %v10395_v0  ;;  %v10398_v38 = vpop.f32.mrb[214].mxu0  ;;  %v12123_v0 = vld [vmem:[%s17083_s5 + $0x430] ss:$8 sps:$4 sm:$0xff]  }
 0x5ed   : > { %v10399_v30 = vpop.f32.mrb[215].mxu0 }
 0x5ee   : > { %v10400_v8 = vadd.f32 %v10399_v30, %v10398_v38  ;;  %v15227_v60 = vadd.f32 %v14986_v42, %v10397_v44  ;;  %v12128_v44 = vld [vmem:[%s17083_s5 + $0x444] ss:$8 sps:$4 sm:$0xff]  }
 0x5ef   : > { %5692 = vmatmul.mubr.bf16.vlgmr.msra.gmra.mrb[64].mxu0 %v12114_v62 }
 0x5f0   : > { %5699 = vmatprep.mubr.bf16.mxu0 %v12119_v51  ;;  %v15230_v49 = vadd.f32 %v14994_v26, %v10400_v8 }
 0x5f2   : > { %v10401_v14 = vpop.f32.mrb[216].mxu0 }
 0x5f3   : > { %v10402_v18 = vpop.f32.mrb[217].mxu0 }
 0x5f4   : > { %v10403_v57 = vadd.f32 %v10402_v18, %v10401_v14  ;;  %v10404_v28 = vpop.f32.mrb[218].mxu0  ;;  %v12126_v14 = vld [vmem:[%s17083_s5 + $0x440] ss:$8 sps:$4 sm:$0xff]  }
 0x5f5   : > { %v10405_v11 = vpop.f32.mrb[219].mxu0 }
 0x5f6   : > { %v10406_v42 = vadd.f32 %v10405_v11, %v10404_v28  ;;  %v15239_v15 = vadd.f32 %v15014_v56, %v10403_v57  ;;  %v12131_v57 = vld [vmem:[%s17083_s5 + $0x454] ss:$8 sps:$4 sm:$0xff]  }
 0x5f7   : > { %5700 = vmatmul.mubr.bf16.gmra.mrb[68].mxu0 %v12117_v55 }
 0x5f8   : > { %5707 = vmatprep.mubr.bf16.mxu0 %v12122_v16  ;;  %v15242_v26 = vadd.f32 %v15022_v21, %v10406_v42 }
 0x5fa   : > { %v10407_v25 = vpop.f32.mrb[220].mxu0 }
 0x5fb   : > { %v10408_v33 = vpop.f32.mrb[221].mxu0 }
 0x5fc   : > { %v10409_v32 = vadd.f32 %v10408_v33, %v10407_v25  ;;  %v10410_v13 = vpop.f32.mrb[222].mxu0  ;;  %v12129_v25 = vld [vmem:[%s17083_s5 + $0x450] ss:$8 sps:$4 sm:$0xff]  }
 0x5fd   : > { %v10411_v19 = vpop.f32.mrb[223].mxu0 }
 0x5fe   : > { %v10412_v56 = vadd.f32 %v10411_v19, %v10410_v13  ;;  %v15251_v7 = vadd.f32 %v15041_v45, %v10409_v32  ;;  %v12134_v32 = vld [vmem:[%s17083_s5 + $0x464] ss:$8 sps:$4 sm:$0xff]  }
 0x5ff   : > { %5708 = vmatmul.mubr.bf16.gmra.mrb[72].mxu0 %v12120_v10 }
 0x600   : > { %5715 = vmatprep.mubr.bf16.mxu0 %v12125_v6  ;;  %v15254_v21 = vadd.f32 %v15051_v23, %v10412_v56 }
 0x602   : > { %v10413_v53 = vpop.f32.mrb[224].mxu0 }
 0x603   : > { %v10414_v29 = vpop.f32.mrb[225].mxu0 }
 0x604   : > { %v10415_v34 = vadd.f32 %v10414_v29, %v10413_v53  ;;  %v10416_v62 = vpop.f32.mrb[226].mxu0  ;;  %v12132_v53 = vld [vmem:[%s17083_s5 + $0x460] ss:$8 sps:$4 sm:$0xff]  }
 0x605   : > { %v10417_v38 = vpop.f32.mrb[227].mxu0 }
 0x606   : > { %v10418_v45 = vadd.f32 %v10417_v38, %v10416_v62  ;;  %v15263_v51 = vadd.f32 %v15059_v46, %v10415_v34  ;;  %v12137_v34 = vld [vmem:[%s17083_s5 + $0x474] ss:$8 sps:$4 sm:$0xff]  }
 0x607   : > { %5716 = vmatmul.mubr.bf16.gmra.mrb[76].mxu0 %v12123_v0 }
 0x608   : > { %5723 = vmatprep.mubr.bf16.mxu0 %v12128_v44  ;;  %v15266_v23 = vadd.f32 %v15067_v41, %v10418_v45 }
 0x60a   : > { %v10419_v30 = vpop.f32.mrb[228].mxu0 }
 0x60b   : > { %v10420_v8 = vpop.f32.mrb[229].mxu0 }
 0x60c   : > { %v10421_v18 = vadd.f32 %v10420_v8, %v10419_v30  ;;  %v10422_v55 = vpop.f32.mrb[230].mxu0 }
 0x60d   : > { %v10423_v28 = vpop.f32.mrb[231].mxu0 }
 0x60e   : > { %v10424_v46 = vadd.f32 %v10423_v28, %v10422_v55  ;;  %v15275_v16 = vadd.f32 %v15075_v61, %v10421_v18  ;;  %v12135_v28 = vld [vmem:[%s17083_s5 + $0x470] ss:$8 sps:$4 sm:$0xff]  }
 0x60f   : > { %5724 = vmatmul.mubr.bf16.gmra.mrb[80].mxu0 %v12126_v14 }
 0x610   : > { %5731 = vmatprep.mubr.bf16.mxu0 %v12131_v57  ;;  %v15278_v41 = vadd.f32 %v15083_v22, %v10424_v46 }
 0x612   : > { %v10425_v11 = vpop.f32.mrb[232].mxu0 }
 0x613   : > { %v10426_v42 = vpop.f32.mrb[233].mxu0 }
 0x614   : > { %v10427_v33 = vadd.f32 %v10426_v42, %v10425_v11  ;;  %v10428_v10 = vpop.f32.mrb[234].mxu0  ;;  %v12140_v11 = vld [vmem:[%s17083_s5 + $0x484] ss:$8 sps:$4 sm:$0xff]  }
 0x615   : > { %v10429_v13 = vpop.f32.mrb[235].mxu0 }
 0x616   : > { %v10430_v61 = vadd.f32 %v10429_v13, %v10428_v10  ;;  %v15287_v6 = vadd.f32 %v15091_v1, %v10427_v33 }
 0x617   : > { %5732 = vmatmul.mubr.bf16.gmra.mrb[84].mxu0 %v12129_v25 }
 0x618   : > { %5739 = vmatprep.mubr.bf16.mxu0 %v12134_v32  ;;  %v15290_v22 = vadd.f32 %v15099_v24, %v10430_v61 }
 0x61a   : > { %v10431_v19 = vpop.f32.mrb[236].mxu0 }
 0x61b   : > { %v10432_v56 = vpop.f32.mrb[237].mxu0 }
 0x61c   : > { %v10433_v29 = vadd.f32 %v10432_v56, %v10431_v19  ;;  %v10434_v0 = vpop.f32.mrb[238].mxu0 }
 0x61d   : > { %v10435_v62 = vpop.f32.mrb[239].mxu0 }
 0x61e   : > { %v10436_v1 = vadd.f32 %v10435_v62, %v10434_v0  ;;  %v10701_v44 = vpop.f32.mrb[0].mxu1  ;;  %v15299_v38 = vadd.f32 %v15107_v43, %v10433_v29  ;;  %v12138_v0 = vld [vmem:[%s17083_s5 + $0x480] ss:$8 sps:$4 sm:$0xff]   ;;  %v12143_v62 = vld [vmem:[%s17083_s5 + $0x494] ss:$8 sps:$4 sm:$0xff]  }
 0x61f   : > { %5740 = vmatmul.mubr.bf16.gmra.mrb[88].mxu0 %v12132_v53  ;;  %v10702_v24 = vpop.f32.mrb[1].mxu1 }
 0x620   : > { %5747 = vmatprep.mubr.bf16.mxu0 %v12137_v34  ;;  %v15301_v45 = vadd.f32 %v10702_v24, %v10701_v44  ;;  %v10704_v30 = vpop.f32.mrb[2].mxu1  ;;  %v15304_v8 = vadd.f32 %v15115_v4, %v10436_v1 }
 0x621   : > { %v10705_v14 = vpop.f32.mrb[3].mxu1 }
 0x622   : > { %v10437_v18 = vpop.f32.mrb[240].mxu0  ;;  %v15306_v55 = vadd.f32 %v10705_v14, %v10704_v30 }
 0x623   : > { %v10438_v57 = vpop.f32.mrb[241].mxu0 }
 0x624   : > { %v10439_v43 = vadd.f32 %v10438_v57, %v10437_v18  ;;  %v10440_v46 = vpop.f32.mrb[242].mxu0 }
 0x625   : > { %v10441_v42 = vpop.f32.mrb[243].mxu0 }
 0x626   : > { %v10442_v25 = vadd.f32 %v10441_v42, %v10440_v46  ;;  %v10707_v33 = vpop.f32.mrb[4].mxu1  ;;  %v15315_v4 = vadd.f32 %v15123_v48, %v10439_v43  ;;  %v12141_v42 = vld [vmem:[%s17083_s5 + $0x490] ss:$8 sps:$4 sm:$0xff]  }
 0x627   : > { %5748 = vmatmul.mubr.bf16.gmra.mrb[92].mxu0 %v12135_v28  ;;  %v10708_v10 = vpop.f32.mrb[5].mxu1 }
 0x628   : > { %5755 = vmatprep.mubr.bf16.mxu0 %v12140_v11  ;;  %v15317_v32 = vadd.f32 %v10708_v10, %v10707_v33  ;;  %v10710_v13 = vpop.f32.mrb[6].mxu1  ;;  %v15320_v61 = vadd.f32 %v15131_v36, %v10442_v25  ;;  %v12146_v33 = vld [vmem:[%s17083_s5 + $0x4a4] ss:$8 sps:$4 sm:$0xff]  }
 0x629   : > { %v10711_v19 = vpop.f32.mrb[7].mxu1 }
 0x62a   : > { %v10443_v56 = vpop.f32.mrb[244].mxu0  ;;  %v15322_v53 = vadd.f32 %v10711_v19, %v10710_v13 }
 0x62b   : > { %v10444_v29 = vpop.f32.mrb[245].mxu0 }
 0x62c   : > { %v10445_v48 = vadd.f32 %v10444_v29, %v10443_v56  ;;  %v10446_v34 = vpop.f32.mrb[246].mxu0 }
 0x62d   : > { %v10447_v1 = vpop.f32.mrb[247].mxu0 }
 0x62e   : > { %v10448_v44 = vadd.f32 %v10447_v1, %v10446_v34  ;;  %v10713_v24 = vpop.f32.mrb[8].mxu1  ;;  %v15331_v36 = vadd.f32 %v15139_v17, %v10445_v48 }
 0x62f   : > { %5756 = vmatmul.mubr.bf16.gmra.mrb[96].mxu0 %v12138_v0  ;;  %v10714_v30 = vpop.f32.mrb[9].mxu1 }
 0x630   : > { %5763 = vmatprep.mubr.bf16.mxu0 %v12143_v62  ;;  %v15333_v14 = vadd.f32 %v10714_v30, %v10713_v24  ;;  %v10716_v18 = vpop.f32.mrb[10].mxu1  ;;  %v15336_v57 = vadd.f32 %v15147_v52, %v10448_v44  ;;  %v12144_v24 = vld [vmem:[%s17083_s5 + $0x4a0] ss:$8 sps:$4 sm:$0xff]  }
 0x631   : > { %v10717_v28 = vpop.f32.mrb[11].mxu1 }
 0x632   : > { %v10449_v43 = vpop.f32.mrb[248].mxu0  ;;  %v15338_v46 = vadd.f32 %v10717_v28, %v10716_v18  ;;  %v12149_v18 = vld [vmem:[%s17083_s5 + $0x4b4] ss:$8 sps:$4 sm:$0xff]  }
 0x633   : > { %v10450_v11 = vpop.f32.mrb[249].mxu0 }
 0x634   : > { %v10451_v17 = vadd.f32 %v10450_v11, %v10449_v43  ;;  %v10452_v25 = vpop.f32.mrb[250].mxu0 }
 0x635   : > { %v10453_v10 = vpop.f32.mrb[251].mxu0 }
 0x636   : > { %v10454_v13 = vadd.f32 %v10453_v10, %v10452_v25  ;;  %v10719_v19 = vpop.f32.mrb[12].mxu1  ;;  %v15347_v52 = vadd.f32 %v15152_v39, %v10451_v17 }
 0x637   : > { %5764 = vmatmul.mubr.bf16.gmra.mrb[100].mxu0 %v12141_v42  ;;  %v10720_v56 = vpop.f32.mrb[13].mxu1 }
 0x638   : > { %5771 = vmatprep.mubr.bf16.mxu0 %v12146_v33  ;;  %v15349_v29 = vadd.f32 %v10720_v56, %v10719_v19  ;;  %v10722_v0 = vpop.f32.mrb[14].mxu1  ;;  %v15352_v48 = vadd.f32 %v15160_v59, %v10454_v13 }
 0x639   : > { %v10723_v34 = vpop.f32.mrb[15].mxu1 }
 0x63a   : > { %v10455_v62 = vpop.f32.mrb[252].mxu0  ;;  %v15354_v1 = vadd.f32 %v10723_v34, %v10722_v0  ;;  %v12147_v0 = vld [vmem:[%s17083_s5 + $0x4b0] ss:$8 sps:$4 sm:$0xff]  }
 0x63b   : > { %v10456_v44 = vpop.f32.mrb[253].mxu0 }
 0x63c   : > { %v10457_v39 = vadd.f32 %v10456_v44, %v10455_v62  ;;  %v10458_v30 = vpop.f32.mrb[254].mxu0  ;;  %v12152_v62 = vld [vmem:[%s17083_s5 + $0x4c4] ss:$8 sps:$4 sm:$0xff]  }
 0x63d   : > { %v10459_v28 = vpop.f32.mrb[255].mxu0 }
 0x63e   : > { %v10460_v43 = vadd.f32 %v10459_v28, %v10458_v30  ;;  %v10725_v11 = vpop.f32.mrb[16].mxu1  ;;  %v15363_v59 = vadd.f32 %v15168_v47, %v10457_v39 }
 0x63f   : > { %5772 = vmatmul.mubr.bf16.gmra.mrb[104].mxu0 %v12144_v24  ;;  %v10726_v42 = vpop.f32.mrb[17].mxu1 }
 0x640   : > { %5779 = vmatprep.mubr.bf16.mxu0 %v12149_v18  ;;  %v15365_v17 = vadd.f32 %v10726_v42, %v10725_v11  ;;  %v10728_v25 = vpop.f32.mrb[18].mxu1  ;;  %v15368_v33 = vadd.f32 %v15176_v37, %v10460_v43 }
 0x641   : > { %v10729_v10 = vpop.f32.mrb[19].mxu1 }
 0x642   : > { %v10589_v13 = vpop.f32.mrb[0].mxu0  ;;  %v15370_v19 = vadd.f32 %v10729_v10, %v10728_v25 }
 0x643   : > { %v10590_v56 = vpop.f32.mrb[1].mxu0 }
 0x644   : > { %v10591_v47 = vadd.f32 %v10590_v56, %v10589_v13  ;;  %v10592_v34 = vpop.f32.mrb[2].mxu0  ;;  %v12150_v56 = vld [vmem:[%s17083_s5 + $0x4c0] ss:$8 sps:$4 sm:$0xff]  }
 0x645   : > { %v10593_v44 = vpop.f32.mrb[3].mxu0 }
 0x646   : > { %v10594_v24 = vadd.f32 %v10593_v44, %v10592_v34  ;;  %v4920_v37 = vadd.f32 %v10591_v47, %v15163_v31  ;;  %v10731_v39 = vpop.f32.mrb[20].mxu1 }
 0x647   : > { %5780 = vmatmul.mubr.bf16.gmra.mrb[108].mxu0 %v12147_v0  ;;  %v10732_v30 = vpop.f32.mrb[21].mxu1 }
 0x648   : > { %v15380_v18 = vadd.f32 %v15301_v45, %v4920_v37  ;;  %v4921_v28 = vadd.f32 %v10594_v24, %v15166_v58  ;;  %5787 = vmatprep.mubr.bf16.mxu0 %v12152_v62  ;;  %v15383_v43 = vadd.f32 %v10732_v30, %v10731_v39  ;;  %v10734_v11 = vpop.f32.mrb[22].mxu1  ;;  %v12155_v58 = vld [vmem:[%s17083_s5 + $0x4d4] ss:$8 sps:$4 sm:$0xff]  }
 0x649   : > { %v10735_v42 = vpop.f32.mrb[23].mxu1 }
 0x64a   : > { %v15386_v25 = vadd.f32 %v15306_v55, %v4921_v28  ;;  %v10595_v10 = vpop.f32.mrb[4].mxu0  ;;  %v15388_v13 = vadd.f32 %v10735_v42, %v10734_v11 }
 0x64b   : > { %v10596_v31 = vpop.f32.mrb[5].mxu0 }
 0x64c   : > { %v10597_v45 = vadd.f32 %v10596_v31, %v10595_v10  ;;  %v10598_v0 = vpop.f32.mrb[6].mxu0  ;;  %v12153_v31 = vld [vmem:[%s17083_s5 + $0x4d0] ss:$8 sps:$4 sm:$0xff]  }
 0x64d   : > { %v10599_v47 = vpop.f32.mrb[7].mxu0 }
 0x64e   : > { %v4922_v34 = vadd.f32 %v10597_v45, %v15179_v63  ;;  %v10600_v62 = vadd.f32 %v10599_v47, %v10598_v0  ;;  %v10737_v55 = vpop.f32.mrb[24].mxu1 }
 0x64f   : > { %5788 = vmatmul.mubr.bf16.gmra.mrb[112].mxu0 %v12150_v56  ;;  %v10738_v44 = vpop.f32.mrb[25].mxu1 }
 0x650   : > { %v4923_v24 = vadd.f32 %v10600_v62, %v15182_v9  ;;  %v15399_v37 = vadd.f32 %v15317_v32, %v4922_v34  ;;  %5795 = vmatprep.mubr.bf16.mxu0 %v12155_v58  ;;  %v15401_v39 = vadd.f32 %v10738_v44, %v10737_v55  ;;  %v10740_v30 = vpop.f32.mrb[26].mxu1  ;;  %v12158_v32 = vld [vmem:[%s17083_s5 + $0x4e4] ss:$8 sps:$4 sm:$0xff]  }
 0x651   : > { %v10741_v28 = vpop.f32.mrb[27].mxu1 }
 0x652   : > { %v15404_v11 = vadd.f32 %v15322_v53, %v4923_v24  ;;  %v10601_v42 = vpop.f32.mrb[8].mxu0  ;;  %v15406_v10 = vadd.f32 %v10741_v28, %v10740_v30 }
 0x653   : > { %v10602_v63 = vpop.f32.mrb[9].mxu0 }
 0x654   : > { %v10603_v9 = vadd.f32 %v10602_v63, %v10601_v42  ;;  %v10604_v56 = vpop.f32.mrb[10].mxu0  ;;  %v12156_v63 = vld [vmem:[%s17083_s5 + $0x4e0] ss:$8 sps:$4 sm:$0xff]  }
 0x655   : > { %v10605_v45 = vpop.f32.mrb[11].mxu0 }
 0x656   : > { %v4924_v0 = vadd.f32 %v10603_v9, %v15191_v27  ;;  %v10606_v58 = vadd.f32 %v10605_v45, %v10604_v56  ;;  %v10743_v53 = vpop.f32.mrb[28].mxu1 }
 0x657   : > { %5796 = vmatmul.mubr.bf16.gmra.mrb[116].mxu0 %v12153_v31  ;;  %v10744_v47 = vpop.f32.mrb[29].mxu1 }
 0x658   : > { %v4925_v34 = vadd.f32 %v10606_v58, %v15194_v2  ;;  %v15417_v62 = vadd.f32 %v15333_v14, %v4924_v0  ;;  %5803 = vmatprep.mubr.bf16.mxu0 %v12158_v32  ;;  %v15419_v55 = vadd.f32 %v10744_v47, %v10743_v53  ;;  %v10746_v44 = vpop.f32.mrb[30].mxu1  ;;  %v12161_v14 = vld [vmem:[%s17083_s5 + $0x4f4] ss:$8 sps:$4 sm:$0xff]  }
 0x659   : > { %v10747_v24 = vpop.f32.mrb[31].mxu1 }
 0x65a   : > { %v15422_v30 = vadd.f32 %v15338_v46, %v4925_v34  ;;  %v10607_v28 = vpop.f32.mrb[12].mxu0  ;;  %v15424_v42 = vadd.f32 %v10747_v24, %v10746_v44 }
 0x65b   : > { %v10608_v27 = vpop.f32.mrb[13].mxu0 }
 0x65c   : > { %v10609_v2 = vadd.f32 %v10608_v27, %v10607_v28  ;;  %v10610_v31 = vpop.f32.mrb[14].mxu0  ;;  %v12159_v27 = vld [vmem:[%s17083_s5 + $0x4f0] ss:$8 sps:$4 sm:$0xff]  }
 0x65d   : > { %v10611_v9 = vpop.f32.mrb[15].mxu0 }
 0x65e   : > { %v4926_v56 = vadd.f32 %v10609_v2, %v15203_v12  ;;  %v10612_v32 = vadd.f32 %v10611_v9, %v10610_v31  ;;  %v10749_v46 = vpop.f32.mrb[32].mxu1 }
 0x65f   : > { %5804 = vmatmul.mubr.bf16.gmra.mrb[120].mxu0 %v12156_v63  ;;  %v10750_v45 = vpop.f32.mrb[33].mxu1 }
 0x660   : > { %v4927_v0 = vadd.f32 %v10612_v32, %v15206_v5  ;;  %v15435_v58 = vadd.f32 %v15349_v29, %v4926_v56  ;;  %5811 = vmatprep.mubr.bf16.mxu0 %v12161_v14  ;;  %v15437_v53 = vadd.f32 %v10750_v45, %v10749_v46  ;;  %v10752_v47 = vpop.f32.mrb[34].mxu1 }
 0x661   : > { %v10753_v34 = vpop.f32.mrb[35].mxu1 }
 0x662   : > { %v15440_v44 = vadd.f32 %v15354_v1, %v4927_v0  ;;  %v10613_v24 = vpop.f32.mrb[16].mxu0  ;;  %v15442_v28 = vadd.f32 %v10753_v34, %v10752_v47 }
 0x663   : > { %v10614_v12 = vpop.f32.mrb[17].mxu0 }
 0x664   : > { %v10615_v5 = vadd.f32 %v10614_v12, %v10613_v24  ;;  %v10616_v63 = vpop.f32.mrb[18].mxu0 }
 0x665   : > { %v10617_v29 = vpop.f32.mrb[19].mxu0 }
 0x666   : > { %v4928_v2 = vadd.f32 %v10615_v5, %v15215_v50  ;;  %v10618_v31 = vadd.f32 %v10617_v29, %v10616_v63  ;;  %v10755_v14 = vpop.f32.mrb[36].mxu1 }
 0x667   : > { %5812 = vmatmul.mubr.bf16.gmra.mrb[124].mxu0 %v12159_v27  ;;  %v10756_v9 = vpop.f32.mrb[37].mxu1 }
 0x668   : > { %v4929_v1 = vadd.f32 %v10618_v31, %v15218_v40  ;;  %v15450_v56 = vadd.f32 %v15365_v17, %v4928_v2  ;;  %v15452_v32 = vadd.f32 %v10756_v9, %v10755_v14  ;;  %v10758_v46 = vpop.f32.mrb[38].mxu1 }
 0x669   : > { %v10759_v45 = vpop.f32.mrb[39].mxu1 }
 0x66a   : > { %v15455_v0 = vadd.f32 %v15370_v19, %v4929_v1  ;;  %v10619_v47 = vpop.f32.mrb[20].mxu0  ;;  %v15457_v34 = vadd.f32 %v10759_v45, %v10758_v46 }
 0x66b   : > { %v10620_v50 = vpop.f32.mrb[21].mxu0 }
 0x66c   : > { %v10621_v24 = vadd.f32 %v10620_v50, %v10619_v47  ;;  %v10622_v12 = vpop.f32.mrb[22].mxu0 }
 0x66d   : > { %v10623_v27 = vpop.f32.mrb[23].mxu0 }
 0x66e   : > { %v4930_v5 = vadd.f32 %v10621_v24, %v15227_v60  ;;  %v10624_v40 = vadd.f32 %v10623_v27, %v10622_v12  ;;  %v10761_v63 = vpop.f32.mrb[40].mxu1 }
 0x66f   : > { %v10762_v17 = vpop.f32.mrb[41].mxu1 }
 0x670   : > { %v4931_v29 = vadd.f32 %v10624_v40, %v15230_v49  ;;  %v15462_v2 = vadd.f32 %v15383_v43, %v4930_v5  ;;  %v15464_v31 = vadd.f32 %v10762_v17, %v10761_v63  ;;  %v10764_v19 = vpop.f32.mrb[42].mxu1 }
 0x671   : > { %v10765_v14 = vpop.f32.mrb[43].mxu1 }
 0x672   : > { %v15467_v9 = vadd.f32 %v15388_v13, %v4931_v29  ;;  %v10625_v1 = vpop.f32.mrb[24].mxu0  ;;  %v15469_v46 = vadd.f32 %v10765_v14, %v10764_v19 }
 0x673   : > { %v10626_v45 = vpop.f32.mrb[25].mxu0 }
 0x674   : > { %v10627_v60 = vadd.f32 %v10626_v45, %v10625_v1  ;;  %v10628_v47 = vpop.f32.mrb[26].mxu0 }
 0x675   : > { %v10629_v50 = vpop.f32.mrb[27].mxu0 }
 0x676   : > { %v4932_v24 = vadd.f32 %v10627_v60, %v15239_v15  ;;  %v10630_v49 = vadd.f32 %v10629_v50, %v10628_v47  ;;  %v10767_v12 = vpop.f32.mrb[44].mxu1 }
 0x677   : > { %v10768_v43 = vpop.f32.mrb[45].mxu1 }
 0x678   : > { %v4933_v27 = vadd.f32 %v10630_v49, %v15242_v26  ;;  %v15474_v5 = vadd.f32 %v15401_v39, %v4932_v24  ;;  %v15476_v40 = vadd.f32 %v10768_v43, %v10767_v12  ;;  %v10770_v13 = vpop.f32.mrb[46].mxu1 }
 0x679   : > { %v10771_v63 = vpop.f32.mrb[47].mxu1 }
 0x67a   : > { %v15479_v17 = vadd.f32 %v15406_v10, %v4933_v27  ;;  %v10631_v29 = vpop.f32.mrb[28].mxu0  ;;  %v15481_v19 = vadd.f32 %v10771_v63, %v10770_v13 }
 0x67b   : > { %v10632_v14 = vpop.f32.mrb[29].mxu0 }
 0x67c   : > { %v10633_v15 = vadd.f32 %v10632_v14, %v10631_v29  ;;  %v10634_v1 = vpop.f32.mrb[30].mxu0 }
 0x67d   : > { %v10635_v45 = vpop.f32.mrb[31].mxu0 }
 0x67e   : > { %v4934_v60 = vadd.f32 %v10633_v15, %v15251_v7  ;;  %v10636_v26 = vadd.f32 %v10635_v45, %v10634_v1  ;;  %v10773_v47 = vpop.f32.mrb[48].mxu1 }
 0x67f   : > { %v10774_v39 = vpop.f32.mrb[49].mxu1 }
 0x680   : > { %v4935_v50 = vadd.f32 %v10636_v26, %v15254_v21  ;;  %v15486_v24 = vadd.f32 %v15419_v55, %v4934_v60  ;;  %v15488_v49 = vadd.f32 %v10774_v39, %v10773_v47  ;;  %v10776_v10 = vpop.f32.mrb[50].mxu1 }
 0x681   : > { %v10777_v12 = vpop.f32.mrb[51].mxu1 }
 0x682   : > { %v15491_v43 = vadd.f32 %v15424_v42, %v4935_v50  ;;  %v10637_v27 = vpop.f32.mrb[32].mxu0  ;;  %v15493_v13 = vadd.f32 %v10777_v12, %v10776_v10 }
 0x683   : > { %v10638_v63 = vpop.f32.mrb[33].mxu0 }
 0x684   : > { %v10639_v7 = vadd.f32 %v10638_v63, %v10637_v27  ;;  %v10640_v29 = vpop.f32.mrb[34].mxu0 }
 0x685   : > { %v10641_v14 = vpop.f32.mrb[35].mxu0 }
 0x686   : > { %v4936_v15 = vadd.f32 %v10639_v7, %v15263_v51  ;;  %v10642_v21 = vadd.f32 %v10641_v14, %v10640_v29  ;;  %v10779_v1 = vpop.f32.mrb[52].mxu1 }
 0x687   : > { %v10780_v55 = vpop.f32.mrb[53].mxu1 }
 0x688   : > { %v4937_v45 = vadd.f32 %v10642_v21, %v15266_v23  ;;  %v15498_v60 = vadd.f32 %v15437_v53, %v4936_v15  ;;  %v15500_v26 = vadd.f32 %v10780_v55, %v10779_v1  ;;  %v10782_v42 = vpop.f32.mrb[54].mxu1 }
 0x689   : > { %v10783_v47 = vpop.f32.mrb[55].mxu1 }
 0x68a   : > { %v15503_v39 = vadd.f32 %v15442_v28, %v4937_v45  ;;  %v10643_v50 = vpop.f32.mrb[36].mxu0  ;;  %v15505_v10 = vadd.f32 %v10783_v47, %v10782_v42 }
 0x68b   : > { %v10644_v12 = vpop.f32.mrb[37].mxu0 }
 0x68c   : > { %v10645_v51 = vadd.f32 %v10644_v12, %v10643_v50  ;;  %v10646_v27 = vpop.f32.mrb[38].mxu0 }
 0x68d   : > { %v10647_v63 = vpop.f32.mrb[39].mxu0 }
 0x68e   : > { %v4938_v7 = vadd.f32 %v10645_v51, %v15275_v16  ;;  %v10648_v23 = vadd.f32 %v10647_v63, %v10646_v27  ;;  %v10785_v29 = vpop.f32.mrb[56].mxu1 }
 0x68f   : > { %v10786_v53 = vpop.f32.mrb[57].mxu1 }
 0x690   : > { %v4939_v14 = vadd.f32 %v10648_v23, %v15278_v41  ;;  %v15510_v15 = vadd.f32 %v15452_v32, %v4938_v7  ;;  %v15512_v21 = vadd.f32 %v10786_v53, %v10785_v29  ;;  %v10788_v28 = vpop.f32.mrb[58].mxu1 }
 0x691   : > { %v10789_v1 = vpop.f32.mrb[59].mxu1 }
 0x692   : > { %v15515_v55 = vadd.f32 %v15457_v34, %v4939_v14  ;;  %v10649_v45 = vpop.f32.mrb[40].mxu0  ;;  %v10790_v42 = vadd.f32 %v10789_v1, %v10788_v28 }
 0x693   : > { %v10650_v47 = vpop.f32.mrb[41].mxu0 }
 0x694   : > { %v10651_v50 = vadd.f32 %v10650_v47, %v10649_v45  ;;  %v10652_v16 = vpop.f32.mrb[42].mxu0 }
 0x695   : > { %v10653_v12 = vpop.f32.mrb[43].mxu0 }
 0x696   : > { %v4940_v51 = vadd.f32 %v10651_v50, %v15287_v6  ;;  %v10654_v27 = vadd.f32 %v10653_v12, %v10652_v16  ;;  %v10791_v41 = vpop.f32.mrb[60].mxu1 }
 0x697   : > { %v10792_v63 = vpop.f32.mrb[61].mxu1 }
 0x698   : > { %v4941_v32 = vadd.f32 %v10654_v27, %v15290_v22  ;;  %v15520_v7 = vadd.f32 %v15464_v31, %v4940_v51  ;;  %v10793_v23 = vadd.f32 %v10792_v63, %v10791_v41  ;;  %v10794_v29 = vpop.f32.mrb[62].mxu1 }
 0x699   : > { %v10795_v34 = vpop.f32.mrb[63].mxu1 }
 0x69a   : > { %v15523_v53 = vadd.f32 %v15469_v46, %v4941_v32  ;;  %v10655_v14 = vpop.f32.mrb[44].mxu0  ;;  %v10796_v28 = vadd.f32 %v10795_v34, %v10794_v29 }
 0x69b   : > { %v10656_v1 = vpop.f32.mrb[45].mxu0 }
 0x69c   : > { %v10657_v45 = vadd.f32 %v10656_v1, %v10655_v14  ;;  %v10658_v47 = vpop.f32.mrb[46].mxu0  ;;  %v5887_v14 = vpop.permute.xlu0 %5886 }
 0x69d   : > { %v10659_v6 = vpop.f32.mrb[47].mxu0 }
 0x69e   : > { %v4942_v50 = vadd.f32 %v10657_v45, %v15299_v38  ;;  %v10660_v16 = vadd.f32 %v10659_v6, %v10658_v47  ;;  %v5892_v47 = vpop.permute.xlu1 %5891 }
 0x6a0   : > { %v4943_v22 = vadd.f32 %v10660_v16, %v15304_v8  ;;  %v15528_v31 = vadd.f32 %v15476_v40, %v4942_v50 }
 0x6a2   : > { %v15531_v12 = vadd.f32 %v15481_v19, %v4943_v22  ;;  %v10661_v51 = vpop.f32.mrb[48].mxu0 }
 0x6a3   : > { %v10662_v46 = vpop.f32.mrb[49].mxu0 }
 0x6a4   : > { %v10663_v27 = vadd.f32 %v10662_v46, %v10661_v51  ;;  %v10664_v41 = vpop.f32.mrb[50].mxu0  ;;  %v15551_v51 = vpop.permute.xlu1 %5971 }
 0x6a5   : > { %v10665_v63 = vpop.f32.mrb[51].mxu0 }
 0x6a6   : > { %v4944_v32 = vadd.f32 %v10663_v27, %v15315_v4  ;;  %v10666_v29 = vadd.f32 %v10665_v63, %v10664_v41 }
 0x6a8   : > { %v4945_v34 = vadd.f32 %v10666_v29, %v15320_v61  ;;  %v15536_v38 = vadd.f32 %v15488_v49, %v4944_v32  ;;  %v15546_v49 = vpop.permute.xlu0 %5966 }
 0x6aa   : > { %v15539_v8 = vadd.f32 %v15493_v13, %v4945_v34  ;;  %v10667_v40 = vpop.f32.mrb[52].mxu0  ;;  %v5902_v34 = vpop.permute.xlu1 %5901 }
 0x6ab   : > { %v10668_v19 = vpop.f32.mrb[53].mxu0 }
 0x6ac   : > { %v10669_v1 = vadd.f32 %v10668_v19, %v10667_v40  ;;  %v10670_v45 = vpop.f32.mrb[54].mxu0  ;;  %v5897_v29 = vpop.permute.xlu0 %5896 }
 0x6ad   : > { %v10671_v6 = vpop.f32.mrb[55].mxu0 }
 0x6ae   : > { %v4946_v50 = vadd.f32 %v10669_v1, %v15331_v36  ;;  %v10672_v16 = vadd.f32 %v10671_v6, %v10670_v45 }
 0x6b0   : > { %v4947_v4 = vadd.f32 %v10672_v16, %v15336_v57  ;;  %v15544_v61 = vadd.f32 %v15500_v26, %v4946_v50  ;;  %v15560_v6 = vpop.permute.xlu0 %5976 }
 0x6b2   : > { %v15549_v13 = vadd.f32 %v15505_v10, %v4947_v4  ;;  %v10673_v22 = vpop.f32.mrb[56].mxu0  ;;  %v15563_v4 = vpop.permute.xlu1 %5981 }
 0x6b3   : > { %v10674_v46 = vpop.f32.mrb[57].mxu0 }
 0x6b4   : > { %v10675_v27 = vadd.f32 %v10674_v46, %v10673_v22  ;;  %v10676_v41 = vpop.f32.mrb[58].mxu0  ;;  %v5907_v46 = vpop.permute.xlu0 %5906 }
 0x6b5   : > { %v10677_v63 = vpop.f32.mrb[59].mxu0 }
 0x6b6   : > { %v4948_v36 = vadd.f32 %v10675_v27, %v15347_v52  ;;  %v10678_v32 = vadd.f32 %v10677_v63, %v10676_v41 }
 0x6b8   : > { %v4949_v57 = vadd.f32 %v10678_v32, %v15352_v48  ;;  %v15556_v26 = vadd.f32 %v15512_v21, %v4948_v36  ;;  %v5912_v36 = vpop.permute.xlu1 %5911 }
 0x6ba   : > { %v15558_v40 = vadd.f32 %v10790_v42, %v4949_v57  ;;  %v10679_v10 = vpop.f32.mrb[60].mxu0 }
 0x6bb   : > { %v10680_v19 = vpop.f32.mrb[61].mxu0 }
 0x6bc   : > { %v10681_v1 = vadd.f32 %v10680_v19, %v10679_v10  ;;  %v10682_v45 = vpop.f32.mrb[62].mxu0 }
 0x6bd   : > { %v10683_v50 = vpop.f32.mrb[63].mxu0 }
 0x6be   : > { %v4950_v16 = vadd.f32 %v10681_v1, %v15363_v59  ;;  %v10684_v52 = vadd.f32 %v10683_v50, %v10682_v45  ;;  %v15572_v1 = vpop.permute.xlu0 %5986  ;;  %v15574_v45 = vpop.permute.xlu1 %5991 }
 0x6c0   : > { %v4951_v48 = vadd.f32 %v10684_v52, %v15368_v33  ;;  %v15566_v22 = vadd.f32 %v10793_v23, %v4950_v16 }
 0x6c2   : > { %v15568_v21 = vadd.f32 %v10796_v28, %v4951_v48  ;;  %v10813_v42 = vpop.f32.mrb[64].mxu0 }
 0x6c3   : > { %v10814_v27 = vpop.f32.mrb[65].mxu0 }
 0x6c4   : > { %v10815_v41 = vadd.f32 %v10814_v27, %v10813_v42  ;;  %v10816_v63 = vpop.f32.mrb[66].mxu0 }
 0x6c5   : > { %v10817_v32 = vpop.f32.mrb[67].mxu0 }
 0x6c6   : > { %v5820_v57 = vadd.f32 %v10815_v41, %v15380_v18  ;;  %v10818_v10 = vadd.f32 %v10817_v32, %v10816_v63 }
 0x6c8   : > { %v6044_v59 = vadd.f32 %v5887_v14, %v5820_v57  ;;  %v5821_v19 = vadd.f32 %v10818_v10, %v15386_v25  ;;  %v5917_v14 = vpop.permute.xlu0 %5916 }
 0x6ca   : > { %v6045_v33 = vadd.f32 %v5892_v47, %v5821_v19  ;;  %v10819_v23 = vpop.f32.mrb[68].mxu0  ;;  %v6076_v50 = vmax.f32 %v6044_v59, 0.0  ;;  %v5922_v47 = vpop.permute.xlu1 %5921 }
 0x6cb   : > { %v10820_v28 = vpop.f32.mrb[69].mxu0 }
 0x6cc   : > { %v6077_v16 = vmax.f32 %v6045_v33, 0.0  ;;  %v10821_v52 = vadd.f32 %v10820_v28, %v10819_v23  ;;  %v10822_v48 = vpop.f32.mrb[70].mxu0  ;;  %v15582_v28 = vpop.permute.xlu0 %5996 }
 0x6cd   : > { %v10823_v42 = vpop.f32.mrb[71].mxu0 }
 0x6ce   : > { %v15576_v27 = vpack.c.bf16 %v6077_v16, %v6076_v50  ;;  %v5822_v18 = vadd.f32 %v10821_v52, %v15399_v37  ;;  %v10824_v41 = vadd.f32 %v10823_v42, %v10822_v48 }
 0x6d0   : > { %v6046_v63 = vadd.f32 %v5897_v29, %v5822_v18  ;;  %v5823_v25 = vadd.f32 %v10824_v41, %v15404_v11  ;;  %6173 = vrot.lane.b32.xlu0 %v15576_v27, %s12436_s12  ;;  %v15587_v11 = vpop.permute.xlu1 %6001  ;;  %v5927_v18 = vpop.permute.xlu0 %5926 }
 0x6d2   : > { %v6047_v32 = vadd.f32 %v5902_v34, %v5823_v25  ;;  %v10825_v57 = vpop.f32.mrb[72].mxu0  ;;  %v6078_v59 = vmax.f32 %v6046_v63, 0.0 }
 0x6d3   : > { %v10826_v10 = vpop.f32.mrb[73].mxu0 }
 0x6d4   : > { %v6079_v19 = vmax.f32 %v6047_v32, 0.0  ;;  %v10827_v33 = vadd.f32 %v10826_v10, %v10825_v57  ;;  %v10828_v23 = vpop.f32.mrb[74].mxu0  ;;  %v5932_v10 = vpop.permute.xlu1 %5931 }
 0x6d5   : > { %v10829_v50 = vpop.f32.mrb[75].mxu0 }
 0x6d6   : > { %v15584_v37 = vpack.c.bf16 %v6079_v19, %v6078_v59  ;;  %v5824_v29 = vadd.f32 %v10827_v33, %v15417_v62  ;;  %v10830_v16 = vadd.f32 %v10829_v50, %v10828_v23 }
 0x6d8   : > { %v6048_v52 = vadd.f32 %v5907_v46, %v5824_v29  ;;  %v5825_v48 = vadd.f32 %v10830_v16, %v15422_v30  ;;  %6175 = vrot.lane.b32.xlu0 %v15584_v37, %s12436_s12  ;;  %v15600_v29 = vpop.permute.xlu1 %6011 }
 0x6da   : > { %v6049_v34 = vadd.f32 %v5912_v36, %v5825_v48  ;;  %v10831_v42 = vpop.f32.mrb[76].mxu0  ;;  %v6080_v63 = vmax.f32 %v6048_v52, 0.0  ;;  %v15598_v36 = vpop.permute.xlu0 %6006 }
 0x6db   : > { %v10832_v41 = vpop.f32.mrb[77].mxu0 }
 0x6dc   : > { %v6081_v25 = vmax.f32 %v6049_v34, 0.0  ;;  %v10833_v32 = vadd.f32 %v10832_v41, %v10831_v42  ;;  %v10834_v57 = vpop.f32.mrb[78].mxu0 }
 0x6dd   : > { %v10835_v59 = vpop.f32.mrb[79].mxu0 }
 0x6de   : > { %v15592_v62 = vpack.c.bf16 %v6081_v25, %v6080_v63  ;;  %v5826_v19 = vadd.f32 %v10833_v32, %v15435_v58  ;;  %v10836_v46 = vadd.f32 %v10835_v59, %v10834_v57  ;;  %v5937_v63 = vpop.permute.xlu0 %5936 }
 0x6e0   : > { %v6050_v33 = vadd.f32 %v5917_v14, %v5826_v19  ;;  %v5827_v30 = vadd.f32 %v10836_v46, %v15440_v44  ;;  %6177 = vrot.lane.b32.xlu0 %v15592_v62, %s12436_s12 }
 0x6e2   : > { %v6051_v23 = vadd.f32 %v5922_v47, %v5827_v30  ;;  %v10837_v50 = vpop.f32.mrb[80].mxu0  ;;  %v6082_v52 = vmax.f32 %v6050_v33, 0.0  ;;  %v5942_v47 = vpop.permute.xlu1 %5941 }
 0x6e3   : > { %v10838_v16 = vpop.f32.mrb[81].mxu0 }
 0x6e4   : > { %v6083_v48 = vmax.f32 %v6051_v23, 0.0  ;;  %v10839_v34 = vadd.f32 %v10838_v16, %v10837_v50  ;;  %v10840_v42 = vpop.f32.mrb[82].mxu0  ;;  %v15608_v50 = vpop.permute.xlu0 %6016 }
 0x6e5   : > { %v10841_v41 = vpop.f32.mrb[83].mxu0 }
 0x6e6   : > { %v15602_v58 = vpack.c.bf16 %v6083_v48, %v6082_v52  ;;  %v5828_v14 = vadd.f32 %v10839_v34, %v15450_v56  ;;  %v10842_v44 = vadd.f32 %v10841_v41, %v10840_v42 }
 0x6e8   : > { %v6052_v25 = vadd.f32 %v5927_v18, %v5828_v14  ;;  %v5829_v32 = vadd.f32 %v10842_v44, %v15455_v0  ;;  %6179 = vrot.lane.b32.xlu0 %v15602_v58, %s12436_s12  ;;  %v15613_v0 = vpop.permute.xlu1 %6021  ;;  %v5947_v41 = vpop.permute.xlu0 %5946 }
 0x6ea   : > { %v6053_v57 = vadd.f32 %v5932_v10, %v5829_v32  ;;  %v10843_v59 = vpop.f32.mrb[84].mxu0  ;;  %v6084_v46 = vmax.f32 %v6052_v25, 0.0 }
 0x6eb   : > { %v10844_v19 = vpop.f32.mrb[85].mxu0 }
 0x6ec   : > { %v6085_v33 = vmax.f32 %v6053_v57, 0.0  ;;  %v10845_v30 = vadd.f32 %v10844_v19, %v10843_v59  ;;  %v10846_v23 = vpop.f32.mrb[86].mxu0  ;;  %v5952_v59 = vpop.permute.xlu1 %5951 }
 0x6ed   : > { %v10847_v16 = vpop.f32.mrb[87].mxu0 }
 0x6ee   : > { %v15610_v56 = vpack.c.bf16 %v6085_v33, %v6084_v46  ;;  %v5830_v18 = vadd.f32 %v10845_v30, %v15462_v2  ;;  %v10848_v52 = vadd.f32 %v10847_v16, %v10846_v23 }
 0x6f0   : > { %v6054_v48 = vadd.f32 %v5937_v63, %v5830_v18  ;;  %v5831_v34 = vadd.f32 %v10848_v52, %v15467_v9  ;;  %6181 = vrot.lane.b32.xlu0 %v15610_v56, %s12436_s12  ;;  %v15626_v16 = vpop.permute.xlu1 %6031 }
 0x6f2   : > { %v6055_v10 = vadd.f32 %v5942_v47, %v5831_v34  ;;  %v10849_v42 = vpop.f32.mrb[88].mxu0  ;;  %v6086_v44 = vmax.f32 %v6054_v48, 0.0  ;;  %v15624_v47 = vpop.permute.xlu0 %6026 }
 0x6f3   : > { %v10850_v14 = vpop.f32.mrb[89].mxu0 }
 0x6f4   : > { %v6087_v25 = vmax.f32 %v6055_v10, 0.0  ;;  %v10851_v32 = vadd.f32 %v10850_v14, %v10849_v42  ;;  %v10852_v57 = vpop.f32.mrb[90].mxu0 }
 0x6f5   : > { %v10853_v19 = vpop.f32.mrb[91].mxu0 }
 0x6f6   : > { %v15618_v2 = vpack.c.bf16 %v6087_v25, %v6086_v44  ;;  %v5832_v46 = vadd.f32 %v10851_v32, %v15474_v5  ;;  %v10854_v63 = vadd.f32 %v10853_v19, %v10852_v57  ;;  %v5957_v14 = vpop.permute.xlu0 %5956  ;;  %v5962_v32 = vpop.permute.xlu1 %5961 }
 0x6f8   : > { %v6056_v33 = vadd.f32 %v5947_v41, %v5832_v46  ;;  %v5833_v9 = vadd.f32 %v10854_v63, %v15479_v17  ;;  %6183 = vrot.lane.b32.xlu0 %v15618_v2, %s12436_s12 }
 0x6fa   : > { %v6057_v30 = vadd.f32 %v5952_v59, %v5833_v9  ;;  %v10855_v23 = vpop.f32.mrb[92].mxu0  ;;  %v6088_v52 = vmax.f32 %v6056_v33, 0.0 }
 0x6fb   : > { %v10856_v18 = vpop.f32.mrb[93].mxu0 }
 0x6fc   : > { %v6089_v48 = vmax.f32 %v6057_v30, 0.0  ;;  %v10857_v34 = vadd.f32 %v10856_v18, %v10855_v23  ;;  %v10858_v10 = vpop.f32.mrb[94].mxu0 }
 0x6fd   : > { %v10859_v42 = vpop.f32.mrb[95].mxu0 }
 0x6fe   : > { %v15628_v5 = vpack.c.bf16 %v6089_v48, %v6088_v52  ;;  %v5834_v41 = vadd.f32 %v10857_v34, %v15486_v24  ;;  %v10860_v17 = vadd.f32 %v10859_v42, %v10858_v10 }
 0x700   : > { %v6058_v44 = vadd.f32 %v5957_v14, %v5834_v41  ;;  %v5835_v25 = vadd.f32 %v10860_v17, %v15491_v43  ;;  %6185 = vrot.lane.b32.xlu0 %v15628_v5, %s12436_s12 }
 0x702   : > { %v6059_v57 = vadd.f32 %v5962_v32, %v5835_v25  ;;  %v10861_v59 = vpop.f32.mrb[96].mxu0  ;;  %v6090_v46 = vmax.f32 %v6058_v44, 0.0 }
 0x703   : > { %v10862_v19 = vpop.f32.mrb[97].mxu0 }
 0x704   : > { %v6091_v63 = vmax.f32 %v6059_v57, 0.0  ;;  %v10863_v33 = vadd.f32 %v10862_v19, %v10861_v59  ;;  %v10864_v9 = vpop.f32.mrb[98].mxu0 }
 0x705   : > { %v10865_v30 = vpop.f32.mrb[99].mxu0 }
 0x706   : > { %v15634_v23 = vpack.c.bf16 %v6091_v63, %v6090_v46  ;;  %v5836_v24 = vadd.f32 %v10863_v33, %v15498_v60  ;;  %v10866_v18 = vadd.f32 %v10865_v30, %v10864_v9 }
 0x708   : > { %v6060_v52 = vadd.f32 %v15546_v49, %v5836_v24  ;;  %v5837_v43 = vadd.f32 %v10866_v18, %v15503_v39  ;;  %6187 = vrot.lane.b32.xlu0 %v15634_v23, %s12436_s12 }
 0x70a   : > { %v6061_v48 = vadd.f32 %v15551_v51, %v5837_v43  ;;  %v10867_v34 = vpop.f32.mrb[100].mxu0  ;;  %v6092_v42 = vmax.f32 %v6060_v52, 0.0 }
 0x70b   : > { %v10868_v10 = vpop.f32.mrb[101].mxu0 }
 0x70c   : > { %v6093_v41 = vmax.f32 %v6061_v48, 0.0  ;;  %v10869_v17 = vadd.f32 %v10868_v10, %v10867_v34  ;;  %v10870_v14 = vpop.f32.mrb[102].mxu0  ;;  %6911 = vrot.lane.b32.xlu0 %v15576_v27, %s12437_s13 }
 0x70d   : > { %v10871_v60 = vpop.f32.mrb[103].mxu0 }
 0x70e   : > { %v15644_v44 = vpack.c.bf16 %v6093_v41, %v6092_v42  ;;  %v5838_v49 = vadd.f32 %v10869_v17, %v15510_v15  ;;  %v10872_v39 = vadd.f32 %v10871_v60, %v10870_v14 }
 0x710   : > { %v6062_v25 = vadd.f32 %v15560_v6, %v5838_v49  ;;  %v5839_v32 = vadd.f32 %v10872_v39, %v15515_v55  ;;  %6189 = vrot.lane.b32.xlu1 %v15644_v44, %s12436_s12  ;;  %11021 = vmatprep.subr.bf16.mxu0 %v15644_v44 }
 0x711   : > { %6913 = vrot.lane.b32.xlu0 %v15584_v37, %s12437_s13  ;;  %11022 = vmatpush3.bf16.msra.mxu0 %v15576_v27 }
 0x712   : > { %v6063_v51 = vadd.f32 %v15563_v4, %v5839_v32  ;;  %v10873_v57 = vpop.f32.mrb[104].mxu0  ;;  %v6094_v15 = vmax.f32 %v6062_v25, 0.0 }
 0x713   : > { %v10874_v59 = vpop.f32.mrb[105].mxu0 }
 0x714   : > { %v6095_v19 = vmax.f32 %v6063_v51, 0.0  ;;  %v10875_v46 = vadd.f32 %v10874_v59, %v10873_v57  ;;  %v10876_v6 = vpop.f32.mrb[106].mxu0 }
 0x715   : > { %6915 = vrot.lane.b32.xlu0 %v15592_v62, %s12437_s13  ;;  %v10877_v55 = vpop.f32.mrb[107].mxu0 }
 0x716   : > { %v15658_v63 = vpack.c.bf16 %v6095_v19, %v6094_v15  ;;  %v5840_v33 = vadd.f32 %v10875_v46, %v15520_v7  ;;  %v10878_v9 = vadd.f32 %v10877_v55, %v10876_v6 }
 0x718   : > { %v6064_v30 = vadd.f32 %v15572_v1, %v5840_v33  ;;  %v5841_v24 = vadd.f32 %v10878_v9, %v15523_v53  ;;  %6191 = vrot.lane.b32.xlu1 %v15658_v63, %s12436_s12  ;;  %11023 = vmatprep.subr.bf16.mxu0 %v15658_v63 }
 0x719   : > { %6917 = vrot.lane.b32.xlu0 %v15602_v58, %s12437_s13  ;;  %11024 = vmatpush3.bf16.msra.mxu0 %v15584_v37 }
 0x71a   : > { %v6065_v4 = vadd.f32 %v15574_v45, %v5841_v24  ;;  %v10879_v18 = vpop.f32.mrb[108].mxu0  ;;  %v6096_v7 = vmax.f32 %v6064_v30, 0.0 }
 0x71b   : > { %v10880_v52 = vpop.f32.mrb[109].mxu0 }
 0x71c   : > { %v6097_v43 = vmax.f32 %v6065_v4, 0.0  ;;  %v10881_v48 = vadd.f32 %v10880_v52, %v10879_v18  ;;  %v10882_v1 = vpop.f32.mrb[110].mxu0 }
 0x71d   : > { %6919 = vrot.lane.b32.xlu0 %v15610_v56, %s12437_s13  ;;  %v10883_v53 = vpop.f32.mrb[111].mxu0 }
 0x71e   : > { %v15672_v34 = vpack.c.bf16 %v6097_v43, %v6096_v7  ;;  %v5842_v10 = vadd.f32 %v10881_v48, %v15528_v31  ;;  %v10884_v42 = vadd.f32 %v10883_v53, %v10882_v1 }
 0x720   : > { %v6066_v41 = vadd.f32 %v15582_v28, %v5842_v10  ;;  %v5843_v17 = vadd.f32 %v10884_v42, %v15531_v12  ;;  %6193 = vrot.lane.b32.xlu1 %v15672_v34, %s12436_s12  ;;  %11025 = vmatprep.subr.bf16.mxu0 %v15672_v34 }
 0x721   : > { %6921 = vrot.lane.b32.xlu0 %v15618_v2, %s12437_s13  ;;  %11026 = vmatpush3.bf16.msra.mxu0 %v15592_v62 }
 0x722   : > { %v6067_v45 = vadd.f32 %v15587_v11, %v5843_v17  ;;  %v10885_v14 = vpop.f32.mrb[112].mxu0  ;;  %v6098_v31 = vmax.f32 %v6066_v41, 0.0 }
 0x723   : > { %v10886_v60 = vpop.f32.mrb[113].mxu0 }
 0x724   : > { %v6099_v49 = vmax.f32 %v6067_v45, 0.0  ;;  %v10887_v39 = vadd.f32 %v10886_v60, %v10885_v14  ;;  %v10888_v28 = vpop.f32.mrb[114].mxu0  ;;  %v12164_v45 = vld [vmem:[%s17085_s7 + $0x4] ss:$8 sps:$4 sm:$0xff]  }
 0x725   : > { %6923 = vrot.lane.b32.xlu0 %v15628_v5, %s12437_s13  ;;  %v10889_v12 = vpop.f32.mrb[115].mxu0  ;;  %6461 = vmatprep.mubr.bf16.mxu1 %v12164_v45 }
 0x726   : > { %v15686_v25 = vpack.c.bf16 %v6099_v49, %v6098_v31  ;;  %v5844_v32 = vadd.f32 %v10887_v39, %v15536_v38  ;;  %v10890_v51 = vadd.f32 %v10889_v12, %v10888_v28  ;;  %v6037_v31 = vpop.permute.xlu0 %6036  ;;  %v6042_v28 = vpop.permute.xlu1 %6041 }
 0x728   : > { %v6068_v57 = vadd.f32 %v15598_v36, %v5844_v32  ;;  %v5845_v59 = vadd.f32 %v10890_v51, %v15539_v8  ;;  %6195 = vrot.lane.b32.xlu1 %v15686_v25, %s12436_s12  ;;  %11027 = vmatprep.subr.bf16.mxu0 %v15686_v25 }
 0x729   : > { %6925 = vrot.lane.b32.xlu0 %v15634_v23, %s12437_s13  ;;  %11028 = vmatpush3.bf16.msra.mxu0 %v15602_v58 }
 0x72a   : > { %v6069_v11 = vadd.f32 %v15600_v29, %v5845_v59  ;;  %v10891_v15 = vpop.f32.mrb[116].mxu0  ;;  %v6100_v38 = vmax.f32 %v6068_v57, 0.0  ;;  %v12179_v57 = vld [vmem:[%s17085_s7 + $0x224] ss:$8 sps:$4 sm:$0xff]   ;;  %v12177_v59 = vld [vmem:[%s17085_s7 + $0x220] ss:$8 sps:$4 sm:$0xff]  }
 0x72b   : > { %v10892_v19 = vpop.f32.mrb[117].mxu0 }
 0x72c   : > { %v6101_v46 = vmax.f32 %v6069_v11, 0.0  ;;  %v10893_v6 = vadd.f32 %v10892_v19, %v10891_v15  ;;  %v10894_v36 = vpop.f32.mrb[118].mxu0  ;;  %v12183_v11 = vld [vmem:[%s17085_s7 + $0x230] ss:$8 sps:$4 sm:$0xff]   ;;  %v12189_v15 = vld [vmem:[%s17085_s7 + $0x240] ss:$8 sps:$4 sm:$0xff]  }
 0x72d   : > { %7361 = vrot.lane.b32.xlu0 %v15576_v27, %s12438_s15  ;;  %v10895_v8 = vpop.f32.mrb[119].mxu0  ;;  %v8277_v19 = vld [vmem:[%s17086_s8 + $0x80] sm:$0xff] }
 0x72e   : > { %v15700_v55 = vpack.c.bf16 %v6101_v46, %v6100_v38  ;;  %v5846_v33 = vadd.f32 %v10893_v6, %v15544_v61  ;;  %v10896_v9 = vadd.f32 %v10895_v8, %v10894_v36  ;;  %v8261_v46 = vld [vmem:[%s17086_s8] sm:$0xff]  ;;  %v8279_v8 = vld [vmem:[%s17086_s8 + $0x90] sm:$0xff] }
 0x72f   : > { %v12203_v6 = vld [vmem:[%s17085_s7 + $0x264] ss:$8 sps:$4 sm:$0xff]  }
 0x730   : > { %v6070_v30 = vadd.f32 %v15608_v50, %v5846_v33  ;;  %v5847_v24 = vadd.f32 %v10896_v9, %v15549_v13  ;;  %6197 = vrot.lane.b32.xlu1 %v15700_v55, %s12436_s12  ;;  %11029 = vmatprep.subr.bf16.mxu0 %v15700_v55  ;;  %v8263_v33 = vld [vmem:[%s17086_s8 + $0x10] sm:$0xff]  ;;  %v12201_v9 = vld [vmem:[%s17085_s7 + $0x260] ss:$8 sps:$4 sm:$0xff]  }
 0x731   : > { %7811 = vrot.lane.b32.xlu0 %v15576_v27, %s12439_s16  ;;  %11030 = vmatpush3.bf16.msra.mxu0 %v15610_v56 }
 0x732   : > { %v6071_v29 = vadd.f32 %v15613_v0, %v5847_v24  ;;  %v10897_v4 = vpop.f32.mrb[120].mxu0  ;;  %v6102_v61 = vmax.f32 %v6070_v30, 0.0  ;;  %v12209_v30 = vld [vmem:[%s17085_s7 + $0x274] ss:$8 sps:$4 sm:$0xff]  }
 0x733   : > { %v10898_v18 = vpop.f32.mrb[121].mxu0 }
 0x734   : > { %v6103_v52 = vmax.f32 %v6071_v29, 0.0  ;;  %v10899_v7 = vadd.f32 %v10898_v18, %v10897_v4  ;;  %v10900_v50 = vpop.f32.mrb[122].mxu0  ;;  %v8281_v29 = vld [vmem:[%s17086_s8 + $0xa0] sm:$0xff]  ;;  %v12207_v18 = vld [vmem:[%s17085_s7 + $0x270] ss:$8 sps:$4 sm:$0xff]  }
 0x735   : > { %7363 = vrot.lane.b32.xlu0 %v15584_v37, %s12438_s15  ;;  %v10901_v13 = vpop.f32.mrb[123].mxu0  ;;  %v8265_v4 = vld [vmem:[%s17086_s8 + $0x20] sm:$0xff] }
 0x736   : > { %v15714_v43 = vpack.c.bf16 %v6103_v52, %v6102_v61  ;;  %v5848_v48 = vadd.f32 %v10899_v7, %v15556_v26  ;;  %v10902_v1 = vadd.f32 %v10901_v13, %v10900_v50  ;;  %v8283_v7 = vld [vmem:[%s17086_s8 + $0xb0] sm:$0xff]  ;;  %v12215_v50 = vld [vmem:[%s17085_s7 + $0x284] ss:$8 sps:$4 sm:$0xff]  }
 0x738   : > { %v6072_v27 = vadd.f32 %v15624_v47, %v5848_v48  ;;  %v5849_v53 = vadd.f32 %v10902_v1, %v15558_v40  ;;  %6199 = vrot.lane.b32.xlu1 %v15714_v43, %s12436_s12  ;;  %11031 = vmatprep.subr.bf16.mxu0 %v15714_v43  ;;  %v8267_v48 = vld [vmem:[%s17086_s8 + $0x30] sm:$0xff]  ;;  %v12213_v1 = vld [vmem:[%s17085_s7 + $0x280] ss:$8 sps:$4 sm:$0xff]  }
 0x739   : > { %7813 = vrot.lane.b32.xlu0 %v15584_v37, %s12439_s16  ;;  %11032 = vmatpush3.bf16.msra.mxu0 %v15618_v2 }
 0x73a   : > { %v6073_v0 = vadd.f32 %v15626_v16, %v5849_v53  ;;  %v10903_v10 = vpop.f32.mrb[124].mxu0  ;;  %v6104_v26 = vmax.f32 %v6072_v27, 0.0  ;;  %v12167_v16 = vld [vmem:[%s17085_s7 + $0x204] ss:$8 sps:$4 sm:$0xff]  }
 0x73b   : > { %v10904_v42 = vpop.f32.mrb[125].mxu0  ;;  %6782 = vmatprep.mubr.bf16.mxu0 %v12167_v16 }
 0x73c   : > { %v6105_v41 = vmax.f32 %v6073_v0, 0.0  ;;  %v10905_v17 = vadd.f32 %v10904_v42, %v10903_v10  ;;  %v10906_v47 = vpop.f32.mrb[126].mxu0  ;;  %v8285_v0 = vld [vmem:[%s17086_s8 + $0xc0] sm:$0xff]  ;;  %v12221_v10 = vld [vmem:[%s17085_s7 + $0x294] ss:$8 sps:$4 sm:$0xff]  }
 0x73d   : > { %7365 = vrot.lane.b32.xlu0 %v15592_v62, %s12438_s15  ;;  %v10907_v40 = vpop.f32.mrb[127].mxu0 }
 0x73e   : > { %v15731_v14 = vpack.c.bf16 %v6105_v41, %v6104_v26  ;;  %v5850_v37 = vadd.f32 %v10905_v17, %v15566_v22  ;;  %v10908_v60 = vadd.f32 %v10907_v40, %v10906_v47  ;;  %v12219_v41 = vld [vmem:[%s17085_s7 + $0x290] ss:$8 sps:$4 sm:$0xff]   ;;  %v12227_v40 = vld [vmem:[%s17085_s7 + $0x2a4] ss:$8 sps:$4 sm:$0xff]  }
 0x73f   : > { %v8287_v47 = vld [vmem:[%s17086_s8 + $0xd0] sm:$0xff] }
 0x740   : > { %v6074_v49 = vadd.f32 %v6037_v31, %v5850_v37  ;;  %v5851_v39 = vadd.f32 %v10908_v60, %v15568_v21  ;;  %6201 = vrot.lane.b32.xlu1 %v15731_v14, %s12436_s12  ;;  %11033 = vmatprep.subr.bf16.mxu0 %v15731_v14  ;;  %v12165_v21 = vld [vmem:[%s17085_s7 + $0x200] ss:$8 sps:$4 sm:$0xff]   ;;  %v8271_v37 = vld [vmem:[%s17086_s8 + $0x50] sm:$0xff] }
 0x741   : > { %7815 = vrot.lane.b32.xlu0 %v15592_v62, %s12439_s16  ;;  %11034 = vmatpush3.bf16.msra.mxu0 %v15628_v5  ;;  %v12173_v62 = vld [vmem:[%s17085_s7 + $0x214] ss:$8 sps:$4 sm:$0xff]   ;;  %v12225_v60 = vld [vmem:[%s17085_s7 + $0x2a0] ss:$8 sps:$4 sm:$0xff]  }
 0x742   : > { %v6075_v22 = vadd.f32 %v6042_v28, %v5851_v39  ;;  %v6106_v12 = vmax.f32 %v6074_v49, 0.0  ;;  %v6174_v38 = vpop.permute.xlu0 %6173  ;;  %v8289_v31 = vld [vmem:[%s17086_s8 + $0xe0] sm:$0xff]  ;;  %v12233_v49 = vld [vmem:[%s17085_s7 + $0x2b4] ss:$8 sps:$4 sm:$0xff]  }
 0x743   : > { %v6205_v13 = vsel %vm562_vm0, %v6174_v38, 0  ;;  %v8273_v28 = vld [vmem:[%s17086_s8 + $0x60] sm:$0xff]  ;;  %v8280_v38 = vld [vmem:[%s17086_s8 + $0x98] sm:$0xff] }
 0x744   : > { %v6107_v32 = vmax.f32 %v6075_v22, 0.0  ;;  %v12231_v22 = vld [vmem:[%s17085_s7 + $0x2b0] ss:$8 sps:$4 sm:$0xff]  }
 0x745   : > { %7367 = vrot.lane.b32.xlu0 %v15602_v58, %s12438_s15 }
 0x746   : > { %v15746_v51 = vpack.c.bf16 %v6107_v32, %v6106_v12 }
 0x748   : > { %6203 = vrot.lane.b32.xlu1 %v15746_v51, %s12436_s12  ;;  %11035 = vmatprep.subr.bf16.mxu0 %v15746_v51  ;;  %s9667_s12 = sshll.u32 (%p12530_p5), %s17094_s20, 2 }
 0x749   : > { %7817 = vrot.lane.b32.xlu0 %v15602_v58, %s12439_s16  ;;  %11036 = vmatpush3.bf16.msra.mxu0 %v15634_v23  ;;  %v12171_v58 = vld [vmem:[%s17085_s7 + $0x210] ss:$8 sps:$4 sm:$0xff]  }
 0x74a   : > { %v6176_v36 = vpop.permute.xlu0 %6175 }
 0x74b   : > { %v6206_v42 = vsel %vm562_vm0, %v6176_v36, 0 }
 0x74c   : > { %6927 = vrot.lane.b32.xlu1 %v15644_v44, %s12437_s13  ;;  %6783 = vmatmul.mubr.bf16.vlgmr.msra.gmra.mrb[128].mxu0 %v12165_v21  ;;  %v8291_v21 = vld [vmem:[%s17086_s8 + $0xf0] sm:$0xff] }
 0x74d   : > { %7369 = vrot.lane.b32.xlu0 %v15610_v56, %s12438_s15  ;;  %6790 = vmatprep.mubr.bf16.mxu0 %v12173_v62  ;;  %v12239_v62 = vld [vmem:[%s17085_s7 + $0x2c4] ss:$8 sps:$4 sm:$0xff]  }
 0x750   : > { %6929 = vrot.lane.b32.xlu1 %v15658_v63, %s12437_s13 }
 0x751   : > { %7819 = vrot.lane.b32.xlu0 %v15610_v56, %s12439_s16  ;;  %v12185_v56 = vld [vmem:[%s17085_s7 + $0x234] ss:$8 sps:$4 sm:$0xff]  }
 0x754   : > { %6931 = vrot.lane.b32.xlu1 %v15672_v34, %s12437_s13  ;;  %6791 = vmatmul.mubr.bf16.gmra.mrb[132].mxu0 %v12171_v58  ;;  %v8275_v58 = vld [vmem:[%s17086_s8 + $0x70] sm:$0xff] }
 0x755   : > { %7371 = vrot.lane.b32.xlu0 %v15618_v2, %s12438_s15  ;;  %6798 = vmatprep.mubr.bf16.mxu0 %v12179_v57 }
 0x758   : > { %6933 = vrot.lane.b32.xlu1 %v15686_v25, %s12437_s13 }
 0x759   : > { %7821 = vrot.lane.b32.xlu0 %v15618_v2, %s12439_s16  ;;  %v12191_v2 = vld [vmem:[%s17085_s7 + $0x244] ss:$8 sps:$4 sm:$0xff]  }
 0x75c   : > { %6935 = vrot.lane.b32.xlu1 %v15700_v55, %s12437_s13  ;;  %6799 = vmatmul.mubr.bf16.gmra.mrb[136].mxu0 %v12177_v59  ;;  %v8278_v59 = vld [vmem:[%s17086_s8 + $0x88] sm:$0xff] }
 0x75d   : > { %7373 = vrot.lane.b32.xlu0 %v15628_v5, %s12438_s15  ;;  %6806 = vmatprep.mubr.bf16.mxu0 %v12185_v56  ;;  %v12237_v56 = vld [vmem:[%s17085_s7 + $0x2c0] ss:$8 sps:$4 sm:$0xff]  }
 0x760   : > { %6937 = vrot.lane.b32.xlu1 %v15714_v43, %s12437_s13 }
 0x761   : > { %7823 = vrot.lane.b32.xlu0 %v15628_v5, %s12439_s16  ;;  %v12197_v5 = vld [vmem:[%s17085_s7 + $0x254] ss:$8 sps:$4 sm:$0xff]  }
 0x764   : > { %6939 = vrot.lane.b32.xlu1 %v15731_v14, %s12437_s13  ;;  %6807 = vmatmul.mubr.bf16.gmra.mrb[140].mxu0 %v12183_v11 }
 0x765   : > { %7375 = vrot.lane.b32.xlu0 %v15634_v23, %s12438_s15  ;;  %6814 = vmatprep.mubr.bf16.mxu0 %v12191_v2  ;;  %v8535_v2 = vld [vmem:[%s17088_s10] sm:$0xff] }
 0x768   : > { %6941 = vrot.lane.b32.xlu1 %v15746_v51, %s12437_s13  ;;  %s8749_s13 = sshll.u32 %s17093_s30, 3 }
 0x769   : > { %7825 = vrot.lane.b32.xlu0 %v15634_v23, %s12439_s16  ;;  %v12195_v23 = vld [vmem:[%s17085_s7 + $0x250] ss:$8 sps:$4 sm:$0xff]   ;;  %s545_s22 = scalar_lea.vmem [#allocation3], %s8749_s13 }
 0x76c   : > { %7377 = vrot.lane.b32.xlu1 %v15644_v44, %s12438_s15  ;;  %6815 = vmatmul.mubr.bf16.gmra.mrb[144].mxu0 %v12189_v15  ;;  %v12245_v15 = vld [vmem:[%s17085_s7 + $0x2d4] ss:$8 sps:$4 sm:$0xff]  }
 0x76d   : > { %8375 = vperm.xlu0 %11616, %v8277_v19   ;;  %6822 = vmatprep.mubr.bf16.mxu0 %v12197_v5  ;;  %v8262_v5 = vld [vmem:[%s17086_s8 + $0x8] sm:$0xff] }
 0x770   : > { %7827 = vrot.lane.b32.xlu1 %v15644_v44, %s12439_s16  ;;  %v6178_v44 = vpop.permute.xlu0 %6177 }
 0x771   : > { %8295 = vperm.xlu0 %11616, %v8261_v46   ;;  %v6207_v45 = vsel %vm562_vm0, %v6178_v44, 0  ;;  %v12243_v46 = vld [vmem:[%s17085_s7 + $0x2d0] ss:$8 sps:$4 sm:$0xff]  }
 0x772   : > { %v8264_v44 = vld [vmem:[%s17086_s8 + $0x18] sm:$0xff] }
 0x774   : > { %7379 = vrot.lane.b32.xlu1 %v15658_v63, %s12438_s15  ;;  %6823 = vmatmul.mubr.bf16.gmra.mrb[148].mxu0 %v12195_v23  ;;  %v6180_v24 = vpop.permute.xlu0 %6179 }
 0x775   : > { %8385 = vperm.xlu0 %11616, %v8279_v8   ;;  %6830 = vmatprep.mubr.bf16.mxu0 %v12203_v6  ;;  %v6208_v39 = vsel %vm562_vm0, %v6180_v24, 0  ;;  %v12251_v6 = vld [vmem:[%s17085_s7 + $0x2e4] ss:$8 sps:$4 sm:$0xff]  }
 0x778   : > { %7829 = vrot.lane.b32.xlu1 %v15658_v63, %s12439_s16  ;;  %v15853_v63 = vpop.permute.xlu0 %6181 }
 0x779   : > { %8305 = vperm.xlu0 %11616, %v8263_v33   ;;  %v8282_v33 = vld [vmem:[%s17086_s8 + $0xa8] sm:$0xff] }
 0x77c   : > { %7381 = vrot.lane.b32.xlu1 %v15672_v34, %s12438_s15  ;;  %6831 = vmatmul.mubr.bf16.gmra.mrb[152].mxu0 %v12201_v9  ;;  %v15863_v61 = vpop.permute.xlu0 %6183  ;;  %v12249_v9 = vld [vmem:[%s17085_s7 + $0x2e0] ss:$8 sps:$4 sm:$0xff]  }
 0x77d   : > { %8395 = vperm.xlu0 %11616, %v8281_v29   ;;  %6838 = vmatprep.mubr.bf16.mxu0 %v12209_v30  ;;  %v12257_v29 = vld [vmem:[%s17085_s7 + $0x2f4] ss:$8 sps:$4 sm:$0xff]  }
 0x780   : > { %7831 = vrot.lane.b32.xlu1 %v15672_v34, %s12439_s16  ;;  %v15877_v34 = vpop.permute.xlu0 %6185 }
 0x781   : > { %8315 = vperm.xlu0 %11616, %v8265_v4   ;;  %v6211_v36 = vsel %vm562_vm0, %v15877_v34, 0  ;;  %v12162_v4 = vld [vmem:[%s17085_s7] ss:$8 sps:$4 sm:$0xff]  }
 0x782   : > { %v6190_v52 = vpop.permute.xlu1 %6189 }
 0x783   : > { %11555 = vmatprep.subr.msk.bf16.mxu1 %vm562_vm0, %v6190_v52 }
 0x784   : > { %7383 = vrot.lane.b32.xlu1 %v15686_v25, %s12438_s15  ;;  %10910 = vmatpush3.bf16.msra.mxu1 %v6205_v13  ;;  %v15887_v27 = vpop.permute.xlu0 %6187  ;;  %v12255_v13 = vld [vmem:[%s17085_s7 + $0x2f0] ss:$8 sps:$4 sm:$0xff]  }
 0x785   : > { %8405 = vperm.xlu0 %11616, %v8283_v7   ;;  %6839 = vmatmul.mubr.bf16.gmra.mrb[156].mxu0 %v12207_v18  ;;  %v8266_v18 = vld [vmem:[%s17086_s8 + $0x28] sm:$0xff] }
 0x786   : > { %6846 = vmatprep.mubr.bf16.mxu0 %v12215_v50  ;;  %v8284_v50 = vld [vmem:[%s17086_s8 + $0xb8] sm:$0xff] }
 0x788   : > { %7833 = vrot.lane.b32.xlu1 %v15686_v25, %s12439_s16  ;;  %v8269_v25 = vld [vmem:[%s17086_s8 + $0x40] sm:$0xff]  ;;  %v15904_v26 = vpop.permute.xlu0 %6911 }
 0x789   : > { %8325 = vperm.xlu0 %11616, %v8267_v48   ;;  %v6943_v20 = vsel %vm566_vm1, %v15904_v26, 0  ;;  %v12263_v48 = vld [vmem:[%s17085_s7 + $0x304] ss:$8 sps:$4 sm:$0xff]  }
 0x78a   : > { %v6192_v53 = vpop.permute.xlu1 %6191  ;;  %v8286_v26 = vld [vmem:[%s17086_s8 + $0xc8] sm:$0xff] }
 0x78b   : > { %11556 = vmatprep.subr.msk.bf16.mxu1 %vm562_vm0, %v6192_v53  ;;  %v8268_v53 = vld [vmem:[%s17086_s8 + $0x38] sm:$0xff] }
 0x78c   : > { %7385 = vrot.lane.b32.xlu1 %v15700_v55, %s12438_s15  ;;  %10912 = vmatpush3.bf16.msra.mxu1 %v6206_v42 }
 0x78d   : > { %8415 = vperm.xlu0 %11616, %v8285_v0   ;;  %6847 = vmatmul.mubr.bf16.gmra.mrb[160].mxu0 %v12213_v1  ;;  %v12176_v0 = vld [vmem:[%s17085_s7 + $0x24] ss:$8 sps:$4 sm:$0xff]  }
 0x78e   : > { %6854 = vmatprep.mubr.bf16.mxu0 %v12221_v10 }
 0x790   : > { %7835 = vrot.lane.b32.xlu1 %v15700_v55, %s12439_s16  ;;  %v15923_v55 = vpop.permute.xlu0 %6913 }
 0x791   : > { %8335 = vperm.xlu0 %11616, %v8269_v25   ;;  %v6944_v1 = vsel %vm566_vm1, %v15923_v55, 0  ;;  %v12182_v55 = vld [vmem:[%s17085_s7 + $0x34] ss:$8 sps:$4 sm:$0xff]  }
 0x792   : > { %v6194_v17 = vpop.permute.xlu1 %6193 }
 0x793   : > { %11557 = vmatprep.subr.msk.bf16.mxu1 %vm562_vm0, %v6194_v17 }
 0x794   : > { %7387 = vrot.lane.b32.xlu1 %v15714_v43, %s12438_s15  ;;  %10914 = vmatpush3.bf16.msra.mxu1 %v6207_v45  ;;  %v8270_v45 = vld [vmem:[%s17086_s8 + $0x48] sm:$0xff] }
 0x795   : > { %8425 = vperm.xlu0 %11616, %v8287_v47   ;;  %6855 = vmatmul.mubr.bf16.gmra.mrb[164].mxu0 %v12219_v41  ;;  %v12174_v47 = vld [vmem:[%s17085_s7 + $0x20] ss:$8 sps:$4 sm:$0xff]  }
 0x796   : > { %6862 = vmatprep.mubr.bf16.mxu0 %v12227_v40 }
 0x798   : > { %7837 = vrot.lane.b32.xlu1 %v15714_v43, %s12439_s16  ;;  %v15943_v43 = vpop.permute.xlu0 %6915 }
 0x799   : > { %8345 = vperm.xlu0 %11616, %v8271_v37   ;;  %v6945_v25 = vsel %vm566_vm1, %v15943_v43, 0  ;;  %v12180_v43 = vld [vmem:[%s17085_s7 + $0x30] ss:$8 sps:$4 sm:$0xff]  }
 0x79a   : > { %v6196_v16 = vpop.permute.xlu1 %6195 }
 0x79b   : > { %11558 = vmatprep.subr.msk.bf16.mxu1 %vm562_vm0, %v6196_v16  ;;  %v8288_v16 = vld [vmem:[%s17086_s8 + $0xd8] sm:$0xff] }
 0x79c   : > { %7389 = vrot.lane.b32.xlu1 %v15731_v14, %s12438_s15  ;;  %10916 = vmatpush3.bf16.msra.mxu1 %v6208_v39  ;;  %v15955_v12 = vpop.permute.xlu0 %6917 }
 0x79d   : > { %8435 = vperm.xlu0 %11616, %v8289_v31   ;;  %6863 = vmatmul.mubr.bf16.gmra.mrb[168].mxu0 %v12225_v60  ;;  %v6946_v17 = vsel %vm566_vm1, %v15955_v12, 0 }
 0x79e   : > { %6870 = vmatprep.mubr.bf16.mxu0 %v12233_v49 }
 0x7a0   : > { %7839 = vrot.lane.b32.xlu1 %v15731_v14, %s12439_s16  ;;  %v6209_v14 = vsel %vm562_vm0, %v15853_v63, 0  ;;  %v15973_v57 = vpop.permute.xlu0 %6919  ;;  %v6212_v63 = vsel %vm562_vm0, %v15887_v27, 0  ;;  %v12168_v27 = vld [vmem:[%s17085_s7 + $0x10] ss:$8 sps:$4 sm:$0xff]  }
 0x7a1   : > { %8355 = vperm.xlu0 %11616, %v8273_v28   ;;  %v6947_v60 = vsel %vm566_vm1, %v15973_v57, 0  ;;  %v8272_v28 = vld [vmem:[%s17086_s8 + $0x58] sm:$0xff]  ;;  %v12186_v57 = vld [vmem:[%s17085_s7 + $0x40] ss:$8 sps:$4 sm:$0xff]  }
 0x7a2   : > { %v6198_v32 = vpop.permute.xlu1 %6197 }
 0x7a3   : > { %11559 = vmatprep.subr.msk.bf16.mxu1 %vm562_vm0, %v6198_v32 }
 0x7a4   : > { %7391 = vrot.lane.b32.xlu1 %v15746_v51, %s12438_s15  ;;  %10918 = vmatpush3.bf16.msra.mxu1 %v6209_v14  ;;  %v15997_v19 = vpop.permute.xlu0 %6921  ;;  %s8641_s15 = scalar_lea.vmem (%p12530_p5), %s17089_s11, %s9667_s12 }
 0x7a5   : > { %8445 = vperm.xlu0 %11616, %v8291_v21   ;;  %6871 = vmatmul.mubr.bf16.gmra.mrb[172].mxu0 %v12231_v22  ;;  %v6948_v39 = vsel %vm566_vm1, %v15997_v19, 0  ;;  %v12188_v22 = vld [vmem:[%s17085_s7 + $0x44] ss:$8 sps:$4 sm:$0xff]  }
 0x7a6   : > { %6878 = vmatprep.mubr.bf16.mxu0 %v12239_v62  ;;  %v8290_v62 = vld [vmem:[%s17086_s8 + $0xe8] sm:$0xff] }
 0x7a8   : > { %7841 = vrot.lane.b32.xlu1 %v15746_v51, %s12439_s16  ;;  %v6210_v51 = vsel %vm562_vm0, %v15863_v61, 0  ;;  %v16013_v8 = vpop.permute.xlu0 %6923  ;;  %v12170_v61 = vld [vmem:[%s17085_s7 + $0x14] ss:$8 sps:$4 sm:$0xff]  }
 0x7a9   : > { %8365 = vperm.xlu0 %11616, %v8275_v58   ;;  %v6949_v32 = vsel %vm566_vm1, %v16013_v8, 0 }
 0x7aa   : > { %v6200_v11 = vpop.permute.xlu1 %6199 }
 0x7ab   : > { %11560 = vmatprep.subr.msk.bf16.mxu1 %vm562_vm0, %v6200_v11 }
 0x7ac   : > { %8380 = vperm.xlu1 %11617, %v8278_v59   ;;  %10920 = vmatpush3.bf16.msra.mxu1 %v6210_v51  ;;  %v16024_v30 = vpop.permute.xlu0 %6925  ;;  %v8274_v59 = vld [vmem:[%s17086_s8 + $0x68] sm:$0xff] }
 0x7ad   : > { %8539 = vperm.xlu0 %11616, %v8535_v2   ;;  %6879 = vmatmul.mubr.bf16.gmra.mrb[176].mxu0 %v12237_v56  ;;  %v6950_v58 = vsel %vm566_vm1, %v16024_v30, 0  ;;  %v12194_v56 = vld [vmem:[%s17085_s7 + $0x54] ss:$8 sps:$4 sm:$0xff]  }
 0x7ae   : > { %6886 = vmatprep.mubr.bf16.mxu0 %v12245_v15  ;;  %v8292_v15 = vld [vmem:[%s17086_s8 + $0xf8] sm:$0xff] }
 0x7b0   : > { %8300 = vperm.xlu1 %11617, %v8262_v5   ;;  %v16048_v7 = vpop.permute.xlu0 %7361  ;;  %v12192_v5 = vld [vmem:[%s17085_s7 + $0x50] ss:$8 sps:$4 sm:$0xff]  }
 0x7b1   : > { %v7393_v54 = vsel %vm571_vm2, %v16048_v7, 0 }
 0x7b2   : > { %v6202_v23 = vpop.permute.xlu1 %6201 }
 0x7b3   : > { %11561 = vmatprep.subr.msk.bf16.mxu1 %vm562_vm0, %v6202_v23 }
 0x7b4   : > { %8390 = vperm.xlu1 %11617, %v8280_v38   ;;  %10922 = vmatpush3.bf16.msra.mxu1 %v6211_v36  ;;  %v16073_v10 = vpop.permute.xlu0 %7811  ;;  %v8276_v38 = vld [vmem:[%s17086_s8 + $0x78] sm:$0xff]  ;;  %v8536_v36 = vld [vmem:[%s17088_s10 + $0x8] sm:$0xff] }
 0x7b5   : > { %6887 = vmatmul.mubr.bf16.gmra.mrb[180].mxu0 %v12243_v46  ;;  %v12200_v46 = vld [vmem:[%s17085_s7 + $0x64] ss:$8 sps:$4 sm:$0xff]  }
 0x7b6   : > { %6894 = vmatprep.mubr.bf16.mxu0 %v12251_v6 }
 0x7b8   : > { %8310 = vperm.xlu1 %11617, %v8264_v44   ;;  %v7364_v40 = vpop.permute.xlu0 %7363 }
 0x7b9   : > { %v7394_v6 = vsel %vm571_vm2, %v7364_v40, 0  ;;  %v12230_v40 = vld [vmem:[%s17085_s7 + $0xb4] ss:$8 sps:$4 sm:$0xff]  }
 0x7ba   : > { %v6204_v24 = vpop.permute.xlu1 %6203 }
 0x7bb   : > { %11562 = vmatprep.subr.msk.bf16.mxu1 %vm562_vm0, %v6204_v24 }
 0x7bc   : > { %8400 = vperm.xlu1 %11617, %v8282_v33   ;;  %10924 = vmatpush3.bf16.msra.mxu1 %v6212_v63  ;;  %v16105_v31 = vpop.permute.xlu0 %7813  ;;  %v12198_v33 = vld [vmem:[%s17085_s7 + $0x60] ss:$8 sps:$4 sm:$0xff]  }
 0x7bd   : > { %6895 = vmatmul.mubr.bf16.gmra.mrb[184].mxu0 %v12249_v9  ;;  %v12206_v9 = vld [vmem:[%s17085_s7 + $0x74] ss:$8 sps:$4 sm:$0xff]  }
 0x7be   : > { %v6928_v52 = vpop.permute.xlu1 %6927  ;;  %6902 = vmatprep.mubr.bf16.mxu0 %v12257_v29 }
 0x7bf   : > { %6462 = vmatmul.mubr.bf16.vlgmr.msra.gmra.mrb[64].mxu1 %v12162_v4  ;;  %11563 = vmatprep.subr.msk.bf16.mxu1 %vm566_vm1, %v6928_v52  ;;  %v12204_v4 = vld [vmem:[%s17085_s7 + $0x70] ss:$8 sps:$4 sm:$0xff]  }
 0x7c0   : > { %8320 = vperm.xlu1 %11617, %v8266_v18   ;;  %11134 = vmatpush3.bf16.msra.mxu1 %v6943_v20  ;;  %v7366_v21 = vpop.permute.xlu0 %7365  ;;  %v12212_v18 = vld [vmem:[%s17085_s7 + $0x84] ss:$8 sps:$4 sm:$0xff]  }
 0x7c1   : > { %6469 = vmatprep.mubr.bf16.mxu1 %v12170_v61  ;;  %v7395_v24 = vsel %vm571_vm2, %v7366_v21, 0  ;;  %v12267_v21 = vld [vmem:[%s17085_s7 + $0x310] ss:$8 sps:$4 sm:$0xff]  }
 0x7c2   : > { %v6930_v34 = vpop.permute.xlu1 %6929 }
 0x7c3   : > { %11564 = vmatprep.subr.msk.bf16.mxu1 %vm566_vm1, %v6930_v34  ;;  %v12218_v34 = vld [vmem:[%s17085_s7 + $0x94] ss:$8 sps:$4 sm:$0xff]  }
 0x7c4   : > { %8410 = vperm.xlu1 %11617, %v8284_v50   ;;  %11136 = vmatpush3.bf16.msra.mxu1 %v6944_v1  ;;  %v16143_v11 = vpop.permute.xlu0 %7815  ;;  %v12210_v50 = vld [vmem:[%s17085_s7 + $0x80] ss:$8 sps:$4 sm:$0xff]  }
 0x7c5   : > { %6903 = vmatmul.mubr.bf16.gmra.mrb[188].mxu0 %v12255_v13 }
 0x7c6   : > { %v6932_v42 = vpop.permute.xlu1 %6931  ;;  %7650 = vmatprep.mubr.bf16.mxu0 %v12263_v48 }
 0x7c7   : > { %6470 = vmatmul.mubr.bf16.gmra.mrb[68].mxu1 %v12168_v27  ;;  %11565 = vmatprep.subr.msk.bf16.mxu1 %vm566_vm1, %v6932_v42  ;;  %v12224_v42 = vld [vmem:[%s17085_s7 + $0xa4] ss:$8 sps:$4 sm:$0xff]  }
 0x7c8   : > { %8330 = vperm.xlu1 %11617, %v8268_v53   ;;  %11138 = vmatpush3.bf16.msra.mxu1 %v6945_v25  ;;  %v7368_v19 = vpop.permute.xlu0 %7367 }
 0x7c9   : > { %6477 = vmatprep.mubr.bf16.mxu1 %v12176_v0  ;;  %v7396_v20 = vsel %vm571_vm2, %v7368_v19, 0  ;;  %v12216_v0 = vld [vmem:[%s17085_s7 + $0x90] ss:$8 sps:$4 sm:$0xff]   ;;  %v12281_v19 = vld [vmem:[%s17085_s7 + $0x334] ss:$8 sps:$4 sm:$0xff]  }
 0x7ca   : > { %v6934_v41 = vpop.permute.xlu1 %6933 }
 0x7cb   : > { %11566 = vmatprep.subr.msk.bf16.mxu1 %vm566_vm1, %v6934_v41 }
 0x7cc   : > { %8420 = vperm.xlu1 %11617, %v8286_v26   ;;  %11140 = vmatpush3.bf16.msra.mxu1 %v6946_v17  ;;  %v16171_v8 = vpop.permute.xlu0 %7817 }
 0x7ce   : > { %v6936_v37 = vpop.permute.xlu1 %6935 }
 0x7cf   : > { %6478 = vmatmul.mubr.bf16.gmra.mrb[72].mxu1 %v12174_v47  ;;  %11567 = vmatprep.subr.msk.bf16.mxu1 %vm566_vm1, %v6936_v37  ;;  %v12222_v47 = vld [vmem:[%s17085_s7 + $0xa0] ss:$8 sps:$4 sm:$0xff]  }
 0x7d0   : > { %8340 = vperm.xlu1 %11617, %v8270_v45   ;;  %11142 = vmatpush3.bf16.msra.mxu1 %v6947_v60  ;;  %v7370_v29 = vpop.permute.xlu0 %7369 }
 0x7d1   : > { %6485 = vmatprep.mubr.bf16.mxu1 %v12182_v55  ;;  %v7397_v1 = vsel %vm571_vm2, %v7370_v29, 0  ;;  %v12287_v29 = vld [vmem:[%s17085_s7 + $0x344] ss:$8 sps:$4 sm:$0xff]  }
 0x7d2   : > { %v6938_v49 = vpop.permute.xlu1 %6937 }
 0x7d3   : > { %11568 = vmatprep.subr.msk.bf16.mxu1 %vm566_vm1, %v6938_v49 }
 0x7d4   : > { %8430 = vperm.xlu1 %11617, %v8288_v16   ;;  %11144 = vmatpush3.bf16.msra.mxu1 %v6948_v39  ;;  %v16193_v61 = vpop.permute.xlu0 %7819  ;;  %v12228_v16 = vld [vmem:[%s17085_s7 + $0xb0] ss:$8 sps:$4 sm:$0xff]   ;;  %v12236_v39 = vld [vmem:[%s17085_s7 + $0xc4] ss:$8 sps:$4 sm:$0xff]  }
 0x7d6   : > { %v6940_v12 = vpop.permute.xlu1 %6939 }
 0x7d7   : > { %6486 = vmatmul.mubr.bf16.gmra.mrb[76].mxu1 %v12180_v43  ;;  %11569 = vmatprep.subr.msk.bf16.mxu1 %vm566_vm1, %v6940_v12  ;;  %v12269_v12 = vld [vmem:[%s17085_s7 + $0x314] ss:$8 sps:$4 sm:$0xff]  }
 0x7d8   : > { %8350 = vperm.xlu1 %11617, %v8272_v28   ;;  %11146 = vmatpush3.bf16.msra.mxu1 %v6949_v32  ;;  %v7372_v13 = vpop.permute.xlu0 %7371  ;;  %v12234_v32 = vld [vmem:[%s17085_s7 + $0xc0] ss:$8 sps:$4 sm:$0xff]  }
 0x7d9   : > { %6493 = vmatprep.mubr.bf16.mxu1 %v12188_v22  ;;  %v7398_v26 = vsel %vm571_vm2, %v7372_v13, 0  ;;  %v12261_v22 = vld [vmem:[%s17085_s7 + $0x300] ss:$8 sps:$4 sm:$0xff]  }
 0x7da   : > { %v6942_v14 = vpop.permute.xlu1 %6941 }
 0x7db   : > { %11570 = vmatprep.subr.msk.bf16.mxu1 %vm566_vm1, %v6942_v14  ;;  %v12275_v14 = vld [vmem:[%s17085_s7 + $0x324] ss:$8 sps:$4 sm:$0xff]  }
 0x7dc   : > { %8440 = vperm.xlu1 %11617, %v8290_v62   ;;  %11148 = vmatpush3.bf16.msra.mxu1 %v6950_v58  ;;  %v16211_v27 = vpop.permute.xlu0 %7821 }
 0x7de   : > { %v7378_v2 = vpop.permute.xlu1 %7377 }
 0x7df   : > { %6494 = vmatmul.mubr.bf16.gmra.mrb[80].mxu1 %v12186_v57  ;;  %11571 = vmatprep.subr.msk.bf16.mxu0 %vm571_vm2, %v7378_v2  ;;  %v12240_v2 = vld [vmem:[%s17085_s7 + $0xd0] ss:$8 sps:$4 sm:$0xff]  }
 0x7e0   : > { %8360 = vperm.xlu1 %11617, %v8274_v59   ;;  %11246 = vmatpush3.bf16.msra.mxu0 %v7393_v54  ;;  %v7374_v41 = vpop.permute.xlu0 %7373 }
 0x7e1   : > { %6501 = vmatprep.mubr.bf16.mxu1 %v12194_v56  ;;  %v7399_v37 = vsel %vm571_vm2, %v7374_v41, 0 }
 0x7e2   : > { %v7828_v51 = vpop.permute.xlu1 %7827 }
 0x7e3   : > { %11579 = vmatprep.subr.msk.bf16.mxu1 %vm575_vm3, %v7828_v51  ;;  %v12273_v51 = vld [vmem:[%s17085_s7 + $0x320] ss:$8 sps:$4 sm:$0xff]  }
 0x7e4   : > { %8450 = vperm.xlu1 %11617, %v8292_v15   ;;  %v16233_v45 = vpop.permute.xlu0 %7823  ;;  %v12248_v15 = vld [vmem:[%s17085_s7 + $0xe4] ss:$8 sps:$4 sm:$0xff]  }
 0x7e6   : > { %v7380_v23 = vpop.permute.xlu1 %7379 }
 0x7e7   : > { %6502 = vmatmul.mubr.bf16.gmra.mrb[84].mxu1 %v12192_v5  ;;  %11572 = vmatprep.subr.msk.bf16.mxu0 %vm571_vm2, %v7380_v23 }
 0x7e8   : > { %8370 = vperm.xlu1 %11617, %v8276_v38   ;;  %11248 = vmatpush3.bf16.msra.mxu0 %v7394_v6  ;;  %v7376_v49 = vpop.permute.xlu0 %7375 }
 0x7e9   : > { %6509 = vmatprep.mubr.bf16.mxu1 %v12200_v46  ;;  %v7400_v28 = vsel %vm571_vm2, %v7376_v49, 0 }
 0x7ea   : > { %v16173_v44 = vpop.permute.xlu1 %7829 }
 0x7ec   : > { %8544 = vperm.xlu1 %11617, %v8536_v36   ;;  %v12246_v36 = vld [vmem:[%s17085_s7 + $0xe0] ss:$8 sps:$4 sm:$0xff]  }
 0x7ee   : > { %v7382_v30 = vpop.permute.xlu1 %7381 }
 0x7ef   : > { %6510 = vmatmul.mubr.bf16.gmra.mrb[88].mxu1 %v12198_v33  ;;  %11573 = vmatprep.subr.msk.bf16.mxu0 %vm571_vm2, %v7382_v30  ;;  %v12279_v30 = vld [vmem:[%s17085_s7 + $0x330] ss:$8 sps:$4 sm:$0xff]  }
 0x7f0   : > { %11250 = vmatpush3.bf16.msra.mxu0 %v7395_v24  ;;  %6517 = vmatprep.mubr.bf16.mxu1 %v12206_v9  ;;  %v12254_v9 = vld [vmem:[%s17085_s7 + $0xf4] ss:$8 sps:$4 sm:$0xff]  }
 0x7f2   : > { %v16185_v63 = vpop.permute.xlu1 %7831 }
 0x7f6   : > { %v7384_v52 = vpop.permute.xlu1 %7383 }
 0x7f7   : > { %6518 = vmatmul.mubr.bf16.gmra.mrb[92].mxu1 %v12204_v4  ;;  %11574 = vmatprep.subr.msk.bf16.mxu0 %vm571_vm2, %v7384_v52 }
 0x7f8   : > { %11252 = vmatpush3.bf16.msra.mxu0 %v7396_v20  ;;  %6525 = vmatprep.mubr.bf16.mxu1 %v12212_v18 }
 0x7fa   : > { %v16199_v7 = vpop.permute.xlu1 %7833 }
 0x7fe   : > { %v7386_v48 = vpop.permute.xlu1 %7385 }
 0x7ff   : > { %6526 = vmatmul.mubr.bf16.gmra.mrb[96].mxu1 %v12210_v50  ;;  %11575 = vmatprep.subr.msk.bf16.mxu0 %vm571_vm2, %v7386_v48  ;;  %v12252_v50 = vld [vmem:[%s17085_s7 + $0xf0] ss:$8 sps:$4 sm:$0xff]   ;;  %v12285_v48 = vld [vmem:[%s17085_s7 + $0x340] ss:$8 sps:$4 sm:$0xff]  }
 0x800   : > { %11254 = vmatpush3.bf16.msra.mxu0 %v7397_v1  ;;  %6533 = vmatprep.mubr.bf16.mxu1 %v12218_v34  ;;  %v12260_v34 = vld [vmem:[%s17085_s7 + $0x104] ss:$8 sps:$4 sm:$0xff]  }
 0x802   : > { %v16213_v53 = vpop.permute.xlu1 %7835 }
 0x806   : > { %v7388_v25 = vpop.permute.xlu1 %7387 }
 0x807   : > { %6534 = vmatmul.mubr.bf16.gmra.mrb[100].mxu1 %v12216_v0  ;;  %11576 = vmatprep.subr.msk.bf16.mxu0 %vm571_vm2, %v7388_v25  ;;  %v12293_v0 = vld [vmem:[%s17085_s7 + $0x354] ss:$8 sps:$4 sm:$0xff]  }
 0x808   : > { %11256 = vmatpush3.bf16.msra.mxu0 %v7398_v26  ;;  %6541 = vmatprep.mubr.bf16.mxu1 %v12224_v42 }
 0x80a   : > { %v16225_v17 = vpop.permute.xlu1 %7837 }
 0x80e   : > { %v7390_v55 = vpop.permute.xlu1 %7389 }
 0x80f   : > { %6542 = vmatmul.mubr.bf16.gmra.mrb[104].mxu1 %v12222_v47  ;;  %11577 = vmatprep.subr.msk.bf16.mxu0 %vm571_vm2, %v7390_v55  ;;  %v12258_v47 = vld [vmem:[%s17085_s7 + $0x100] ss:$8 sps:$4 sm:$0xff]   ;;  %v12266_v55 = vld [vmem:[%s17085_s7 + $0x114] ss:$8 sps:$4 sm:$0xff]  }
 0x810   : > { %11258 = vmatpush3.bf16.msra.mxu0 %v7399_v37  ;;  %6549 = vmatprep.mubr.bf16.mxu1 %v12230_v40  ;;  %v7843_v37 = vsel %vm575_vm3, %v16073_v10, 0 }
 0x812   : > { %v16239_v60 = vpop.permute.xlu1 %7839 }
 0x816   : > { %v7392_v43 = vpop.permute.xlu1 %7391 }
 0x817   : > { %6550 = vmatmul.mubr.bf16.gmra.mrb[108].mxu1 %v12228_v16  ;;  %11578 = vmatprep.subr.msk.bf16.mxu0 %vm571_vm2, %v7392_v43  ;;  %v12291_v16 = vld [vmem:[%s17085_s7 + $0x350] ss:$8 sps:$4 sm:$0xff]  }
 0x818   : > { %11260 = vmatpush3.bf16.msra.mxu0 %v7400_v28  ;;  %6557 = vmatprep.mubr.bf16.mxu1 %v12236_v39  ;;  %v12299_v39 = vld [vmem:[%s17085_s7 + $0x364] ss:$8 sps:$4 sm:$0xff]  }
 0x81b   : > { %7651 = vmatmul.mubr.bf16.vlgmr.msra.gmra.mrb[192].mxu0 %v12261_v22 }
 0x81c   : > { %7658 = vmatprep.mubr.bf16.mxu0 %v12269_v12  ;;  %v7844_v12 = vsel %vm575_vm3, %v16105_v31, 0  ;;  %v7845_v31 = vsel %vm575_vm3, %v16143_v11, 0 }
 0x81f   : > { %6558 = vmatmul.mubr.bf16.gmra.mrb[112].mxu1 %v12234_v32  ;;  %v11037_v62 = vpop.f32.mrb[128].mxu0  ;;  %v12264_v32 = vld [vmem:[%s17085_s7 + $0x110] ss:$8 sps:$4 sm:$0xff]  }
 0x820   : > { %6565 = vmatprep.mubr.bf16.mxu1 %v12242_v35  ;;  %v11038_v58 = vpop.f32.mrb[129].mxu0 }
 0x821   : > { %v16269_v57 = vadd.f32 %v11038_v58, %v11037_v62  ;;  %v11040_v59 = vpop.f32.mrb[130].mxu0 }
 0x822   : > { %v11041_v56 = vpop.f32.mrb[131].mxu0 }
 0x823   : > { %7659 = vmatmul.mubr.bf16.gmra.mrb[196].mxu0 %v12267_v21  ;;  %v16274_v54 = vadd.f32 %v11041_v56, %v11040_v59  ;;  %v12297_v21 = vld [vmem:[%s17085_s7 + $0x360] ss:$8 sps:$4 sm:$0xff]   ;;  %v7846_v56 = vsel %vm575_vm3, %v16171_v8, 0  ;;  %v7847_v8 = vsel %vm575_vm3, %v16193_v61, 0 }
 0x824   : > { %7666 = vmatprep.mubr.bf16.mxu0 %v12275_v14  ;;  %v12305_v14 = vld [vmem:[%s17085_s7 + $0x374] ss:$8 sps:$4 sm:$0xff]  }
 0x827   : > { %6566 = vmatmul.mubr.bf16.gmra.mrb[116].mxu1 %v12240_v2  ;;  %v11043_v5 = vpop.f32.mrb[132].mxu0  ;;  %v12270_v2 = vld [vmem:[%s17085_s7 + $0x120] ss:$8 sps:$4 sm:$0xff]  }
 0x828   : > { %6573 = vmatprep.mubr.bf16.mxu1 %v12248_v15  ;;  %v11044_v38 = vpop.f32.mrb[133].mxu0 }
 0x829   : > { %v16285_v46 = vadd.f32 %v11044_v38, %v11043_v5  ;;  %v11046_v23 = vpop.f32.mrb[134].mxu0 }
 0x82a   : > { %v11047_v6 = vpop.f32.mrb[135].mxu0 }
 0x82b   : > { %7667 = vmatmul.mubr.bf16.gmra.mrb[200].mxu0 %v12273_v51  ;;  %v16290_v33 = vadd.f32 %v11047_v6, %v11046_v23  ;;  %v12303_v51 = vld [vmem:[%s17085_s7 + $0x370] ss:$8 sps:$4 sm:$0xff]   ;;  %v7848_v6 = vsel %vm575_vm3, %v16211_v27, 0  ;;  %v7849_v27 = vsel %vm575_vm3, %v16233_v45, 0 }
 0x82c   : > { %7674 = vmatprep.mubr.bf16.mxu0 %v12281_v19  ;;  %v12311_v19 = vld [vmem:[%s17085_s7 + $0x384] ss:$8 sps:$4 sm:$0xff]  }
 0x82f   : > { %6574 = vmatmul.mubr.bf16.gmra.mrb[120].mxu1 %v12246_v36  ;;  %v11049_v24 = vpop.f32.mrb[136].mxu0  ;;  %v12276_v36 = vld [vmem:[%s17085_s7 + $0x130] ss:$8 sps:$4 sm:$0xff]  }
 0x830   : > { %6581 = vmatprep.mubr.bf16.mxu1 %v12254_v9  ;;  %v11050_v4 = vpop.f32.mrb[137].mxu0 }
 0x831   : > { %v16301_v18 = vadd.f32 %v11050_v4, %v11049_v24  ;;  %v11052_v52 = vpop.f32.mrb[138].mxu0  ;;  %v12309_v24 = vld [vmem:[%s17085_s7 + $0x380] ss:$8 sps:$4 sm:$0xff]   ;;  %v12317_v4 = vld [vmem:[%s17085_s7 + $0x394] ss:$8 sps:$4 sm:$0xff]  }
 0x832   : > { %v11053_v20 = vpop.f32.mrb[139].mxu0 }
 0x833   : > { %7675 = vmatmul.mubr.bf16.gmra.mrb[204].mxu0 %v12279_v30  ;;  %v16306_v13 = vadd.f32 %v11053_v20, %v11052_v52  ;;  %v7826_v30 = vpop.permute.xlu0 %7825 }
 0x834   : > { %7682 = vmatprep.mubr.bf16.mxu0 %v12287_v29  ;;  %v7842_v29 = vpop.permute.xlu1 %7841 }
 0x837   : > { %6582 = vmatmul.mubr.bf16.gmra.mrb[124].mxu1 %v12252_v50  ;;  %v11055_v1 = vpop.f32.mrb[140].mxu0  ;;  %v7850_v50 = vsel %vm575_vm3, %v7826_v30, 0 }
 0x838   : > { %7200 = vmatprep.mubr.bf16.mxu1 %v12260_v34  ;;  %v11056_v42 = vpop.f32.mrb[141].mxu0  ;;  %v12282_v34 = vld [vmem:[%s17085_s7 + $0x140] ss:$8 sps:$4 sm:$0xff]  }
 0x839   : > { %v16317_v25 = vadd.f32 %v11056_v42, %v11055_v1  ;;  %v11058_v26 = vpop.f32.mrb[142].mxu0  ;;  %v12290_v1 = vld [vmem:[%s17085_s7 + $0x154] ss:$8 sps:$4 sm:$0xff]   ;;  %v12323_v42 = vld [vmem:[%s17085_s7 + $0x3a4] ss:$8 sps:$4 sm:$0xff]  }
 0x83a   : > { %v11059_v41 = vpop.f32.mrb[143].mxu0 }
 0x83b   : > { %7683 = vmatmul.mubr.bf16.gmra.mrb[208].mxu0 %v12285_v48  ;;  %v16322_v40 = vadd.f32 %v11059_v41, %v11058_v26 }
 0x83c   : > { %7690 = vmatprep.mubr.bf16.mxu0 %v12293_v0 }
 0x83f   : > { %7201 = vmatmul.mubr.bf16.vlgmr.msra.gmra.mrb[128].mxu1 %v12258_v47  ;;  %v11061_v49 = vpop.f32.mrb[144].mxu0 }
 0x840   : > { %11358 = vmatpush3.bf16.msra.mxu1 %v7843_v37  ;;  %7208 = vmatprep.mubr.bf16.mxu1 %v12266_v55  ;;  %v11062_v43 = vpop.f32.mrb[145].mxu0  ;;  %v12288_v37 = vld [vmem:[%s17085_s7 + $0x150] ss:$8 sps:$4 sm:$0xff]  }
 0x841   : > { %11580 = vmatprep.subr.msk.bf16.mxu1 %vm575_vm3, %v16173_v44  ;;  %v16339_v28 = vadd.f32 %v11062_v43, %v11061_v49  ;;  %v11064_v10 = vpop.f32.mrb[146].mxu0  ;;  %v12272_v44 = vld [vmem:[%s17085_s7 + $0x124] ss:$8 sps:$4 sm:$0xff]   ;;  %v12321_v43 = vld [vmem:[%s17085_s7 + $0x3a0] ss:$8 sps:$4 sm:$0xff]  }
 0x842   : > { %v11065_v22 = vpop.f32.mrb[147].mxu0  ;;  %v12296_v49 = vld [vmem:[%s17085_s7 + $0x164] ss:$8 sps:$4 sm:$0xff]  }
 0x843   : > { %7691 = vmatmul.mubr.bf16.gmra.mrb[212].mxu0 %v12291_v16  ;;  %v16347_v35 = vadd.f32 %v11065_v22, %v11064_v10  ;;  %v12329_v10 = vld [vmem:[%s17085_s7 + $0x3b4] ss:$8 sps:$4 sm:$0xff]  }
 0x844   : > { %11360 = vmatpush3.bf16.msra.mxu1 %v7844_v12  ;;  %7698 = vmatprep.mubr.bf16.mxu0 %v12299_v39 }
 0x845   : > { %11581 = vmatprep.subr.msk.bf16.mxu1 %vm575_vm3, %v16185_v63 }
 0x847   : > { %7209 = vmatmul.mubr.bf16.gmra.mrb[132].mxu1 %v12264_v32  ;;  %v11067_v62 = vpop.f32.mrb[148].mxu0 }
 0x848   : > { %11362 = vmatpush3.bf16.msra.mxu1 %v7845_v31  ;;  %7216 = vmatprep.mubr.bf16.mxu1 %v12272_v44  ;;  %v11068_v58 = vpop.f32.mrb[149].mxu0  ;;  %v12294_v31 = vld [vmem:[%s17085_s7 + $0x160] ss:$8 sps:$4 sm:$0xff]  }
 0x849   : > { %11582 = vmatprep.subr.msk.bf16.mxu1 %vm575_vm3, %v16199_v7  ;;  %v16367_v63 = vadd.f32 %v11068_v58, %v11067_v62  ;;  %v11070_v11 = vpop.f32.mrb[150].mxu0  ;;  %v12278_v7 = vld [vmem:[%s17085_s7 + $0x134] ss:$8 sps:$4 sm:$0xff]   ;;  %v12327_v58 = vld [vmem:[%s17085_s7 + $0x3b0] ss:$8 sps:$4 sm:$0xff]  }
 0x84a   : > { %v11071_v59 = vpop.f32.mrb[151].mxu0  ;;  %v12302_v62 = vld [vmem:[%s17085_s7 + $0x174] ss:$8 sps:$4 sm:$0xff]  }
 0x84b   : > { %7699 = vmatmul.mubr.bf16.gmra.mrb[216].mxu0 %v12297_v21  ;;  %v16375_v15 = vadd.f32 %v11071_v59, %v11070_v11  ;;  %v12335_v11 = vld [vmem:[%s17085_s7 + $0x3c4] ss:$8 sps:$4 sm:$0xff]  }
 0x84c   : > { %11364 = vmatpush3.bf16.msra.mxu1 %v7846_v56  ;;  %7706 = vmatprep.mubr.bf16.mxu0 %v12305_v14 }
 0x84d   : > { %11583 = vmatprep.subr.msk.bf16.mxu1 %vm575_vm3, %v16213_v53 }
 0x84f   : > { %7217 = vmatmul.mubr.bf16.gmra.mrb[136].mxu1 %v12270_v2  ;;  %v11073_v5 = vpop.f32.mrb[152].mxu0 }
 0x850   : > { %11366 = vmatpush3.bf16.msra.mxu1 %v7847_v8  ;;  %7224 = vmatprep.mubr.bf16.mxu1 %v12278_v7  ;;  %v11074_v38 = vpop.f32.mrb[153].mxu0  ;;  %v12300_v8 = vld [vmem:[%s17085_s7 + $0x170] ss:$8 sps:$4 sm:$0xff]  }
 0x851   : > { %11584 = vmatprep.subr.msk.bf16.mxu1 %vm575_vm3, %v16225_v17  ;;  %v16395_v53 = vadd.f32 %v11074_v38, %v11073_v5  ;;  %v11076_v61 = vpop.f32.mrb[154].mxu0  ;;  %v12284_v17 = vld [vmem:[%s17085_s7 + $0x144] ss:$8 sps:$4 sm:$0xff]   ;;  %v12333_v38 = vld [vmem:[%s17085_s7 + $0x3c0] ss:$8 sps:$4 sm:$0xff]  }
 0x852   : > { %v11077_v23 = vpop.f32.mrb[155].mxu0  ;;  %v12308_v5 = vld [vmem:[%s17085_s7 + $0x184] ss:$8 sps:$4 sm:$0xff]  }
 0x853   : > { %7707 = vmatmul.mubr.bf16.gmra.mrb[220].mxu0 %v12303_v51  ;;  %v16403_v9 = vadd.f32 %v11077_v23, %v11076_v61  ;;  %v12341_v61 = vld [vmem:[%s17085_s7 + $0x3d4] ss:$8 sps:$4 sm:$0xff]  }
 0x854   : > { %11368 = vmatpush3.bf16.msra.mxu1 %v7848_v6  ;;  %7714 = vmatprep.mubr.bf16.mxu0 %v12311_v19 }
 0x855   : > { %11585 = vmatprep.subr.msk.bf16.mxu1 %vm575_vm3, %v16239_v60 }
 0x857   : > { %7225 = vmatmul.mubr.bf16.gmra.mrb[140].mxu1 %v12276_v36 }
 0x858   : > { %11370 = vmatpush3.bf16.msra.mxu1 %v7849_v27  ;;  %7232 = vmatprep.mubr.bf16.mxu1 %v12284_v17  ;;  %v11079_v52 = vpop.f32.mrb[156].mxu0  ;;  %v12306_v27 = vld [vmem:[%s17085_s7 + $0x180] ss:$8 sps:$4 sm:$0xff]  }
 0x859   : > { %11586 = vmatprep.subr.msk.bf16.mxu1 %vm575_vm3, %v7842_v29  ;;  %v11080_v60 = vpop.f32.mrb[157].mxu0 }
 0x85a   : > { %v16422_v20 = vadd.f32 %v11080_v60, %v11079_v52  ;;  %v11082_v45 = vpop.f32.mrb[158].mxu0  ;;  %v12347_v52 = vld [vmem:[%s17085_s7 + $0x3e4] ss:$8 sps:$4 sm:$0xff]  }
 0x85b   : > { %7715 = vmatmul.mubr.bf16.gmra.mrb[224].mxu0 %v12309_v24  ;;  %v11083_v48 = vpop.f32.mrb[159].mxu0  ;;  %v12314_v24 = vld [vmem:[%s17085_s7 + $0x194] ss:$8 sps:$4 sm:$0xff]  }
 0x85c   : > { %11372 = vmatpush3.bf16.msra.mxu1 %v7850_v50  ;;  %7722 = vmatprep.mubr.bf16.mxu0 %v12317_v4  ;;  %v16432_v0 = vadd.f32 %v11083_v48, %v11082_v45  ;;  %v12339_v4 = vld [vmem:[%s17085_s7 + $0x3d0] ss:$8 sps:$4 sm:$0xff]  }
 0x85d   : > { %v12312_v48 = vld [vmem:[%s17085_s7 + $0x190] ss:$8 sps:$4 sm:$0xff]  }
 0x85f   : > { %7233 = vmatmul.mubr.bf16.gmra.mrb[144].mxu1 %v12282_v34 }
 0x860   : > { %7240 = vmatprep.mubr.bf16.mxu1 %v12290_v1  ;;  %v11085_v26 = vpop.f32.mrb[160].mxu0 }
 0x861   : > { %v11086_v41 = vpop.f32.mrb[161].mxu0 }
 0x862   : > { %v16440_v47 = vadd.f32 %v11086_v41, %v11085_v26  ;;  %v11088_v55 = vpop.f32.mrb[162].mxu0  ;;  %v12345_v26 = vld [vmem:[%s17085_s7 + $0x3e0] ss:$8 sps:$4 sm:$0xff]   ;;  %v12353_v41 = vld [vmem:[%s17085_s7 + $0x3f4] ss:$8 sps:$4 sm:$0xff]  }
 0x863   : > { %7723 = vmatmul.mubr.bf16.gmra.mrb[228].mxu0 %v12315_v3  ;;  %v11089_v16 = vpop.f32.mrb[163].mxu0  ;;  %v12320_v3 = vld [vmem:[%s17085_s7 + $0x1a4] ss:$8 sps:$4 sm:$0xff]  }
 0x864   : > { %7730 = vmatprep.mubr.bf16.mxu0 %v12323_v42  ;;  %v16448_v39 = vadd.f32 %v11089_v16, %v11088_v55 }
 0x867   : > { %7241 = vmatmul.mubr.bf16.gmra.mrb[148].mxu1 %v12288_v37 }
 0x868   : > { %7248 = vmatprep.mubr.bf16.mxu1 %v12296_v49  ;;  %v11091_v22 = vpop.f32.mrb[164].mxu0 }
 0x869   : > { %v11092_v12 = vpop.f32.mrb[165].mxu0 }
 0x86a   : > { %v16456_v32 = vadd.f32 %v11092_v12, %v11091_v22  ;;  %v11094_v44 = vpop.f32.mrb[166].mxu0  ;;  %v12326_v22 = vld [vmem:[%s17085_s7 + $0x1b4] ss:$8 sps:$4 sm:$0xff]  }
 0x86b   : > { %7731 = vmatmul.mubr.bf16.gmra.mrb[232].mxu0 %v12321_v43  ;;  %v11095_v21 = vpop.f32.mrb[167].mxu0  ;;  %v12318_v43 = vld [vmem:[%s17085_s7 + $0x1a0] ss:$8 sps:$4 sm:$0xff]  }
 0x86c   : > { %7738 = vmatprep.mubr.bf16.mxu0 %v12329_v10  ;;  %v16464_v14 = vadd.f32 %v11095_v21, %v11094_v44  ;;  %v12351_v44 = vld [vmem:[%s17085_s7 + $0x3f0] ss:$8 sps:$4 sm:$0xff]  }
 0x86f   : > { %7249 = vmatmul.mubr.bf16.gmra.mrb[152].mxu1 %v12294_v31 }
 0x870   : > { %7256 = vmatprep.mubr.bf16.mxu1 %v12302_v62  ;;  %v11097_v59 = vpop.f32.mrb[168].mxu0 }
 0x871   : > { %v11098_v56 = vpop.f32.mrb[169].mxu0 }
 0x872   : > { %v16472_v2 = vadd.f32 %v11098_v56, %v11097_v59  ;;  %v11100_v7 = vpop.f32.mrb[170].mxu0  ;;  %v12324_v56 = vld [vmem:[%s17085_s7 + $0x1b0] ss:$8 sps:$4 sm:$0xff]  }
 0x873   : > { %7739 = vmatmul.mubr.bf16.gmra.mrb[236].mxu0 %v12327_v58  ;;  %v11101_v51 = vpop.f32.mrb[171].mxu0 }
 0x874   : > { %7746 = vmatprep.mubr.bf16.mxu0 %v12335_v11  ;;  %v16480_v19 = vadd.f32 %v11101_v51, %v11100_v7 }
 0x877   : > { %7257 = vmatmul.mubr.bf16.gmra.mrb[156].mxu1 %v12300_v8 }
 0x878   : > { %7264 = vmatprep.mubr.bf16.mxu1 %v12308_v5  ;;  %v11103_v23 = vpop.f32.mrb[172].mxu0  ;;  %v12332_v5 = vld [vmem:[%s17085_s7 + $0x1c4] ss:$8 sps:$4 sm:$0xff]  }
 0x879   : > { %v11104_v6 = vpop.f32.mrb[173].mxu0 }
 0x87a   : > { %v16488_v36 = vadd.f32 %v11104_v6, %v11103_v23  ;;  %v11106_v17 = vpop.f32.mrb[174].mxu0 }
 0x87b   : > { %7747 = vmatmul.mubr.bf16.gmra.mrb[240].mxu0 %v12333_v38  ;;  %v11107_v30 = vpop.f32.mrb[175].mxu0 }
 0x87c   : > { %7754 = vmatprep.mubr.bf16.mxu0 %v12341_v61  ;;  %v16496_v29 = vadd.f32 %v11107_v30, %v11106_v17 }
 0x87f   : > { %7265 = vmatmul.mubr.bf16.gmra.mrb[160].mxu1 %v12306_v27 }
 0x880   : > { %7272 = vmatprep.mubr.bf16.mxu1 %v12314_v24  ;;  %v11109_v60 = vpop.f32.mrb[176].mxu0 }
 0x881   : > { %v11110_v45 = vpop.f32.mrb[177].mxu0 }
 0x882   : > { %v16504_v50 = vadd.f32 %v11110_v45, %v11109_v60  ;;  %v11112_v34 = vpop.f32.mrb[178].mxu0  ;;  %v12330_v45 = vld [vmem:[%s17085_s7 + $0x1c0] ss:$8 sps:$4 sm:$0xff]  }
 0x883   : > { %7755 = vmatmul.mubr.bf16.gmra.mrb[244].mxu0 %v12339_v4  ;;  %v11113_v1 = vpop.f32.mrb[179].mxu0 }
 0x884   : > { %7762 = vmatprep.mubr.bf16.mxu0 %v12347_v52  ;;  %v16512_v42 = vadd.f32 %v11113_v1, %v11112_v34 }
 0x887   : > { %7273 = vmatmul.mubr.bf16.gmra.mrb[164].mxu1 %v12312_v48 }
 0x888   : > { %7280 = vmatprep.mubr.bf16.mxu1 %v12320_v3  ;;  %v11115_v55 = vpop.f32.mrb[180].mxu0 }
 0x889   : > { %v11116_v37 = vpop.f32.mrb[181].mxu0 }
 0x88a   : > { %v16520_v16 = vadd.f32 %v11116_v37, %v11115_v55  ;;  %v11118_v49 = vpop.f32.mrb[182].mxu0 }
 0x88b   : > { %7763 = vmatmul.mubr.bf16.gmra.mrb[248].mxu0 %v12345_v26  ;;  %v11119_v10 = vpop.f32.mrb[183].mxu0 }
 0x88c   : > { %7770 = vmatprep.mubr.bf16.mxu0 %v12353_v41  ;;  %v16528_v12 = vadd.f32 %v11119_v10, %v11118_v49 }
 0x88f   : > { %7281 = vmatmul.mubr.bf16.gmra.mrb[168].mxu1 %v12318_v43  ;;  %v12336_v43 = vld [vmem:[%s17085_s7 + $0x1d0] ss:$8 sps:$4 sm:$0xff]  }
 0x890   : > { %7288 = vmatprep.mubr.bf16.mxu1 %v12326_v22  ;;  %v11121_v31 = vpop.f32.mrb[184].mxu0 }
 0x891   : > { %v11122_v21 = vpop.f32.mrb[185].mxu0 }
 0x892   : > { %v10925_v62 = vpop.f32.mrb[64].mxu1  ;;  %v16533_v58 = vadd.f32 %v11122_v21, %v11121_v31  ;;  %v11124_v11 = vpop.f32.mrb[186].mxu0 }
 0x893   : > { %v10926_v59 = vpop.f32.mrb[65].mxu1  ;;  %7771 = vmatmul.mubr.bf16.gmra.mrb[252].mxu0 %v12351_v44  ;;  %v11125_v7 = vpop.f32.mrb[187].mxu0  ;;  %v12344_v44 = vld [vmem:[%s17085_s7 + $0x1e4] ss:$8 sps:$4 sm:$0xff]  }
 0x894   : > { %v10927_v8 = vadd.f32 %v10926_v59, %v10925_v62  ;;  %v10928_v51 = vpop.f32.mrb[66].mxu1  ;;  %v16541_v38 = vadd.f32 %v11125_v7, %v11124_v11  ;;  %v12342_v59 = vld [vmem:[%s17085_s7 + $0x1e0] ss:$8 sps:$4 sm:$0xff]  }
 0x895   : > { %v10929_v61 = vpop.f32.mrb[67].mxu1 }
 0x896   : > { %v16544_v23 = vadd.f32 %v16269_v57, %v10927_v8  ;;  %v10930_v6 = vadd.f32 %v10929_v61, %v10928_v51  ;;  %v12350_v8 = vld [vmem:[%s17085_s7 + $0x1f4] ss:$8 sps:$4 sm:$0xff]  }
 0x897   : > { %7289 = vmatmul.mubr.bf16.gmra.mrb[172].mxu1 %v12324_v56 }
 0x898   : > { %v16547_v17 = vadd.f32 %v16274_v54, %v10930_v6  ;;  %7296 = vmatprep.mubr.bf16.mxu1 %v12332_v5  ;;  %v11127_v27 = vpop.f32.mrb[188].mxu0  ;;  %v12338_v54 = vld [vmem:[%s17085_s7 + $0x1d4] ss:$8 sps:$4 sm:$0xff]  }
 0x899   : > { %v11128_v30 = vpop.f32.mrb[189].mxu0 }
 0x89a   : > { %v10931_v24 = vpop.f32.mrb[68].mxu1  ;;  %v16549_v4 = vadd.f32 %v11128_v30, %v11127_v27  ;;  %v11130_v52 = vpop.f32.mrb[190].mxu0  ;;  %v12348_v27 = vld [vmem:[%s17085_s7 + $0x1f0] ss:$8 sps:$4 sm:$0xff]  }
 0x89b   : > { %v10932_v60 = vpop.f32.mrb[69].mxu1  ;;  %v11131_v34 = vpop.f32.mrb[191].mxu0 }
 0x89c   : > { %v10933_v57 = vadd.f32 %v10932_v60, %v10931_v24  ;;  %v10934_v48 = vpop.f32.mrb[70].mxu1  ;;  %v16557_v1 = vadd.f32 %v11131_v34, %v11130_v52  ;;  %v12356_v52 = vld [vmem:[%s17085_s7 + $0x404] ss:$8 sps:$4 sm:$0xff]  }
 0x89d   : > { %v10935_v3 = vpop.f32.mrb[71].mxu1 }
 0x89e   : > { %v16560_v26 = vadd.f32 %v16285_v46, %v10933_v57  ;;  %v10936_v41 = vadd.f32 %v10935_v3, %v10934_v48  ;;  %v12354_v48 = vld [vmem:[%s17085_s7 + $0x400] ss:$8 sps:$4 sm:$0xff]  }
 0x89f   : > { %7297 = vmatmul.mubr.bf16.gmra.mrb[176].mxu1 %v12330_v45 }
 0x8a0   : > { %v16563_v55 = vadd.f32 %v16290_v33, %v10936_v41  ;;  %7304 = vmatprep.mubr.bf16.mxu1 %v12338_v54  ;;  %v12359_v41 = vld [vmem:[%s17085_s7 + $0x414] ss:$8 sps:$4 sm:$0xff]  }
 0x8a2   : > { %v10937_v37 = vpop.f32.mrb[72].mxu1 }
 0x8a3   : > { %v10938_v49 = vpop.f32.mrb[73].mxu1 }
 0x8a4   : > { %v10939_v10 = vadd.f32 %v10938_v49, %v10937_v37  ;;  %v10940_v22 = vpop.f32.mrb[74].mxu1 }
 0x8a5   : > { %v10941_v46 = vpop.f32.mrb[75].mxu1 }
 0x8a6   : > { %v16572_v31 = vadd.f32 %v16301_v18, %v10939_v10  ;;  %v10942_v21 = vadd.f32 %v10941_v46, %v10940_v22  ;;  %v12357_v22 = vld [vmem:[%s17085_s7 + $0x410] ss:$8 sps:$4 sm:$0xff]  }
 0x8a7   : > { %7305 = vmatmul.mubr.bf16.gmra.mrb[180].mxu1 %v12336_v43 }
 0x8a8   : > { %v16575_v33 = vadd.f32 %v16306_v13, %v10942_v21  ;;  %7312 = vmatprep.mubr.bf16.mxu1 %v12344_v44  ;;  %v12362_v21 = vld [vmem:[%s17085_s7 + $0x424] ss:$8 sps:$4 sm:$0xff]  }
 0x8aa   : > { %v10943_v62 = vpop.f32.mrb[76].mxu1 }
 0x8ab   : > { %v10944_v11 = vpop.f32.mrb[77].mxu1 }
 0x8ac   : > { %v10945_v56 = vadd.f32 %v10944_v11, %v10943_v62  ;;  %v10946_v7 = vpop.f32.mrb[78].mxu1 }
 0x8ad   : > { %v10947_v18 = vpop.f32.mrb[79].mxu1 }
 0x8ae   : > { %v16584_v51 = vadd.f32 %v16317_v25, %v10945_v56  ;;  %v10948_v5 = vadd.f32 %v10947_v18, %v10946_v7  ;;  %v12360_v7 = vld [vmem:[%s17085_s7 + $0x420] ss:$8 sps:$4 sm:$0xff]  }
 0x8af   : > { %7313 = vmatmul.mubr.bf16.gmra.mrb[184].mxu1 %v12342_v59 }
 0x8b0   : > { %v16587_v13 = vadd.f32 %v16322_v40, %v10948_v5  ;;  %7320 = vmatprep.mubr.bf16.mxu1 %v12350_v8  ;;  %v12365_v5 = vld [vmem:[%s17085_s7 + $0x434] ss:$8 sps:$4 sm:$0xff]  }
 0x8b2   : > { %v10949_v61 = vpop.f32.mrb[80].mxu1 }
 0x8b3   : > { %v10950_v6 = vpop.f32.mrb[81].mxu1 }
 0x8b4   : > { %v10951_v30 = vadd.f32 %v10950_v6, %v10949_v61  ;;  %v10952_v24 = vpop.f32.mrb[82].mxu1 }
 0x8b5   : > { %v10953_v25 = vpop.f32.mrb[83].mxu1 }
 0x8b6   : > { %v16596_v60 = vadd.f32 %v16339_v28, %v10951_v30  ;;  %v10954_v45 = vadd.f32 %v10953_v25, %v10952_v24  ;;  %v12363_v24 = vld [vmem:[%s17085_s7 + $0x430] ss:$8 sps:$4 sm:$0xff]  }
 0x8b7   : > { %7321 = vmatmul.mubr.bf16.gmra.mrb[188].mxu1 %v12348_v27 }
 0x8b8   : > { %v16599_v40 = vadd.f32 %v16347_v35, %v10954_v45  ;;  %8100 = vmatprep.mubr.bf16.mxu1 %v12356_v52  ;;  %v12368_v45 = vld [vmem:[%s17085_s7 + $0x444] ss:$8 sps:$4 sm:$0xff]  }
 0x8ba   : > { %v10955_v34 = vpop.f32.mrb[84].mxu1 }
 0x8bb   : > { %v10956_v57 = vpop.f32.mrb[85].mxu1 }
 0x8bc   : > { %v10957_v54 = vadd.f32 %v10956_v57, %v10955_v34  ;;  %v10958_v3 = vpop.f32.mrb[86].mxu1 }
 0x8bd   : > { %v10959_v28 = vpop.f32.mrb[87].mxu1 }
 0x8be   : > { %v16608_v37 = vadd.f32 %v16367_v63, %v10957_v54  ;;  %v10960_v49 = vadd.f32 %v10959_v28, %v10958_v3  ;;  %v12366_v3 = vld [vmem:[%s17085_s7 + $0x440] ss:$8 sps:$4 sm:$0xff]  }
 0x8bf   : > { %8101 = vmatmul.mubr.bf16.vlgmr.msra.gmra.mrb[192].mxu1 %v12354_v48 }
 0x8c0   : > { %v16611_v35 = vadd.f32 %v16375_v15, %v10960_v49  ;;  %8108 = vmatprep.mubr.bf16.mxu1 %v12359_v41  ;;  %v12371_v49 = vld [vmem:[%s17085_s7 + $0x454] ss:$8 sps:$4 sm:$0xff]  }
 0x8c2   : > { %v10961_v43 = vpop.f32.mrb[88].mxu1 }
 0x8c3   : > { %v10962_v10 = vpop.f32.mrb[89].mxu1 }
 0x8c4   : > { %v10963_v44 = vadd.f32 %v10962_v10, %v10961_v43  ;;  %v10964_v46 = vpop.f32.mrb[90].mxu1 }
 0x8c5   : > { %v10965_v63 = vpop.f32.mrb[91].mxu1 }
 0x8c6   : > { %v16620_v62 = vadd.f32 %v16395_v53, %v10963_v44  ;;  %v10966_v11 = vadd.f32 %v10965_v63, %v10964_v46  ;;  %v12369_v46 = vld [vmem:[%s17085_s7 + $0x450] ss:$8 sps:$4 sm:$0xff]  }
 0x8c7   : > { %8109 = vmatmul.mubr.bf16.gmra.mrb[196].mxu1 %v12357_v22 }
 0x8c8   : > { %v16623_v15 = vadd.f32 %v16403_v9, %v10966_v11  ;;  %8116 = vmatprep.mubr.bf16.mxu1 %v12362_v21  ;;  %v12374_v11 = vld [vmem:[%s17085_s7 + $0x464] ss:$8 sps:$4 sm:$0xff]  }
 0x8ca   : > { %v10967_v59 = vpop.f32.mrb[92].mxu1 }
 0x8cb   : > { %v10968_v56 = vpop.f32.mrb[93].mxu1 }
 0x8cc   : > { %v10969_v8 = vadd.f32 %v10968_v56, %v10967_v59  ;;  %v10970_v18 = vpop.f32.mrb[94].mxu1 }
 0x8cd   : > { %v10971_v53 = vpop.f32.mrb[95].mxu1 }
 0x8ce   : > { %v16632_v61 = vadd.f32 %v16422_v20, %v10969_v8  ;;  %v10972_v6 = vadd.f32 %v10971_v53, %v10970_v18  ;;  %v12372_v18 = vld [vmem:[%s17085_s7 + $0x460] ss:$8 sps:$4 sm:$0xff]  }
 0x8cf   : > { %8117 = vmatmul.mubr.bf16.gmra.mrb[200].mxu1 %v12360_v7 }
 0x8d0   : > { %v16635_v9 = vadd.f32 %v16432_v0, %v10972_v6  ;;  %8124 = vmatprep.mubr.bf16.mxu1 %v12365_v5  ;;  %v12377_v6 = vld [vmem:[%s17085_s7 + $0x474] ss:$8 sps:$4 sm:$0xff]  }
 0x8d2   : > { %v10973_v27 = vpop.f32.mrb[96].mxu1 }
 0x8d3   : > { %v10974_v30 = vpop.f32.mrb[97].mxu1 }
 0x8d4   : > { %v10975_v52 = vadd.f32 %v10974_v30, %v10973_v27  ;;  %v10976_v25 = vpop.f32.mrb[98].mxu1 }
 0x8d5   : > { %v10977_v20 = vpop.f32.mrb[99].mxu1 }
 0x8d6   : > { %v16644_v34 = vadd.f32 %v16440_v47, %v10975_v52  ;;  %v10978_v57 = vadd.f32 %v10977_v20, %v10976_v25 }
 0x8d7   : > { %8125 = vmatmul.mubr.bf16.gmra.mrb[204].mxu1 %v12363_v24 }
 0x8d8   : > { %v16647_v0 = vadd.f32 %v16448_v39, %v10978_v57  ;;  %8132 = vmatprep.mubr.bf16.mxu1 %v12368_v45 }
 0x8da   : > { %v10979_v48 = vpop.f32.mrb[100].mxu1 }
 0x8db   : > { %v10980_v54 = vpop.f32.mrb[101].mxu1 }
 0x8dc   : > { %v10981_v41 = vadd.f32 %v10980_v54, %v10979_v48  ;;  %v10982_v28 = vpop.f32.mrb[102].mxu1 }
 0x8dd   : > { %v10983_v47 = vpop.f32.mrb[103].mxu1 }
 0x8de   : > { %v16656_v43 = vadd.f32 %v16456_v32, %v10981_v41  ;;  %v10984_v10 = vadd.f32 %v10983_v47, %v10982_v28 }
 0x8df   : > { %8133 = vmatmul.mubr.bf16.gmra.mrb[208].mxu1 %v12366_v3 }
 0x8e0   : > { %v16659_v39 = vadd.f32 %v16464_v14, %v10984_v10  ;;  %8140 = vmatprep.mubr.bf16.mxu1 %v12371_v49 }
 0x8e2   : > { %v10985_v22 = vpop.f32.mrb[104].mxu1 }
 0x8e3   : > { %v10986_v44 = vpop.f32.mrb[105].mxu1 }
 0x8e4   : > { %v10987_v21 = vadd.f32 %v10986_v44, %v10985_v22  ;;  %v10988_v63 = vpop.f32.mrb[106].mxu1 }
 0x8e5   : > { %v10989_v32 = vpop.f32.mrb[107].mxu1 }
 0x8e6   : > { %v16668_v59 = vadd.f32 %v16472_v2, %v10987_v21  ;;  %v10990_v56 = vadd.f32 %v10989_v32, %v10988_v63 }
 0x8e7   : > { %8141 = vmatmul.mubr.bf16.gmra.mrb[212].mxu1 %v12369_v46 }
 0x8e8   : > { %v16671_v14 = vadd.f32 %v16480_v19, %v10990_v56  ;;  %8148 = vmatprep.mubr.bf16.mxu1 %v12374_v11 }
 0x8ea   : > { %v10991_v7 = vpop.f32.mrb[108].mxu1 }
 0x8eb   : > { %v10992_v8 = vpop.f32.mrb[109].mxu1 }
 0x8ec   : > { %v10993_v5 = vadd.f32 %v10992_v8, %v10991_v7  ;;  %v10994_v53 = vpop.f32.mrb[110].mxu1 }
 0x8ed   : > { %v10995_v2 = vpop.f32.mrb[111].mxu1 }
 0x8ee   : > { %v16680_v27 = vadd.f32 %v16488_v36, %v10993_v5  ;;  %v10996_v30 = vadd.f32 %v10995_v2, %v10994_v53  ;;  %v11261_v19 = vpop.f32.mrb[192].mxu0  ;;  %v12375_v36 = vld [vmem:[%s17085_s7 + $0x470] ss:$8 sps:$4 sm:$0xff]  }
 0x8ef   : > { %8149 = vmatmul.mubr.bf16.gmra.mrb[216].mxu1 %v12372_v18  ;;  %v11262_v24 = vpop.f32.mrb[193].mxu0 }
 0x8f0   : > { %v16683_v52 = vadd.f32 %v16496_v29, %v10996_v30  ;;  %8156 = vmatprep.mubr.bf16.mxu1 %v12377_v6  ;;  %v16685_v25 = vadd.f32 %v11262_v24, %v11261_v19  ;;  %v11264_v45 = vpop.f32.mrb[194].mxu0  ;;  %v12380_v29 = vld [vmem:[%s17085_s7 + $0x484] ss:$8 sps:$4 sm:$0xff]  }
 0x8f1   : > { %v11265_v20 = vpop.f32.mrb[195].mxu0 }
 0x8f2   : > { %v10997_v57 = vpop.f32.mrb[112].mxu1  ;;  %v16687_v48 = vadd.f32 %v11265_v20, %v11264_v45 }
 0x8f3   : > { %v10998_v54 = vpop.f32.mrb[113].mxu1 }
 0x8f4   : > { %v10999_v3 = vadd.f32 %v10998_v54, %v10997_v57  ;;  %v11000_v41 = vpop.f32.mrb[114].mxu1 }
 0x8f5   : > { %v11001_v28 = vpop.f32.mrb[115].mxu1 }
 0x8f6   : > { %v16696_v49 = vadd.f32 %v16504_v50, %v10999_v3  ;;  %v11002_v47 = vadd.f32 %v11001_v28, %v11000_v41  ;;  %v11267_v10 = vpop.f32.mrb[196].mxu0  ;;  %v12378_v50 = vld [vmem:[%s17085_s7 + $0x480] ss:$8 sps:$4 sm:$0xff]  }
 0x8f7   : > { %8157 = vmatmul.mubr.bf16.gmra.mrb[220].mxu1 %v12375_v36  ;;  %v11268_v22 = vpop.f32.mrb[197].mxu0 }
 0x8f8   : > { %v16699_v44 = vadd.f32 %v16512_v42, %v11002_v47  ;;  %8164 = vmatprep.mubr.bf16.mxu1 %v12380_v29  ;;  %v16701_v46 = vadd.f32 %v11268_v22, %v11267_v10  ;;  %v11270_v21 = vpop.f32.mrb[198].mxu0  ;;  %v12383_v42 = vld [vmem:[%s17085_s7 + $0x494] ss:$8 sps:$4 sm:$0xff]  }
 0x8f9   : > { %v11271_v63 = vpop.f32.mrb[199].mxu0 }
 0x8fa   : > { %v11003_v11 = vpop.f32.mrb[116].mxu1  ;;  %v16703_v32 = vadd.f32 %v11271_v63, %v11270_v21 }
 0x8fb   : > { %v11004_v56 = vpop.f32.mrb[117].mxu1 }
 0x8fc   : > { %v11005_v7 = vadd.f32 %v11004_v56, %v11003_v11  ;;  %v11006_v8 = vpop.f32.mrb[118].mxu1 }
 0x8fd   : > { %v11007_v18 = vpop.f32.mrb[119].mxu1 }
 0x8fe   : > { %v16712_v5 = vadd.f32 %v16520_v16, %v11005_v7  ;;  %v11008_v53 = vadd.f32 %v11007_v18, %v11006_v8  ;;  %v11273_v6 = vpop.f32.mrb[200].mxu0  ;;  %v12381_v16 = vld [vmem:[%s17085_s7 + $0x490] ss:$8 sps:$4 sm:$0xff]  }
 0x8ff   : > { %8165 = vmatmul.mubr.bf16.gmra.mrb[224].mxu1 %v12378_v50  ;;  %v11274_v2 = vpop.f32.mrb[201].mxu0 }
 0x900   : > { %v16715_v30 = vadd.f32 %v16528_v12, %v11008_v53  ;;  %8172 = vmatprep.mubr.bf16.mxu1 %v12383_v42  ;;  %v16717_v19 = vadd.f32 %v11274_v2, %v11273_v6  ;;  %v11276_v24 = vpop.f32.mrb[202].mxu0  ;;  %v12386_v12 = vld [vmem:[%s17085_s7 + $0x4a4] ss:$8 sps:$4 sm:$0xff]  }
 0x901   : > { %v11277_v45 = vpop.f32.mrb[203].mxu0 }
 0x902   : > { %v11009_v20 = vpop.f32.mrb[120].mxu1  ;;  %v16719_v57 = vadd.f32 %v11277_v45, %v11276_v24 }
 0x903   : > { %v11010_v54 = vpop.f32.mrb[121].mxu1 }
 0x904   : > { %v11011_v36 = vadd.f32 %v11010_v54, %v11009_v20  ;;  %v11012_v3 = vpop.f32.mrb[122].mxu1 }
 0x905   : > { %v11013_v41 = vpop.f32.mrb[123].mxu1 }
 0x906   : > { %v16728_v29 = vadd.f32 %v16533_v58, %v11011_v36  ;;  %v11014_v28 = vadd.f32 %v11013_v41, %v11012_v3  ;;  %v11279_v47 = vpop.f32.mrb[204].mxu0  ;;  %v12384_v58 = vld [vmem:[%s17085_s7 + $0x4a0] ss:$8 sps:$4 sm:$0xff]  }
 0x907   : > { %8173 = vmatmul.mubr.bf16.gmra.mrb[228].mxu1 %v12381_v16  ;;  %v11280_v10 = vpop.f32.mrb[205].mxu0 }
 0x908   : > { %v16731_v22 = vadd.f32 %v16541_v38, %v11014_v28  ;;  %8180 = vmatprep.mubr.bf16.mxu1 %v12386_v12  ;;  %v16733_v21 = vadd.f32 %v11280_v10, %v11279_v47  ;;  %v11282_v63 = vpop.f32.mrb[206].mxu0  ;;  %v12389_v38 = vld [vmem:[%s17085_s7 + $0x4b4] ss:$8 sps:$4 sm:$0xff]  }
 0x909   : > { %v11283_v11 = vpop.f32.mrb[207].mxu0 }
 0x90a   : > { %v11015_v56 = vpop.f32.mrb[124].mxu1  ;;  %v16735_v50 = vadd.f32 %v11283_v11, %v11282_v63 }
 0x90b   : > { %v11016_v7 = vpop.f32.mrb[125].mxu1 }
 0x90c   : > { %v11017_v8 = vadd.f32 %v11016_v7, %v11015_v56  ;;  %v11018_v42 = vpop.f32.mrb[126].mxu1 }
 0x90d   : > { %v11019_v18 = vpop.f32.mrb[127].mxu1 }
 0x90e   : > { %v16744_v53 = vadd.f32 %v16549_v4, %v11017_v8  ;;  %v11020_v6 = vadd.f32 %v11019_v18, %v11018_v42  ;;  %v11285_v2 = vpop.f32.mrb[208].mxu0  ;;  %v12387_v4 = vld [vmem:[%s17085_s7 + $0x4b0] ss:$8 sps:$4 sm:$0xff]  }
 0x90f   : > { %8181 = vmatmul.mubr.bf16.gmra.mrb[232].mxu1 %v12384_v58  ;;  %v11286_v24 = vpop.f32.mrb[209].mxu0 }
 0x910   : > { %v16747_v45 = vadd.f32 %v16557_v1, %v11020_v6  ;;  %8188 = vmatprep.mubr.bf16.mxu1 %v12389_v38  ;;  %v16749_v20 = vadd.f32 %v11286_v24, %v11285_v2  ;;  %v11288_v54 = vpop.f32.mrb[210].mxu0  ;;  %v12392_v1 = vld [vmem:[%s17085_s7 + $0x4c4] ss:$8 sps:$4 sm:$0xff]   ;;  %v12390_v24 = vld [vmem:[%s17085_s7 + $0x4c0] ss:$8 sps:$4 sm:$0xff]  }
 0x911   : > { %v11289_v16 = vpop.f32.mrb[211].mxu0 }
 0x912   : > { %v11149_v36 = vpop.f32.mrb[128].mxu1  ;;  %v16751_v3 = vadd.f32 %v11289_v16, %v11288_v54 }
 0x913   : > { %v11150_v12 = vpop.f32.mrb[129].mxu1 }
 0x914   : > { %v11151_v41 = vadd.f32 %v11150_v12, %v11149_v36  ;;  %v11152_v28 = vpop.f32.mrb[130].mxu1 }
 0x915   : > { %v11153_v47 = vpop.f32.mrb[131].mxu1 }
 0x916   : > { %v7329_v10 = vadd.f32 %v11151_v41, %v16544_v23  ;;  %v11154_v63 = vadd.f32 %v11153_v47, %v11152_v28  ;;  %v11291_v11 = vpop.f32.mrb[212].mxu0 }
 0x917   : > { %8189 = vmatmul.mubr.bf16.gmra.mrb[236].mxu1 %v12387_v4  ;;  %v11292_v56 = vpop.f32.mrb[213].mxu0 }
 0x918   : > { %v7330_v7 = vadd.f32 %v11154_v63, %v16547_v17  ;;  %v16762_v58 = vadd.f32 %v16685_v25, %v7329_v10  ;;  %8196 = vmatprep.mubr.bf16.mxu1 %v12392_v1  ;;  %v16764_v8 = vadd.f32 %v11292_v56, %v11291_v11  ;;  %v11294_v42 = vpop.f32.mrb[214].mxu0  ;;  %v12395_v25 = vld [vmem:[%s17085_s7 + $0x4d4] ss:$8 sps:$4 sm:$0xff]  }
 0x919   : > { %v11295_v38 = vpop.f32.mrb[215].mxu0 }
 0x91a   : > { %v16767_v18 = vadd.f32 %v16687_v48, %v7330_v7  ;;  %v11155_v6 = vpop.f32.mrb[132].mxu1  ;;  %v16769_v2 = vadd.f32 %v11295_v38, %v11294_v42  ;;  %v12393_v7 = vld [vmem:[%s17085_s7 + $0x4d0] ss:$8 sps:$4 sm:$0xff]  }
 0x91b   : > { %v11156_v23 = vpop.f32.mrb[133].mxu1 }
 0x91c   : > { %v11157_v17 = vadd.f32 %v11156_v23, %v11155_v6  ;;  %v11158_v54 = vpop.f32.mrb[134].mxu1 }
 0x91d   : > { %v11159_v16 = vpop.f32.mrb[135].mxu1 }
 0x91e   : > { %v7331_v36 = vadd.f32 %v11157_v17, %v16560_v26  ;;  %v11160_v12 = vadd.f32 %v11159_v16, %v11158_v54  ;;  %v11297_v48 = vpop.f32.mrb[216].mxu0 }
 0x91f   : > { %8197 = vmatmul.mubr.bf16.gmra.mrb[240].mxu1 %v12390_v24  ;;  %v11298_v4 = vpop.f32.mrb[217].mxu0 }
 0x920   : > { %v7332_v41 = vadd.f32 %v11160_v12, %v16563_v55  ;;  %v16780_v28 = vadd.f32 %v16701_v46, %v7331_v36  ;;  %8204 = vmatprep.mubr.bf16.mxu1 %v12395_v25  ;;  %v16782_v1 = vadd.f32 %v11298_v4, %v11297_v48  ;;  %v11300_v47 = vpop.f32.mrb[218].mxu0  ;;  %v12398_v46 = vld [vmem:[%s17085_s7 + $0x4e4] ss:$8 sps:$4 sm:$0xff]  }
 0x921   : > { %v11301_v10 = vpop.f32.mrb[219].mxu0 }
 0x922   : > { %v16785_v63 = vadd.f32 %v16703_v32, %v7332_v41  ;;  %v11161_v11 = vpop.f32.mrb[136].mxu1  ;;  %v16787_v56 = vadd.f32 %v11301_v10, %v11300_v47  ;;  %v12396_v41 = vld [vmem:[%s17085_s7 + $0x4e0] ss:$8 sps:$4 sm:$0xff]  }
 0x923   : > { %v11162_v26 = vpop.f32.mrb[137].mxu1 }
 0x924   : > { %v11163_v55 = vadd.f32 %v11162_v26, %v11161_v11  ;;  %v11164_v42 = vpop.f32.mrb[138].mxu1 }
 0x925   : > { %v11165_v38 = vpop.f32.mrb[139].mxu1 }
 0x926   : > { %v7333_v6 = vadd.f32 %v11163_v55, %v16572_v31  ;;  %v11166_v23 = vadd.f32 %v11165_v38, %v11164_v42  ;;  %v11303_v32 = vpop.f32.mrb[220].mxu0 }
 0x927   : > { %8205 = vmatmul.mubr.bf16.gmra.mrb[244].mxu1 %v12393_v7  ;;  %v11304_v24 = vpop.f32.mrb[221].mxu0 }
 0x928   : > { %v7334_v17 = vadd.f32 %v11166_v23, %v16575_v33  ;;  %v16798_v54 = vadd.f32 %v16717_v19, %v7333_v6  ;;  %8212 = vmatprep.mubr.bf16.mxu1 %v12398_v46  ;;  %v16800_v25 = vadd.f32 %v11304_v24, %v11303_v32  ;;  %v11306_v16 = vpop.f32.mrb[222].mxu0  ;;  %v12401_v19 = vld [vmem:[%s17085_s7 + $0x4f4] ss:$8 sps:$4 sm:$0xff]  }
 0x929   : > { %v11307_v36 = vpop.f32.mrb[223].mxu0 }
 0x92a   : > { %v16803_v12 = vadd.f32 %v16719_v57, %v7334_v17  ;;  %v11167_v48 = vpop.f32.mrb[140].mxu1  ;;  %v16805_v4 = vadd.f32 %v11307_v36, %v11306_v16  ;;  %v12399_v17 = vld [vmem:[%s17085_s7 + $0x4f0] ss:$8 sps:$4 sm:$0xff]  }
 0x92b   : > { %v11168_v31 = vpop.f32.mrb[141].mxu1 }
 0x92c   : > { %v11169_v33 = vadd.f32 %v11168_v31, %v11167_v48  ;;  %v11170_v47 = vpop.f32.mrb[142].mxu1 }
 0x92d   : > { %v11171_v10 = vpop.f32.mrb[143].mxu1 }
 0x92e   : > { %v7335_v11 = vadd.f32 %v11169_v33, %v16584_v51  ;;  %v11172_v26 = vadd.f32 %v11171_v10, %v11170_v47  ;;  %v11309_v57 = vpop.f32.mrb[224].mxu0 }
 0x92f   : > { %8213 = vmatmul.mubr.bf16.gmra.mrb[248].mxu1 %v12396_v41  ;;  %v11310_v7 = vpop.f32.mrb[225].mxu0 }
 0x930   : > { %v7336_v55 = vadd.f32 %v11172_v26, %v16587_v13  ;;  %v16816_v42 = vadd.f32 %v16733_v21, %v7335_v11  ;;  %8220 = vmatprep.mubr.bf16.mxu1 %v12401_v19  ;;  %v16818_v46 = vadd.f32 %v11310_v7, %v11309_v57  ;;  %v11312_v38 = vpop.f32.mrb[226].mxu0 }
 0x931   : > { %v11313_v6 = vpop.f32.mrb[227].mxu0 }
 0x932   : > { %v16821_v23 = vadd.f32 %v16735_v50, %v7336_v55  ;;  %v11173_v32 = vpop.f32.mrb[144].mxu1  ;;  %v16823_v24 = vadd.f32 %v11313_v6, %v11312_v38 }
 0x933   : > { %v11174_v51 = vpop.f32.mrb[145].mxu1 }
 0x934   : > { %v11175_v13 = vadd.f32 %v11174_v51, %v11173_v32  ;;  %v11176_v16 = vpop.f32.mrb[146].mxu1 }
 0x935   : > { %v11177_v21 = vpop.f32.mrb[147].mxu1 }
 0x936   : > { %v7337_v36 = vadd.f32 %v11175_v13, %v16596_v60  ;;  %v11178_v48 = vadd.f32 %v11177_v21, %v11176_v16  ;;  %v11315_v31 = vpop.f32.mrb[228].mxu0 }
 0x937   : > { %8221 = vmatmul.mubr.bf16.gmra.mrb[252].mxu1 %v12399_v17  ;;  %v11316_v41 = vpop.f32.mrb[229].mxu0 }
 0x938   : > { %v7338_v50 = vadd.f32 %v11178_v48, %v16599_v40  ;;  %v16831_v33 = vadd.f32 %v16749_v20, %v7337_v36  ;;  %v16833_v47 = vadd.f32 %v11316_v41, %v11315_v31  ;;  %v11318_v19 = vpop.f32.mrb[230].mxu0 }
 0x939   : > { %v11319_v10 = vpop.f32.mrb[231].mxu0 }
 0x93a   : > { %v16836_v11 = vadd.f32 %v16751_v3, %v7338_v50  ;;  %v11179_v26 = vpop.f32.mrb[148].mxu1  ;;  %v16838_v57 = vadd.f32 %v11319_v10, %v11318_v19 }
 0x93b   : > { %v11180_v60 = vpop.f32.mrb[149].mxu1 }
 0x93c   : > { %v11181_v7 = vadd.f32 %v11180_v60, %v11179_v26  ;;  %v11182_v55 = vpop.f32.mrb[150].mxu1 }
 0x93d   : > { %v11183_v38 = vpop.f32.mrb[151].mxu1 }
 0x93e   : > { %v7339_v6 = vadd.f32 %v11181_v7, %v16608_v37  ;;  %v11184_v40 = vadd.f32 %v11183_v38, %v11182_v55  ;;  %v11321_v32 = vpop.f32.mrb[232].mxu0 }
 0x93f   : > { %v11322_v20 = vpop.f32.mrb[233].mxu0 }
 0x940   : > { %v7340_v51 = vadd.f32 %v11184_v40, %v16611_v35  ;;  %v16843_v17 = vadd.f32 %v16764_v8, %v7339_v6  ;;  %v16845_v13 = vadd.f32 %v11322_v20, %v11321_v32  ;;  %v11324_v3 = vpop.f32.mrb[234].mxu0 }
 0x941   : > { %v11325_v16 = vpop.f32.mrb[235].mxu0 }
 0x942   : > { %v16848_v21 = vadd.f32 %v16769_v2, %v7340_v51  ;;  %v11185_v36 = vpop.f32.mrb[152].mxu1  ;;  %v16850_v48 = vadd.f32 %v11325_v16, %v11324_v3 }
 0x943   : > { %v11186_v31 = vpop.f32.mrb[153].mxu1 }
 0x944   : > { %v11187_v37 = vadd.f32 %v11186_v31, %v11185_v36  ;;  %v11188_v41 = vpop.f32.mrb[154].mxu1 }
 0x945   : > { %v11189_v50 = vpop.f32.mrb[155].mxu1 }
 0x946   : > { %v7341_v19 = vadd.f32 %v11187_v37, %v16620_v62  ;;  %v11190_v35 = vadd.f32 %v11189_v50, %v11188_v41  ;;  %v11327_v10 = vpop.f32.mrb[236].mxu0 }
 0x947   : > { %v11328_v8 = vpop.f32.mrb[237].mxu0 }
 0x948   : > { %v7342_v26 = vadd.f32 %v11190_v35, %v16623_v15  ;;  %v16855_v60 = vadd.f32 %v16782_v1, %v7341_v19  ;;  %v16857_v7 = vadd.f32 %v11328_v8, %v11327_v10  ;;  %v11330_v2 = vpop.f32.mrb[238].mxu0 }
 0x949   : > { %v11331_v55 = vpop.f32.mrb[239].mxu0 }
 0x94a   : > { %v16860_v38 = vadd.f32 %v16787_v56, %v7342_v26  ;;  %v11191_v6 = vpop.f32.mrb[156].mxu1  ;;  %v16862_v40 = vadd.f32 %v11331_v55, %v11330_v2 }
 0x94b   : > { %v11192_v32 = vpop.f32.mrb[157].mxu1 }
 0x94c   : > { %v11193_v62 = vadd.f32 %v11192_v32, %v11191_v6  ;;  %v11194_v20 = vpop.f32.mrb[158].mxu1 }
 0x94d   : > { %v11195_v51 = vpop.f32.mrb[159].mxu1 }
 0x94e   : > { %v7343_v3 = vadd.f32 %v11193_v62, %v16632_v61  ;;  %v11196_v15 = vadd.f32 %v11195_v51, %v11194_v20  ;;  %v11333_v16 = vpop.f32.mrb[240].mxu0 }
 0x94f   : > { %v11334_v1 = vpop.f32.mrb[241].mxu0 }
 0x950   : > { %v7344_v36 = vadd.f32 %v11196_v15, %v16635_v9  ;;  %v16867_v31 = vadd.f32 %v16800_v25, %v7343_v3  ;;  %v16869_v37 = vadd.f32 %v11334_v1, %v11333_v16  ;;  %v11336_v56 = vpop.f32.mrb[242].mxu0 }
 0x951   : > { %v11337_v41 = vpop.f32.mrb[243].mxu0 }
 0x952   : > { %v16872_v50 = vadd.f32 %v16805_v4, %v7344_v36  ;;  %v11197_v19 = vpop.f32.mrb[160].mxu1  ;;  %v16874_v35 = vadd.f32 %v11337_v41, %v11336_v56 }
 0x953   : > { %v11198_v10 = vpop.f32.mrb[161].mxu1 }
 0x954   : > { %v11199_v61 = vadd.f32 %v11198_v10, %v11197_v19  ;;  %v11200_v8 = vpop.f32.mrb[162].mxu1 }
 0x955   : > { %v11201_v26 = vpop.f32.mrb[163].mxu1 }
 0x956   : > { %v7345_v2 = vadd.f32 %v11199_v61, %v16644_v34  ;;  %v11202_v9 = vadd.f32 %v11201_v26, %v11200_v8  ;;  %v11339_v55 = vpop.f32.mrb[244].mxu0 }
 0x957   : > { %v11340_v25 = vpop.f32.mrb[245].mxu0 }
 0x958   : > { %v7346_v6 = vadd.f32 %v11202_v9, %v16647_v0  ;;  %v16879_v32 = vadd.f32 %v16818_v46, %v7345_v2  ;;  %v16881_v62 = vadd.f32 %v11340_v25, %v11339_v55  ;;  %v11342_v4 = vpop.f32.mrb[246].mxu0 }
 0x959   : > { %v11343_v20 = vpop.f32.mrb[247].mxu0 }
 0x95a   : > { %v16884_v51 = vadd.f32 %v16823_v24, %v7346_v6  ;;  %v11203_v3 = vpop.f32.mrb[164].mxu1  ;;  %v16886_v15 = vadd.f32 %v11343_v20, %v11342_v4 }
 0x95b   : > { %v11204_v16 = vpop.f32.mrb[165].mxu1 }
 0x95c   : > { %v11205_v34 = vadd.f32 %v11204_v16, %v11203_v3  ;;  %v11206_v1 = vpop.f32.mrb[166].mxu1 }
 0x95d   : > { %v11207_v36 = vpop.f32.mrb[167].mxu1 }
 0x95e   : > { %v7347_v56 = vadd.f32 %v11205_v34, %v16656_v43  ;;  %v11208_v0 = vadd.f32 %v11207_v36, %v11206_v1  ;;  %v11345_v41 = vpop.f32.mrb[248].mxu0 }
 0x95f   : > { %v11346_v46 = vpop.f32.mrb[249].mxu0 }
 0x960   : > { %v7348_v19 = vadd.f32 %v11208_v0, %v16659_v39  ;;  %v16891_v10 = vadd.f32 %v16833_v47, %v7347_v56  ;;  %v16893_v61 = vadd.f32 %v11346_v46, %v11345_v41  ;;  %v11348_v24 = vpop.f32.mrb[250].mxu0 }
 0x961   : > { %v11349_v8 = vpop.f32.mrb[251].mxu0 }
 0x962   : > { %v16896_v26 = vadd.f32 %v16838_v57, %v7348_v19  ;;  %v11209_v2 = vpop.f32.mrb[168].mxu1  ;;  %v16898_v9 = vadd.f32 %v11349_v8, %v11348_v24 }
 0x963   : > { %v11210_v55 = vpop.f32.mrb[169].mxu1 }
 0x964   : > { %v11211_v43 = vadd.f32 %v11210_v55, %v11209_v2  ;;  %v11212_v25 = vpop.f32.mrb[170].mxu1 }
 0x965   : > { %v11213_v6 = vpop.f32.mrb[171].mxu1 }
 0x966   : > { %v7349_v4 = vadd.f32 %v11211_v43, %v16668_v59  ;;  %v11214_v39 = vadd.f32 %v11213_v6, %v11212_v25  ;;  %v11351_v20 = vpop.f32.mrb[252].mxu0  ;;  %v16918_v6 = vpop.permute.xlu0 %8375 }
 0x967   : > { %v11352_v47 = vpop.f32.mrb[253].mxu0 }
 0x968   : > { %v7350_v3 = vadd.f32 %v11214_v39, %v16671_v14  ;;  %v16903_v16 = vadd.f32 %v16845_v13, %v7349_v4  ;;  %v16905_v34 = vadd.f32 %v11352_v47, %v11351_v20  ;;  %v11354_v57 = vpop.f32.mrb[254].mxu0 }
 0x969   : > { %v11355_v1 = vpop.f32.mrb[255].mxu0 }
 0x96a   : > { %v16908_v36 = vadd.f32 %v16850_v48, %v7350_v3  ;;  %v11215_v56 = vpop.f32.mrb[172].mxu1  ;;  %v11356_v0 = vadd.f32 %v11355_v1, %v11354_v57  ;;  %v8296_v3 = vpop.permute.xlu0 %8295 }
 0x96b   : > { %v11216_v41 = vpop.f32.mrb[173].mxu1 }
 0x96c   : > { %v11217_v46 = vadd.f32 %v11216_v41, %v11215_v56  ;;  %v11218_v59 = vpop.f32.mrb[174].mxu1 }
 0x96d   : > { %v11219_v19 = vpop.f32.mrb[175].mxu1 }
 0x96e   : > { %v7351_v24 = vadd.f32 %v11217_v46, %v16680_v27  ;;  %v11220_v8 = vadd.f32 %v11219_v19, %v11218_v59  ;;  %v16921_v27 = vpop.permute.xlu1 %8380 }
 0x970   : > { %v7352_v14 = vadd.f32 %v11220_v8, %v16683_v52  ;;  %v16913_v13 = vadd.f32 %v16857_v7, %v7351_v24 }
 0x972   : > { %v16916_v2 = vadd.f32 %v16862_v40, %v7352_v14  ;;  %v11221_v55 = vpop.f32.mrb[176].mxu1  ;;  %v8301_v41 = vpop.permute.xlu1 %8300 }
 0x973   : > { %v11222_v48 = vpop.f32.mrb[177].mxu1 }
 0x974   : > { %v11223_v43 = vadd.f32 %v11222_v48, %v11221_v55  ;;  %v11224_v25 = vpop.f32.mrb[178].mxu1 }
 0x975   : > { %v11225_v4 = vpop.f32.mrb[179].mxu1 }
 0x976   : > { %v7353_v39 = vadd.f32 %v11223_v43, %v16696_v49  ;;  %v11226_v20 = vadd.f32 %v11225_v4, %v11224_v25  ;;  %v16940_v8 = vpop.permute.xlu1 %8390 }
 0x978   : > { %v7354_v52 = vadd.f32 %v11226_v20, %v16699_v44  ;;  %v16925_v7 = vadd.f32 %v16869_v37, %v7353_v39  ;;  %v16935_v37 = vpop.permute.xlu0 %8385 }
 0x97a   : > { %v16928_v40 = vadd.f32 %v16874_v35, %v7354_v52  ;;  %v11227_v47 = vpop.f32.mrb[180].mxu1  ;;  %v8311_v39 = vpop.permute.xlu1 %8310 }
 0x97b   : > { %v11228_v57 = vpop.f32.mrb[181].mxu1 }
 0x97c   : > { %v11229_v1 = vadd.f32 %v11228_v57, %v11227_v47  ;;  %v11230_v56 = vpop.f32.mrb[182].mxu1  ;;  %v8306_v4 = vpop.permute.xlu0 %8305 }
 0x97d   : > { %v11231_v46 = vpop.f32.mrb[183].mxu1 }
 0x97e   : > { %v7355_v49 = vadd.f32 %v11229_v1, %v16712_v5  ;;  %v11232_v59 = vadd.f32 %v11231_v46, %v11230_v56 }
 0x980   : > { %v7356_v19 = vadd.f32 %v11232_v59, %v16715_v30  ;;  %v16933_v44 = vadd.f32 %v16881_v62, %v7355_v49  ;;  %v16950_v1 = vpop.permute.xlu0 %8395  ;;  %v16953_v49 = vpop.permute.xlu1 %8400 }
 0x982   : > { %v16938_v35 = vadd.f32 %v16886_v15, %v7356_v19  ;;  %v11233_v24 = vpop.f32.mrb[184].mxu1 }
 0x983   : > { %v11234_v14 = vpop.f32.mrb[185].mxu1 }
 0x984   : > { %v11235_v55 = vadd.f32 %v11234_v14, %v11233_v24  ;;  %v11236_v48 = vpop.f32.mrb[186].mxu1  ;;  %v8316_v19 = vpop.permute.xlu0 %8315 }
 0x985   : > { %v11237_v43 = vpop.f32.mrb[187].mxu1 }
 0x986   : > { %v7357_v5 = vadd.f32 %v11235_v55, %v16728_v29  ;;  %v11238_v25 = vadd.f32 %v11237_v43, %v11236_v48  ;;  %v8321_v48 = vpop.permute.xlu1 %8320 }
 0x988   : > { %v7358_v30 = vadd.f32 %v11238_v25, %v16731_v22  ;;  %v16945_v62 = vadd.f32 %v16893_v61, %v7357_v5 }
 0x98a   : > { %v16948_v15 = vadd.f32 %v16898_v9, %v7358_v30  ;;  %v11239_v20 = vpop.f32.mrb[188].mxu1 }
 0x98b   : > { %v11240_v52 = vpop.f32.mrb[189].mxu1 }
 0x98c   : > { %v11241_v47 = vadd.f32 %v11240_v52, %v11239_v20  ;;  %v11242_v57 = vpop.f32.mrb[190].mxu1  ;;  %v16963_v20 = vpop.permute.xlu0 %8405 }
 0x98d   : > { %v11243_v56 = vpop.f32.mrb[191].mxu1  ;;  %v16968_v52 = vpop.permute.xlu1 %8410 }
 0x98e   : > { %v7359_v29 = vadd.f32 %v11241_v47, %v16744_v53  ;;  %v11244_v46 = vadd.f32 %v11243_v56, %v11242_v57 }
 0x990   : > { %v7360_v22 = vadd.f32 %v11244_v46, %v16747_v45  ;;  %v16957_v61 = vadd.f32 %v16905_v34, %v7359_v29  ;;  %v12404_v45 = vld [vmem:[%s17087_s9 + $0x4] ss:$8 sps:$4 sm:$0xff]  }
 0x991   : > { %8589 = vmatprep.mubr.bf16.mxu0 %v12404_v45 }
 0x992   : > { %v16959_v59 = vadd.f32 %v11356_v0, %v7360_v22  ;;  %v11373_v9 = vpop.f32.mrb[192].mxu1 }
 0x993   : > { %v11374_v24 = vpop.f32.mrb[193].mxu1 }
 0x994   : > { %v11375_v14 = vadd.f32 %v11374_v24, %v11373_v9  ;;  %v11376_v55 = vpop.f32.mrb[194].mxu1  ;;  %v8326_v9 = vpop.permute.xlu0 %8325 }
 0x995   : > { %v11377_v43 = vpop.f32.mrb[195].mxu1 }
 0x996   : > { %v8229_v5 = vadd.f32 %v11375_v14, %v16762_v58  ;;  %v11378_v53 = vadd.f32 %v11377_v43, %v11376_v55 }
 0x998   : > { %v8453_v25 = vadd.f32 %v8296_v3, %v8229_v5  ;;  %v8230_v30 = vadd.f32 %v11378_v53, %v16767_v18 }
 0x99a   : > { %v8454_v34 = vadd.f32 %v8301_v41, %v8230_v30  ;;  %v11379_v0 = vpop.f32.mrb[196].mxu1  ;;  %v8485_v57 = vmax.f32 %v8453_v25, 0.0  ;;  %v8331_v41 = vpop.permute.xlu1 %8330 }
 0x99b   : > { %v11380_v47 = vpop.f32.mrb[197].mxu1 }
 0x99c   : > { %v8486_v56 = vmax.f32 %v8454_v34, 0.0  ;;  %v11381_v29 = vadd.f32 %v11380_v47, %v11379_v0  ;;  %v11382_v58 = vpop.f32.mrb[198].mxu1  ;;  %v16974_v34 = vpop.permute.xlu0 %8415 }
 0x99d   : > { %v11383_v46 = vpop.f32.mrb[199].mxu1 }
 0x99e   : > { %v16970_v3 = vpack.c.bf16 %v8486_v56, %v8485_v57  ;;  %v8231_v18 = vadd.f32 %v11381_v29, %v16780_v28  ;;  %v11384_v22 = vadd.f32 %v11383_v46, %v11382_v58  ;;  %v16979_v56 = vpop.permute.xlu1 %8420 }
 0x9a0   : > { %v8455_v24 = vadd.f32 %v8306_v4, %v8231_v18  ;;  %v8232_v14 = vadd.f32 %v11384_v22, %v16785_v63  ;;  %v8336_v58 = vpop.permute.xlu0 %8335 }
 0x9a2   : > { %v8456_v55 = vadd.f32 %v8311_v39, %v8232_v14  ;;  %v11385_v43 = vpop.f32.mrb[200].mxu1  ;;  %v8487_v53 = vmax.f32 %v8455_v24, 0.0 }
 0x9a3   : > { %v11386_v5 = vpop.f32.mrb[201].mxu1 }
 0x9a4   : > { %v8488_v30 = vmax.f32 %v8456_v55, 0.0  ;;  %v11387_v25 = vadd.f32 %v11386_v5, %v11385_v43  ;;  %v11388_v45 = vpop.f32.mrb[202].mxu1  ;;  %v8341_v55 = vpop.permute.xlu1 %8340 }
 0x9a5   : > { %v11389_v0 = vpop.f32.mrb[203].mxu1 }
 0x9a6   : > { %v16976_v47 = vpack.c.bf16 %v8488_v30, %v8487_v53  ;;  %v8233_v28 = vadd.f32 %v11387_v25, %v16798_v54  ;;  %v11390_v57 = vadd.f32 %v11389_v0, %v11388_v45  ;;  %v16986_v25 = vpop.permute.xlu0 %8425 }
 0x9a8   : > { %v8457_v4 = vadd.f32 %v8316_v19, %v8233_v28  ;;  %v8234_v63 = vadd.f32 %v11390_v57, %v16803_v12  ;;  %v16988_v45 = vpop.permute.xlu1 %8430 }
 0x9aa   : > { %v8458_v39 = vadd.f32 %v8321_v48, %v8234_v63  ;;  %v11391_v29 = vpop.f32.mrb[204].mxu1  ;;  %v8489_v18 = vmax.f32 %v8457_v4, 0.0 }
 0x9ab   : > { %v11392_v46 = vpop.f32.mrb[205].mxu1 }
 0x9ac   : > { %v8490_v22 = vmax.f32 %v8458_v39, 0.0  ;;  %v11393_v24 = vadd.f32 %v11392_v46, %v11391_v29  ;;  %v11394_v14 = vpop.f32.mrb[206].mxu1 }
 0x9ad   : > { %v11395_v43 = vpop.f32.mrb[207].mxu1 }
 0x9ae   : > { %v16982_v5 = vpack.c.bf16 %v8490_v22, %v8489_v18  ;;  %v8235_v54 = vadd.f32 %v11393_v24, %v16816_v42  ;;  %v11396_v53 = vadd.f32 %v11395_v43, %v11394_v14  ;;  %v8351_v22 = vpop.permute.xlu1 %8350 }
 0x9b0   : > { %v8459_v30 = vadd.f32 %v8326_v9, %v8235_v54  ;;  %v8236_v19 = vadd.f32 %v11396_v53, %v16821_v23  ;;  %v8346_v9 = vpop.permute.xlu0 %8345 }
 0x9b2   : > { %v8460_v12 = vadd.f32 %v8331_v41, %v8236_v19  ;;  %v11397_v48 = vpop.f32.mrb[208].mxu1  ;;  %v8491_v28 = vmax.f32 %v8459_v30, 0.0 }
 0x9b3   : > { %v11398_v0 = vpop.f32.mrb[209].mxu1 }
 0x9b4   : > { %v8492_v57 = vmax.f32 %v8460_v12, 0.0  ;;  %v11399_v4 = vadd.f32 %v11398_v0, %v11397_v48  ;;  %v11400_v63 = vpop.f32.mrb[210].mxu1  ;;  %v16994_v19 = vpop.permute.xlu0 %8435 }
 0x9b5   : > { %v11401_v39 = vpop.f32.mrb[211].mxu1 }
 0x9b6   : > { %v16990_v29 = vpack.c.bf16 %v8492_v57, %v8491_v28  ;;  %v8237_v42 = vadd.f32 %v11399_v4, %v16831_v33  ;;  %v11402_v46 = vadd.f32 %v11401_v39, %v11400_v63  ;;  %v16999_v28 = vpop.permute.xlu1 %8440 }
 0x9b8   : > { %v8461_v18 = vadd.f32 %v8336_v58, %v8237_v42  ;;  %v8238_v23 = vadd.f32 %v11402_v46, %v16836_v11  ;;  %v8356_v4 = vpop.permute.xlu0 %8355 }
 0x9ba   : > { %v8462_v41 = vadd.f32 %v8341_v55, %v8238_v23  ;;  %v11403_v24 = vpop.f32.mrb[212].mxu1  ;;  %v8493_v43 = vmax.f32 %v8461_v18, 0.0  ;;  %v8361_v23 = vpop.permute.xlu1 %8360 }
 0x9bb   : > { %v11404_v14 = vpop.f32.mrb[213].mxu1 }
 0x9bc   : > { %v8494_v54 = vmax.f32 %v8462_v41, 0.0  ;;  %v11405_v53 = vadd.f32 %v11404_v14, %v11403_v24  ;;  %v11406_v30 = vpop.f32.mrb[214].mxu1 }
 0x9bd   : > { %v11407_v12 = vpop.f32.mrb[215].mxu1 }
 0x9be   : > { %v16996_v48 = vpack.c.bf16 %v8494_v54, %v8493_v43  ;;  %v8239_v33 = vadd.f32 %v11405_v53, %v16843_v17  ;;  %v11408_v0 = vadd.f32 %v11407_v12, %v11406_v30  ;;  %v17006_v54 = vpop.permute.xlu0 %8445  ;;  %v17008_v53 = vpop.permute.xlu1 %8450 }
 0x9c0   : > { %v8463_v58 = vadd.f32 %v8346_v9, %v8239_v33  ;;  %v8240_v11 = vadd.f32 %v11408_v0, %v16848_v21 }
 0x9c2   : > { %v8464_v55 = vadd.f32 %v8351_v22, %v8240_v11  ;;  %v11409_v57 = vpop.f32.mrb[216].mxu1  ;;  %v8495_v39 = vmax.f32 %v8463_v58, 0.0 }
 0x9c3   : > { %v11410_v63 = vpop.f32.mrb[217].mxu1 }
 0x9c4   : > { %v8496_v42 = vmax.f32 %v8464_v55, 0.0  ;;  %v11411_v46 = vadd.f32 %v11410_v63, %v11409_v57  ;;  %v11412_v18 = vpop.f32.mrb[218].mxu1 }
 0x9c5   : > { %v11413_v41 = vpop.f32.mrb[219].mxu1 }
 0x9c6   : > { %v17002_v24 = vpack.c.bf16 %v8496_v42, %v8495_v39  ;;  %v8241_v17 = vadd.f32 %v11411_v46, %v16855_v60  ;;  %v11414_v14 = vadd.f32 %v11413_v41, %v11412_v18  ;;  %v8371_v39 = vpop.permute.xlu1 %8370 }
 0x9c8   : > { %v8465_v43 = vadd.f32 %v8356_v4, %v8241_v17  ;;  %v8242_v9 = vadd.f32 %v11414_v14, %v16860_v38  ;;  %v8366_v4 = vpop.permute.xlu0 %8365 }
 0x9ca   : > { %v8466_v21 = vadd.f32 %v8361_v23, %v8242_v9  ;;  %v11415_v22 = vpop.f32.mrb[220].mxu1  ;;  %v8497_v12 = vmax.f32 %v8465_v43, 0.0 }
 0x9cb   : > { %v11416_v30 = vpop.f32.mrb[221].mxu1 }
 0x9cc   : > { %v8498_v33 = vmax.f32 %v8466_v21, 0.0  ;;  %v11417_v0 = vadd.f32 %v11416_v30, %v11415_v22  ;;  %v11418_v58 = vpop.f32.mrb[222].mxu1 }
 0x9cd   : > { %v11419_v11 = vpop.f32.mrb[223].mxu1 }
 0x9ce   : > { %v17010_v55 = vpack.c.bf16 %v8498_v33, %v8497_v12  ;;  %v8243_v60 = vadd.f32 %v11417_v0, %v16867_v31  ;;  %v11420_v57 = vadd.f32 %v11419_v11, %v11418_v58 }
 0x9d0   : > { %v8467_v63 = vadd.f32 %v8366_v4, %v8243_v60  ;;  %v8244_v38 = vadd.f32 %v11420_v57, %v16872_v50 }
 0x9d2   : > { %v8468_v42 = vadd.f32 %v8371_v39, %v8244_v38  ;;  %v11421_v46 = vpop.f32.mrb[224].mxu1  ;;  %v8499_v23 = vmax.f32 %v8467_v63, 0.0 }
 0x9d3   : > { %v11422_v18 = vpop.f32.mrb[225].mxu1 }
 0x9d4   : > { %v8500_v41 = vmax.f32 %v8468_v42, 0.0  ;;  %v11423_v17 = vadd.f32 %v11422_v18, %v11421_v46  ;;  %v11424_v14 = vpop.f32.mrb[226].mxu1 }
 0x9d5   : > { %v11425_v43 = vpop.f32.mrb[227].mxu1 }
 0x9d6   : > { %v17014_v9 = vpack.c.bf16 %v8500_v41, %v8499_v23  ;;  %v8245_v21 = vadd.f32 %v11423_v17, %v16879_v32  ;;  %v11426_v22 = vadd.f32 %v11425_v43, %v11424_v14 }
 0x9d8   : > { %v8469_v31 = vadd.f32 %v16918_v6, %v8245_v21  ;;  %v8246_v30 = vadd.f32 %v11426_v22, %v16884_v51 }
 0x9da   : > { %v8470_v50 = vadd.f32 %v16921_v27, %v8246_v30  ;;  %v11427_v12 = vpop.f32.mrb[228].mxu1  ;;  %v8501_v0 = vmax.f32 %v8469_v31, 0.0 }
 0x9db   : > { %v11428_v33 = vpop.f32.mrb[229].mxu1 }
 0x9dc   : > { %v8502_v58 = vmax.f32 %v8470_v50, 0.0  ;;  %v11429_v11 = vadd.f32 %v11428_v33, %v11427_v12  ;;  %v11430_v60 = vpop.f32.mrb[230].mxu1 }
 0x9dd   : > { %v11431_v57 = vpop.f32.mrb[231].mxu1 }
 0x9de   : > { %v8247_v4 = vadd.f32 %v11429_v11, %v16891_v10  ;;  %v11432_v63 = vadd.f32 %v11431_v57, %v11430_v60  ;;  %v8525_v38 = vpack.c.bf16 %v8502_v58, %v8501_v0 }
 0x9e0   : > { %v8471_v32 = vadd.f32 %v16935_v37, %v8247_v4  ;;  %v8248_v39 = vadd.f32 %v11432_v63, %v16896_v26  ;;  %11469 = vmatprep.subr.bf16.mxu0 %v8525_v38 }
 0x9e1   : > { %11470 = vmatpush3.bf16.msra.mxu0 %v16970_v3 }
 0x9e2   : > { %v8472_v51 = vadd.f32 %v16940_v8, %v8248_v39  ;;  %v11433_v6 = vpop.f32.mrb[232].mxu1  ;;  %v8503_v42 = vmax.f32 %v8471_v32, 0.0 }
 0x9e3   : > { %v11434_v27 = vpop.f32.mrb[233].mxu1 }
 0x9e4   : > { %v8504_v46 = vmax.f32 %v8472_v51, 0.0  ;;  %v11435_v18 = vadd.f32 %v11434_v27, %v11433_v6  ;;  %v11436_v23 = vpop.f32.mrb[234].mxu1 }
 0x9e5   : > { %v11437_v41 = vpop.f32.mrb[235].mxu1 }
 0x9e6   : > { %v8249_v10 = vadd.f32 %v11435_v18, %v16903_v16  ;;  %v11438_v17 = vadd.f32 %v11437_v41, %v11436_v23  ;;  %v8526_v14 = vpack.c.bf16 %v8504_v46, %v8503_v42 }
 0x9e8   : > { %v8473_v37 = vadd.f32 %v16950_v1, %v8249_v10  ;;  %v8250_v26 = vadd.f32 %v11438_v17, %v16908_v36  ;;  %11471 = vmatprep.subr.bf16.mxu0 %v8526_v14 }
 0x9e9   : > { %11472 = vmatpush3.bf16.msra.mxu0 %v16976_v47 }
 0x9ea   : > { %v8474_v8 = vadd.f32 %v16953_v49, %v8250_v26  ;;  %v11439_v3 = vpop.f32.mrb[236].mxu1  ;;  %v8505_v21 = vmax.f32 %v8473_v37, 0.0 }
 0x9eb   : > { %v11440_v43 = vpop.f32.mrb[237].mxu1 }
 0x9ec   : > { %v8506_v22 = vmax.f32 %v8474_v8, 0.0  ;;  %v11441_v31 = vadd.f32 %v11440_v43, %v11439_v3  ;;  %v11442_v30 = vpop.f32.mrb[238].mxu1 }
 0x9ed   : > { %v11443_v50 = vpop.f32.mrb[239].mxu1 }
 0x9ee   : > { %v8251_v16 = vadd.f32 %v11441_v31, %v16913_v13  ;;  %v11444_v12 = vadd.f32 %v11443_v50, %v11442_v30  ;;  %v8527_v33 = vpack.c.bf16 %v8506_v22, %v8505_v21 }
 0x9f0   : > { %v8475_v1 = vadd.f32 %v16963_v20, %v8251_v16  ;;  %v8252_v36 = vadd.f32 %v11444_v12, %v16916_v2  ;;  %11473 = vmatprep.subr.bf16.mxu0 %v8527_v33 }
 0x9f1   : > { %11474 = vmatpush3.bf16.msra.mxu0 %v16982_v5 }
 0x9f2   : > { %v8476_v49 = vadd.f32 %v16968_v52, %v8252_v36  ;;  %v11445_v47 = vpop.f32.mrb[240].mxu1  ;;  %v8507_v58 = vmax.f32 %v8475_v1, 0.0  ;;  %v12402_v1 = vld [vmem:[%s17087_s9] ss:$8 sps:$4 sm:$0xff]  }
 0x9f3   : > { %v11446_v0 = vpop.f32.mrb[241].mxu1 }
 0x9f4   : > { %v8508_v11 = vmax.f32 %v8476_v49, 0.0  ;;  %v11447_v60 = vadd.f32 %v11446_v0, %v11445_v47  ;;  %v11448_v57 = vpop.f32.mrb[242].mxu1  ;;  %v8545_v0 = vpop.permute.xlu1 %8544 }
 0x9f5   : > { %v11449_v4 = vpop.f32.mrb[243].mxu1 }
 0x9f6   : > { %v8253_v13 = vadd.f32 %v11447_v60, %v16925_v7  ;;  %v11450_v63 = vadd.f32 %v11449_v4, %v11448_v57  ;;  %v8528_v38 = vpack.c.bf16 %v8508_v11, %v8507_v58 }
 0x9f8   : > { %v8477_v20 = vadd.f32 %v16974_v34, %v8253_v13  ;;  %v8254_v2 = vadd.f32 %v11450_v63, %v16928_v40  ;;  %11475 = vmatprep.subr.bf16.mxu0 %v8528_v38 }
 0x9f9   : > { %11476 = vmatpush3.bf16.msra.mxu0 %v16990_v29 }
 0x9fa   : > { %v8478_v52 = vadd.f32 %v16979_v56, %v8254_v2  ;;  %v11451_v5 = vpop.f32.mrb[244].mxu1  ;;  %v8509_v39 = vmax.f32 %v8477_v20, 0.0 }
 0x9fb   : > { %v11452_v32 = vpop.f32.mrb[245].mxu1 }
 0x9fc   : > { %v8510_v51 = vmax.f32 %v8478_v52, 0.0  ;;  %v11453_v6 = vadd.f32 %v11452_v32, %v11451_v5  ;;  %v11454_v27 = vpop.f32.mrb[246].mxu1 }
 0x9fd   : > { %v11455_v42 = vpop.f32.mrb[247].mxu1 }
 0x9fe   : > { %v8255_v7 = vadd.f32 %v11453_v6, %v16933_v44  ;;  %v11456_v46 = vadd.f32 %v11455_v42, %v11454_v27  ;;  %v8529_v18 = vpack.c.bf16 %v8510_v51, %v8509_v39 }
 0xa00   : > { %v8479_v34 = vadd.f32 %v16986_v25, %v8255_v7  ;;  %v8256_v40 = vadd.f32 %v11456_v46, %v16938_v35  ;;  %11477 = vmatprep.subr.bf16.mxu0 %v8529_v18 }
 0xa01   : > { %11478 = vmatpush3.bf16.msra.mxu0 %v16996_v48 }
 0xa02   : > { %v8480_v56 = vadd.f32 %v16988_v45, %v8256_v40  ;;  %v11457_v29 = vpop.f32.mrb[248].mxu1  ;;  %v8511_v41 = vmax.f32 %v8479_v34, 0.0 }
 0xa03   : > { %v11458_v23 = vpop.f32.mrb[249].mxu1 }
 0xa04   : > { %v8512_v10 = vmax.f32 %v8480_v56, 0.0  ;;  %v11459_v17 = vadd.f32 %v11458_v23, %v11457_v29  ;;  %v11460_v14 = vpop.f32.mrb[250].mxu1 }
 0xa05   : > { %v11461_v37 = vpop.f32.mrb[251].mxu1 }
 0xa06   : > { %v8257_v44 = vadd.f32 %v11459_v17, %v16945_v62  ;;  %v11462_v26 = vadd.f32 %v11461_v37, %v11460_v14  ;;  %v8530_v8 = vpack.c.bf16 %v8512_v10, %v8511_v41 }
 0xa08   : > { %v8481_v25 = vadd.f32 %v16994_v19, %v8257_v44  ;;  %v8258_v35 = vadd.f32 %v11462_v26, %v16948_v15  ;;  %11479 = vmatprep.subr.bf16.mxu0 %v8530_v8 }
 0xa09   : > { %11480 = vmatpush3.bf16.msra.mxu0 %v17002_v24 }
 0xa0a   : > { %v8482_v45 = vadd.f32 %v16999_v28, %v8258_v35  ;;  %v11463_v48 = vpop.f32.mrb[252].mxu1  ;;  %v8513_v43 = vmax.f32 %v8481_v25, 0.0 }
 0xa0b   : > { %v11464_v3 = vpop.f32.mrb[253].mxu1 }
 0xa0c   : > { %v8514_v21 = vmax.f32 %v8482_v45, 0.0  ;;  %v11465_v22 = vadd.f32 %v11464_v3, %v11463_v48  ;;  %v11466_v31 = vpop.f32.mrb[254].mxu1 }
 0xa0d   : > { %v11467_v30 = vpop.f32.mrb[255].mxu1 }
 0xa0e   : > { %v8259_v62 = vadd.f32 %v11465_v22, %v16957_v61  ;;  %v11468_v50 = vadd.f32 %v11467_v30, %v11466_v31  ;;  %v8531_v16 = vpack.c.bf16 %v8514_v21, %v8513_v43 }
 0xa10   : > { %v8483_v19 = vadd.f32 %v17006_v54, %v8259_v62  ;;  %v8260_v15 = vadd.f32 %v11468_v50, %v16959_v59  ;;  %11481 = vmatprep.subr.bf16.mxu0 %v8531_v16 }
 0xa11   : > { %11482 = vmatpush3.bf16.msra.mxu0 %v17010_v55  ;;  %v8540_v55 = vpop.permute.xlu0 %8539 }
 0xa12   : > { %v8484_v28 = vadd.f32 %v17008_v53, %v8260_v15  ;;  %v8515_v24 = vmax.f32 %v8483_v19, 0.0 }
 0xa14   : > { %v8516_v12 = vmax.f32 %v8484_v28, 0.0 }
 0xa16   : > { %v8532_v33 = vpack.c.bf16 %v8516_v12, %v8515_v24 }
 0xa18   : > { %11483 = vmatprep.subr.bf16.mxu0 %v8532_v33 }
 0xa19   : > { %11484 = vmatpush3.bf16.msra.mxu0 %v17014_v9 }
 0xa1c   : > { %8590 = vmatmul.mubr.bf16.vlgmr.msra.gmra.mrb[0].mxu0 %v12402_v1 }
 0xaef   : > { %v11485_v61 = vpop.f32.mrb[0].mxu0 }
 0xaf0   : > { %v11486_v54 = vpop.f32.mrb[1].mxu0 }
 0xaf1   : > { %v11487_v36 = vadd.f32 %v11486_v54, %v11485_v61  ;;  %v11488_v59 = vpop.f32.mrb[2].mxu0 }
 0xaf2   : > { %v11489_v49 = vpop.f32.mrb[3].mxu0 }
 0xaf3   : > { %v11490_v47 = vadd.f32 %v11489_v49, %v11488_v59  ;;  %v8592_v53 = vadd.f32 %v11487_v36, %v8540_v55 }
 0xaf5   : > { %v8595_v58 = vadd.f32 %v11490_v47, %v8545_v0 }
 0xaf7   : > { %v8598_v11 = vmax.f32 %v8592_v53, %v8595_v58 }
 0xaf9   : > { %v8599_v60 = vrot.slane %v8598_v11, 4 }
 0xafb   : > { %v8600_v57 = vmax.f32 %v8598_v11, %v8599_v60 }
 0xafd   : > { %v8601_v4 = vrot.slane %v8600_v57, 2 }
 0xaff   : > { %v8602_v13 = vmax.f32 %v8600_v57, %v8601_v4 }
 0xb01   : > { %v8603_v63 = vrot.slane %v8602_v13, 1 }
 0xb03   : > { %v8604_v38 = vmax.f32 %v8602_v13, %v8603_v63 }
 0xb05   : > { %v8605_v20 = vsub.f32 %v8592_v53, %v8604_v38  ;;  %v8606_v9 = vsub.f32 %v8595_v58, %v8604_v38 }
 0xb07   : > { %v8607_v2 = vmul.f32 1.442695, %v8605_v20  ;;  %v8609_v52 = vmul.f32 1.442695, %v8606_v9 }
 0xb09   : > { %12405 = vpow2.f32 %v8607_v2 }
 0xb0a   : > { %12407 = vpow2.f32 %v8609_v52 }
 0xb13   : > { %v12406_v5 = vpop.eup %12405 }
 0xb14   : > { %v12408_v32 = vpop.eup %12407 }
 0xb15   : > { %v8611_v39 = vadd.f32 %v12408_v32, %v12406_v5 }
 0xb17   : > { %v8612_v51 = vrot.slane %v8611_v39, 4 }
 0xb19   : > { %v8613_v6 = vadd.f32 %v8612_v51, %v8611_v39 }
 0xb1b   : > { %v8614_v27 = vrot.slane %v8613_v6, 2 }
 0xb1d   : > { %v8615_v42 = vadd.f32 %v8614_v27, %v8613_v6 }
 0xb1f   : > { %v8616_v7 = vrot.slane %v8615_v42, 1 }
 0xb21   : > { %v8617_v46 = vadd.f32 %v8616_v7, %v8615_v42 }
 0xb23   : > { %12409 = vlog2.f32 %v8617_v46 }
 0xb2d   : > { %v12410_v18 = vpop.eup %12409 }
 0xb2e   : > { %v8619_v34 = vmul.f32 0.6931472, %v12410_v18 }
 0xb30   : > { %v8620_v40 = vadd.f32 %v8619_v34, %v8604_v38  ;;  %8639 = sbr.rel (!%p12530_p5) target bundleno = 2879 (0xb3f), region = 109 }
 0xb32   : > { %v8621_v56 = vsub.f32 %v8592_v53, %v8620_v40  ;;  %v8622_v29 = vsub.f32 %v8595_v58, %v8620_v40 }
 0xb34   : > { %v9675_v23 = vpack.c.bf16 %v8622_v29, %v8621_v56 }
 0xb36   : > { %9676 = vst [vmem:[%s545_s22] sm:$0xff] %v9675_v23  }
 0xb3d   : > { %v8657_v41 = vld [vmem:[%s545_s22] sm:$0xf]  ;;  %v8659_v10 = vld [vmem:[%s545_s22 + $0x4] sm:$0xf] }
 0xb3e   : > { %8658 = vst [vmem:[%s8641_s15] sm:$0xf] %v8657_v41  ;;  %8660 = vst [vmem:[%s8641_s15 + $0x8] sm:$0xf] %v8659_v10 }
 0xb3f PF: > { %p18_p10 = scmp.ge.s32.totalorder %s12517_s21, 4   ;;  %s17095_s17 = smov %s12429_s18 }
 0xb40   : > { %s17096_s18 = smov %s12528_s24  ;;  %s17097_s19 = smov %s12517_s21 }
 0xb41   :  { %20 = sbr.rel (!%p18_p10) target bundleno = 2 (0x2), region = 193 }

</bundles_post_ra>
